<compile_context>
chip_gen: v6e
topology: v6e:2x2x1
jax: 0.10.0
libtpu: 0.0.40
codegen_flags: <defaults>
</compile_context>

<pallas_src>
import math

import jax
import jax.numpy as jnp
from jax.experimental import pallas as pl
from jax.experimental.pallas import tpu as pltpu


# ------------------------------- small helpers -------------------------------

def _round_up(x, m):
    return (x + m - 1) // m * m


# ----------------------- standalone BN + ReLU (first input) ------------------

def _bn_relu_kernel(x_ref, scale_ref, shift_ref, o_ref):
    y = x_ref[...].astype(jnp.float32) * scale_ref[...] + shift_ref[...]
    o_ref[...] = jnp.maximum(y, 0.0).astype(o_ref.dtype)


def pallas_bn_relu(x_nhwc, scale, shift, out_dtype=jnp.bfloat16):
    """y = relu(x * scale + shift); only used on the group's raw input
    (all later BN1+ReLU are fused into the previous conv2 epilogue)."""
    n, h, w, c = x_nhwc.shape
    if c >= 128:
        x2d = x_nhwc.reshape(n * h * w, c)
        rep = 1
    else:
        # lane-densify small-C inputs by folding W into the lane dim
        x2d = x_nhwc.reshape(n * h, w * c)
        rep = w
    cols = x2d.shape[1]
    s2 = jnp.tile(scale.astype(jnp.float32), (rep,)).reshape(1, cols)
    b2 = jnp.tile(shift.astype(jnp.float32), (rep,)).reshape(1, cols)

    m = x2d.shape[0]
    bytes_per_row = cols * (x2d.dtype.itemsize + 2)
    cap_rows = max(8, ((8 << 20) // max(1, bytes_per_row)) // 8 * 8)
    tm = min(1024, cap_rows, _round_up(m, 8))
    mp = _round_up(m, tm)
    if mp != m:
        x2d = jnp.pad(x2d, ((0, mp - m), (0, 0)))

    out = pl.pallas_call(
        _bn_relu_kernel,
        out_shape=jax.ShapeDtypeStruct((mp, cols), out_dtype),
        grid=(mp // tm,),
        in_specs=[pl.BlockSpec((tm, cols), lambda i: (i, 0)),
                  pl.BlockSpec((1, cols), lambda i: (0, 0)),
                  pl.BlockSpec((1, cols), lambda i: (0, 0))],
        out_specs=pl.BlockSpec((tm, cols), lambda i: (i, 0)),
        compiler_params=pltpu.CompilerParams(
            dimension_semantics=("parallel",),
            vmem_limit_bytes=32 << 20),
    )(x2d, s2, b2)

    if mp != m:
        out = out[:m]
    return out.reshape(n, h, w, c)


# ------------------------------ 3x3 conv kernels ------------------------------
# A conv step keeps the padded activation slab of `nb` images in VMEM and does
# 9 shifted-tap dots (bf16 operands, f32 accumulator scratch), then applies a
# fused epilogue and stores bf16.

def _make_conv1_kernel(nb, ho, wo, cin, stride, with_shortcut):
    m = nb * ho * wo

    def tap(xp_ref, dh, dw):
        if stride == 1:
            r0, c0, l0 = dh, dw, 0
        else:  # stride 2: space-to-depth layout (nb, Hp/2, Wp/2, 4*Cin)
            r0, c0, l0 = dh // 2, dw // 2, ((dh % 2) * 2 + (dw % 2)) * cin
        a = xp_ref[:, r0:r0 + ho, c0:c0 + wo, l0:l0 + cin]
        return a.reshape(m, cin)

    def kernel(*refs):
        if with_shortcut:
            xp_ref, w_ref, sw_ref, s_ref, b_ref, o_ref, r_ref, acc_ref = refs
        else:
            xp_ref, w_ref, s_ref, b_ref, o_ref, acc_ref = refs
        for t in range(9):
            dh, dw = divmod(t, 3)
            d = jnp.dot(tap(xp_ref, dh, dw), w_ref[t],
                        preferred_element_type=jnp.float32)
            if t == 0:
                acc_ref[...] = d
            else:
                acc_ref[...] += d
        # fused BN2 + ReLU epilogue
        y = acc_ref[...] * s_ref[...] + b_ref[...]
        o_ref[...] = jnp.maximum(y, 0.0).astype(o_ref.dtype)
        if with_shortcut:
            # fused 1x1 strided shortcut projection (center tap, own weights)
            r_ref[...] = jnp.dot(tap(xp_ref, 1, 1), sw_ref[...],
                                 preferred_element_type=jnp.float32
                                 ).astype(r_ref.dtype)

    return kernel


def _make_conv2_kernel(nb, ho, wo, cin, with_next_bn):
    m = nb * ho * wo

    def tap(xp_ref, dh, dw):
        a = xp_ref[:, dh:dh + ho, dw:dw + wo, :]
        return a.reshape(m, cin)

    def kernel(*refs):
        if with_next_bn:
            xp_ref, w_ref, r_ref, s_ref, b_ref, y_ref, a_ref, acc_ref = refs
        else:
            xp_ref, w_ref, r_ref, y_ref, acc_ref = refs
        for t in range(9):
            dh, dw = divmod(t, 3)
            d = jnp.dot(tap(xp_ref, dh, dw), w_ref[t],
                        preferred_element_type=jnp.float32)
            if t == 0:
                acc_ref[...] = d
            else:
                acc_ref[...] += d
        # fused residual add (f32 in-register), stored bf16
        y = acc_ref[...] + r_ref[...].astype(jnp.float32)
        y_ref[...] = y.astype(y_ref.dtype)
        if with_next_bn:
            # fused next-block BN1 + ReLU (second output)
            z = y * s_ref[...] + b_ref[...]
            a_ref[...] = jnp.maximum(z, 0.0).astype(a_ref.dtype)

    return kernel


def _pick_nb(n, m_img, per_step_bytes, budget=36 << 20):
    """Largest images-per-step dividing N that fits the VMEM budget, keeps
    >= 2 grid steps when N >= 2 (2-TC coverage), and <= ~4096 rows/step."""
    best = 1
    for nb in range(1, n + 1):
        if n % nb:
            continue
        if n >= 2 and n // nb < 2:
            continue
        if nb * m_img > 4096:
            continue
        if per_step_bytes(nb) > budget:
            continue
        best = nb
    return best


def pallas_conv3x3(act4, w9, stride, *,
                   bn_scale=None, bn_shift=None, short_w=None,      # conv1 mode
                   residual=None, next_scale=None, next_shift=None  # conv2 mode
                   ):
    """3x3 conv (padding=1) as 9 in-VMEM shifted-tap MXU dots + fused epilogue.

    conv1 mode (bn_scale given):  out = relu(bn2(conv(act)))   [bf16]
                                  optional 2nd output: 1x1 strided shortcut.
    conv2 mode (residual given):  y = conv(act) + residual     [bf16]
                                  optional 2nd output: relu(next_bn1(y)).
    Returns 2-D (N*Ho*Wo, Cout) arrays.
    """
    n, h, w, cin = act4.shape
    cout = w9.shape[2]
    assert stride in (1, 2), "WRN only uses stride 1 or 2"
    ho = (h - 1) // stride + 1
    wo = (w - 1) // stride + 1
    m_img = ho * wo
    conv1_mode = bn_scale is not None

    xp = jnp.pad(act4.astype(jnp.bfloat16), ((0, 0), (1, 1), (1, 1), (0, 0)))
    if stride == 2:
        hp, wp = h + 2, w + 2
        # space-to-depth so every tap is a contiguous static in-kernel slice
        xp = (xp.reshape(n, hp // 2, 2, wp // 2, 2, cin)
                .transpose(0, 1, 3, 2, 4, 5)
                .reshape(n, hp // 2, wp // 2, 4 * cin))
    xs = xp.shape

    w9 = w9.astype(jnp.bfloat16)
    n_out = 2 if ((conv1_mode and short_w is not None) or
                  (not conv1_mode and next_scale is not None)) else 1

    def per_step_bytes(nb):
        m = nb * m_img
        b = 2 * (nb * xs[1] * xs[2] * xs[3] * 2     # activation slab (dbl-buffered)
                 + int(w9.size) * 2                 # weights
                 + n_out * m * cout * 2)            # outputs
        if residual is not None:
            b += 2 * m * cout * 2
        b += m * cout * 4                           # f32 accumulator scratch
        b += 4 * m * cin * 2                        # in-kernel tap slice temporaries
        return b + (2 << 20)

    nb = _pick_nb(n, m_img, per_step_bytes)
    if (nb * m_img) % 8 != 0:
        nb = n          # fall back to a single full block (row dim == full dim)
    m_blk = nb * m_img
    grid = (n // nb,)

    xp_spec = pl.BlockSpec((nb,) + xs[1:], lambda i: (i, 0, 0, 0))
    w_spec = pl.BlockSpec(w9.shape, lambda i: (0, 0, 0))
    row_spec = pl.BlockSpec((m_blk, cout), lambda i: (i, 0))
    vec_spec = pl.BlockSpec((1, cout), lambda i: (0, 0))

    in_specs = [xp_spec, w_spec]
    args = [xp, w9]
    if conv1_mode:
        if short_w is not None:
            in_specs.append(pl.BlockSpec((cin, cout), lambda i: (0, 0)))
            args.append(short_w.astype(jnp.bfloat16))
        in_specs += [vec_spec, vec_spec]
        args += [bn_scale.reshape(1, cout).astype(jnp.float32),
                 bn_shift.reshape(1, cout).astype(jnp.float32)]
        kernel = _make_conv1_kernel(nb, ho, wo, cin, stride,
                                    with_shortcut=short_w is not None)
    else:
        in_specs.append(row_spec)
        args.append(residual.astype(jnp.bfloat16))
        if next_scale is not None:
            in_specs += [vec_spec, vec_spec]
            args += [next_scale.reshape(1, cout).astype(jnp.float32),
                     next_shift.reshape(1, cout).astype(jnp.float32)]
        kernel = _make_conv2_kernel(nb, ho, wo, cin,
                                    with_next_bn=next_scale is not None)

    out_sdt = jax.ShapeDtypeStruct((n * m_img, cout), jnp.bfloat16)
    if n_out == 2:
        out_shape = (out_sdt, out_sdt)
        out_specs = (row_spec, row_spec)
    else:
        out_shape = out_sdt
        out_specs = row_spec

    est = per_step_bytes(nb)
    vmem_limit = int(min(56 << 20, max(32 << 20, 2 * est)))

    return pl.pallas_call(
        kernel,
        out_shape=out_shape,
        grid=grid,
        in_specs=in_specs,
        out_specs=out_specs,
        scratch_shapes=[pltpu.VMEM((m_blk, cout), jnp.float32)],
        compiler_params=pltpu.CompilerParams(
            dimension_semantics=("parallel",),
            vmem_limit_bytes=vmem_limit),
    )(*args)


# ------------------------------ parameter prep --------------------------------

def _bn_affine(p, prefix):
    scale = p[prefix + '_gamma'] / jnp.sqrt(p[prefix + '_var'] + 1e-5)
    shift = p[prefix + '_beta'] - p[prefix + '_mean'] * scale
    return scale.astype(jnp.float32), shift.astype(jnp.float32)


def prepare_block_params(p):
    """One-time prep: (9, Cin, Cout) bf16 tap-major weights + folded BN affines."""
    cout, cin = p['conv1_w'].shape[0], p['conv1_w'].shape[1]
    q = {
        'conv1_w9': jnp.transpose(p['conv1_w'], (2, 3, 1, 0))
                      .reshape(9, cin, cout).astype(jnp.bfloat16),
        'conv2_w9': jnp.transpose(p['conv2_w'], (2, 3, 1, 0))
                      .reshape(9, cout, cout).astype(jnp.bfloat16),
        'short_w': None,
    }
    q['bn1_scale'], q['bn1_shift'] = _bn_affine(p, 'bn1')
    q['bn2_scale'], q['bn2_shift'] = _bn_affine(p, 'bn2')
    if 'short_w' in p:
        q['short_w'] = p['short_w'].reshape(cout, cin).T.astype(jnp.bfloat16)
    return q


# --------------------------------- forward ------------------------------------

def network_block_forward(x_nchw, packed, stride):
    x = jnp.transpose(x_nchw, (0, 2, 3, 1)).astype(jnp.float32)   # NCHW -> NHWC
    n = x.shape[0]
    nblk = len(packed)

    # BN1 + ReLU of the first block only (later ones are fused into conv2).
    act4 = pallas_bn_relu(x, packed[0]['bn1_scale'], packed[0]['bn1_shift'])

    y2d = None
    ho = wo = cout = None
    for i, q in enumerate(packed):
        s = stride if i == 0 else 1
        _, h, w, cin = act4.shape
        cout = q['conv1_w9'].shape[2]
        equal = q['short_w'] is None
        if equal and s != 1:
            raise ValueError("identity shortcut requires stride == 1")
        ho = (h - 1) // s + 1
        wo = (w - 1) // s + 1

        # conv1 (+ fused BN2/ReLU; + fused 1x1 shortcut projection when present)
        if not equal:
            out1, resid = pallas_conv3x3(
                act4, q['conv1_w9'], s,
                bn_scale=q['bn2_scale'], bn_shift=q['bn2_shift'],
                short_w=q['short_w'])
        else:
            out1 = pallas_conv3x3(
                act4, q['conv1_w9'], s,
                bn_scale=q['bn2_scale'], bn_shift=q['bn2_shift'])
            if i == 0:
                resid = x.reshape(n * h * w, cin).astype(jnp.bfloat16)
            else:
                resid = y2d
        # TODO(synk): dropout skipped — dropRate=0.0 (module default), eval forward.

        out1_4 = out1.reshape(n, ho, wo, cout)

        # conv2 (+ fused residual add; + fused next-block BN1/ReLU when not last)
        if i + 1 < nblk:
            qn = packed[i + 1]
            y2d, act_next = pallas_conv3x3(
                out1_4, q['conv2_w9'], 1, residual=resid,
                next_scale=qn['bn1_scale'], next_shift=qn['bn1_shift'])
            act4 = act_next.reshape(n, ho, wo, cout)
        else:
            y2d = pallas_conv3x3(out1_4, q['conv2_w9'], 1, residual=resid)

    y = y2d.reshape(n, ho, wo, cout).astype(jnp.float32)
    return jnp.transpose(y, (0, 3, 1, 2))                          # NHWC -> NCHW


# --------------------------- deterministic params -----------------------------

def init_network_block_params(key, nb_layers, in_planes, out_planes):
    params = []
    for i in range(int(nb_layers)):
        cin = in_planes if i == 0 else out_planes
        cout = out_planes
        ks = jax.random.split(jax.random.fold_in(key, i), 12)
        std = math.sqrt(2.0 / (9 * cout))          # WRN kaiming-style init
        p = {
            'bn1_gamma': jax.random.uniform(ks[0], (cin,), jnp.float32, 0.5, 1.5),
            'bn1_beta':  0.1 * jax.random.normal(ks[1], (cin,), jnp.float32),
            'bn1_mean':  0.1 * jax.random.normal(ks[2], (cin,), jnp.float32),
            'bn1_var':   jax.random.uniform(ks[3], (cin,), jnp.float32, 0.5, 1.5),
            'conv1_w':   std * jax.random.normal(ks[4], (cout, cin, 3, 3), jnp.float32),
            'bn2_gamma': jax.random.uniform(ks[5], (cout,), jnp.float32, 0.5, 1.5),
            'bn2_beta':  0.1 * jax.random.normal(ks[6], (cout,), jnp.float32),
            'bn2_mean':  0.1 * jax.random.normal(ks[7], (cout,), jnp.float32),
            'bn2_var':   jax.random.uniform(ks[8], (cout,), jnp.float32, 0.5, 1.5),
            'conv2_w':   std * jax.random.normal(ks[9], (cout, cout, 3, 3), jnp.float32),
        }
        if cin != cout:
            p['short_w'] = (math.sqrt(2.0 / cout) *
                            jax.random.normal(ks[10], (cout, cin, 1, 1), jnp.float32))
        params.append(p)
    return params


# ------------------------------ pure-JAX reference ----------------------------
# Mirrors the PyTorch WRN BasicBlock chain exactly (eval mode, dropRate 0),
# with conv operands cast to bf16 at the same points as the Pallas path so the
# check isolates kernel correctness from bf16-vs-f32 operand rounding.

def _conv_ref(x, w, stride, pad):
    return jax.lax.conv_general_dilated(
        x.astype(jnp.bfloat16), w.astype(jnp.bfloat16),
        (stride, stride), ((pad, pad), (pad, pad)),
        dimension_numbers=('NCHW', 'OIHW', 'NCHW'),
        preferred_element_type=jnp.float32)


def _bn_relu_ref(x, p, prefix):
    scale = p[prefix + '_gamma'] / jnp.sqrt(p[prefix + '_var'] + 1e-5)
    shift = p[prefix + '_beta'] - p[prefix + '_mean'] * scale
    return jax.nn.relu(x.astype(jnp.float32) * scale[None, :, None, None]
                       + shift[None, :, None, None])


def network_block_ref(x, params_list, stride):
    for i, p in enumerate(params_list):
        s = stride if i == 0 else 1
        cin, cout = x.shape[1], p['conv1_w'].shape[0]
        equal = (cin == cout)
        act = _bn_relu_ref(x, p, 'bn1').astype(jnp.bfloat16)
        out = _conv_ref(act, p['conv1_w'], s, 1)
        out = _bn_relu_ref(out, p, 'bn2').astype(jnp.bfloat16)
        out = _conv_ref(out, p['conv2_w'], 1, 1)
        sc = x if equal else _conv_ref(act, p['short_w'], s, 0)
        x = sc.astype(jnp.float32) + out
    return x


# ---------------------------------- main ---------------------------------------

if __name__ == "__main__":
    key = jax.random.PRNGKey(0)
    nb_layers, in_planes, out_planes, stride = 2, 4, 8, 2

    kx, kp = jax.random.split(key)
    x = jax.random.normal(kx, (2, in_planes, 16, 16), jnp.float32)   # NCHW like torch
    params = init_network_block_params(kp, nb_layers, in_planes, out_planes)
    packed = [prepare_block_params(p) for p in params]               # one-time prep

    fwd = jax.jit(lambda a: network_block_forward(a, packed, stride))
    y = jax.block_until_ready(fwd(x))

    y_ref = network_block_ref(x, params, stride)
    assert y.shape == (2, out_planes, 8, 8), y.shape
    max_err = float(jnp.max(jnp.abs(y - y_ref)))
    assert jnp.allclose(y, y_ref, rtol=2e-2, atol=2e-2), max_err

    print("KERNEL_OK")
</pallas_src>

<mosaic_0001>
module attributes {stable_mosaic.version = 11 : i64} {
  func.func @_bn_relu_kernel(%arg0: i32, %arg1: memref<32x64xf32, #tpu.memory_space<vmem>>, %arg2: memref<1x64xf32, #tpu.memory_space<vmem>>, %arg3: memref<1x64xf32, #tpu.memory_space<vmem>>, %arg4: memref<32x64xbf16, #tpu.memory_space<vmem>>) attributes {dimension_semantics = [#tpu.dimension_semantics<parallel>], iteration_bounds = array<i64: 1>, scalar_prefetch = 0 : i64, scratch_operands = 0 : i64, tpu.core_type = #tpu.core_type<tc>, window_params = [{transform_indices = @transform_0, window_bounds = array<i64: 32, 64>}, {pipeline_mode = #tpu.pipeline_mode<synchronous>, transform_indices = @transform_1, window_bounds = array<i64: 1, 64>}, {pipeline_mode = #tpu.pipeline_mode<synchronous>, transform_indices = @transform_2, window_bounds = array<i64: 1, 64>}, {transform_indices = @transform_3, window_bounds = array<i64: 32, 64>}]} {
    %c0 = arith.constant 0 : index
    %c0_0 = arith.constant 0 : index
    %0 = vector.load %arg1[%c0, %c0_0] : memref<32x64xf32, #tpu.memory_space<vmem>>, vector<32x64xf32>
    %c0_1 = arith.constant 0 : index
    %c0_2 = arith.constant 0 : index
    %1 = vector.load %arg2[%c0_1, %c0_2] : memref<1x64xf32, #tpu.memory_space<vmem>>, vector<1x64xf32>
    %2 = vector.broadcast %1 : vector<1x64xf32> to vector<32x64xf32>
    %3 = arith.mulf %0, %2 : vector<32x64xf32>
    %c0_3 = arith.constant 0 : index
    %c0_4 = arith.constant 0 : index
    %4 = vector.load %arg3[%c0_3, %c0_4] : memref<1x64xf32, #tpu.memory_space<vmem>>, vector<1x64xf32>
    %5 = vector.broadcast %4 : vector<1x64xf32> to vector<32x64xf32>
    %6 = arith.addf %3, %5 : vector<32x64xf32>
    %cst = arith.constant 0.000000e+00 : f32
    %7 = vector.broadcast %cst : f32 to vector<32x64xf32>
    %8 = arith.maximumf %6, %7 : vector<32x64xf32>
    %9 = arith.truncf %8 : vector<32x64xf32> to vector<32x64xbf16>
    %c0_5 = arith.constant 0 : index
    %c0_6 = arith.constant 0 : index
    %10 = vector.load %arg4[%c0_5, %c0_6] : memref<32x64xbf16, #tpu.memory_space<vmem>>, vector<32x64xbf16>
    tpu.vector_store %arg4[%c0_5, %c0_6], %9 {strides = array<i32>} : memref<32x64xbf16, #tpu.memory_space<vmem>>, vector<32x64xbf16>,
    return
  }
  func.func @transform_0(%arg0: i32) -> (i32, i32) {
    %c0_i32 = arith.constant 0 : i32
    %c0_i32_0 = arith.constant 0 : i32
    return %arg0, %c0_i32 : i32, i32
  }
  func.func @transform_1(%arg0: i32) -> (i32, i32) {
    %c0_i32 = arith.constant 0 : i32
    %c0_i32_0 = arith.constant 0 : i32
    %c0_i32_1 = arith.constant 0 : i32
    return %c0_i32, %c0_i32_0 : i32, i32
  }
  func.func @transform_2(%arg0: i32) -> (i32, i32) {
    %c0_i32 = arith.constant 0 : i32
    %c0_i32_0 = arith.constant 0 : i32
    %c0_i32_1 = arith.constant 0 : i32
    return %c0_i32, %c0_i32_0 : i32, i32
  }
  func.func @transform_3(%arg0: i32) -> (i32, i32) {
    %c0_i32 = arith.constant 0 : i32
    %c0_i32_0 = arith.constant 0 : i32
    return %arg0, %c0_i32 : i32, i32
  }
}

module attributes {stable_mosaic.version = 11 : i64} {
  func.func @kernel(%arg0: i32, %arg1: memref<1x9x9x16xbf16, #tpu.memory_space<vmem>>, %arg2: memref<9x4x8xbf16, #tpu.memory_space<vmem>>, %arg3: memref<4x8xbf16, #tpu.memory_space<vmem>>, %arg4: memref<1x8xf32, #tpu.memory_space<vmem>>, %arg5: memref<1x8xf32, #tpu.memory_space<vmem>>, %arg6: memref<64x8xbf16, #tpu.memory_space<vmem>>, %arg7: memref<64x8xbf16, #tpu.memory_space<vmem>>, %arg8: memref<64x8xf32, #tpu.memory_space<vmem>>) attributes {dimension_semantics = [#tpu.dimension_semantics<parallel>], iteration_bounds = array<i64: 2>, scalar_prefetch = 0 : i64, scratch_operands = 1 : i64, tpu.core_type = #tpu.core_type<tc>, window_params = [{transform_indices = @transform_0, window_bounds = array<i64: 1, 9, 9, 16>}, {pipeline_mode = #tpu.pipeline_mode<synchronous>, transform_indices = @transform_1, window_bounds = array<i64: 9, 4, 8>}, {pipeline_mode = #tpu.pipeline_mode<synchronous>, transform_indices = @transform_2, window_bounds = array<i64: 4, 8>}, {pipeline_mode = #tpu.pipeline_mode<synchronous>, transform_indices = @transform_3, window_bounds = array<i64: 1, 8>}, {pipeline_mode = #tpu.pipeline_mode<synchronous>, transform_indices = @transform_4, window_bounds = array<i64: 1, 8>}, {transform_indices = @transform_5, window_bounds = array<i64: 64, 8>}, {transform_indices = @transform_6, window_bounds = array<i64: 64, 8>}]} {
    %c0 = arith.constant 0 : index
    %c0_0 = arith.constant 0 : index
    %c0_1 = arith.constant 0 : index
    %c0_2 = arith.constant 0 : index
    %0 = vector.load %arg1[%c0, %c0_0, %c0_1, %c0_2] : memref<1x9x9x16xbf16, #tpu.memory_space<vmem>>, vector<1x8x8x4xbf16>
    %1 = vector.shape_cast %0 : vector<1x8x8x4xbf16> to vector<64x4xbf16>
    %c0_3 = arith.constant 0 : index
    %c0_4 = arith.constant 0 : index
    %c0_5 = arith.constant 0 : index
    %2 = vector.load %arg2[%c0_3, %c0_4, %c0_5] : memref<9x4x8xbf16, #tpu.memory_space<vmem>>, vector<1x4x8xbf16>
    %3 = vector.shape_cast %2 : vector<1x4x8xbf16> to vector<4x8xbf16>
    %cst = arith.constant dense<0.000000e+00> : vector<64x8xf32>
    %4 = tpu.matmul %1, %3, %cst {dimension_numbers = #tpu.dot_dimension_numbers<[1], [0], [0], [1], [0, 0, 1, 1], [], []>} : vector<64x4xbf16>, vector<4x8xbf16>, vector<64x8xf32> -> vector<64x8xf32>
    %c0_6 = arith.constant 0 : index
    %c0_7 = arith.constant 0 : index
    %5 = vector.load %arg8[%c0_6, %c0_7] : memref<64x8xf32, #tpu.memory_space<vmem>>, vector<64x8xf32>
    tpu.vector_store %arg8[%c0_6, %c0_7], %4 {strides = array<i32>} : memref<64x8xf32, #tpu.memory_space<vmem>>, vector<64x8xf32>,
    %c0_8 = arith.constant 0 : index
    %c0_9 = arith.constant 0 : index
    %c0_10 = arith.constant 0 : index
    %c4 = arith.constant 4 : index
    %6 = vector.load %arg1[%c0_8, %c0_9, %c0_10, %c4] : memref<1x9x9x16xbf16, #tpu.memory_space<vmem>>, vector<1x8x8x4xbf16>
    %7 = vector.shape_cast %6 : vector<1x8x8x4xbf16> to vector<64x4xbf16>
    %c1 = arith.constant 1 : index
    %c0_11 = arith.constant 0 : index
    %c0_12 = arith.constant 0 : index
    %8 = vector.load %arg2[%c1, %c0_11, %c0_12] : memref<9x4x8xbf16, #tpu.memory_space<vmem>>, vector<1x4x8xbf16>
    %9 = vector.shape_cast %8 : vector<1x4x8xbf16> to vector<4x8xbf16>
    %cst_13 = arith.constant dense<0.000000e+00> : vector<64x8xf32>
    %10 = tpu.matmul %7, %9, %cst_13 {dimension_numbers = #tpu.dot_dimension_numbers<[1], [0], [0], [1], [0, 0, 1, 1], [], []>} : vector<64x4xbf16>, vector<4x8xbf16>, vector<64x8xf32> -> vector<64x8xf32>
    %c0_14 = arith.constant 0 : index
    %c0_15 = arith.constant 0 : index
    %11 = vector.load %arg8[%c0_14, %c0_15] : memref<64x8xf32, #tpu.memory_space<vmem>>, vector<64x8xf32>
    %12 = arith.addf %11, %10 : vector<64x8xf32>
    %c0_16 = arith.constant 0 : index
    %c0_17 = arith.constant 0 : index
    %13 = vector.load %arg8[%c0_16, %c0_17] : memref<64x8xf32, #tpu.memory_space<vmem>>, vector<64x8xf32>
    tpu.vector_store %arg8[%c0_16, %c0_17], %12 {strides = array<i32>} : memref<64x8xf32, #tpu.memory_space<vmem>>, vector<64x8xf32>,
    %c0_18 = arith.constant 0 : index
    %c0_19 = arith.constant 0 : index
    %c1_20 = arith.constant 1 : index
    %c0_21 = arith.constant 0 : index
    %14 = vector.load %arg1[%c0_18, %c0_19, %c1_20, %c0_21] : memref<1x9x9x16xbf16, #tpu.memory_space<vmem>>, vector<1x8x8x4xbf16>
    %15 = vector.shape_cast %14 : vector<1x8x8x4xbf16> to vector<64x4xbf16>
    %c2 = arith.constant 2 : index
    %c0_22 = arith.constant 0 : index
    %c0_23 = arith.constant 0 : index
    %16 = vector.load %arg2[%c2, %c0_22, %c0_23] : memref<9x4x8xbf16, #tpu.memory_space<vmem>>, vector<1x4x8xbf16>
    %17 = vector.shape_cast %16 : vector<1x4x8xbf16> to vector<4x8xbf16>
    %cst_24 = arith.constant dense<0.000000e+00> : vector<64x8xf32>
    %18 = tpu.matmul %15, %17, %cst_24 {dimension_numbers = #tpu.dot_dimension_numbers<[1], [0], [0], [1], [0, 0, 1, 1], [], []>} : vector<64x4xbf16>, vector<4x8xbf16>, vector<64x8xf32> -> vector<64x8xf32>
    %c0_25 = arith.constant 0 : index
    %c0_26 = arith.constant 0 : index
    %19 = vector.load %arg8[%c0_25, %c0_26] : memref<64x8xf32, #tpu.memory_space<vmem>>, vector<64x8xf32>
    %20 = arith.addf %19, %18 : vector<64x8xf32>
    %c0_27 = arith.constant 0 : index
    %c0_28 = arith.constant 0 : index
    %21 = vector.load %arg8[%c0_27, %c0_28] : memref<64x8xf32, #tpu.memory_space<vmem>>, vector<64x8xf32>
    tpu.vector_store %arg8[%c0_27, %c0_28], %20 {strides = array<i32>} : memref<64x8xf32, #tpu.memory_space<vmem>>, vector<64x8xf32>,
    %c0_29 = arith.constant 0 : index
    %c0_30 = arith.constant 0 : index
    %c0_31 = arith.constant 0 : index
    %c8 = arith.constant 8 : index
    %22 = vector.load %arg1[%c0_29, %c0_30, %c0_31, %c8] : memref<1x9x9x16xbf16, #tpu.memory_space<vmem>>, vector<1x8x8x4xbf16>
    %23 = vector.shape_cast %22 : vector<1x8x8x4xbf16> to vector<64x4xbf16>
    %c3 = arith.constant 3 : index
    %c0_32 = arith.constant 0 : index
    %c0_33 = arith.constant 0 : index
    %24 = vector.load %arg2[%c3, %c0_32, %c0_33] : memref<9x4x8xbf16, #tpu.memory_space<vmem>>, vector<1x4x8xbf16>
    %25 = vector.shape_cast %24 : vector<1x4x8xbf16> to vector<4x8xbf16>
    %cst_34 = arith.constant dense<0.000000e+00> : vector<64x8xf32>
    %26 = tpu.matmul %23, %25, %cst_34 {dimension_numbers = #tpu.dot_dimension_numbers<[1], [0], [0], [1], [0, 0, 1, 1], [], []>} : vector<64x4xbf16>, vector<4x8xbf16>, vector<64x8xf32> -> vector<64x8xf32>
    %c0_35 = arith.constant 0 : index
    %c0_36 = arith.constant 0 : index
    %27 = vector.load %arg8[%c0_35, %c0_36] : memref<64x8xf32, #tpu.memory_space<vmem>>, vector<64x8xf32>
    %28 = arith.addf %27, %26 : vector<64x8xf32>
    %c0_37 = arith.constant 0 : index
    %c0_38 = arith.constant 0 : index
    %29 = vector.load %arg8[%c0_37, %c0_38] : memref<64x8xf32, #tpu.memory_space<vmem>>, vector<64x8xf32>
    tpu.vector_store %arg8[%c0_37, %c0_38], %28 {strides = array<i32>} : memref<64x8xf32, #tpu.memory_space<vmem>>, vector<64x8xf32>,
    %c0_39 = arith.constant 0 : index
    %c0_40 = arith.constant 0 : index
    %c0_41 = arith.constant 0 : index
    %c12 = arith.constant 12 : index
    %30 = vector.load %arg1[%c0_39, %c0_40, %c0_41, %c12] : memref<1x9x9x16xbf16, #tpu.memory_space<vmem>>, vector<1x8x8x4xbf16>
    %31 = vector.shape_cast %30 : vector<1x8x8x4xbf16> to vector<64x4xbf16>
    %c4_42 = arith.constant 4 : index
    %c0_43 = arith.constant 0 : index
    %c0_44 = arith.constant 0 : index
    %32 = vector.load %arg2[%c4_42, %c0_43, %c0_44] : memref<9x4x8xbf16, #tpu.memory_space<vmem>>, vector<1x4x8xbf16>
    %33 = vector.shape_cast %32 : vector<1x4x8xbf16> to vector<4x8xbf16>
    %cst_45 = arith.constant dense<0.000000e+00> : vector<64x8xf32>
    %34 = tpu.matmul %31, %33, %cst_45 {dimension_numbers = #tpu.dot_dimension_numbers<[1], [0], [0], [1], [0, 0, 1, 1], [], []>} : vector<64x4xbf16>, vector<4x8xbf16>, vector<64x8xf32> -> vector<64x8xf32>
    %c0_46 = arith.constant 0 : index
    %c0_47 = arith.constant 0 : index
    %35 = vector.load %arg8[%c0_46, %c0_47] : memref<64x8xf32, #tpu.memory_space<vmem>>, vector<64x8xf32>
    %36 = arith.addf %35, %34 : vector<64x8xf32>
    %c0_48 = arith.constant 0 : index
    %c0_49 = arith.constant 0 : index
    %37 = vector.load %arg8[%c0_48, %c0_49] : memref<64x8xf32, #tpu.memory_space<vmem>>, vector<64x8xf32>
    tpu.vector_store %arg8[%c0_48, %c0_49], %36 {strides = array<i32>} : memref<64x8xf32, #tpu.memory_space<vmem>>, vector<64x8xf32>,
    %c0_50 = arith.constant 0 : index
    %c0_51 = arith.constant 0 : index
    %c1_52 = arith.constant 1 : index
    %c8_53 = arith.constant 8 : index
    %38 = vector.load %arg1[%c0_50, %c0_51, %c1_52, %c8_53] : memref<1x9x9x16xbf16, #tpu.memory_space<vmem>>, vector<1x8x8x4xbf16>
    %39 = vector.shape_cast %38 : vector<1x8x8x4xbf16> to vector<64x4xbf16>
    %c5 = arith.constant 5 : index
    %c0_54 = arith.constant 0 : index
    %c0_55 = arith.constant 0 : index
    %40 = vector.load %arg2[%c5, %c0_54, %c0_55] : memref<9x4x8xbf16, #tpu.memory_space<vmem>>, vector<1x4x8xbf16>
    %41 = vector.shape_cast %40 : vector<1x4x8xbf16> to vector<4x8xbf16>
    %cst_56 = arith.constant dense<0.000000e+00> : vector<64x8xf32>
    %42 = tpu.matmul %39, %41, %cst_56 {dimension_numbers = #tpu.dot_dimension_numbers<[1], [0], [0], [1], [0, 0, 1, 1], [], []>} : vector<64x4xbf16>, vector<4x8xbf16>, vector<64x8xf32> -> vector<64x8xf32>
    %c0_57 = arith.constant 0 : index
    %c0_58 = arith.constant 0 : index
    %43 = vector.load %arg8[%c0_57, %c0_58] : memref<64x8xf32, #tpu.memory_space<vmem>>, vector<64x8xf32>
    %44 = arith.addf %43, %42 : vector<64x8xf32>
    %c0_59 = arith.constant 0 : index
    %c0_60 = arith.constant 0 : index
    %45 = vector.load %arg8[%c0_59, %c0_60] : memref<64x8xf32, #tpu.memory_space<vmem>>, vector<64x8xf32>
    tpu.vector_store %arg8[%c0_59, %c0_60], %44 {strides = array<i32>} : memref<64x8xf32, #tpu.memory_space<vmem>>, vector<64x8xf32>,
    %c0_61 = arith.constant 0 : index
    %c1_62 = arith.constant 1 : index
    %c0_63 = arith.constant 0 : index
    %c0_64 = arith.constant 0 : index
    %46 = vector.load %arg1[%c0_61, %c1_62, %c0_63, %c0_64] : memref<1x9x9x16xbf16, #tpu.memory_space<vmem>>, vector<1x8x8x4xbf16>
    %47 = vector.shape_cast %46 : vector<1x8x8x4xbf16> to vector<64x4xbf16>
    %c6 = arith.constant 6 : index
    %c0_65 = arith.constant 0 : index
    %c0_66 = arith.constant 0 : index
    %48 = vector.load %arg2[%c6, %c0_65, %c0_66] : memref<9x4x8xbf16, #tpu.memory_space<vmem>>, vector<1x4x8xbf16>
    %49 = vector.shape_cast %48 : vector<1x4x8xbf16> to vector<4x8xbf16>
    %cst_67 = arith.constant dense<0.000000e+00> : vector<64x8xf32>
    %50 = tpu.matmul %47, %49, %cst_67 {dimension_numbers = #tpu.dot_dimension_numbers<[1], [0], [0], [1], [0, 0, 1, 1], [], []>} : vector<64x4xbf16>, vector<4x8xbf16>, vector<64x8xf32> -> vector<64x8xf32>
    %c0_68 = arith.constant 0 : index
    %c0_69 = arith.constant 0 : index
    %51 = vector.load %arg8[%c0_68, %c0_69] : memref<64x8xf32, #tpu.memory_space<vmem>>, vector<64x8xf32>
    %52 = arith.addf %51, %50 : vector<64x8xf32>
    %c0_70 = arith.constant 0 : index
    %c0_71 = arith.constant 0 : index
    %53 = vector.load %arg8[%c0_70, %c0_71] : memref<64x8xf32, #tpu.memory_space<vmem>>, vector<64x8xf32>
    tpu.vector_store %arg8[%c0_70, %c0_71], %52 {strides = array<i32>} : memref<64x8xf32, #tpu.memory_space<vmem>>, vector<64x8xf32>,
    %c0_72 = arith.constant 0 : index
    %c1_73 = arith.constant 1 : index
    %c0_74 = arith.constant 0 : index
    %c4_75 = arith.constant 4 : index
    %54 = vector.load %arg1[%c0_72, %c1_73, %c0_74, %c4_75] : memref<1x9x9x16xbf16, #tpu.memory_space<vmem>>, vector<1x8x8x4xbf16>
    %55 = vector.shape_cast %54 : vector<1x8x8x4xbf16> to vector<64x4xbf16>
    %c7 = arith.constant 7 : index
    %c0_76 = arith.constant 0 : index
    %c0_77 = arith.constant 0 : index
    %56 = vector.load %arg2[%c7, %c0_76, %c0_77] : memref<9x4x8xbf16, #tpu.memory_space<vmem>>, vector<1x4x8xbf16>
    %57 = vector.shape_cast %56 : vector<1x4x8xbf16> to vector<4x8xbf16>
    %cst_78 = arith.constant dense<0.000000e+00> : vector<64x8xf32>
    %58 = tpu.matmul %55, %57, %cst_78 {dimension_numbers = #tpu.dot_dimension_numbers<[1], [0], [0], [1], [0, 0, 1, 1], [], []>} : vector<64x4xbf16>, vector<4x8xbf16>, vector<64x8xf32> -> vector<64x8xf32>
    %c0_79 = arith.constant 0 : index
    %c0_80 = arith.constant 0 : index
    %59 = vector.load %arg8[%c0_79, %c0_80] : memref<64x8xf32, #tpu.memory_space<vmem>>, vector<64x8xf32>
    %60 = arith.addf %59, %58 : vector<64x8xf32>
    %c0_81 = arith.constant 0 : index
    %c0_82 = arith.constant 0 : index
    %61 = vector.load %arg8[%c0_81, %c0_82] : memref<64x8xf32, #tpu.memory_space<vmem>>, vector<64x8xf32>
    tpu.vector_store %arg8[%c0_81, %c0_82], %60 {strides = array<i32>} : memref<64x8xf32, #tpu.memory_space<vmem>>, vector<64x8xf32>,
    %c0_83 = arith.constant 0 : index
    %c1_84 = arith.constant 1 : index
    %c1_85 = arith.constant 1 : index
    %c0_86 = arith.constant 0 : index
    %62 = vector.load %arg1[%c0_83, %c1_84, %c1_85, %c0_86] : memref<1x9x9x16xbf16, #tpu.memory_space<vmem>>, vector<1x8x8x4xbf16>
    %63 = vector.shape_cast %62 : vector<1x8x8x4xbf16> to vector<64x4xbf16>
    %c8_87 = arith.constant 8 : index
    %c0_88 = arith.constant 0 : index
    %c0_89 = arith.constant 0 : index
    %64 = vector.load %arg2[%c8_87, %c0_88, %c0_89] : memref<9x4x8xbf16, #tpu.memory_space<vmem>>, vector<1x4x8xbf16>
    %65 = vector.shape_cast %64 : vector<1x4x8xbf16> to vector<4x8xbf16>
    %cst_90 = arith.constant dense<0.000000e+00> : vector<64x8xf32>
    %66 = tpu.matmul %63, %65, %cst_90 {dimension_numbers = #tpu.dot_dimension_numbers<[1], [0], [0], [1], [0, 0, 1, 1], [], []>} : vector<64x4xbf16>, vector<4x8xbf16>, vector<64x8xf32> -> vector<64x8xf32>
    %c0_91 = arith.constant 0 : index
    %c0_92 = arith.constant 0 : index
    %67 = vector.load %arg8[%c0_91, %c0_92] : memref<64x8xf32, #tpu.memory_space<vmem>>, vector<64x8xf32>
    %68 = arith.addf %67, %66 : vector<64x8xf32>
    %c0_93 = arith.constant 0 : index
    %c0_94 = arith.constant 0 : index
    %69 = vector.load %arg8[%c0_93, %c0_94] : memref<64x8xf32, #tpu.memory_space<vmem>>, vector<64x8xf32>
    tpu.vector_store %arg8[%c0_93, %c0_94], %68 {strides = array<i32>} : memref<64x8xf32, #tpu.memory_space<vmem>>, vector<64x8xf32>,
    %c0_95 = arith.constant 0 : index
    %c0_96 = arith.constant 0 : index
    %70 = vector.load %arg8[%c0_95, %c0_96] : memref<64x8xf32, #tpu.memory_space<vmem>>, vector<64x8xf32>
    %c0_97 = arith.constant 0 : index
    %c0_98 = arith.constant 0 : index
    %71 = vector.load %arg4[%c0_97, %c0_98] : memref<1x8xf32, #tpu.memory_space<vmem>>, vector<1x8xf32>
    %72 = vector.broadcast %71 : vector<1x8xf32> to vector<64x8xf32>
    %73 = arith.mulf %70, %72 : vector<64x8xf32>
    %c0_99 = arith.constant 0 : index
    %c0_100 = arith.constant 0 : index
    %74 = vector.load %arg5[%c0_99, %c0_100] : memref<1x8xf32, #tpu.memory_space<vmem>>, vector<1x8xf32>
    %75 = vector.broadcast %74 : vector<1x8xf32> to vector<64x8xf32>
    %76 = arith.addf %73, %75 : vector<64x8xf32>
    %cst_101 = arith.constant 0.000000e+00 : f32
    %77 = vector.broadcast %cst_101 : f32 to vector<64x8xf32>
    %78 = arith.maximumf %76, %77 : vector<64x8xf32>
    %79 = arith.truncf %78 : vector<64x8xf32> to vector<64x8xbf16>
    %c0_102 = arith.constant 0 : index
    %c0_103 = arith.constant 0 : index
    %80 = vector.load %arg6[%c0_102, %c0_103] : memref<64x8xbf16, #tpu.memory_space<vmem>>, vector<64x8xbf16>
    tpu.vector_store %arg6[%c0_102, %c0_103], %79 {strides = array<i32>} : memref<64x8xbf16, #tpu.memory_space<vmem>>, vector<64x8xbf16>,
    %c0_104 = arith.constant 0 : index
    %c0_105 = arith.constant 0 : index
    %c0_106 = arith.constant 0 : index
    %c12_107 = arith.constant 12 : index
    %81 = vector.load %arg1[%c0_104, %c0_105, %c0_106, %c12_107] : memref<1x9x9x16xbf16, #tpu.memory_space<vmem>>, vector<1x8x8x4xbf16>
    %82 = vector.shape_cast %81 : vector<1x8x8x4xbf16> to vector<64x4xbf16>
    %c0_108 = arith.constant 0 : index
    %c0_109 = arith.constant 0 : index
    %83 = vector.load %arg3[%c0_108, %c0_109] : memref<4x8xbf16, #tpu.memory_space<vmem>>, vector<4x8xbf16>
    %cst_110 = arith.constant dense<0.000000e+00> : vector<64x8xf32>
    %84 = tpu.matmul %82, %83, %cst_110 {dimension_numbers = #tpu.dot_dimension_numbers<[1], [0], [0], [1], [0, 0, 1, 1], [], []>} : vector<64x4xbf16>, vector<4x8xbf16>, vector<64x8xf32> -> vector<64x8xf32>
    %85 = arith.truncf %84 : vector<64x8xf32> to vector<64x8xbf16>
    %c0_111 = arith.constant 0 : index
    %c0_112 = arith.constant 0 : index
    %86 = vector.load %arg7[%c0_111, %c0_112] : memref<64x8xbf16, #tpu.memory_space<vmem>>, vector<64x8xbf16>
    tpu.vector_store %arg7[%c0_111, %c0_112], %85 {strides = array<i32>} : memref<64x8xbf16, #tpu.memory_space<vmem>>, vector<64x8xbf16>,
    return
  }
  func.func @transform_0(%arg0: i32) -> (i32, i32, i32, i32) {
    %c0_i32 = arith.constant 0 : i32
    %c0_i32_0 = arith.constant 0 : i32
    %c0_i32_1 = arith.constant 0 : i32
    %c0_i32_2 = arith.constant 0 : i32
    return %arg0, %c0_i32, %c0_i32_0, %c0_i32_1 : i32, i32, i32, i32
  }
  func.func @transform_1(%arg0: i32) -> (i32, i32, i32) {
    %c0_i32 = arith.constant 0 : i32
    %c0_i32_0 = arith.constant 0 : i32
    %c0_i32_1 = arith.constant 0 : i32
    %c0_i32_2 = arith.constant 0 : i32
    return %c0_i32, %c0_i32_0, %c0_i32_1 : i32, i32, i32
  }
  func.func @transform_2(%arg0: i32) -> (i32, i32) {
    %c0_i32 = arith.constant 0 : i32
    %c0_i32_0 = arith.constant 0 : i32
    %c0_i32_1 = arith.constant 0 : i32
    return %c0_i32, %c0_i32_0 : i32, i32
  }
  func.func @transform_3(%arg0: i32) -> (i32, i32) {
    %c0_i32 = arith.constant 0 : i32
    %c0_i32_0 = arith.constant 0 : i32
    %c0_i32_1 = arith.constant 0 : i32
    return %c0_i32, %c0_i32_0 : i32, i32
  }
  func.func @transform_4(%arg0: i32) -> (i32, i32) {
    %c0_i32 = arith.constant 0 : i32
    %c0_i32_0 = arith.constant 0 : i32
    %c0_i32_1 = arith.constant 0 : i32
    return %c0_i32, %c0_i32_0 : i32, i32
  }
  func.func @transform_5(%arg0: i32) -> (i32, i32) {
    %c0_i32 = arith.constant 0 : i32
    %c0_i32_0 = arith.constant 0 : i32
    return %arg0, %c0_i32 : i32, i32
  }
  func.func @transform_6(%arg0: i32) -> (i32, i32) {
    %c0_i32 = arith.constant 0 : i32
    %c0_i32_0 = arith.constant 0 : i32
    return %arg0, %c0_i32 : i32, i32
  }
}

module attributes {stable_mosaic.version = 11 : i64} {
  func.func @kernel(%arg0: i32, %arg1: memref<1x10x10x8xbf16, #tpu.memory_space<vmem>>, %arg2: memref<9x8x8xbf16, #tpu.memory_space<vmem>>, %arg3: memref<64x8xbf16, #tpu.memory_space<vmem>>, %arg4: memref<1x8xf32, #tpu.memory_space<vmem>>, %arg5: memref<1x8xf32, #tpu.memory_space<vmem>>, %arg6: memref<64x8xbf16, #tpu.memory_space<vmem>>, %arg7: memref<64x8xbf16, #tpu.memory_space<vmem>>, %arg8: memref<64x8xf32, #tpu.memory_space<vmem>>) attributes {dimension_semantics = [#tpu.dimension_semantics<parallel>], iteration_bounds = array<i64: 2>, scalar_prefetch = 0 : i64, scratch_operands = 1 : i64, tpu.core_type = #tpu.core_type<tc>, window_params = [{transform_indices = @transform_0, window_bounds = array<i64: 1, 10, 10, 8>}, {pipeline_mode = #tpu.pipeline_mode<synchronous>, transform_indices = @transform_1, window_bounds = array<i64: 9, 8, 8>}, {transform_indices = @transform_2, window_bounds = array<i64: 64, 8>}, {pipeline_mode = #tpu.pipeline_mode<synchronous>, transform_indices = @transform_3, window_bounds = array<i64: 1, 8>}, {pipeline_mode = #tpu.pipeline_mode<synchronous>, transform_indices = @transform_4, window_bounds = array<i64: 1, 8>}, {transform_indices = @transform_5, window_bounds = array<i64: 64, 8>}, {transform_indices = @transform_6, window_bounds = array<i64: 64, 8>}]} {
    %c0 = arith.constant 0 : index
    %c0_0 = arith.constant 0 : index
    %c0_1 = arith.constant 0 : index
    %c0_2 = arith.constant 0 : index
    %0 = vector.load %arg1[%c0, %c0_0, %c0_1, %c0_2] : memref<1x10x10x8xbf16, #tpu.memory_space<vmem>>, vector<1x8x8x8xbf16>
    %1 = vector.shape_cast %0 : vector<1x8x8x8xbf16> to vector<64x8xbf16>
    %c0_3 = arith.constant 0 : index
    %c0_4 = arith.constant 0 : index
    %c0_5 = arith.constant 0 : index
    %2 = vector.load %arg2[%c0_3, %c0_4, %c0_5] : memref<9x8x8xbf16, #tpu.memory_space<vmem>>, vector<1x8x8xbf16>
    %3 = vector.shape_cast %2 : vector<1x8x8xbf16> to vector<8x8xbf16>
    %cst = arith.constant dense<0.000000e+00> : vector<64x8xf32>
    %4 = tpu.matmul %1, %3, %cst {dimension_numbers = #tpu.dot_dimension_numbers<[1], [0], [0], [1], [0, 0, 1, 1], [], []>} : vector<64x8xbf16>, vector<8x8xbf16>, vector<64x8xf32> -> vector<64x8xf32>
    %c0_6 = arith.constant 0 : index
    %c0_7 = arith.constant 0 : index
    %5 = vector.load %arg8[%c0_6, %c0_7] : memref<64x8xf32, #tpu.memory_space<vmem>>, vector<64x8xf32>
    tpu.vector_store %arg8[%c0_6, %c0_7], %4 {strides = array<i32>} : memref<64x8xf32, #tpu.memory_space<vmem>>, vector<64x8xf32>,
    %c0_8 = arith.constant 0 : index
    %c0_9 = arith.constant 0 : index
    %c1 = arith.constant 1 : index
    %c0_10 = arith.constant 0 : index
    %6 = vector.load %arg1[%c0_8, %c0_9, %c1, %c0_10] : memref<1x10x10x8xbf16, #tpu.memory_space<vmem>>, vector<1x8x8x8xbf16>
    %7 = vector.shape_cast %6 : vector<1x8x8x8xbf16> to vector<64x8xbf16>
    %c1_11 = arith.constant 1 : index
    %c0_12 = arith.constant 0 : index
    %c0_13 = arith.constant 0 : index
    %8 = vector.load %arg2[%c1_11, %c0_12, %c0_13] : memref<9x8x8xbf16, #tpu.memory_space<vmem>>, vector<1x8x8xbf16>
    %9 = vector.shape_cast %8 : vector<1x8x8xbf16> to vector<8x8xbf16>
    %cst_14 = arith.constant dense<0.000000e+00> : vector<64x8xf32>
    %10 = tpu.matmul %7, %9, %cst_14 {dimension_numbers = #tpu.dot_dimension_numbers<[1], [0], [0], [1], [0, 0, 1, 1], [], []>} : vector<64x8xbf16>, vector<8x8xbf16>, vector<64x8xf32> -> vector<64x8xf32>
    %c0_15 = arith.constant 0 : index
    %c0_16 = arith.constant 0 : index
    %11 = vector.load %arg8[%c0_15, %c0_16] : memref<64x8xf32, #tpu.memory_space<vmem>>, vector<64x8xf32>
    %12 = arith.addf %11, %10 : vector<64x8xf32>
    %c0_17 = arith.constant 0 : index
    %c0_18 = arith.constant 0 : index
    %13 = vector.load %arg8[%c0_17, %c0_18] : memref<64x8xf32, #tpu.memory_space<vmem>>, vector<64x8xf32>
    tpu.vector_store %arg8[%c0_17, %c0_18], %12 {strides = array<i32>} : memref<64x8xf32, #tpu.memory_space<vmem>>, vector<64x8xf32>,
    %c0_19 = arith.constant 0 : index
    %c0_20 = arith.constant 0 : index
    %c2 = arith.constant 2 : index
    %c0_21 = arith.constant 0 : index
    %14 = vector.load %arg1[%c0_19, %c0_20, %c2, %c0_21] : memref<1x10x10x8xbf16, #tpu.memory_space<vmem>>, vector<1x8x8x8xbf16>
    %15 = vector.shape_cast %14 : vector<1x8x8x8xbf16> to vector<64x8xbf16>
    %c2_22 = arith.constant 2 : index
    %c0_23 = arith.constant 0 : index
    %c0_24 = arith.constant 0 : index
    %16 = vector.load %arg2[%c2_22, %c0_23, %c0_24] : memref<9x8x8xbf16, #tpu.memory_space<vmem>>, vector<1x8x8xbf16>
    %17 = vector.shape_cast %16 : vector<1x8x8xbf16> to vector<8x8xbf16>
    %cst_25 = arith.constant dense<0.000000e+00> : vector<64x8xf32>
    %18 = tpu.matmul %15, %17, %cst_25 {dimension_numbers = #tpu.dot_dimension_numbers<[1], [0], [0], [1], [0, 0, 1, 1], [], []>} : vector<64x8xbf16>, vector<8x8xbf16>, vector<64x8xf32> -> vector<64x8xf32>
    %c0_26 = arith.constant 0 : index
    %c0_27 = arith.constant 0 : index
    %19 = vector.load %arg8[%c0_26, %c0_27] : memref<64x8xf32, #tpu.memory_space<vmem>>, vector<64x8xf32>
    %20 = arith.addf %19, %18 : vector<64x8xf32>
    %c0_28 = arith.constant 0 : index
    %c0_29 = arith.constant 0 : index
    %21 = vector.load %arg8[%c0_28, %c0_29] : memref<64x8xf32, #tpu.memory_space<vmem>>, vector<64x8xf32>
    tpu.vector_store %arg8[%c0_28, %c0_29], %20 {strides = array<i32>} : memref<64x8xf32, #tpu.memory_space<vmem>>, vector<64x8xf32>,
    %c0_30 = arith.constant 0 : index
    %c1_31 = arith.constant 1 : index
    %c0_32 = arith.constant 0 : index
    %c0_33 = arith.constant 0 : index
    %22 = vector.load %arg1[%c0_30, %c1_31, %c0_32, %c0_33] : memref<1x10x10x8xbf16, #tpu.memory_space<vmem>>, vector<1x8x8x8xbf16>
    %23 = vector.shape_cast %22 : vector<1x8x8x8xbf16> to vector<64x8xbf16>
    %c3 = arith.constant 3 : index
    %c0_34 = arith.constant 0 : index
    %c0_35 = arith.constant 0 : index
    %24 = vector.load %arg2[%c3, %c0_34, %c0_35] : memref<9x8x8xbf16, #tpu.memory_space<vmem>>, vector<1x8x8xbf16>
    %25 = vector.shape_cast %24 : vector<1x8x8xbf16> to vector<8x8xbf16>
    %cst_36 = arith.constant dense<0.000000e+00> : vector<64x8xf32>
    %26 = tpu.matmul %23, %25, %cst_36 {dimension_numbers = #tpu.dot_dimension_numbers<[1], [0], [0], [1], [0, 0, 1, 1], [], []>} : vector<64x8xbf16>, vector<8x8xbf16>, vector<64x8xf32> -> vector<64x8xf32>
    %c0_37 = arith.constant 0 : index
    %c0_38 = arith.constant 0 : index
    %27 = vector.load %arg8[%c0_37, %c0_38] : memref<64x8xf32, #tpu.memory_space<vmem>>, vector<64x8xf32>
    %28 = arith.addf %27, %26 : vector<64x8xf32>
    %c0_39 = arith.constant 0 : index
    %c0_40 = arith.constant 0 : index
    %29 = vector.load %arg8[%c0_39, %c0_40] : memref<64x8xf32, #tpu.memory_space<vmem>>, vector<64x8xf32>
    tpu.vector_store %arg8[%c0_39, %c0_40], %28 {strides = array<i32>} : memref<64x8xf32, #tpu.memory_space<vmem>>, vector<64x8xf32>,
    %c0_41 = arith.constant 0 : index
    %c1_42 = arith.constant 1 : index
    %c1_43 = arith.constant 1 : index
    %c0_44 = arith.constant 0 : index
    %30 = vector.load %arg1[%c0_41, %c1_42, %c1_43, %c0_44] : memref<1x10x10x8xbf16, #tpu.memory_space<vmem>>, vector<1x8x8x8xbf16>
    %31 = vector.shape_cast %30 : vector<1x8x8x8xbf16> to vector<64x8xbf16>
    %c4 = arith.constant 4 : index
    %c0_45 = arith.constant 0 : index
    %c0_46 = arith.constant 0 : index
    %32 = vector.load %arg2[%c4, %c0_45, %c0_46] : memref<9x8x8xbf16, #tpu.memory_space<vmem>>, vector<1x8x8xbf16>
    %33 = vector.shape_cast %32 : vector<1x8x8xbf16> to vector<8x8xbf16>
    %cst_47 = arith.constant dense<0.000000e+00> : vector<64x8xf32>
    %34 = tpu.matmul %31, %33, %cst_47 {dimension_numbers = #tpu.dot_dimension_numbers<[1], [0], [0], [1], [0, 0, 1, 1], [], []>} : vector<64x8xbf16>, vector<8x8xbf16>, vector<64x8xf32> -> vector<64x8xf32>
    %c0_48 = arith.constant 0 : index
    %c0_49 = arith.constant 0 : index
    %35 = vector.load %arg8[%c0_48, %c0_49] : memref<64x8xf32, #tpu.memory_space<vmem>>, vector<64x8xf32>
    %36 = arith.addf %35, %34 : vector<64x8xf32>
    %c0_50 = arith.constant 0 : index
    %c0_51 = arith.constant 0 : index
    %37 = vector.load %arg8[%c0_50, %c0_51] : memref<64x8xf32, #tpu.memory_space<vmem>>, vector<64x8xf32>
    tpu.vector_store %arg8[%c0_50, %c0_51], %36 {strides = array<i32>} : memref<64x8xf32, #tpu.memory_space<vmem>>, vector<64x8xf32>,
    %c0_52 = arith.constant 0 : index
    %c1_53 = arith.constant 1 : index
    %c2_54 = arith.constant 2 : index
    %c0_55 = arith.constant 0 : index
    %38 = vector.load %arg1[%c0_52, %c1_53, %c2_54, %c0_55] : memref<1x10x10x8xbf16, #tpu.memory_space<vmem>>, vector<1x8x8x8xbf16>
    %39 = vector.shape_cast %38 : vector<1x8x8x8xbf16> to vector<64x8xbf16>
    %c5 = arith.constant 5 : index
    %c0_56 = arith.constant 0 : index
    %c0_57 = arith.constant 0 : index
    %40 = vector.load %arg2[%c5, %c0_56, %c0_57] : memref<9x8x8xbf16, #tpu.memory_space<vmem>>, vector<1x8x8xbf16>
    %41 = vector.shape_cast %40 : vector<1x8x8xbf16> to vector<8x8xbf16>
    %cst_58 = arith.constant dense<0.000000e+00> : vector<64x8xf32>
    %42 = tpu.matmul %39, %41, %cst_58 {dimension_numbers = #tpu.dot_dimension_numbers<[1], [0], [0], [1], [0, 0, 1, 1], [], []>} : vector<64x8xbf16>, vector<8x8xbf16>, vector<64x8xf32> -> vector<64x8xf32>
    %c0_59 = arith.constant 0 : index
    %c0_60 = arith.constant 0 : index
    %43 = vector.load %arg8[%c0_59, %c0_60] : memref<64x8xf32, #tpu.memory_space<vmem>>, vector<64x8xf32>
    %44 = arith.addf %43, %42 : vector<64x8xf32>
    %c0_61 = arith.constant 0 : index
    %c0_62 = arith.constant 0 : index
    %45 = vector.load %arg8[%c0_61, %c0_62] : memref<64x8xf32, #tpu.memory_space<vmem>>, vector<64x8xf32>
    tpu.vector_store %arg8[%c0_61, %c0_62], %44 {strides = array<i32>} : memref<64x8xf32, #tpu.memory_space<vmem>>, vector<64x8xf32>,
    %c0_63 = arith.constant 0 : index
    %c2_64 = arith.constant 2 : index
    %c0_65 = arith.constant 0 : index
    %c0_66 = arith.constant 0 : index
    %46 = vector.load %arg1[%c0_63, %c2_64, %c0_65, %c0_66] : memref<1x10x10x8xbf16, #tpu.memory_space<vmem>>, vector<1x8x8x8xbf16>
    %47 = vector.shape_cast %46 : vector<1x8x8x8xbf16> to vector<64x8xbf16>
    %c6 = arith.constant 6 : index
    %c0_67 = arith.constant 0 : index
    %c0_68 = arith.constant 0 : index
    %48 = vector.load %arg2[%c6, %c0_67, %c0_68] : memref<9x8x8xbf16, #tpu.memory_space<vmem>>, vector<1x8x8xbf16>
    %49 = vector.shape_cast %48 : vector<1x8x8xbf16> to vector<8x8xbf16>
    %cst_69 = arith.constant dense<0.000000e+00> : vector<64x8xf32>
    %50 = tpu.matmul %47, %49, %cst_69 {dimension_numbers = #tpu.dot_dimension_numbers<[1], [0], [0], [1], [0, 0, 1, 1], [], []>} : vector<64x8xbf16>, vector<8x8xbf16>, vector<64x8xf32> -> vector<64x8xf32>
    %c0_70 = arith.constant 0 : index
    %c0_71 = arith.constant 0 : index
    %51 = vector.load %arg8[%c0_70, %c0_71] : memref<64x8xf32, #tpu.memory_space<vmem>>, vector<64x8xf32>
    %52 = arith.addf %51, %50 : vector<64x8xf32>
    %c0_72 = arith.constant 0 : index
    %c0_73 = arith.constant 0 : index
    %53 = vector.load %arg8[%c0_72, %c0_73] : memref<64x8xf32, #tpu.memory_space<vmem>>, vector<64x8xf32>
    tpu.vector_store %arg8[%c0_72, %c0_73], %52 {strides = array<i32>} : memref<64x8xf32, #tpu.memory_space<vmem>>, vector<64x8xf32>,
    %c0_74 = arith.constant 0 : index
    %c2_75 = arith.constant 2 : index
    %c1_76 = arith.constant 1 : index
    %c0_77 = arith.constant 0 : index
    %54 = vector.load %arg1[%c0_74, %c2_75, %c1_76, %c0_77] : memref<1x10x10x8xbf16, #tpu.memory_space<vmem>>, vector<1x8x8x8xbf16>
    %55 = vector.shape_cast %54 : vector<1x8x8x8xbf16> to vector<64x8xbf16>
    %c7 = arith.constant 7 : index
    %c0_78 = arith.constant 0 : index
    %c0_79 = arith.constant 0 : index
    %56 = vector.load %arg2[%c7, %c0_78, %c0_79] : memref<9x8x8xbf16, #tpu.memory_space<vmem>>, vector<1x8x8xbf16>
    %57 = vector.shape_cast %56 : vector<1x8x8xbf16> to vector<8x8xbf16>
    %cst_80 = arith.constant dense<0.000000e+00> : vector<64x8xf32>
    %58 = tpu.matmul %55, %57, %cst_80 {dimension_numbers = #tpu.dot_dimension_numbers<[1], [0], [0], [1], [0, 0, 1, 1], [], []>} : vector<64x8xbf16>, vector<8x8xbf16>, vector<64x8xf32> -> vector<64x8xf32>
    %c0_81 = arith.constant 0 : index
    %c0_82 = arith.constant 0 : index
    %59 = vector.load %arg8[%c0_81, %c0_82] : memref<64x8xf32, #tpu.memory_space<vmem>>, vector<64x8xf32>
    %60 = arith.addf %59, %58 : vector<64x8xf32>
    %c0_83 = arith.constant 0 : index
    %c0_84 = arith.constant 0 : index
    %61 = vector.load %arg8[%c0_83, %c0_84] : memref<64x8xf32, #tpu.memory_space<vmem>>, vector<64x8xf32>
    tpu.vector_store %arg8[%c0_83, %c0_84], %60 {strides = array<i32>} : memref<64x8xf32, #tpu.memory_space<vmem>>, vector<64x8xf32>,
    %c0_85 = arith.constant 0 : index
    %c2_86 = arith.constant 2 : index
    %c2_87 = arith.constant 2 : index
    %c0_88 = arith.constant 0 : index
    %62 = vector.load %arg1[%c0_85, %c2_86, %c2_87, %c0_88] : memref<1x10x10x8xbf16, #tpu.memory_space<vmem>>, vector<1x8x8x8xbf16>
    %63 = vector.shape_cast %62 : vector<1x8x8x8xbf16> to vector<64x8xbf16>
    %c8 = arith.constant 8 : index
    %c0_89 = arith.constant 0 : index
    %c0_90 = arith.constant 0 : index
    %64 = vector.load %arg2[%c8, %c0_89, %c0_90] : memref<9x8x8xbf16, #tpu.memory_space<vmem>>, vector<1x8x8xbf16>
    %65 = vector.shape_cast %64 : vector<1x8x8xbf16> to vector<8x8xbf16>
    %cst_91 = arith.constant dense<0.000000e+00> : vector<64x8xf32>
    %66 = tpu.matmul %63, %65, %cst_91 {dimension_numbers = #tpu.dot_dimension_numbers<[1], [0], [0], [1], [0, 0, 1, 1], [], []>} : vector<64x8xbf16>, vector<8x8xbf16>, vector<64x8xf32> -> vector<64x8xf32>
    %c0_92 = arith.constant 0 : index
    %c0_93 = arith.constant 0 : index
    %67 = vector.load %arg8[%c0_92, %c0_93] : memref<64x8xf32, #tpu.memory_space<vmem>>, vector<64x8xf32>
    %68 = arith.addf %67, %66 : vector<64x8xf32>
    %c0_94 = arith.constant 0 : index
    %c0_95 = arith.constant 0 : index
    %69 = vector.load %arg8[%c0_94, %c0_95] : memref<64x8xf32, #tpu.memory_space<vmem>>, vector<64x8xf32>
    tpu.vector_store %arg8[%c0_94, %c0_95], %68 {strides = array<i32>} : memref<64x8xf32, #tpu.memory_space<vmem>>, vector<64x8xf32>,
    %c0_96 = arith.constant 0 : index
    %c0_97 = arith.constant 0 : index
    %70 = vector.load %arg8[%c0_96, %c0_97] : memref<64x8xf32, #tpu.memory_space<vmem>>, vector<64x8xf32>
    %c0_98 = arith.constant 0 : index
    %c0_99 = arith.constant 0 : index
    %71 = vector.load %arg3[%c0_98, %c0_99] : memref<64x8xbf16, #tpu.memory_space<vmem>>, vector<64x8xbf16>
    %72 = arith.extf %71 : vector<64x8xbf16> to vector<64x8xf32>
    %73 = arith.addf %70, %72 : vector<64x8xf32>
    %74 = arith.truncf %73 : vector<64x8xf32> to vector<64x8xbf16>
    %c0_100 = arith.constant 0 : index
    %c0_101 = arith.constant 0 : index
    %75 = vector.load %arg6[%c0_100, %c0_101] : memref<64x8xbf16, #tpu.memory_space<vmem>>, vector<64x8xbf16>
    tpu.vector_store %arg6[%c0_100, %c0_101], %74 {strides = array<i32>} : memref<64x8xbf16, #tpu.memory_space<vmem>>, vector<64x8xbf16>,
    %c0_102 = arith.constant 0 : index
    %c0_103 = arith.constant 0 : index
    %76 = vector.load %arg4[%c0_102, %c0_103] : memref<1x8xf32, #tpu.memory_space<vmem>>, vector<1x8xf32>
    %77 = vector.broadcast %76 : vector<1x8xf32> to vector<64x8xf32>
    %78 = arith.mulf %73, %77 : vector<64x8xf32>
    %c0_104 = arith.constant 0 : index
    %c0_105 = arith.constant 0 : index
    %79 = vector.load %arg5[%c0_104, %c0_105] : memref<1x8xf32, #tpu.memory_space<vmem>>, vector<1x8xf32>
    %80 = vector.broadcast %79 : vector<1x8xf32> to vector<64x8xf32>
    %81 = arith.addf %78, %80 : vector<64x8xf32>
    %cst_106 = arith.constant 0.000000e+00 : f32
    %82 = vector.broadcast %cst_106 : f32 to vector<64x8xf32>
    %83 = arith.maximumf %81, %82 : vector<64x8xf32>
    %84 = arith.truncf %83 : vector<64x8xf32> to vector<64x8xbf16>
    %c0_107 = arith.constant 0 : index
    %c0_108 = arith.constant 0 : index
    %85 = vector.load %arg7[%c0_107, %c0_108] : memref<64x8xbf16, #tpu.memory_space<vmem>>, vector<64x8xbf16>
    tpu.vector_store %arg7[%c0_107, %c0_108], %84 {strides = array<i32>} : memref<64x8xbf16, #tpu.memory_space<vmem>>, vector<64x8xbf16>,
    return
  }
  func.func @transform_0(%arg0: i32) -> (i32, i32, i32, i32) {
    %c0_i32 = arith.constant 0 : i32
    %c0_i32_0 = arith.constant 0 : i32
    %c0_i32_1 = arith.constant 0 : i32
    %c0_i32_2 = arith.constant 0 : i32
    return %arg0, %c0_i32, %c0_i32_0, %c0_i32_1 : i32, i32, i32, i32
  }
  func.func @transform_1(%arg0: i32) -> (i32, i32, i32) {
    %c0_i32 = arith.constant 0 : i32
    %c0_i32_0 = arith.constant 0 : i32
    %c0_i32_1 = arith.constant 0 : i32
    %c0_i32_2 = arith.constant 0 : i32
    return %c0_i32, %c0_i32_0, %c0_i32_1 : i32, i32, i32
  }
  func.func @transform_2(%arg0: i32) -> (i32, i32) {
    %c0_i32 = arith.constant 0 : i32
    %c0_i32_0 = arith.constant 0 : i32
    return %arg0, %c0_i32 : i32, i32
  }
  func.func @transform_3(%arg0: i32) -> (i32, i32) {
    %c0_i32 = arith.constant 0 : i32
    %c0_i32_0 = arith.constant 0 : i32
    %c0_i32_1 = arith.constant 0 : i32
    return %c0_i32, %c0_i32_0 : i32, i32
  }
  func.func @transform_4(%arg0: i32) -> (i32, i32) {
    %c0_i32 = arith.constant 0 : i32
    %c0_i32_0 = arith.constant 0 : i32
    %c0_i32_1 = arith.constant 0 : i32
    return %c0_i32, %c0_i32_0 : i32, i32
  }
  func.func @transform_5(%arg0: i32) -> (i32, i32) {
    %c0_i32 = arith.constant 0 : i32
    %c0_i32_0 = arith.constant 0 : i32
    return %arg0, %c0_i32 : i32, i32
  }
  func.func @transform_6(%arg0: i32) -> (i32, i32) {
    %c0_i32 = arith.constant 0 : i32
    %c0_i32_0 = arith.constant 0 : i32
    return %arg0, %c0_i32 : i32, i32
  }
}

module attributes {stable_mosaic.version = 11 : i64} {
  func.func @kernel(%arg0: i32, %arg1: memref<1x10x10x8xbf16, #tpu.memory_space<vmem>>, %arg2: memref<9x8x8xbf16, #tpu.memory_space<vmem>>, %arg3: memref<64x8xbf16, #tpu.memory_space<vmem>>, %arg4: memref<64x8xbf16, #tpu.memory_space<vmem>>, %arg5: memref<64x8xf32, #tpu.memory_space<vmem>>) attributes {dimension_semantics = [#tpu.dimension_semantics<parallel>], iteration_bounds = array<i64: 2>, scalar_prefetch = 0 : i64, scratch_operands = 1 : i64, tpu.core_type = #tpu.core_type<tc>, window_params = [{transform_indices = @transform_0, window_bounds = array<i64: 1, 10, 10, 8>}, {pipeline_mode = #tpu.pipeline_mode<synchronous>, transform_indices = @transform_1, window_bounds = array<i64: 9, 8, 8>}, {transform_indices = @transform_2, window_bounds = array<i64: 64, 8>}, {transform_indices = @transform_3, window_bounds = array<i64: 64, 8>}]} {
    %c0 = arith.constant 0 : index
    %c0_0 = arith.constant 0 : index
    %c0_1 = arith.constant 0 : index
    %c0_2 = arith.constant 0 : index
    %0 = vector.load %arg1[%c0, %c0_0, %c0_1, %c0_2] : memref<1x10x10x8xbf16, #tpu.memory_space<vmem>>, vector<1x8x8x8xbf16>
    %1 = vector.shape_cast %0 : vector<1x8x8x8xbf16> to vector<64x8xbf16>
    %c0_3 = arith.constant 0 : index
    %c0_4 = arith.constant 0 : index
    %c0_5 = arith.constant 0 : index
    %2 = vector.load %arg2[%c0_3, %c0_4, %c0_5] : memref<9x8x8xbf16, #tpu.memory_space<vmem>>, vector<1x8x8xbf16>
    %3 = vector.shape_cast %2 : vector<1x8x8xbf16> to vector<8x8xbf16>
    %cst = arith.constant dense<0.000000e+00> : vector<64x8xf32>
    %4 = tpu.matmul %1, %3, %cst {dimension_numbers = #tpu.dot_dimension_numbers<[1], [0], [0], [1], [0, 0, 1, 1], [], []>} : vector<64x8xbf16>, vector<8x8xbf16>, vector<64x8xf32> -> vector<64x8xf32>
    %c0_6 = arith.constant 0 : index
    %c0_7 = arith.constant 0 : index
    %5 = vector.load %arg5[%c0_6, %c0_7] : memref<64x8xf32, #tpu.memory_space<vmem>>, vector<64x8xf32>
    tpu.vector_store %arg5[%c0_6, %c0_7], %4 {strides = array<i32>} : memref<64x8xf32, #tpu.memory_space<vmem>>, vector<64x8xf32>,
    %c0_8 = arith.constant 0 : index
    %c0_9 = arith.constant 0 : index
    %c1 = arith.constant 1 : index
    %c0_10 = arith.constant 0 : index
    %6 = vector.load %arg1[%c0_8, %c0_9, %c1, %c0_10] : memref<1x10x10x8xbf16, #tpu.memory_space<vmem>>, vector<1x8x8x8xbf16>
    %7 = vector.shape_cast %6 : vector<1x8x8x8xbf16> to vector<64x8xbf16>
    %c1_11 = arith.constant 1 : index
    %c0_12 = arith.constant 0 : index
    %c0_13 = arith.constant 0 : index
    %8 = vector.load %arg2[%c1_11, %c0_12, %c0_13] : memref<9x8x8xbf16, #tpu.memory_space<vmem>>, vector<1x8x8xbf16>
    %9 = vector.shape_cast %8 : vector<1x8x8xbf16> to vector<8x8xbf16>
    %cst_14 = arith.constant dense<0.000000e+00> : vector<64x8xf32>
    %10 = tpu.matmul %7, %9, %cst_14 {dimension_numbers = #tpu.dot_dimension_numbers<[1], [0], [0], [1], [0, 0, 1, 1], [], []>} : vector<64x8xbf16>, vector<8x8xbf16>, vector<64x8xf32> -> vector<64x8xf32>
    %c0_15 = arith.constant 0 : index
    %c0_16 = arith.constant 0 : index
    %11 = vector.load %arg5[%c0_15, %c0_16] : memref<64x8xf32, #tpu.memory_space<vmem>>, vector<64x8xf32>
    %12 = arith.addf %11, %10 : vector<64x8xf32>
    %c0_17 = arith.constant 0 : index
    %c0_18 = arith.constant 0 : index
    %13 = vector.load %arg5[%c0_17, %c0_18] : memref<64x8xf32, #tpu.memory_space<vmem>>, vector<64x8xf32>
    tpu.vector_store %arg5[%c0_17, %c0_18], %12 {strides = array<i32>} : memref<64x8xf32, #tpu.memory_space<vmem>>, vector<64x8xf32>,
    %c0_19 = arith.constant 0 : index
    %c0_20 = arith.constant 0 : index
    %c2 = arith.constant 2 : index
    %c0_21 = arith.constant 0 : index
    %14 = vector.load %arg1[%c0_19, %c0_20, %c2, %c0_21] : memref<1x10x10x8xbf16, #tpu.memory_space<vmem>>, vector<1x8x8x8xbf16>
    %15 = vector.shape_cast %14 : vector<1x8x8x8xbf16> to vector<64x8xbf16>
    %c2_22 = arith.constant 2 : index
    %c0_23 = arith.constant 0 : index
    %c0_24 = arith.constant 0 : index
    %16 = vector.load %arg2[%c2_22, %c0_23, %c0_24] : memref<9x8x8xbf16, #tpu.memory_space<vmem>>, vector<1x8x8xbf16>
    %17 = vector.shape_cast %16 : vector<1x8x8xbf16> to vector<8x8xbf16>
    %cst_25 = arith.constant dense<0.000000e+00> : vector<64x8xf32>
    %18 = tpu.matmul %15, %17, %cst_25 {dimension_numbers = #tpu.dot_dimension_numbers<[1], [0], [0], [1], [0, 0, 1, 1], [], []>} : vector<64x8xbf16>, vector<8x8xbf16>, vector<64x8xf32> -> vector<64x8xf32>
    %c0_26 = arith.constant 0 : index
    %c0_27 = arith.constant 0 : index
    %19 = vector.load %arg5[%c0_26, %c0_27] : memref<64x8xf32, #tpu.memory_space<vmem>>, vector<64x8xf32>
    %20 = arith.addf %19, %18 : vector<64x8xf32>
    %c0_28 = arith.constant 0 : index
    %c0_29 = arith.constant 0 : index
    %21 = vector.load %arg5[%c0_28, %c0_29] : memref<64x8xf32, #tpu.memory_space<vmem>>, vector<64x8xf32>
    tpu.vector_store %arg5[%c0_28, %c0_29], %20 {strides = array<i32>} : memref<64x8xf32, #tpu.memory_space<vmem>>, vector<64x8xf32>,
    %c0_30 = arith.constant 0 : index
    %c1_31 = arith.constant 1 : index
    %c0_32 = arith.constant 0 : index
    %c0_33 = arith.constant 0 : index
    %22 = vector.load %arg1[%c0_30, %c1_31, %c0_32, %c0_33] : memref<1x10x10x8xbf16, #tpu.memory_space<vmem>>, vector<1x8x8x8xbf16>
    %23 = vector.shape_cast %22 : vector<1x8x8x8xbf16> to vector<64x8xbf16>
    %c3 = arith.constant 3 : index
    %c0_34 = arith.constant 0 : index
    %c0_35 = arith.constant 0 : index
    %24 = vector.load %arg2[%c3, %c0_34, %c0_35] : memref<9x8x8xbf16, #tpu.memory_space<vmem>>, vector<1x8x8xbf16>
    %25 = vector.shape_cast %24 : vector<1x8x8xbf16> to vector<8x8xbf16>
    %cst_36 = arith.constant dense<0.000000e+00> : vector<64x8xf32>
    %26 = tpu.matmul %23, %25, %cst_36 {dimension_numbers = #tpu.dot_dimension_numbers<[1], [0], [0], [1], [0, 0, 1, 1], [], []>} : vector<64x8xbf16>, vector<8x8xbf16>, vector<64x8xf32> -> vector<64x8xf32>
    %c0_37 = arith.constant 0 : index
    %c0_38 = arith.constant 0 : index
    %27 = vector.load %arg5[%c0_37, %c0_38] : memref<64x8xf32, #tpu.memory_space<vmem>>, vector<64x8xf32>
    %28 = arith.addf %27, %26 : vector<64x8xf32>
    %c0_39 = arith.constant 0 : index
    %c0_40 = arith.constant 0 : index
    %29 = vector.load %arg5[%c0_39, %c0_40] : memref<64x8xf32, #tpu.memory_space<vmem>>, vector<64x8xf32>
    tpu.vector_store %arg5[%c0_39, %c0_40], %28 {strides = array<i32>} : memref<64x8xf32, #tpu.memory_space<vmem>>, vector<64x8xf32>,
    %c0_41 = arith.constant 0 : index
    %c1_42 = arith.constant 1 : index
    %c1_43 = arith.constant 1 : index
    %c0_44 = arith.constant 0 : index
    %30 = vector.load %arg1[%c0_41, %c1_42, %c1_43, %c0_44] : memref<1x10x10x8xbf16, #tpu.memory_space<vmem>>, vector<1x8x8x8xbf16>
    %31 = vector.shape_cast %30 : vector<1x8x8x8xbf16> to vector<64x8xbf16>
    %c4 = arith.constant 4 : index
    %c0_45 = arith.constant 0 : index
    %c0_46 = arith.constant 0 : index
    %32 = vector.load %arg2[%c4, %c0_45, %c0_46] : memref<9x8x8xbf16, #tpu.memory_space<vmem>>, vector<1x8x8xbf16>
    %33 = vector.shape_cast %32 : vector<1x8x8xbf16> to vector<8x8xbf16>
    %cst_47 = arith.constant dense<0.000000e+00> : vector<64x8xf32>
    %34 = tpu.matmul %31, %33, %cst_47 {dimension_numbers = #tpu.dot_dimension_numbers<[1], [0], [0], [1], [0, 0, 1, 1], [], []>} : vector<64x8xbf16>, vector<8x8xbf16>, vector<64x8xf32> -> vector<64x8xf32>
    %c0_48 = arith.constant 0 : index
    %c0_49 = arith.constant 0 : index
    %35 = vector.load %arg5[%c0_48, %c0_49] : memref<64x8xf32, #tpu.memory_space<vmem>>, vector<64x8xf32>
    %36 = arith.addf %35, %34 : vector<64x8xf32>
    %c0_50 = arith.constant 0 : index
    %c0_51 = arith.constant 0 : index
    %37 = vector.load %arg5[%c0_50, %c0_51] : memref<64x8xf32, #tpu.memory_space<vmem>>, vector<64x8xf32>
    tpu.vector_store %arg5[%c0_50, %c0_51], %36 {strides = array<i32>} : memref<64x8xf32, #tpu.memory_space<vmem>>, vector<64x8xf32>,
    %c0_52 = arith.constant 0 : index
    %c1_53 = arith.constant 1 : index
    %c2_54 = arith.constant 2 : index
    %c0_55 = arith.constant 0 : index
    %38 = vector.load %arg1[%c0_52, %c1_53, %c2_54, %c0_55] : memref<1x10x10x8xbf16, #tpu.memory_space<vmem>>, vector<1x8x8x8xbf16>
    %39 = vector.shape_cast %38 : vector<1x8x8x8xbf16> to vector<64x8xbf16>
    %c5 = arith.constant 5 : index
    %c0_56 = arith.constant 0 : index
    %c0_57 = arith.constant 0 : index
    %40 = vector.load %arg2[%c5, %c0_56, %c0_57] : memref<9x8x8xbf16, #tpu.memory_space<vmem>>, vector<1x8x8xbf16>
    %41 = vector.shape_cast %40 : vector<1x8x8xbf16> to vector<8x8xbf16>
    %cst_58 = arith.constant dense<0.000000e+00> : vector<64x8xf32>
    %42 = tpu.matmul %39, %41, %cst_58 {dimension_numbers = #tpu.dot_dimension_numbers<[1], [0], [0], [1], [0, 0, 1, 1], [], []>} : vector<64x8xbf16>, vector<8x8xbf16>, vector<64x8xf32> -> vector<64x8xf32>
    %c0_59 = arith.constant 0 : index
    %c0_60 = arith.constant 0 : index
    %43 = vector.load %arg5[%c0_59, %c0_60] : memref<64x8xf32, #tpu.memory_space<vmem>>, vector<64x8xf32>
    %44 = arith.addf %43, %42 : vector<64x8xf32>
    %c0_61 = arith.constant 0 : index
    %c0_62 = arith.constant 0 : index
    %45 = vector.load %arg5[%c0_61, %c0_62] : memref<64x8xf32, #tpu.memory_space<vmem>>, vector<64x8xf32>
    tpu.vector_store %arg5[%c0_61, %c0_62], %44 {strides = array<i32>} : memref<64x8xf32, #tpu.memory_space<vmem>>, vector<64x8xf32>,
    %c0_63 = arith.constant 0 : index
    %c2_64 = arith.constant 2 : index
    %c0_65 = arith.constant 0 : index
    %c0_66 = arith.constant 0 : index
    %46 = vector.load %arg1[%c0_63, %c2_64, %c0_65, %c0_66] : memref<1x10x10x8xbf16, #tpu.memory_space<vmem>>, vector<1x8x8x8xbf16>
    %47 = vector.shape_cast %46 : vector<1x8x8x8xbf16> to vector<64x8xbf16>
    %c6 = arith.constant 6 : index
    %c0_67 = arith.constant 0 : index
    %c0_68 = arith.constant 0 : index
    %48 = vector.load %arg2[%c6, %c0_67, %c0_68] : memref<9x8x8xbf16, #tpu.memory_space<vmem>>, vector<1x8x8xbf16>
    %49 = vector.shape_cast %48 : vector<1x8x8xbf16> to vector<8x8xbf16>
    %cst_69 = arith.constant dense<0.000000e+00> : vector<64x8xf32>
    %50 = tpu.matmul %47, %49, %cst_69 {dimension_numbers = #tpu.dot_dimension_numbers<[1], [0], [0], [1], [0, 0, 1, 1], [], []>} : vector<64x8xbf16>, vector<8x8xbf16>, vector<64x8xf32> -> vector<64x8xf32>
    %c0_70 = arith.constant 0 : index
    %c0_71 = arith.constant 0 : index
    %51 = vector.load %arg5[%c0_70, %c0_71] : memref<64x8xf32, #tpu.memory_space<vmem>>, vector<64x8xf32>
    %52 = arith.addf %51, %50 : vector<64x8xf32>
    %c0_72 = arith.constant 0 : index
    %c0_73 = arith.constant 0 : index
    %53 = vector.load %arg5[%c0_72, %c0_73] : memref<64x8xf32, #tpu.memory_space<vmem>>, vector<64x8xf32>
    tpu.vector_store %arg5[%c0_72, %c0_73], %52 {strides = array<i32>} : memref<64x8xf32, #tpu.memory_space<vmem>>, vector<64x8xf32>,
    %c0_74 = arith.constant 0 : index
    %c2_75 = arith.constant 2 : index
    %c1_76 = arith.constant 1 : index
    %c0_77 = arith.constant 0 : index
    %54 = vector.load %arg1[%c0_74, %c2_75, %c1_76, %c0_77] : memref<1x10x10x8xbf16, #tpu.memory_space<vmem>>, vector<1x8x8x8xbf16>
    %55 = vector.shape_cast %54 : vector<1x8x8x8xbf16> to vector<64x8xbf16>
    %c7 = arith.constant 7 : index
    %c0_78 = arith.constant 0 : index
    %c0_79 = arith.constant 0 : index
    %56 = vector.load %arg2[%c7, %c0_78, %c0_79] : memref<9x8x8xbf16, #tpu.memory_space<vmem>>, vector<1x8x8xbf16>
    %57 = vector.shape_cast %56 : vector<1x8x8xbf16> to vector<8x8xbf16>
    %cst_80 = arith.constant dense<0.000000e+00> : vector<64x8xf32>
    %58 = tpu.matmul %55, %57, %cst_80 {dimension_numbers = #tpu.dot_dimension_numbers<[1], [0], [0], [1], [0, 0, 1, 1], [], []>} : vector<64x8xbf16>, vector<8x8xbf16>, vector<64x8xf32> -> vector<64x8xf32>
    %c0_81 = arith.constant 0 : index
    %c0_82 = arith.constant 0 : index
    %59 = vector.load %arg5[%c0_81, %c0_82] : memref<64x8xf32, #tpu.memory_space<vmem>>, vector<64x8xf32>
    %60 = arith.addf %59, %58 : vector<64x8xf32>
    %c0_83 = arith.constant 0 : index
    %c0_84 = arith.constant 0 : index
    %61 = vector.load %arg5[%c0_83, %c0_84] : memref<64x8xf32, #tpu.memory_space<vmem>>, vector<64x8xf32>
    tpu.vector_store %arg5[%c0_83, %c0_84], %60 {strides = array<i32>} : memref<64x8xf32, #tpu.memory_space<vmem>>, vector<64x8xf32>,
    %c0_85 = arith.constant 0 : index
    %c2_86 = arith.constant 2 : index
    %c2_87 = arith.constant 2 : index
    %c0_88 = arith.constant 0 : index
    %62 = vector.load %arg1[%c0_85, %c2_86, %c2_87, %c0_88] : memref<1x10x10x8xbf16, #tpu.memory_space<vmem>>, vector<1x8x8x8xbf16>
    %63 = vector.shape_cast %62 : vector<1x8x8x8xbf16> to vector<64x8xbf16>
    %c8 = arith.constant 8 : index
    %c0_89 = arith.constant 0 : index
    %c0_90 = arith.constant 0 : index
    %64 = vector.load %arg2[%c8, %c0_89, %c0_90] : memref<9x8x8xbf16, #tpu.memory_space<vmem>>, vector<1x8x8xbf16>
    %65 = vector.shape_cast %64 : vector<1x8x8xbf16> to vector<8x8xbf16>
    %cst_91 = arith.constant dense<0.000000e+00> : vector<64x8xf32>
    %66 = tpu.matmul %63, %65, %cst_91 {dimension_numbers = #tpu.dot_dimension_numbers<[1], [0], [0], [1], [0, 0, 1, 1], [], []>} : vector<64x8xbf16>, vector<8x8xbf16>, vector<64x8xf32> -> vector<64x8xf32>
    %c0_92 = arith.constant 0 : index
    %c0_93 = arith.constant 0 : index
    %67 = vector.load %arg5[%c0_92, %c0_93] : memref<64x8xf32, #tpu.memory_space<vmem>>, vector<64x8xf32>
    %68 = arith.addf %67, %66 : vector<64x8xf32>
    %c0_94 = arith.constant 0 : index
    %c0_95 = arith.constant 0 : index
    %69 = vector.load %arg5[%c0_94, %c0_95] : memref<64x8xf32, #tpu.memory_space<vmem>>, vector<64x8xf32>
    tpu.vector_store %arg5[%c0_94, %c0_95], %68 {strides = array<i32>} : memref<64x8xf32, #tpu.memory_space<vmem>>, vector<64x8xf32>,
    %c0_96 = arith.constant 0 : index
    %c0_97 = arith.constant 0 : index
    %70 = vector.load %arg5[%c0_96, %c0_97] : memref<64x8xf32, #tpu.memory_space<vmem>>, vector<64x8xf32>
    %c0_98 = arith.constant 0 : index
    %c0_99 = arith.constant 0 : index
    %71 = vector.load %arg3[%c0_98, %c0_99] : memref<64x8xbf16, #tpu.memory_space<vmem>>, vector<64x8xbf16>
    %72 = arith.extf %71 : vector<64x8xbf16> to vector<64x8xf32>
    %73 = arith.addf %70, %72 : vector<64x8xf32>
    %74 = arith.truncf %73 : vector<64x8xf32> to vector<64x8xbf16>
    %c0_100 = arith.constant 0 : index
    %c0_101 = arith.constant 0 : index
    %75 = vector.load %arg4[%c0_100, %c0_101] : memref<64x8xbf16, #tpu.memory_space<vmem>>, vector<64x8xbf16>
    tpu.vector_store %arg4[%c0_100, %c0_101], %74 {strides = array<i32>} : memref<64x8xbf16, #tpu.memory_space<vmem>>, vector<64x8xbf16>,
    return
  }
  func.func @transform_0(%arg0: i32) -> (i32, i32, i32, i32) {
    %c0_i32 = arith.constant 0 : i32
    %c0_i32_0 = arith.constant 0 : i32
    %c0_i32_1 = arith.constant 0 : i32
    %c0_i32_2 = arith.constant 0 : i32
    return %arg0, %c0_i32, %c0_i32_0, %c0_i32_1 : i32, i32, i32, i32
  }
  func.func @transform_1(%arg0: i32) -> (i32, i32, i32) {
    %c0_i32 = arith.constant 0 : i32
    %c0_i32_0 = arith.constant 0 : i32
    %c0_i32_1 = arith.constant 0 : i32
    %c0_i32_2 = arith.constant 0 : i32
    return %c0_i32, %c0_i32_0, %c0_i32_1 : i32, i32, i32
  }
  func.func @transform_2(%arg0: i32) -> (i32, i32) {
    %c0_i32 = arith.constant 0 : i32
    %c0_i32_0 = arith.constant 0 : i32
    return %arg0, %c0_i32 : i32, i32
  }
  func.func @transform_3(%arg0: i32) -> (i32, i32) {
    %c0_i32 = arith.constant 0 : i32
    %c0_i32_0 = arith.constant 0 : i32
    return %arg0, %c0_i32 : i32, i32
  }
}

module attributes {stable_mosaic.version = 11 : i64} {
  func.func @kernel(%arg0: i32, %arg1: memref<1x10x10x8xbf16, #tpu.memory_space<vmem>>, %arg2: memref<9x8x8xbf16, #tpu.memory_space<vmem>>, %arg3: memref<1x8xf32, #tpu.memory_space<vmem>>, %arg4: memref<1x8xf32, #tpu.memory_space<vmem>>, %arg5: memref<64x8xbf16, #tpu.memory_space<vmem>>, %arg6: memref<64x8xf32, #tpu.memory_space<vmem>>) attributes {dimension_semantics = [#tpu.dimension_semantics<parallel>], iteration_bounds = array<i64: 2>, scalar_prefetch = 0 : i64, scratch_operands = 1 : i64, tpu.core_type = #tpu.core_type<tc>, window_params = [{transform_indices = @transform_0, window_bounds = array<i64: 1, 10, 10, 8>}, {pipeline_mode = #tpu.pipeline_mode<synchronous>, transform_indices = @transform_1, window_bounds = array<i64: 9, 8, 8>}, {pipeline_mode = #tpu.pipeline_mode<synchronous>, transform_indices = @transform_2, window_bounds = array<i64: 1, 8>}, {pipeline_mode = #tpu.pipeline_mode<synchronous>, transform_indices = @transform_3, window_bounds = array<i64: 1, 8>}, {transform_indices = @transform_4, window_bounds = array<i64: 64, 8>}]} {
    %c0 = arith.constant 0 : index
    %c0_0 = arith.constant 0 : index
    %c0_1 = arith.constant 0 : index
    %c0_2 = arith.constant 0 : index
    %0 = vector.load %arg1[%c0, %c0_0, %c0_1, %c0_2] : memref<1x10x10x8xbf16, #tpu.memory_space<vmem>>, vector<1x8x8x8xbf16>
    %1 = vector.shape_cast %0 : vector<1x8x8x8xbf16> to vector<64x8xbf16>
    %c0_3 = arith.constant 0 : index
    %c0_4 = arith.constant 0 : index
    %c0_5 = arith.constant 0 : index
    %2 = vector.load %arg2[%c0_3, %c0_4, %c0_5] : memref<9x8x8xbf16, #tpu.memory_space<vmem>>, vector<1x8x8xbf16>
    %3 = vector.shape_cast %2 : vector<1x8x8xbf16> to vector<8x8xbf16>
    %cst = arith.constant dense<0.000000e+00> : vector<64x8xf32>
    %4 = tpu.matmul %1, %3, %cst {dimension_numbers = #tpu.dot_dimension_numbers<[1], [0], [0], [1], [0, 0, 1, 1], [], []>} : vector<64x8xbf16>, vector<8x8xbf16>, vector<64x8xf32> -> vector<64x8xf32>
    %c0_6 = arith.constant 0 : index
    %c0_7 = arith.constant 0 : index
    %5 = vector.load %arg6[%c0_6, %c0_7] : memref<64x8xf32, #tpu.memory_space<vmem>>, vector<64x8xf32>
    tpu.vector_store %arg6[%c0_6, %c0_7], %4 {strides = array<i32>} : memref<64x8xf32, #tpu.memory_space<vmem>>, vector<64x8xf32>,
    %c0_8 = arith.constant 0 : index
    %c0_9 = arith.constant 0 : index
    %c1 = arith.constant 1 : index
    %c0_10 = arith.constant 0 : index
    %6 = vector.load %arg1[%c0_8, %c0_9, %c1, %c0_10] : memref<1x10x10x8xbf16, #tpu.memory_space<vmem>>, vector<1x8x8x8xbf16>
    %7 = vector.shape_cast %6 : vector<1x8x8x8xbf16> to vector<64x8xbf16>
    %c1_11 = arith.constant 1 : index
    %c0_12 = arith.constant 0 : index
    %c0_13 = arith.constant 0 : index
    %8 = vector.load %arg2[%c1_11, %c0_12, %c0_13] : memref<9x8x8xbf16, #tpu.memory_space<vmem>>, vector<1x8x8xbf16>
    %9 = vector.shape_cast %8 : vector<1x8x8xbf16> to vector<8x8xbf16>
    %cst_14 = arith.constant dense<0.000000e+00> : vector<64x8xf32>
    %10 = tpu.matmul %7, %9, %cst_14 {dimension_numbers = #tpu.dot_dimension_numbers<[1], [0], [0], [1], [0, 0, 1, 1], [], []>} : vector<64x8xbf16>, vector<8x8xbf16>, vector<64x8xf32> -> vector<64x8xf32>
    %c0_15 = arith.constant 0 : index
    %c0_16 = arith.constant 0 : index
    %11 = vector.load %arg6[%c0_15, %c0_16] : memref<64x8xf32, #tpu.memory_space<vmem>>, vector<64x8xf32>
    %12 = arith.addf %11, %10 : vector<64x8xf32>
    %c0_17 = arith.constant 0 : index
    %c0_18 = arith.constant 0 : index
    %13 = vector.load %arg6[%c0_17, %c0_18] : memref<64x8xf32, #tpu.memory_space<vmem>>, vector<64x8xf32>
    tpu.vector_store %arg6[%c0_17, %c0_18], %12 {strides = array<i32>} : memref<64x8xf32, #tpu.memory_space<vmem>>, vector<64x8xf32>,
    %c0_19 = arith.constant 0 : index
    %c0_20 = arith.constant 0 : index
    %c2 = arith.constant 2 : index
    %c0_21 = arith.constant 0 : index
    %14 = vector.load %arg1[%c0_19, %c0_20, %c2, %c0_21] : memref<1x10x10x8xbf16, #tpu.memory_space<vmem>>, vector<1x8x8x8xbf16>
    %15 = vector.shape_cast %14 : vector<1x8x8x8xbf16> to vector<64x8xbf16>
    %c2_22 = arith.constant 2 : index
    %c0_23 = arith.constant 0 : index
    %c0_24 = arith.constant 0 : index
    %16 = vector.load %arg2[%c2_22, %c0_23, %c0_24] : memref<9x8x8xbf16, #tpu.memory_space<vmem>>, vector<1x8x8xbf16>
    %17 = vector.shape_cast %16 : vector<1x8x8xbf16> to vector<8x8xbf16>
    %cst_25 = arith.constant dense<0.000000e+00> : vector<64x8xf32>
    %18 = tpu.matmul %15, %17, %cst_25 {dimension_numbers = #tpu.dot_dimension_numbers<[1], [0], [0], [1], [0, 0, 1, 1], [], []>} : vector<64x8xbf16>, vector<8x8xbf16>, vector<64x8xf32> -> vector<64x8xf32>
    %c0_26 = arith.constant 0 : index
    %c0_27 = arith.constant 0 : index
    %19 = vector.load %arg6[%c0_26, %c0_27] : memref<64x8xf32, #tpu.memory_space<vmem>>, vector<64x8xf32>
    %20 = arith.addf %19, %18 : vector<64x8xf32>
    %c0_28 = arith.constant 0 : index
    %c0_29 = arith.constant 0 : index
    %21 = vector.load %arg6[%c0_28, %c0_29] : memref<64x8xf32, #tpu.memory_space<vmem>>, vector<64x8xf32>
    tpu.vector_store %arg6[%c0_28, %c0_29], %20 {strides = array<i32>} : memref<64x8xf32, #tpu.memory_space<vmem>>, vector<64x8xf32>,
    %c0_30 = arith.constant 0 : index
    %c1_31 = arith.constant 1 : index
    %c0_32 = arith.constant 0 : index
    %c0_33 = arith.constant 0 : index
    %22 = vector.load %arg1[%c0_30, %c1_31, %c0_32, %c0_33] : memref<1x10x10x8xbf16, #tpu.memory_space<vmem>>, vector<1x8x8x8xbf16>
    %23 = vector.shape_cast %22 : vector<1x8x8x8xbf16> to vector<64x8xbf16>
    %c3 = arith.constant 3 : index
    %c0_34 = arith.constant 0 : index
    %c0_35 = arith.constant 0 : index
    %24 = vector.load %arg2[%c3, %c0_34, %c0_35] : memref<9x8x8xbf16, #tpu.memory_space<vmem>>, vector<1x8x8xbf16>
    %25 = vector.shape_cast %24 : vector<1x8x8xbf16> to vector<8x8xbf16>
    %cst_36 = arith.constant dense<0.000000e+00> : vector<64x8xf32>
    %26 = tpu.matmul %23, %25, %cst_36 {dimension_numbers = #tpu.dot_dimension_numbers<[1], [0], [0], [1], [0, 0, 1, 1], [], []>} : vector<64x8xbf16>, vector<8x8xbf16>, vector<64x8xf32> -> vector<64x8xf32>
    %c0_37 = arith.constant 0 : index
    %c0_38 = arith.constant 0 : index
    %27 = vector.load %arg6[%c0_37, %c0_38] : memref<64x8xf32, #tpu.memory_space<vmem>>, vector<64x8xf32>
    %28 = arith.addf %27, %26 : vector<64x8xf32>
    %c0_39 = arith.constant 0 : index
    %c0_40 = arith.constant 0 : index
    %29 = vector.load %arg6[%c0_39, %c0_40] : memref<64x8xf32, #tpu.memory_space<vmem>>, vector<64x8xf32>
    tpu.vector_store %arg6[%c0_39, %c0_40], %28 {strides = array<i32>} : memref<64x8xf32, #tpu.memory_space<vmem>>, vector<64x8xf32>,
    %c0_41 = arith.constant 0 : index
    %c1_42 = arith.constant 1 : index
    %c1_43 = arith.constant 1 : index
    %c0_44 = arith.constant 0 : index
    %30 = vector.load %arg1[%c0_41, %c1_42, %c1_43, %c0_44] : memref<1x10x10x8xbf16, #tpu.memory_space<vmem>>, vector<1x8x8x8xbf16>
    %31 = vector.shape_cast %30 : vector<1x8x8x8xbf16> to vector<64x8xbf16>
    %c4 = arith.constant 4 : index
    %c0_45 = arith.constant 0 : index
    %c0_46 = arith.constant 0 : index
    %32 = vector.load %arg2[%c4, %c0_45, %c0_46] : memref<9x8x8xbf16, #tpu.memory_space<vmem>>, vector<1x8x8xbf16>
    %33 = vector.shape_cast %32 : vector<1x8x8xbf16> to vector<8x8xbf16>
    %cst_47 = arith.constant dense<0.000000e+00> : vector<64x8xf32>
    %34 = tpu.matmul %31, %33, %cst_47 {dimension_numbers = #tpu.dot_dimension_numbers<[1], [0], [0], [1], [0, 0, 1, 1], [], []>} : vector<64x8xbf16>, vector<8x8xbf16>, vector<64x8xf32> -> vector<64x8xf32>
    %c0_48 = arith.constant 0 : index
    %c0_49 = arith.constant 0 : index
    %35 = vector.load %arg6[%c0_48, %c0_49] : memref<64x8xf32, #tpu.memory_space<vmem>>, vector<64x8xf32>
    %36 = arith.addf %35, %34 : vector<64x8xf32>
    %c0_50 = arith.constant 0 : index
    %c0_51 = arith.constant 0 : index
    %37 = vector.load %arg6[%c0_50, %c0_51] : memref<64x8xf32, #tpu.memory_space<vmem>>, vector<64x8xf32>
    tpu.vector_store %arg6[%c0_50, %c0_51], %36 {strides = array<i32>} : memref<64x8xf32, #tpu.memory_space<vmem>>, vector<64x8xf32>,
    %c0_52 = arith.constant 0 : index
    %c1_53 = arith.constant 1 : index
    %c2_54 = arith.constant 2 : index
    %c0_55 = arith.constant 0 : index
    %38 = vector.load %arg1[%c0_52, %c1_53, %c2_54, %c0_55] : memref<1x10x10x8xbf16, #tpu.memory_space<vmem>>, vector<1x8x8x8xbf16>
    %39 = vector.shape_cast %38 : vector<1x8x8x8xbf16> to vector<64x8xbf16>
    %c5 = arith.constant 5 : index
    %c0_56 = arith.constant 0 : index
    %c0_57 = arith.constant 0 : index
    %40 = vector.load %arg2[%c5, %c0_56, %c0_57] : memref<9x8x8xbf16, #tpu.memory_space<vmem>>, vector<1x8x8xbf16>
    %41 = vector.shape_cast %40 : vector<1x8x8xbf16> to vector<8x8xbf16>
    %cst_58 = arith.constant dense<0.000000e+00> : vector<64x8xf32>
    %42 = tpu.matmul %39, %41, %cst_58 {dimension_numbers = #tpu.dot_dimension_numbers<[1], [0], [0], [1], [0, 0, 1, 1], [], []>} : vector<64x8xbf16>, vector<8x8xbf16>, vector<64x8xf32> -> vector<64x8xf32>
    %c0_59 = arith.constant 0 : index
    %c0_60 = arith.constant 0 : index
    %43 = vector.load %arg6[%c0_59, %c0_60] : memref<64x8xf32, #tpu.memory_space<vmem>>, vector<64x8xf32>
    %44 = arith.addf %43, %42 : vector<64x8xf32>
    %c0_61 = arith.constant 0 : index
    %c0_62 = arith.constant 0 : index
    %45 = vector.load %arg6[%c0_61, %c0_62] : memref<64x8xf32, #tpu.memory_space<vmem>>, vector<64x8xf32>
    tpu.vector_store %arg6[%c0_61, %c0_62], %44 {strides = array<i32>} : memref<64x8xf32, #tpu.memory_space<vmem>>, vector<64x8xf32>,
    %c0_63 = arith.constant 0 : index
    %c2_64 = arith.constant 2 : index
    %c0_65 = arith.constant 0 : index
    %c0_66 = arith.constant 0 : index
    %46 = vector.load %arg1[%c0_63, %c2_64, %c0_65, %c0_66] : memref<1x10x10x8xbf16, #tpu.memory_space<vmem>>, vector<1x8x8x8xbf16>
    %47 = vector.shape_cast %46 : vector<1x8x8x8xbf16> to vector<64x8xbf16>
    %c6 = arith.constant 6 : index
    %c0_67 = arith.constant 0 : index
    %c0_68 = arith.constant 0 : index
    %48 = vector.load %arg2[%c6, %c0_67, %c0_68] : memref<9x8x8xbf16, #tpu.memory_space<vmem>>, vector<1x8x8xbf16>
    %49 = vector.shape_cast %48 : vector<1x8x8xbf16> to vector<8x8xbf16>
    %cst_69 = arith.constant dense<0.000000e+00> : vector<64x8xf32>
    %50 = tpu.matmul %47, %49, %cst_69 {dimension_numbers = #tpu.dot_dimension_numbers<[1], [0], [0], [1], [0, 0, 1, 1], [], []>} : vector<64x8xbf16>, vector<8x8xbf16>, vector<64x8xf32> -> vector<64x8xf32>
    %c0_70 = arith.constant 0 : index
    %c0_71 = arith.constant 0 : index
    %51 = vector.load %arg6[%c0_70, %c0_71] : memref<64x8xf32, #tpu.memory_space<vmem>>, vector<64x8xf32>
    %52 = arith.addf %51, %50 : vector<64x8xf32>
    %c0_72 = arith.constant 0 : index
    %c0_73 = arith.constant 0 : index
    %53 = vector.load %arg6[%c0_72, %c0_73] : memref<64x8xf32, #tpu.memory_space<vmem>>, vector<64x8xf32>
    tpu.vector_store %arg6[%c0_72, %c0_73], %52 {strides = array<i32>} : memref<64x8xf32, #tpu.memory_space<vmem>>, vector<64x8xf32>,
    %c0_74 = arith.constant 0 : index
    %c2_75 = arith.constant 2 : index
    %c1_76 = arith.constant 1 : index
    %c0_77 = arith.constant 0 : index
    %54 = vector.load %arg1[%c0_74, %c2_75, %c1_76, %c0_77] : memref<1x10x10x8xbf16, #tpu.memory_space<vmem>>, vector<1x8x8x8xbf16>
    %55 = vector.shape_cast %54 : vector<1x8x8x8xbf16> to vector<64x8xbf16>
    %c7 = arith.constant 7 : index
    %c0_78 = arith.constant 0 : index
    %c0_79 = arith.constant 0 : index
    %56 = vector.load %arg2[%c7, %c0_78, %c0_79] : memref<9x8x8xbf16, #tpu.memory_space<vmem>>, vector<1x8x8xbf16>
    %57 = vector.shape_cast %56 : vector<1x8x8xbf16> to vector<8x8xbf16>
    %cst_80 = arith.constant dense<0.000000e+00> : vector<64x8xf32>
    %58 = tpu.matmul %55, %57, %cst_80 {dimension_numbers = #tpu.dot_dimension_numbers<[1], [0], [0], [1], [0, 0, 1, 1], [], []>} : vector<64x8xbf16>, vector<8x8xbf16>, vector<64x8xf32> -> vector<64x8xf32>
    %c0_81 = arith.constant 0 : index
    %c0_82 = arith.constant 0 : index
    %59 = vector.load %arg6[%c0_81, %c0_82] : memref<64x8xf32, #tpu.memory_space<vmem>>, vector<64x8xf32>
    %60 = arith.addf %59, %58 : vector<64x8xf32>
    %c0_83 = arith.constant 0 : index
    %c0_84 = arith.constant 0 : index
    %61 = vector.load %arg6[%c0_83, %c0_84] : memref<64x8xf32, #tpu.memory_space<vmem>>, vector<64x8xf32>
    tpu.vector_store %arg6[%c0_83, %c0_84], %60 {strides = array<i32>} : memref<64x8xf32, #tpu.memory_space<vmem>>, vector<64x8xf32>,
    %c0_85 = arith.constant 0 : index
    %c2_86 = arith.constant 2 : index
    %c2_87 = arith.constant 2 : index
    %c0_88 = arith.constant 0 : index
    %62 = vector.load %arg1[%c0_85, %c2_86, %c2_87, %c0_88] : memref<1x10x10x8xbf16, #tpu.memory_space<vmem>>, vector<1x8x8x8xbf16>
    %63 = vector.shape_cast %62 : vector<1x8x8x8xbf16> to vector<64x8xbf16>
    %c8 = arith.constant 8 : index
    %c0_89 = arith.constant 0 : index
    %c0_90 = arith.constant 0 : index
    %64 = vector.load %arg2[%c8, %c0_89, %c0_90] : memref<9x8x8xbf16, #tpu.memory_space<vmem>>, vector<1x8x8xbf16>
    %65 = vector.shape_cast %64 : vector<1x8x8xbf16> to vector<8x8xbf16>
    %cst_91 = arith.constant dense<0.000000e+00> : vector<64x8xf32>
    %66 = tpu.matmul %63, %65, %cst_91 {dimension_numbers = #tpu.dot_dimension_numbers<[1], [0], [0], [1], [0, 0, 1, 1], [], []>} : vector<64x8xbf16>, vector<8x8xbf16>, vector<64x8xf32> -> vector<64x8xf32>
    %c0_92 = arith.constant 0 : index
    %c0_93 = arith.constant 0 : index
    %67 = vector.load %arg6[%c0_92, %c0_93] : memref<64x8xf32, #tpu.memory_space<vmem>>, vector<64x8xf32>
    %68 = arith.addf %67, %66 : vector<64x8xf32>
    %c0_94 = arith.constant 0 : index
    %c0_95 = arith.constant 0 : index
    %69 = vector.load %arg6[%c0_94, %c0_95] : memref<64x8xf32, #tpu.memory_space<vmem>>, vector<64x8xf32>
    tpu.vector_store %arg6[%c0_94, %c0_95], %68 {strides = array<i32>} : memref<64x8xf32, #tpu.memory_space<vmem>>, vector<64x8xf32>,
    %c0_96 = arith.constant 0 : index
    %c0_97 = arith.constant 0 : index
    %70 = vector.load %arg6[%c0_96, %c0_97] : memref<64x8xf32, #tpu.memory_space<vmem>>, vector<64x8xf32>
    %c0_98 = arith.constant 0 : index
    %c0_99 = arith.constant 0 : index
    %71 = vector.load %arg3[%c0_98, %c0_99] : memref<1x8xf32, #tpu.memory_space<vmem>>, vector<1x8xf32>
    %72 = vector.broadcast %71 : vector<1x8xf32> to vector<64x8xf32>
    %73 = arith.mulf %70, %72 : vector<64x8xf32>
    %c0_100 = arith.constant 0 : index
    %c0_101 = arith.constant 0 : index
    %74 = vector.load %arg4[%c0_100, %c0_101] : memref<1x8xf32, #tpu.memory_space<vmem>>, vector<1x8xf32>
    %75 = vector.broadcast %74 : vector<1x8xf32> to vector<64x8xf32>
    %76 = arith.addf %73, %75 : vector<64x8xf32>
    %cst_102 = arith.constant 0.000000e+00 : f32
    %77 = vector.broadcast %cst_102 : f32 to vector<64x8xf32>
    %78 = arith.maximumf %76, %77 : vector<64x8xf32>
    %79 = arith.truncf %78 : vector<64x8xf32> to vector<64x8xbf16>
    %c0_103 = arith.constant 0 : index
    %c0_104 = arith.constant 0 : index
    %80 = vector.load %arg5[%c0_103, %c0_104] : memref<64x8xbf16, #tpu.memory_space<vmem>>, vector<64x8xbf16>
    tpu.vector_store %arg5[%c0_103, %c0_104], %79 {strides = array<i32>} : memref<64x8xbf16, #tpu.memory_space<vmem>>, vector<64x8xbf16>,
    return
  }
  func.func @transform_0(%arg0: i32) -> (i32, i32, i32, i32) {
    %c0_i32 = arith.constant 0 : i32
    %c0_i32_0 = arith.constant 0 : i32
    %c0_i32_1 = arith.constant 0 : i32
    %c0_i32_2 = arith.constant 0 : i32
    return %arg0, %c0_i32, %c0_i32_0, %c0_i32_1 : i32, i32, i32, i32
  }
  func.func @transform_1(%arg0: i32) -> (i32, i32, i32) {
    %c0_i32 = arith.constant 0 : i32
    %c0_i32_0 = arith.constant 0 : i32
    %c0_i32_1 = arith.constant 0 : i32
    %c0_i32_2 = arith.constant 0 : i32
    return %c0_i32, %c0_i32_0, %c0_i32_1 : i32, i32, i32
  }
  func.func @transform_2(%arg0: i32) -> (i32, i32) {
    %c0_i32 = arith.constant 0 : i32
    %c0_i32_0 = arith.constant 0 : i32
    %c0_i32_1 = arith.constant 0 : i32
    return %c0_i32, %c0_i32_0 : i32, i32
  }
  func.func @transform_3(%arg0: i32) -> (i32, i32) {
    %c0_i32 = arith.constant 0 : i32
    %c0_i32_0 = arith.constant 0 : i32
    %c0_i32_1 = arith.constant 0 : i32
    return %c0_i32, %c0_i32_0 : i32, i32
  }
  func.func @transform_4(%arg0: i32) -> (i32, i32) {
    %c0_i32 = arith.constant 0 : i32
    %c0_i32_0 = arith.constant 0 : i32
    return %arg0, %c0_i32 : i32, i32
  }
}

</mosaic_0001>

<bundles_post_ra>
// kernel: tile.11
= control target key start
LH: loop header
LB: loop body
LE: loop exit
PB: predicated region body
PF: predicated region fallthrough
CT: control target
= control target key end

     0   :  { %s133_s10 = smov 60   ;;  %s134_s11 = smov 52   ;;  %vm3_vm0 = vcmask 31744   ;;  %vm9_vm1 = vcmask 523744   ;;  %vm15_vm2 = vcmask 490944   ;;  %vm21_vm3 = vcmask 458144   ;;  %s209_s0 = inlined_call_operand.vmem [shape: f32[16,4], index: 0, kind: input, shape index: {}]   ;;  %s210_s1 = inlined_call_operand.vmem [shape: f32[1,64], index: 1, kind: output, shape index: {}]  }
   0x1   :  { %v103_v0 = vld [vmem:[%s209_s0 + $0xf] sm:$0x1]   ;;  %v105_v1 = vld [vmem:[%s209_s0 + $0xd] sm:$0x1]   ;;  %v104_v2 = vld [vmem:[%s209_s0 + $0xe] sm:$0x1]  }
   0x2   :  { %7 = vrot.lane.b32.xlu0 %v103_v0, %s133_s10  ;;  %19 = vrot.lane.b32.xlu1 %v105_v1, %s134_s11  ;;  %v106_v3 = vld [vmem:[%s209_s0 + $0xc] sm:$0x1]   ;;  %s135_s16 = smov 56   ;;  %s136_s17 = smov 48   ;;  %v107_v4 = vld [vmem:[%s209_s0 + $0xb] sm:$0x1]  }
   0x3   :  { %v108_v5 = vld [vmem:[%s209_s0 + $0xa] sm:$0x1]   ;;  %v2_v6 = vld [vmem:[%s209_s0] sm:$0x1]   ;;  %s137_s24 = smov 44   ;;  %s138_s25 = smov 40  }
   0x4   :  { %4 = vst.msk [vmem:[#allocation0] sm:$0x1] %vm3_vm0, %v2_v6   ;;  %v109_v7 = vld [vmem:[%s209_s0 + $0x9] sm:$0x1]   ;;  %v110_v8 = vld [vmem:[%s209_s0 + $0x8] sm:$0x1]  }
   0x5   :  { %s139_s30 = smov 36   ;;  %s140_s2 = smov 32   ;;  %v111_v9 = vld [vmem:[%s209_s0 + $0x7] sm:$0x1]   ;;  %v112_v10 = vld [vmem:[%s209_s0 + $0x6] sm:$0x1]  }
   0x6   :  { %13 = vrot.lane.b32.xlu0 %v104_v2, %s135_s16  ;;  %25 = vrot.lane.b32.xlu1 %v106_v3, %s136_s17  ;;  %s141_s7 = smov 28   ;;  %s142_s8 = smov 24   ;;  %v113_v11 = vld [vmem:[%s209_s0 + $0x5] sm:$0x1]   ;;  %v114_v12 = vld [vmem:[%s209_s0 + $0x4] sm:$0x1]  }
   0x7   :  { %s143_s13 = smov 20   ;;  %s144_s14 = smov 16   ;;  %v115_v13 = vld [vmem:[%s209_s0 + $0x3] sm:$0x1]   ;;  %v116_v14 = vld [vmem:[%s209_s0 + $0x2] sm:$0x1]  }
   0x8   :  { %s145_s19 = smov 12   ;;  %s146_s20 = smov 8   ;;  %v117_v15 = vld [vmem:[%s209_s0 + $0x1] sm:$0x1]   ;;  %vm27_vm4 = vcmask 425344   ;;  %vm33_vm5 = vcmask 392544  }
   0x9   :  { %s147_s0 = smov 4   ;;  %vm39_vm6 = vcmask 359744   ;;  %vm45_vm7 = vcmask 326944   ;;  %vm51_vm8 = vcmask 294144   ;;  %vm57_vm9 = vcmask 261344  }
   0xa   :  { %31 = vrot.lane.b32.xlu0 %v107_v4, %s137_s24  ;;  %37 = vrot.lane.b32.xlu1 %v108_v5, %s138_s25  ;;  %vm63_vm10 = vcmask 228544   ;;  %vm69_vm11 = vcmask 195744   ;;  %vm75_vm12 = vcmask 162944   ;;  %vm81_vm13 = vcmask 130144  }
   0xb   :  { %vm87_vm14 = vcmask 97344   ;;  %vm93_vm15 = vcmask 64544  }
   0xe   :  { %43 = vrot.lane.b32.xlu0 %v109_v7, %s139_s30  ;;  %49 = vrot.lane.b32.xlu1 %v110_v8, %s140_s2 }
  0x12   :  { %55 = vrot.lane.b32.xlu0 %v111_v9, %s141_s7  ;;  %61 = vrot.lane.b32.xlu1 %v112_v10, %s142_s8 }
  0x16   :  { %67 = vrot.lane.b32.xlu0 %v113_v11, %s143_s13  ;;  %73 = vrot.lane.b32.xlu1 %v114_v12, %s144_s14 }
  0x1a   :  { %79 = vrot.lane.b32.xlu0 %v115_v13, %s145_s19  ;;  %85 = vrot.lane.b32.xlu1 %v116_v14, %s146_s20 }
  0x1e   :  { %91 = vrot.lane.b32.xlu0 %v117_v15, %s147_s0 }
  0x74   :  { %v8_v16 = vpop.permute.xlu0 %7   ;;  %v20_v17 = vpop.permute.xlu1 %19  }
  0x75   :  { %10 = vst.msk [vmem:[#allocation0] sm:$0x1] %vm9_vm1, %v8_v16  }
  0x78   :  { %v14_v18 = vpop.permute.xlu0 %13   ;;  %v26_v19 = vpop.permute.xlu1 %25  }
  0x79   :  { %16 = vst.msk [vmem:[#allocation0] sm:$0x1] %vm15_vm2, %v14_v18  }
  0x7a   :  { %22 = vst.msk [vmem:[#allocation0] sm:$0x1] %vm21_vm3, %v20_v17  }
  0x7b   :  { %28 = vst.msk [vmem:[#allocation0] sm:$0x1] %vm27_vm4, %v26_v19  }
  0x7c   :  { %v32_v20 = vpop.permute.xlu0 %31   ;;  %v38_v21 = vpop.permute.xlu1 %37  }
  0x7d   :  { %34 = vst.msk [vmem:[#allocation0] sm:$0x1] %vm33_vm5, %v32_v20  }
  0x7e   :  { %40 = vst.msk [vmem:[#allocation0] sm:$0x1] %vm39_vm6, %v38_v21  }
  0x80   :  { %v44_v22 = vpop.permute.xlu0 %43   ;;  %v50_v23 = vpop.permute.xlu1 %49  }
  0x81   :  { %46 = vst.msk [vmem:[#allocation0] sm:$0x1] %vm45_vm7, %v44_v22  }
  0x82   :  { %52 = vst.msk [vmem:[#allocation0] sm:$0x1] %vm51_vm8, %v50_v23  }
  0x84   :  { %v56_v24 = vpop.permute.xlu0 %55   ;;  %v62_v25 = vpop.permute.xlu1 %61  }
  0x85   :  { %58 = vst.msk [vmem:[#allocation0] sm:$0x1] %vm57_vm9, %v56_v24  }
  0x86   :  { %64 = vst.msk [vmem:[#allocation0] sm:$0x1] %vm63_vm10, %v62_v25  }
  0x88   :  { %v68_v26 = vpop.permute.xlu0 %67   ;;  %v74_v27 = vpop.permute.xlu1 %73  }
  0x89   :  { %70 = vst.msk [vmem:[#allocation0] sm:$0x1] %vm69_vm11, %v68_v26  }
  0x8a   :  { %76 = vst.msk [vmem:[#allocation0] sm:$0x1] %vm75_vm12, %v74_v27  }
  0x8c   :  { %v80_v28 = vpop.permute.xlu0 %79   ;;  %v86_v29 = vpop.permute.xlu1 %85  }
  0x8d   :  { %82 = vst.msk [vmem:[#allocation0] sm:$0x1] %vm81_vm13, %v80_v28  }
  0x8e   :  { %88 = vst.msk [vmem:[#allocation0] sm:$0x1] %vm87_vm14, %v86_v29  }
  0x90   :  { %v92_v30 = vpop.permute.xlu0 %91  }
  0x91   :  { %94 = vst.msk [vmem:[#allocation0] sm:$0x1] %vm93_vm15, %v92_v30  }
  0x98   :  { %v99_v31 = vld [vmem:[#allocation0] sm:$0x1] }
  0x99   :  { %102 = vst [vmem:[%s210_s1] sm:$0x1] %v99_v31 }

// kernel: tile.10
= control target key start
LH: loop header
LB: loop body
LE: loop exit
PB: predicated region body
PF: predicated region fallthrough
CT: control target
= control target key end

     0   :  { %s28_s0 = inlined_call_operand.vmem [shape: f32[4], index: 0, kind: input, shape index: {}]   ;;  %s29_s1 = inlined_call_operand.vmem [shape: f32[16,4], index: 1, kind: output, shape index: {}]  }
   0x1   :  { %v4_v0 = vld [vmem:[%s28_s0] ss:$0 sm:$0xff] }
   0x2   :  { %5 = vst [vmem:[%s29_s1] sm:$0xff] %v4_v0  ;;  %8 = vst [vmem:[%s29_s1 + $0x8] sm:$0xff] %v4_v0 }

// kernel: _lambda_.5
= control target key start
LH: loop header
LB: loop body
LE: loop exit
PB: predicated region body
PF: predicated region fallthrough
CT: control target
= control target key end

     0   :  { %vm60_vm0 = vcmask 519168   ;;  %s129_s0 = inlined_call_operand.vmem [shape: f32[32,64], index: 0, kind: input, shape index: {}]   ;;  %s130_s1 = inlined_call_operand.vmem [shape: f32[1,64], index: 1, kind: input, shape index: {}]   ;;  %s131_s2 = inlined_call_operand.vmem [shape: f32[1,64], index: 2, kind: input, shape index: {}]   ;;  %s132_s3 = inlined_call_operand.vmem [shape: bf16[32,64], index: 3, kind: output, shape index: {}]  }
   0x1   :  { %v14_v0 = vld [vmem:[%s129_s0] sm:$0xff]  ;;  %v15_v4 = vld [vmem:[%s129_s0 + $0x8] sm:$0xff]  ;;  %v16_v5 = vld [vmem:[%s129_s0 + $0x10] sm:$0xff] }
   0x2   :  { %v69_v1 = vld [vmem:[%s130_s1] ss:$0 sm:$0xff]  ;;  %v17_v6 = vld [vmem:[%s129_s0 + $0x18] sm:$0xff] }
   0x3   :  { %v70_v2 = vld [vmem:[%s131_s2] ss:$0 sm:$0xff]  ;;  %v25_v3 = vmul.f32 %v69_v1, %v14_v0  ;;  %v26_v7 = vmul.f32 %v69_v1, %v15_v4  ;;  %v27_v8 = vmul.f32 %v69_v1, %v16_v5  ;;  %v28_v9 = vmul.f32 %v69_v1, %v17_v6 }
   0x5   :  { %v36_v10 = vadd.f32 %v70_v2, %v25_v3  ;;  %v37_v11 = vadd.f32 %v70_v2, %v26_v7  ;;  %v38_v12 = vadd.f32 %v70_v2, %v27_v8  ;;  %v39_v13 = vadd.f32 %v70_v2, %v28_v9 }
   0x7   :  { %v40_v14 = vmax.f32 %v36_v10, 0.0  ;;  %v41_v15 = vmax.f32 %v37_v11, 0.0  ;;  %v42_v16 = vmax.f32 %v38_v12, 0.0  ;;  %v43_v17 = vmax.f32 %v39_v13, 0.0 }
   0x9   :  { %v75_v18 = vpack.c.bf16 %v40_v14, %v40_v14  ;;  %v76_v19 = vpack.c.bf16 %v41_v15, %v41_v15  ;;  %v77_v20 = vpack.c.bf16 %v42_v16, %v42_v16  ;;  %v78_v21 = vpack.c.bf16 %v43_v17, %v43_v17 }
   0xb   :  { %61 = vst.msk [vmem:[%s132_s3] sm:$0xf] %vm60_vm0, %v75_v18  ;;  %62 = vst.msk [vmem:[%s132_s3 + $0x4] sm:$0xf] %vm60_vm0, %v76_v19 }
   0xc   :  { %63 = vst.msk [vmem:[%s132_s3 + $0x8] sm:$0xf] %vm60_vm0, %v77_v20  ;;  %64 = vst.msk [vmem:[%s132_s3 + $0xc] sm:$0xf] %vm60_vm0, %v78_v21 }

// kernel: _lambda_.6
= control target key start
LH: loop header
LB: loop body
LE: loop exit
PB: predicated region body
PF: predicated region fallthrough
CT: control target
= control target key end

     0   :  { %s2586_s21 = smov 0   ;;  %s3004_s0 = inlined_call_operand.vmem [shape: bf16[2,9,9,16], index: 0, kind: input, shape index: {}]   ;;  %s3005_s1 = inlined_call_operand.vmem [shape: bf16[9,4,8], index: 1, kind: input, shape index: {}]   ;;  %s3006_s2 = inlined_call_operand.vmem [shape: bf16[4,8], index: 2, kind: input, shape index: {}]   ;;  %s3007_s3 = inlined_call_operand.vmem [shape: f32[1,8], index: 3, kind: input, shape index: {}]   ;;  %s3008_s4 = inlined_call_operand.vmem [shape: f32[1,8], index: 4, kind: input, shape index: {}]   ;;  %s3009_s5 = inlined_call_operand.vmem [shape: bf16[128,8], index: 5, kind: output, shape index: {0}]   ;;  %s3010_s6 = inlined_call_operand.vmem [shape: bf16[128,8], index: 6, kind: output, shape index: {1}]  }
   0x1 LB: > { %s2592_s22 = sadd.s32 4294967295, %s2546_s21   ;;  %p2178_p0 = scmp.ge.s32.totalorder %s2546_s21, 1  ;;  %s2546_s21 = sphi %s2586_s21, %s17_s21  }
   0x2   : > { %p215_p1 = scmp.lt.s32.totalorder %s2546_s21, 3 }
   0x4   : > { %p216_p2 = pnand %p2178_p0, %p215_p1 }
   0x5   : > { %p250_p3 = scmp.lt.s32.totalorder (!%p216_p2), %s2592_s22, 1  ;;  %s2548_s12 = smov (!%p216_p2), 124  }
   0x6   : > { %219 = sbr.rel (%p216_p2) target bundleno = 432 (0x1b0), region = 40  ;;  %s2549_s13 = smov (!%p216_p2), 120  }
   0x7   : > { %s2550_s14 = smov (!%p216_p2), 116   ;;  %s2180_s29 = sshll.u32 (!%p216_p2), %s2592_s22, 3 }
   0x8   : > { %p2913_p4 = scmp.lt.s32.totalorder (!%p216_p2), %s2180_s29, 15 }
   0xb   : > { %v276_v0 = vld [vmem:[%s3005_s1] sm:$0x3]  ;;  %vm310_vm0 = vcmask 1041408   ;;  %s251_s25 = scalar_select %p250_p3, %s2592_s22, 1  ;;  %v2606_v2 = vld [vmem:[%s3005_s1 + $0x4] sm:$0x3] }
   0xc   : > { %2490 = vmatprep.subr.msk.bf16.mxu0 %vm310_vm0, %v276_v0  ;;  %v312_v1 = vsel %vm310_vm0, %v276_v0, 0  ;;  %v2192_v3 = vld [vmem:[%s3005_s1 + $0x2] sm:$0x3]  ;;  %v2616_v5 = vld [vmem:[%s3005_s1 + $0x6] sm:$0x3]  ;;  %vm297_vm4 = vcmask 31744  }
   0xd   : > { %2391 = vmatpush3.bf16.msra.mxu0 %v312_v1  ;;  %2491 = vmatprep.subr.msk.bf16.mxu1 %vm310_vm0, %v2192_v3  ;;  %v439_v4 = vsel %vm310_vm0, %v2192_v3, 0  ;;  %s2500_s8 = smul.u32 72, %s251_s25  ;;  %vm546_vm1 = vsmask.f32 3328  ;;  %vm547_vm2 = vsmask.f32 7440 }
   0xe   : > { %2492 = vmatprep.subr.msk.bf16.mxu0 %vm310_vm0, %v2606_v2  ;;  %2401 = vmatpush3.bf16.msra.mxu1 %v439_v4  ;;  %vm2658_vm3 = vmor %vm546_vm1, %vm547_vm2  ;;  %vm379_vm5 = vcmask 64512   ;;  %s3015_s29 = smov (!%p2913_p4, %s2180_s29), 15  ;;  %vm1918_vm6 = vcmask 60416  }
   0xf   : > { %2493 = vmatprep.subr.msk.bf16.mxu1 %vm310_vm0, %v2616_v5  ;;  %s2625_s11 = scalar_lea.vmem %s3004_s0, %s2500_s8  ;;  %s2181_s22 = sshll.u32 %s3015_s29, 2 }
  0x10   : > { %v2512_v6 = vld [vmem:[%s2625_s11] ss:$8 sps:$4 sm:$0xff]   ;;  %v2513_v7 = vld [vmem:[%s2625_s11 + $0x10] ss:$8 sps:$4 sm:$0xff]   ;;  %v1064_v16 = vld [vmem:[%s2625_s11 + $0x4] sm:$0x1]  ;;  %s2937_s9 = scalar_lea.vmem %s3010_s6, %s2181_s22  ;;  %s2982_s16 = scalar_lea.vmem %s3009_s5, %s2181_s22 }
  0x11   : > { %418 = vrot.lane.b32.xlu0 %v2512_v6, %s2548_s12  ;;  %v2514_v8 = vld [vmem:[%s2625_s11 + $0x20] ss:$8 sps:$4 sm:$0xff]   ;;  %v2515_v9 = vld [vmem:[%s2625_s11 + $0x30] ss:$8 sps:$4 sm:$0xff]   ;;  %v1066_v18 = vld [vmem:[%s2625_s11 + $0xc] sm:$0x1] }
  0x12   : > { %422 = vrot.lane.b32.xlu1 %v2514_v8, %s2548_s12  ;;  %v2516_v10 = vld [vmem:[%s2625_s11] ss:$8 sps:$4 sm:$0xff]   ;;  %v2517_v11 = vld [vmem:[%s2625_s11 + $0x10] ss:$8 sps:$4 sm:$0xff]   ;;  %v1089_v21 = vshll.u32 %v1064_v16, 16  ;;  %v1103_v25 = vshll.u32 %v1066_v18, 16 }
  0x13   : > { %v2518_v12 = vld [vmem:[%s2625_s11 + $0x20] ss:$8 sps:$4 sm:$0xff]   ;;  %v2519_v13 = vld [vmem:[%s2625_s11 + $0x30] ss:$8 sps:$4 sm:$0xff]   ;;  %v1068_v27 = vld [vmem:[%s2625_s11 + $0x14] sm:$0x1] }
  0x14   : > { %v2520_v14 = vld [vmem:[%s2625_s11] ss:$8 sps:$4 sm:$0xff]   ;;  %v2521_v23 = vld [vmem:[%s2625_s11 + $0x10] ss:$8 sps:$4 sm:$0xff]   ;;  %v1091_v30 = vrot.slane %v1089_v21, 5  ;;  %v1105_v35 = vrot.slane %v1103_v25, 5 }
  0x15   : > { %420 = vrot.lane.b32.xlu0 %v2513_v7, %s2548_s12  ;;  %v1063_v15 = vld [vmem:[%s2625_s11] sm:$0xf]  ;;  %v1065_v17 = vld [vmem:[%s2625_s11 + $0x8] sm:$0xf]  ;;  %v1067_v26 = vld [vmem:[%s2625_s11 + $0x10] sm:$0xf] }
  0x16   : > { %424 = vrot.lane.b32.xlu1 %v2515_v9, %s2548_s12  ;;  %v1080_v19 = vshrl.u32 %v1063_v15, 16  ;;  %v1083_v20 = vshll.u32 %v1063_v15, 16  ;;  %v1094_v22 = vshrl.u32 %v1065_v17, 16  ;;  %v1097_v24 = vshll.u32 %v1065_v17, 16  ;;  %v1069_v32 = vld [vmem:[%s2625_s11 + $0x18] sm:$0xf] }
  0x17   : > { %v2522_v33 = vld [vmem:[%s2625_s11 + $0x20] ss:$8 sps:$4 sm:$0xff]   ;;  %v1070_v36 = vld [vmem:[%s2625_s11 + $0x1c] sm:$0x1]  ;;  %v1108_v37 = vshrl.u32 %v1067_v26, 16  ;;  %v1111_v38 = vshll.u32 %v1067_v26, 16 }
  0x18   : > { %v1082_v28 = vrot.slane %v1080_v19, 4  ;;  %v1085_v29 = vrot.slane %v1083_v20, 5  ;;  %v1096_v31 = vrot.slane %v1094_v22, 4  ;;  %v1099_v34 = vrot.slane %v1097_v24, 5  ;;  %v1071_v43 = vld [vmem:[%s2625_s11 + $0x20] sm:$0xf] }
  0x19   : > { %809 = vrot.lane.b32.xlu0 %v2516_v10, %s2549_s13  ;;  %v1117_v40 = vshll.u32 %v1068_v27, 16  ;;  %v1122_v41 = vshrl.u32 %v1069_v32, 16  ;;  %v1125_v42 = vshll.u32 %v1069_v32, 16  ;;  %v1110_v46 = vrot.slane %v1108_v37, 4  ;;  %v1072_v49 = vld [vmem:[%s2625_s11 + $0x24] sm:$0x1] }
  0x1a   : > { %811 = vrot.lane.b32.xlu1 %v2517_v11, %s2549_s13  ;;  %v1086_v39 = vor.u32 %v1085_v29, %v1082_v28  ;;  %v1100_v45 = vor.u32 %v1099_v34, %v1096_v31  ;;  %v1113_v47 = vrot.slane %v1111_v38, 5  ;;  %v1131_v48 = vshll.u32 %v1070_v36, 16  ;;  %v1073_v54 = vld [vmem:[%s2625_s11 + $0x28] sm:$0xf]  ;;  %v2523_v55 = vld [vmem:[%s2625_s11 + $0x30] ss:$8 sps:$4 sm:$0xff]  }
  0x1b   : > { %v1119_v51 = vrot.slane %v1117_v40, 5  ;;  %v1124_v52 = vrot.slane %v1122_v41, 4  ;;  %v1127_v53 = vrot.slane %v1125_v42, 5  ;;  %v1136_v59 = vshrl.u32 %v1071_v43, 16  ;;  %v1074_v62 = vld [vmem:[%s2625_s11 + $0x2c] sm:$0x1] }
  0x1c   : > { %v1087_v50 = vrot.slane %v1086_v39, 4  ;;  %v1101_v56 = vrot.slane %v1100_v45, 4  ;;  %v1114_v57 = vor.u32 %v1113_v47, %v1110_v46  ;;  %v1133_v58 = vrot.slane %v1131_v48, 5  ;;  %v1075_v7 = vld [vmem:[%s2625_s11 + $0x30] sm:$0xf] }
  0x1d   : > { %813 = vrot.lane.b32.xlu0 %v2518_v12, %s2549_s13  ;;  %v1128_v61 = vor.u32 %v1127_v53, %v1124_v52  ;;  %v1139_v63 = vshll.u32 %v1071_v43, 16  ;;  %v1145_v0 = vshll.u32 %v1072_v49, 16  ;;  %v1138_v4 = vrot.slane %v1136_v59, 4  ;;  %v1076_v11 = vld [vmem:[%s2625_s11 + $0x34] sm:$0x1] }
  0x1e   : > { %815 = vrot.lane.b32.xlu1 %v2519_v13, %s2549_s13  ;;  %v1092_v60 = vsel %vm2658_vm3, %v1087_v50, %v1091_v30  ;;  %v1106_v1 = vsel %vm2658_vm3, %v1101_v56, %v1105_v35  ;;  %v1115_v3 = vrot.slane %v1114_v57, 4  ;;  %v1150_v6 = vshrl.u32 %v1073_v54, 16  ;;  %v1077_v12 = vld [vmem:[%s2625_s11 + $0x38] sm:$0xf]  ;;  %v1078_v19 = vld [vmem:[%s2625_s11 + $0x3c] sm:$0x1] }
  0x1f   : > { %v2229_v8 = vcombine.low %v1092_v60, %v1106_v1  ;;  %v1129_v9 = vrot.slane %v1128_v61, 4  ;;  %v1141_v10 = vrot.slane %v1139_v63, 5  ;;  %v1153_v15 = vshll.u32 %v1073_v54, 16  ;;  %v2524_v48 = vld [vmem:[%s2625_s11 + $0x8] ss:$8 sps:$4 sm:$0xff]  }
  0x20   : > { %v1120_v13 = vsel %vm2658_vm3, %v1115_v3, %v1119_v51  ;;  %v1159_v16 = vshll.u32 %v1074_v62, 16  ;;  %v1164_v20 = vshrl.u32 %v1075_v7, 16  ;;  %v1167_v21 = vshll.u32 %v1075_v7, 16  ;;  %v2525_v51 = vld [vmem:[%s2625_s11 + $0x18] ss:$8 sps:$4 sm:$0xff]  }
  0x21   : > { %951 = vrot.lane.b32.xlu0 %v2520_v14, %s2550_s14  ;;  %v1152_v14 = vrot.slane %v1150_v6, 4  ;;  %v1134_v17 = vsel %vm2658_vm3, %v1129_v9, %v1133_v58  ;;  %v1142_v18 = vor.u32 %v1141_v10, %v1138_v4  ;;  %v1155_v24 = vrot.slane %v1153_v15, 5  ;;  %v2526_v52 = vld [vmem:[%s2625_s11 + $0x28] ss:$8 sps:$4 sm:$0xff]   ;;  %v2527_v57 = vld [vmem:[%s2625_s11 + $0x38] ss:$8 sps:$4 sm:$0xff]  }
  0x22   : > { %953 = vrot.lane.b32.xlu1 %v2521_v23, %s2550_s14  ;;  %v2230_v22 = vcombine.low %v1120_v13, %v1134_v17  ;;  %v1147_v23 = vrot.slane %v1145_v0, 5  ;;  %v1173_v25 = vshll.u32 %v1076_v11, 16  ;;  %v1166_v27 = vrot.slane %v1164_v20, 4  ;;  %v2532_v53 = vld [vmem:[%s2625_s11] ss:$8 sps:$4 sm:$0xff]  }
  0x23   : > { %v1143_v26 = vrot.slane %v1142_v18, 4  ;;  %v1169_v28 = vrot.slane %v1167_v21, 5  ;;  %v1178_v29 = vshrl.u32 %v1077_v12, 16  ;;  %v1156_v30 = vor.u32 %v1155_v24, %v1152_v14  ;;  %v2533_v54 = vld [vmem:[%s2625_s11 + $0x10] ss:$8 sps:$4 sm:$0xff]   ;;  %2392 = vmatprep.mubr.msk.bf16.mxu0 %vm297_vm4, %v2532_v53 }
  0x24   : > { %v1161_v31 = vrot.slane %v1159_v16, 5  ;;  %v1181_v32 = vshll.u32 %v1077_v12, 16  ;;  %v1175_v38 = vrot.slane %v1173_v25, 5  ;;  %v688_v56 = vsel %vm310_vm0, %v2606_v2, 0  ;;  %v2528_v58 = vld [vmem:[%s2625_s11] ss:$8 sps:$4 sm:$0xff]   ;;  %2393 = vmatmul.mubr.msk.bf16.vlgmr.msra.gmra.mxu0 %vm297_vm4, %v2533_v54 }
  0x25   : > { %955 = vrot.lane.b32.xlu0 %v2522_v33, %s2550_s14  ;;  %v1187_v33 = vshll.u32 %v1078_v19, 16  ;;  %v1170_v34 = vor.u32 %v1169_v28, %v1166_v27  ;;  %v1180_v35 = vrot.slane %v1178_v29, 4  ;;  %v1148_v36 = vsel %vm2658_vm3, %v1143_v26, %v1147_v23  ;;  %v530_v59 = vld [vmem:[%s2625_s11] sm:$0xf]  ;;  %v531_v60 = vld [vmem:[%s2625_s11 + $0x4] sm:$0x1]  ;;  %2411 = vmatpush3.bf16.msra.mxu0 %v688_v56 }
  0x26   : > { %957 = vrot.lane.b32.xlu1 %v2523_v55, %s2550_s14  ;;  %v1157_v37 = vrot.slane %v1156_v30, 4  ;;  %v1183_v39 = vrot.slane %v1181_v32, 5  ;;  %v2534_v55 = vld [vmem:[%s2625_s11 + $0x20] ss:$8 sps:$4 sm:$0xff]   ;;  %v533_v62 = vld [vmem:[%s2625_s11 + $0xc] sm:$0x1] }
  0x27   : > { %v1171_v40 = vrot.slane %v1170_v34, 4  ;;  %v1189_v43 = vrot.slane %v1187_v33, 5  ;;  %v532_v61 = vld [vmem:[%s2625_s11 + $0x8] sm:$0xf]  ;;  %2396 = vmatprep.mubr.msk.bf16.mxu0 %vm297_vm4, %v2534_v55  ;;  %v550_v63 = vshrl.u32 %v530_v59, 16  ;;  %v553_v2 = vshll.u32 %v530_v59, 16 }
  0x28   : > { %v1162_v41 = vsel %vm2658_vm3, %v1157_v37, %v1161_v31  ;;  %v1184_v42 = vor.u32 %v1183_v39, %v1180_v35  ;;  %v559_v0 = vshll.u32 %v531_v60, 16  ;;  %v564_v1 = vshrl.u32 %v532_v61, 16  ;;  %v2535_v3 = vld [vmem:[%s2625_s11 + $0x30] ss:$8 sps:$4 sm:$0xff]   ;;  %v2530_v15 = vld [vmem:[%s2625_s11 + $0x20] ss:$8 sps:$4 sm:$0xff]  }
  0x29   : > { %1205 = vrot.lane.b32.xlu0 %v2229_v8, %s2549_s13  ;;  %v2231_v45 = vcombine.low %v1148_v36, %v1162_v41  ;;  %v1176_v46 = vsel %vm2658_vm3, %v1171_v40, %v1175_v38  ;;  %v567_v4 = vshll.u32 %v532_v61, 16  ;;  %v573_v6 = vshll.u32 %v533_v62, 16  ;;  %v534_v7 = vld [vmem:[%s2625_s11 + $0x10] sm:$0xf]  ;;  %v535_v8 = vld [vmem:[%s2625_s11 + $0x14] sm:$0x1] }
  0x2a   : > { %1207 = vrot.lane.b32.xlu1 %v2230_v22, %s2549_s13  ;;  %v1185_v47 = vrot.slane %v1184_v42, 4  ;;  %v552_v9 = vrot.slane %v550_v63, 4  ;;  %v555_v10 = vrot.slane %v553_v2, 5  ;;  %v561_v11 = vrot.slane %v559_v0, 5  ;;  %v536_v13 = vld [vmem:[%s2625_s11 + $0x18] sm:$0xf] }
  0x2b   : > { %v566_v12 = vrot.slane %v564_v1, 4  ;;  %v2529_v14 = vld [vmem:[%s2625_s11 + $0x10] ss:$8 sps:$4 sm:$0xff]   ;;  %v569_v16 = vrot.slane %v567_v4, 5  ;;  %v575_v17 = vrot.slane %v573_v6, 5  ;;  %v578_v19 = vshrl.u32 %v534_v7, 16 }
  0x2c   : > { %v1190_v49 = vsel %vm2658_vm3, %v1185_v47, %v1189_v43  ;;  %v537_v18 = vld [vmem:[%s2625_s11 + $0x1c] sm:$0x1]  ;;  %v581_v20 = vshll.u32 %v534_v7, 16  ;;  %v556_v21 = vor.u32 %v555_v10, %v552_v9  ;;  %v587_v22 = vshll.u32 %v535_v8, 16  ;;  %v538_v25 = vld [vmem:[%s2625_s11 + $0x20] sm:$0xf]  ;;  %2397 = vmatmul.mubr.msk.bf16.gmra.mxu0 %vm297_vm4, %v2535_v3 }
  0x2d   : > { %1209 = vrot.lane.b32.xlu0 %v2231_v45, %s2549_s13  ;;  %v2232_v50 = vcombine.low %v1176_v46, %v1190_v49  ;;  %v592_v23 = vshrl.u32 %v536_v13, 16  ;;  %v595_v24 = vshll.u32 %v536_v13, 16  ;;  %v570_v26 = vor.u32 %v569_v16, %v566_v12  ;;  %v539_v30 = vld [vmem:[%s2625_s11 + $0x24] sm:$0x1]  ;;  %v540_v35 = vld [vmem:[%s2625_s11 + $0x28] sm:$0xf] }
  0x2e   : > { %v580_v27 = vrot.slane %v578_v19, 4  ;;  %v583_v28 = vrot.slane %v581_v20, 5  ;;  %v601_v29 = vshll.u32 %v537_v18, 16  ;;  %v557_v31 = vrot.slane %v556_v21, 4  ;;  %v2531_v40 = vld [vmem:[%s2625_s11 + $0x30] ss:$8 sps:$4 sm:$0xff]  }
  0x2f   : > { %1211 = vrot.lane.b32.xlu1 %v2232_v50, %s2549_s13  ;;  %v589_v32 = vrot.slane %v587_v22, 5  ;;  %v594_v33 = vrot.slane %v592_v23, 4  ;;  %v597_v34 = vrot.slane %v595_v24, 5  ;;  %v571_v36 = vrot.slane %v570_v26, 4  ;;  %v541_v43 = vld [vmem:[%s2625_s11 + $0x2c] sm:$0x1] }
  0x30   : > { %v584_v37 = vor.u32 %v583_v28, %v580_v27  ;;  %v603_v38 = vrot.slane %v601_v29, 5  ;;  %v606_v39 = vshrl.u32 %v538_v25, 16  ;;  %v562_v41 = vsel %vm2658_vm3, %v557_v31, %v561_v11  ;;  %v543_v55 = vld [vmem:[%s2625_s11 + $0x34] sm:$0x1]  ;;  %v544_v56 = vld [vmem:[%s2625_s11 + $0x38] sm:$0xf] }
  0x31   : > { %1482 = vrot.lane.b32.xlu0 %v2524_v48, %s2548_s12  ;;  %v598_v42 = vor.u32 %v597_v34, %v594_v33  ;;  %v609_v45 = vshll.u32 %v538_v25, 16  ;;  %v615_v46 = vshll.u32 %v539_v30, 16  ;;  %v576_v47 = vsel %vm2658_vm3, %v571_v36, %v575_v17  ;;  %v2219_v61 = vld [vmem:[%s3005_s1 + $0x8] sm:$0x3]  ;;  %v545_v2 = vld [vmem:[%s2625_s11 + $0x3c] sm:$0x1] }
  0x32   : > { %v585_v48 = vrot.slane %v584_v37, 4  ;;  %v608_v49 = vrot.slane %v606_v39, 4  ;;  %v620_v50 = vshrl.u32 %v540_v35, 16  ;;  %v623_v59 = vshll.u32 %v540_v35, 16  ;;  %2494 = vmatprep.subr.msk.bf16.mxu0 %vm310_vm0, %v2219_v61  ;;  %v2245_v16 = vld [vmem:[%s3005_s1 + $0xc] sm:$0x3] }
  0x33   : > { %1484 = vrot.lane.b32.xlu1 %v2525_v51, %s2548_s12  ;;  %v542_v51 = vld [vmem:[%s2625_s11 + $0x30] sm:$0xf]  ;;  %v599_v53 = vrot.slane %v598_v42, 4  ;;  %v611_v54 = vrot.slane %v609_v45, 5  ;;  %v629_v60 = vshll.u32 %v541_v43, 16  ;;  %v617_v4 = vrot.slane %v615_v46, 5 }
  0x34   : > { %v634_v0 = vshrl.u32 %v542_v51, 16  ;;  %v637_v1 = vshll.u32 %v542_v51, 16  ;;  %v625_v6 = vrot.slane %v623_v59, 5  ;;  %v643_v7 = vshll.u32 %v543_v55, 16  ;;  %v2228_v37 = vld [vmem:[%s3005_s1 + $0xa] sm:$0x3] }
  0x35   : > { %1486 = vrot.lane.b32.xlu0 %v2526_v52, %s2548_s12  ;;  %v2202_v52 = vcombine.low %v562_v41, %v576_v47  ;;  %v604_v62 = vsel %vm2658_vm3, %v599_v53, %v603_v38  ;;  %v612_v63 = vor.u32 %v611_v54, %v608_v49  ;;  %v648_v11 = vshrl.u32 %v544_v56, 16  ;;  %v2271_v42 = vld [vmem:[%s2625_s11 + $0x8] sm:$0xf]  ;;  %v2273_v45 = vld [vmem:[%s2625_s11 + $0x10] sm:$0xf] }
  0x36   : > { %v636_v9 = vrot.slane %v634_v0, 4  ;;  %v639_v10 = vrot.slane %v637_v1, 5  ;;  %v631_v13 = vrot.slane %v629_v60, 5  ;;  %v972_v19 = vsel %vm310_vm0, %v2219_v61, 0  ;;  %v2262_v54 = vld [vmem:[%s3005_s1 + $0xe] sm:$0x3] }
  0x37   : > { %1488 = vrot.lane.b32.xlu1 %v2527_v57, %s2548_s12  ;;  %v590_v57 = vsel %vm2658_vm3, %v585_v48, %v589_v32  ;;  %2412 = vmatprep.mubr.msk.bf16.mxu0 %vm297_vm4, %v2202_v52  ;;  %v613_v8 = vrot.slane %v612_v63, 4  ;;  %v650_v18 = vrot.slane %v648_v11, 4  ;;  %v645_v22 = vrot.slane %v643_v7, 5  ;;  %v2287_v55 = vld [vmem:[%s3005_s1 + $0x10] sm:$0x3] }
  0x38   : > { %v2203_v3 = vcombine.low %v590_v57, %v604_v62  ;;  %v640_v17 = vor.u32 %v639_v10, %v636_v9  ;;  %v830_v35 = vsel %vm310_vm0, %v2616_v5, 0  ;;  %v1361_v46 = vsel %vm310_vm0, %v2245_v16, 0  ;;  %v2274_v59 = vld [vmem:[%s2625_s11 + $0x14] sm:$0x1]  ;;  %v2275_v62 = vld [vmem:[%s2625_s11 + $0x18] sm:$0xf] }
  0x39   : > { %1956 = vrot.lane.b32.xlu0 %v2528_v58, %s2550_s14  ;;  %v622_v58 = vrot.slane %v620_v50, 4  ;;  %v618_v20 = vsel %vm2658_vm3, %v613_v8, %v617_v4  ;;  %v1611_v48 = vshrl.u32 %v2271_v42, 16  ;;  %v1614_v49 = vshll.u32 %v2271_v42, 16  ;;  %v2277_v0 = vld [vmem:[%s2625_s11 + $0x20] sm:$0xf] }
  0x3a   : > { %2413 = vmatmul.mubr.msk.bf16.vlgmr.msra.gmra.mxu0 %vm297_vm4, %v2203_v3  ;;  %v641_v24 = vrot.slane %v640_v17, 4  ;;  %v1226_v50 = vsel %vm310_vm0, %v2228_v37, 0  ;;  %v1625_v51 = vshrl.u32 %v2273_v45, 16  ;;  %v1628_v52 = vshll.u32 %v2273_v45, 16  ;;  %v2279_v7 = vld [vmem:[%s2625_s11 + $0x28] sm:$0xf] }
  0x3b   : > { %1958 = vrot.lane.b32.xlu1 %v2529_v14, %s2550_s14  ;;  %v626_v12 = vor.u32 %v625_v6, %v622_v58  ;;  %v651_v14 = vshll.u32 %v544_v56, 16  ;;  %2431 = vmatpush3.bf16.msra.mxu0 %v972_v19  ;;  %v2272_v56 = vld [vmem:[%s2625_s11 + $0xc] sm:$0x1]  ;;  %v1613_v57 = vrot.slane %v1611_v48, 4  ;;  %v1616_v58 = vrot.slane %v1614_v49, 5 }
  0x3c   : > { %2496 = vmatprep.subr.msk.bf16.mxu0 %vm310_vm0, %v2245_v16  ;;  %v646_v29 = vsel %vm2658_vm3, %v641_v24, %v645_v22  ;;  %v1627_v60 = vrot.slane %v1625_v51, 4  ;;  %v1630_v61 = vrot.slane %v1628_v52, 5  ;;  %v1620_v1 = vshll.u32 %v2272_v56, 16  ;;  %v2281_v8 = vld [vmem:[%s2625_s11 + $0x30] sm:$0xf] }
  0x3d   : > { %1960 = vrot.lane.b32.xlu0 %v2530_v15, %s2550_s14  ;;  %v657_v15 = vshll.u32 %v545_v2, 16  ;;  %v627_v21 = vrot.slane %v626_v12, 4  ;;  %v653_v23 = vrot.slane %v651_v14, 5  ;;  %v2536_v2 = vld [vmem:[%s2625_s11 + $0x8] ss:$8 sps:$4 sm:$0xff]   ;;  %v1617_v3 = vor.u32 %v1616_v58, %v1613_v57 }
  0x3e   : > { %v1634_v4 = vshll.u32 %v2274_v59, 16  ;;  %v1639_v6 = vshrl.u32 %v2275_v62, 16  ;;  %v1631_v10 = vor.u32 %v1630_v61, %v1627_v60  ;;  %v1642_v11 = vshll.u32 %v2275_v62, 16  ;;  %v2537_v14 = vld [vmem:[%s2625_s11 + $0x18] ss:$8 sps:$4 sm:$0xff]  }
  0x3f   : > { %1962 = vrot.lane.b32.xlu1 %v2531_v40, %s2550_s14  ;;  %v632_v25 = vsel %vm2658_vm3, %v627_v21, %v631_v13  ;;  %v654_v26 = vor.u32 %v653_v23, %v650_v18  ;;  %v659_v27 = vrot.slane %v657_v15, 5  ;;  %v1653_v12 = vshrl.u32 %v2277_v0, 16  ;;  %v2276_v22 = vld [vmem:[%s2625_s11 + $0x1c] sm:$0x1]  ;;  %v1935_v48 = vld [vmem:[%s3006_s2] sm:$0x3] }
  0x40   : > { %v2204_v28 = vcombine.low %v618_v20, %v632_v25  ;;  %v1656_v13 = vshll.u32 %v2277_v0, 16  ;;  %v1667_v15 = vshrl.u32 %v2279_v7, 16  ;;  %v1670_v16 = vshll.u32 %v2279_v7, 16  ;;  %v2278_v25 = vld [vmem:[%s2625_s11 + $0x24] sm:$0x1] }
  0x41   : > { %v655_v30 = vrot.slane %v654_v26, 4  ;;  %v1681_v17 = vshrl.u32 %v2281_v8, 16  ;;  %v1684_v18 = vshll.u32 %v2281_v8, 16  ;;  %v1618_v19 = vrot.slane %v1617_v3, 4  ;;  %v2539_v58 = vld [vmem:[%s2625_s11 + $0x38] ss:$8 sps:$4 sm:$0xff]  }
  0x42   : > { %2416 = vmatprep.mubr.msk.bf16.mxu0 %vm297_vm4, %v2204_v28  ;;  %v1622_v20 = vrot.slane %v1620_v1, 5  ;;  %v1636_v21 = vrot.slane %v1634_v4, 5  ;;  %v1641_v23 = vrot.slane %v1639_v6, 4  ;;  %v1632_v24 = vrot.slane %v1631_v10, 4 }
  0x43   : > { %v660_v31 = vsel %vm2658_vm3, %v655_v30, %v659_v27  ;;  %v1644_v26 = vrot.slane %v1642_v11, 5  ;;  %v1655_v27 = vrot.slane %v1653_v12, 4  ;;  %v1658_v28 = vrot.slane %v1656_v13, 5  ;;  %v2538_v30 = vld [vmem:[%s2625_s11 + $0x28] ss:$8 sps:$4 sm:$0xff]  }
  0x44   : > { %v2205_v32 = vcombine.low %v646_v29, %v660_v31  ;;  %v1503_v29 = vsel %vm310_vm0, %v2262_v54, 0  ;;  %v1749_v31 = vsel %vm310_vm0, %v2287_v55, 0  ;;  %v1637_v45 = vsel %vm2658_vm3, %v1632_v24, %v1636_v21 }
  0x46   : > { %2417 = vmatmul.mubr.msk.bf16.gmra.mxu0 %vm297_vm4, %v2205_v32  ;;  %v2283_v32 = vld [vmem:[%s2625_s11 + $0x38] sm:$0xf] }
  0x47   : > { %v1695_v49 = vshrl.u32 %v2283_v32, 16 }
  0x83   : > { %v419_v33 = vpop.permute.xlu0 %418 }
  0x84   : > { %2402 = vmatprep.mubr.msk.bf16.mxu1 %vm297_vm4, %v419_v33  ;;  %v423_v34 = vpop.permute.xlu1 %422  ;;  %v1669_v33 = vrot.slane %v1667_v15, 4 }
  0x87   : > { %v421_v36 = vpop.permute.xlu0 %420 }
  0x88   : > { %2403 = vmatmul.mubr.msk.bf16.vlgmr.msra.gmra.mxu1 %vm297_vm4, %v421_v36  ;;  %v425_v38 = vpop.permute.xlu1 %424  ;;  %v1686_v36 = vrot.slane %v1684_v18, 5 }
  0x89   : > { %2406 = vmatprep.mubr.msk.bf16.mxu1 %vm297_vm4, %v423_v34  ;;  %2421 = vmatpush3.bf16.msra.mxu1 %v830_v35  ;;  %v1672_v34 = vrot.slane %v1670_v16, 5  ;;  %v1683_v35 = vrot.slane %v1681_v17, 4 }
  0x8a   : > { %2495 = vmatprep.subr.msk.bf16.mxu1 %vm310_vm0, %v2228_v37  ;;  %v2285_v37 = vld [vmem:[%s2625_s11 + $0x40] sm:$0xf] }
  0x8b   : > { %v810_v39 = vpop.permute.xlu0 %809  ;;  %v1709_v51 = vshrl.u32 %v2285_v37, 16  ;;  %v1712_v52 = vshll.u32 %v2285_v37, 16 }
  0x8c   : > { %v812_v40 = vpop.permute.xlu1 %811 }
  0x8d   : > { %v1711_v1 = vrot.slane %v1709_v51, 4  ;;  %v1714_v3 = vrot.slane %v1712_v52, 5 }
  0x8f   : > { %v814_v41 = vpop.permute.xlu0 %813  ;;  %v1715_v16 = vor.u32 %v1714_v3, %v1711_v1 }
  0x90   : > { %2407 = vmatmul.mubr.msk.bf16.gmra.mxu1 %vm297_vm4, %v425_v38  ;;  %v816_v5 = vpop.permute.xlu1 %815 }
  0x91   : > { %2422 = vmatprep.mubr.msk.bf16.mxu1 %vm297_vm4, %v810_v39  ;;  %v1648_v39 = vshll.u32 %v2276_v22, 16  ;;  %v1716_v24 = vrot.slane %v1715_v16, 4 }
  0x93   : > { %v952_v43 = vpop.permute.xlu0 %951  ;;  %v1650_v57 = vrot.slane %v1648_v39, 5 }
  0x94   : > { %2432 = vmatprep.mubr.msk.bf16.mxu0 %vm297_vm4, %v952_v43  ;;  %v954_v47 = vpop.permute.xlu1 %953  ;;  %v1623_v43 = vsel %vm2658_vm3, %v1618_v19, %v1622_v20 }
  0x95   : > { %2433 = vmatmul.mubr.msk.bf16.vlgmr.msra.gmra.mxu0 %vm297_vm4, %v954_v47  ;;  %v1659_v47 = vor.u32 %v1658_v28, %v1655_v27  ;;  %v2288_v59 = vcombine.low %v1623_v43, %v1637_v45  ;;  %v1977_v28 = vsel %vm310_vm0, %v1935_v48, 0 }
  0x96   : > { %2451 = vmatpush3.bf16.msra.mxu0 %v1361_v46  ;;  %v1645_v46 = vor.u32 %v1644_v26, %v1641_v23 }
  0x97   : > { %v956_v53 = vpop.permute.xlu0 %955  ;;  %2498 = vmatprep.subr.msk.bf16.mxu0 %vm310_vm0, %v2287_v55  ;;  %v1687_v55 = vor.u32 %v1686_v36, %v1683_v35  ;;  %v1660_v61 = vrot.slane %v1659_v47, 4 }
  0x98   : > { %2423 = vmatmul.mubr.msk.bf16.vlgmr.msra.gmra.mxu1 %vm297_vm4, %v812_v40  ;;  %2436 = vmatprep.mubr.msk.bf16.mxu0 %vm297_vm4, %v956_v53  ;;  %v958_v63 = vpop.permute.xlu1 %957  ;;  %v1662_v40 = vshll.u32 %v2278_v25, 16  ;;  %v1673_v53 = vor.u32 %v1672_v34, %v1669_v33  ;;  %v1646_v60 = vrot.slane %v1645_v46, 4 }
  0x99   : > { %2426 = vmatprep.mubr.msk.bf16.mxu1 %vm297_vm4, %v814_v41  ;;  %2441 = vmatpush3.bf16.msra.mxu1 %v1226_v50  ;;  %v2280_v41 = vld [vmem:[%s2625_s11 + $0x2c] sm:$0x1]  ;;  %v1698_v50 = vshll.u32 %v2283_v32, 16  ;;  %v1688_v7 = vrot.slane %v1687_v55, 4 }
  0x9a   : > { %2497 = vmatprep.subr.msk.bf16.mxu1 %vm310_vm0, %v2262_v54  ;;  %v1676_v54 = vshll.u32 %v2280_v41, 16  ;;  %v1664_v62 = vrot.slane %v1662_v40, 5  ;;  %v1674_v4 = vrot.slane %v1673_v53, 4  ;;  %v1651_v12 = vsel %vm2658_vm3, %v1646_v60, %v1650_v57 }
  0x9b   : > { %v1206_v9 = vpop.permute.xlu0 %1205  ;;  %v1700_v0 = vrot.slane %v1698_v50, 5 }
  0x9c   : > { %v1208_v38 = vpop.permute.xlu1 %1207  ;;  %v1678_v6 = vrot.slane %v1676_v54, 5 }
  0x9d   : > { %2437 = vmatmul.mubr.msk.bf16.gmra.mxu0 %vm297_vm4, %v958_v63  ;;  %v2284_v63 = vld [vmem:[%s2625_s11 + $0x3c] sm:$0x1] }
  0x9e   : > { %2452 = vmatprep.mubr.msk.bf16.mxu0 %vm297_vm4, %v2536_v2  ;;  %v1697_v2 = vrot.slane %v1695_v49, 4  ;;  %v1704_v13 = vshll.u32 %v2284_v63, 16  ;;  %v1679_v18 = vsel %vm2658_vm3, %v1674_v4, %v1678_v6 }
  0x9f   : > { %v1210_v42 = vpop.permute.xlu0 %1209 }
  0xa0   : > { %2427 = vmatmul.mubr.msk.bf16.gmra.mxu1 %vm297_vm4, %v816_v5  ;;  %v2282_v5 = vld [vmem:[%s2625_s11 + $0x34] sm:$0x1]  ;;  %v1701_v15 = vor.u32 %v1700_v0, %v1697_v2  ;;  %v1706_v21 = vrot.slane %v1704_v13, 5 }
  0xa1   : > { %2442 = vmatprep.mubr.msk.bf16.mxu1 %vm297_vm4, %v1206_v9  ;;  %v1690_v56 = vshll.u32 %v2282_v5, 16  ;;  %v2286_v9 = vld [vmem:[%s2625_s11 + $0x44] sm:$0x1]  ;;  %v1212_v10 = vpop.permute.xlu1 %1211 }
  0xa2   : > { %v1718_v17 = vshll.u32 %v2286_v9, 16  ;;  %v1702_v23 = vrot.slane %v1701_v15, 4 }
  0xa3   : > { %v1692_v8 = vrot.slane %v1690_v56, 5  ;;  %v1483_v11 = vpop.permute.xlu0 %1482 }
  0xa4   : > { %v1720_v25 = vrot.slane %v1718_v17, 5 }
  0xa5   : > { %2453 = vmatmul.mubr.msk.bf16.vlgmr.msra.gmra.mxu0 %vm297_vm4, %v2537_v14  ;;  %v1665_v14 = vsel %vm2658_vm3, %v1660_v61, %v1664_v62  ;;  %v1693_v19 = vsel %vm2658_vm3, %v1688_v7, %v1692_v8  ;;  %v1485_v26 = vpop.permute.xlu1 %1484 }
  0xa6   : > { %2456 = vmatprep.mubr.msk.bf16.mxu0 %vm297_vm4, %v2538_v30  ;;  %2471 = vmatpush3.bf16.msra.mxu0 %v1749_v31  ;;  %v2289_v20 = vcombine.low %v1651_v12, %v1665_v14  ;;  %v2290_v22 = vcombine.low %v1679_v18, %v1693_v19  ;;  %v1721_v30 = vsel %vm2658_vm3, %v1716_v24, %v1720_v25 }
  0xa7   : > { %v1487_v27 = vpop.permute.xlu0 %1486 }
  0xa8   : > { %2443 = vmatmul.mubr.msk.bf16.vlgmr.msra.gmra.mxu1 %vm297_vm4, %v1208_v38 }
  0xa9   : > { %2446 = vmatprep.mubr.msk.bf16.mxu1 %vm297_vm4, %v1210_v42  ;;  %2461 = vmatpush3.bf16.msra.mxu1 %v1503_v29  ;;  %v1707_v29 = vsel %vm2658_vm3, %v1702_v23, %v1706_v21  ;;  %v1489_v32 = vpop.permute.xlu1 %1488 }
  0xaa   : > { %2499 = vmatprep.subr.msk.bf16.mxu1 %vm310_vm0, %v1935_v48  ;;  %v2291_v31 = vcombine.low %v1707_v29, %v1721_v30 }
  0xab   : > { %v1957_v33 = vpop.permute.xlu0 %1956 }
  0xad   : > { %2457 = vmatmul.mubr.msk.bf16.gmra.mxu0 %vm297_vm4, %v2539_v58  ;;  %v1959_v34 = vpop.permute.xlu1 %1958 }
  0xae   : > { %2472 = vmatprep.mubr.msk.bf16.mxu0 %vm297_vm4, %v2288_v59 }
  0xaf   : > { %v1961_v35 = vpop.permute.xlu0 %1960 }
  0xb0   : > { %2447 = vmatmul.mubr.msk.bf16.gmra.mxu1 %vm297_vm4, %v1212_v10 }
  0xb1   : > { %2462 = vmatprep.mubr.msk.bf16.mxu1 %vm297_vm4, %v1483_v11  ;;  %v1963_v44 = vpop.permute.xlu1 %1962 }
  0xb5   : > { %2473 = vmatmul.mubr.msk.bf16.vlgmr.msra.gmra.mxu0 %vm297_vm4, %v2289_v20 }
  0xb6   : > { %2476 = vmatprep.mubr.msk.bf16.mxu0 %vm297_vm4, %v2290_v22 }
  0xb8   : > { %2463 = vmatmul.mubr.msk.bf16.vlgmr.msra.gmra.mxu1 %vm297_vm4, %v1485_v26 }
  0xb9   : > { %2466 = vmatprep.mubr.msk.bf16.mxu1 %vm297_vm4, %v1487_v27  ;;  %2481 = vmatpush3.bf16.msra.mxu1 %v1977_v28 }
  0xbd   : > { %2477 = vmatmul.mubr.msk.bf16.gmra.mxu0 %vm297_vm4, %v2291_v31 }
  0xc0   : > { %2467 = vmatmul.mubr.msk.bf16.gmra.mxu1 %vm297_vm4, %v1489_v32 }
  0xc1   : > { %2482 = vmatprep.mubr.msk.bf16.mxu1 %vm297_vm4, %v1957_v33 }
  0xc8   : > { %2483 = vmatmul.mubr.msk.bf16.vlgmr.msra.gmra.mxu1 %vm297_vm4, %v1959_v34 }
  0xc9   : > { %2486 = vmatprep.mubr.msk.bf16.mxu1 %vm297_vm4, %v1961_v35 }
  0xd0   : > { %2487 = vmatmul.mubr.msk.bf16.gmra.mxu1 %vm297_vm4, %v1963_v44 }
  0xe4   : > { %v2394_v36 = vpop.f32.mrf.mxu0 }
  0xe5   : > { %382 = vst.msk [vmem:[#allocation2 + $0x10] sm:$0xff] %vm379_vm5, %v2394_v36 }
  0xe6   : > { %v348_v37 = vpop.f32.mrf.mxu0 }
  0xe7   : > { %380 = vst.msk [vmem:[#allocation2] sm:$0xff] %vm379_vm5, %v348_v37 }
  0xe8   : > { %v2395_v38 = vpop.f32.mrf.mxu0 }
  0xe9   : > { %383 = vst.msk [vmem:[#allocation2 + $0x18] sm:$0xff] %vm379_vm5, %v2395_v38 }
  0xea   : > { %v351_v39 = vpop.f32.mrf.mxu0 }
  0xeb   : > { %381 = vst.msk [vmem:[#allocation2 + $0x8] sm:$0xff] %vm379_vm5, %v351_v39 }
  0xec   : > { %v2398_v40 = vpop.f32.mrf.mxu0  ;;  %v508_v48 = vld [vmem:[#allocation2 + $0x10] sm:$0xff] }
  0xed   : > { %386 = vst.msk [vmem:[#allocation2 + $0x30] sm:$0xff] %vm379_vm5, %v2398_v40 }
  0xee   : > { %v364_v41 = vpop.f32.mrf.mxu0  ;;  %v506_v53 = vld [vmem:[#allocation2] sm:$0xff] }
  0xef   : > { %384 = vst.msk [vmem:[#allocation2 + $0x20] sm:$0xff] %vm379_vm5, %v364_v41 }
  0xf0   : > { %v2399_v5 = vpop.f32.mrf.mxu0  ;;  %v509_v56 = vld [vmem:[#allocation2 + $0x18] sm:$0xff] }
  0xf1   : > { %387 = vst.msk [vmem:[#allocation2 + $0x38] sm:$0xff] %vm379_vm5, %v2399_v5 }
  0xf2   : > { %v367_v42 = vpop.f32.mrf.mxu0  ;;  %v507_v60 = vld [vmem:[#allocation2 + $0x8] sm:$0xff] }
  0xf3   : > { %385 = vst.msk [vmem:[#allocation2 + $0x28] sm:$0xff] %vm379_vm5, %v367_v42 }
  0xf4   : > { %v512_v61 = vld [vmem:[#allocation2 + $0x30] sm:$0xff] }
  0xf6   : > { %v510_v4 = vld [vmem:[#allocation2 + $0x20] sm:$0xff] }
  0xf8   : > { %v513_v10 = vld [vmem:[#allocation2 + $0x38] sm:$0xff] }
  0xfa   : > { %v2414_v43 = vpop.f32.mrf.mxu0  ;;  %v511_v16 = vld [vmem:[#allocation2 + $0x28] sm:$0xff] }
  0xfc   : > { %v724_v45 = vpop.f32.mrf.mxu0 }
  0xfe   : > { %v2415_v46 = vpop.f32.mrf.mxu0 }
 0x100   : > { %v727_v47 = vpop.f32.mrf.mxu0 }
 0x106   : > { %v2418_v50 = vpop.f32.mrf.mxu0 }
 0x108   : > { %v740_v57 = vpop.f32.mrf.mxu0 }
 0x10a   : > { %v2419_v2 = vpop.f32.mrf.mxu0 }
 0x10c   : > { %v743_v11 = vpop.f32.mrf.mxu0 }
 0x148   : > { %v2404_v49 = vpop.f32.mrf.mxu1 }
 0x149   : > { %v516_v51 = vadd.f32 %v2404_v49, %v508_v48 }
 0x14a   : > { %v475_v52 = vpop.f32.mrf.mxu1 }
 0x14b   : > { %524 = vst.msk [vmem:[#allocation2 + $0x10] sm:$0xff] %vm379_vm5, %v516_v51  ;;  %v514_v54 = vadd.f32 %v506_v53, %v475_v52 }
 0x14c   : > { %v2405_v55 = vpop.f32.mrf.mxu1 }
 0x14d   : > { %522 = vst.msk [vmem:[#allocation2] sm:$0xff] %vm379_vm5, %v514_v54  ;;  %v517_v58 = vadd.f32 %v2405_v55, %v509_v56 }
 0x14e   : > { %v478_v59 = vpop.f32.mrf.mxu1 }
 0x14f   : > { %525 = vst.msk [vmem:[#allocation2 + $0x18] sm:$0xff] %vm379_vm5, %v517_v58  ;;  %v515_v62 = vadd.f32 %v507_v60, %v478_v59 }
 0x150   : > { %v2408_v63 = vpop.f32.mrf.mxu1 }
 0x151   : > { %523 = vst.msk [vmem:[#allocation2 + $0x8] sm:$0xff] %vm379_vm5, %v515_v62  ;;  %v520_v0 = vadd.f32 %v2408_v63, %v512_v61 }
 0x152   : > { %v757_v1 = vld [vmem:[#allocation2 + $0x10] sm:$0xff]  ;;  %v491_v3 = vpop.f32.mrf.mxu1 }
 0x153   : > { %v765_v6 = vadd.f32 %v2414_v43, %v757_v1  ;;  %528 = vst.msk [vmem:[#allocation2 + $0x30] sm:$0xff] %vm379_vm5, %v520_v0  ;;  %v518_v7 = vadd.f32 %v510_v4, %v491_v3 }
 0x154   : > { %v755_v8 = vld [vmem:[#allocation2] sm:$0xff]  ;;  %v2409_v9 = vpop.f32.mrf.mxu1 }
 0x155   : > { %773 = vst.msk [vmem:[#allocation2 + $0x10] sm:$0xff] %vm379_vm5, %v765_v6  ;;  %v763_v12 = vadd.f32 %v755_v8, %v724_v45  ;;  %526 = vst.msk [vmem:[#allocation2 + $0x20] sm:$0xff] %vm379_vm5, %v518_v7  ;;  %v521_v13 = vadd.f32 %v2409_v9, %v513_v10  ;;  %v2434_v17 = vpop.f32.mrf.mxu0 }
 0x156   : > { %v758_v14 = vld [vmem:[#allocation2 + $0x18] sm:$0xff]  ;;  %v494_v15 = vpop.f32.mrf.mxu1 }
 0x157   : > { %771 = vst.msk [vmem:[#allocation2] sm:$0xff] %vm379_vm5, %v763_v12  ;;  %v766_v18 = vadd.f32 %v2415_v46, %v758_v14  ;;  %529 = vst.msk [vmem:[#allocation2 + $0x38] sm:$0xff] %vm379_vm5, %v521_v13  ;;  %v519_v19 = vadd.f32 %v511_v16, %v494_v15  ;;  %v1008_v22 = vpop.f32.mrf.mxu0 }
 0x158   : > { %v756_v20 = vld [vmem:[#allocation2 + $0x8] sm:$0xff]  ;;  %v2424_v21 = vpop.f32.mrf.mxu1 }
 0x159   : > { %774 = vst.msk [vmem:[#allocation2 + $0x18] sm:$0xff] %vm379_vm5, %v766_v18  ;;  %v764_v23 = vadd.f32 %v756_v20, %v727_v47  ;;  %527 = vst.msk [vmem:[#allocation2 + $0x28] sm:$0xff] %vm379_vm5, %v519_v19  ;;  %v2435_v26 = vpop.f32.mrf.mxu0 }
 0x15a   : > { %v761_v24 = vld [vmem:[#allocation2 + $0x30] sm:$0xff]  ;;  %v866_v25 = vpop.f32.mrf.mxu1 }
 0x15b   : > { %772 = vst.msk [vmem:[#allocation2 + $0x8] sm:$0xff] %vm379_vm5, %v764_v23  ;;  %v769_v27 = vadd.f32 %v2418_v50, %v761_v24  ;;  %v1011_v31 = vpop.f32.mrf.mxu0 }
 0x15c   : > { %v759_v28 = vld [vmem:[#allocation2 + $0x20] sm:$0xff]  ;;  %v899_v29 = vld [vmem:[#allocation2 + $0x10] sm:$0xff]  ;;  %v2425_v30 = vpop.f32.mrf.mxu1 }
 0x15d   : > { %777 = vst.msk [vmem:[#allocation2 + $0x30] sm:$0xff] %vm379_vm5, %v769_v27  ;;  %v767_v32 = vadd.f32 %v759_v28, %v740_v57  ;;  %v907_v33 = vadd.f32 %v2424_v21, %v899_v29  ;;  %v2438_v36 = vpop.f32.mrf.mxu0 }
 0x15e   : > { %v762_v34 = vld [vmem:[#allocation2 + $0x38] sm:$0xff]  ;;  %v897_v35 = vld [vmem:[#allocation2] sm:$0xff]  ;;  %v869_v44 = vpop.f32.mrf.mxu1 }
 0x15f   : > { %775 = vst.msk [vmem:[#allocation2 + $0x20] sm:$0xff] %vm379_vm5, %v767_v32  ;;  %v770_v37 = vadd.f32 %v2419_v2, %v762_v34  ;;  %915 = vst.msk [vmem:[#allocation2 + $0x10] sm:$0xff] %vm379_vm5, %v907_v33  ;;  %v905_v38 = vadd.f32 %v897_v35, %v866_v25  ;;  %v1024_v5 = vpop.f32.mrf.mxu0 }
 0x160   : > { %v760_v39 = vld [vmem:[#allocation2 + $0x28] sm:$0xff]  ;;  %v900_v40 = vld [vmem:[#allocation2 + $0x18] sm:$0xff]  ;;  %v2428_v41 = vpop.f32.mrf.mxu1 }
 0x161   : > { %778 = vst.msk [vmem:[#allocation2 + $0x38] sm:$0xff] %vm379_vm5, %v770_v37  ;;  %v768_v42 = vadd.f32 %v760_v39, %v743_v11  ;;  %913 = vst.msk [vmem:[#allocation2] sm:$0xff] %vm379_vm5, %v905_v38  ;;  %v908_v43 = vadd.f32 %v2425_v30, %v900_v40  ;;  %v2439_v47 = vpop.f32.mrf.mxu0 }
 0x162   : > { %v898_v45 = vld [vmem:[#allocation2 + $0x8] sm:$0xff]  ;;  %v882_v46 = vpop.f32.mrf.mxu1 }
 0x163   : > { %776 = vst.msk [vmem:[#allocation2 + $0x28] sm:$0xff] %vm379_vm5, %v768_v42  ;;  %916 = vst.msk [vmem:[#allocation2 + $0x18] sm:$0xff] %vm379_vm5, %v908_v43  ;;  %v906_v48 = vadd.f32 %v898_v45, %v869_v44  ;;  %v1027_v51 = vpop.f32.mrf.mxu0 }
 0x164   : > { %v903_v49 = vld [vmem:[#allocation2 + $0x30] sm:$0xff]  ;;  %v2429_v50 = vpop.f32.mrf.mxu1 }
 0x165   : > { %914 = vst.msk [vmem:[#allocation2 + $0x8] sm:$0xff] %vm379_vm5, %v906_v48  ;;  %v911_v52 = vadd.f32 %v2428_v41, %v903_v49  ;;  %v2883_v56 = vpop.f32.mrf.mxu0 }
 0x166   : > { %v1041_v53 = vld [vmem:[#allocation2 + $0x10] sm:$0xff]  ;;  %v901_v54 = vld [vmem:[#allocation2 + $0x20] sm:$0xff]  ;;  %v885_v55 = vpop.f32.mrf.mxu1 }
 0x167   : > { %v1049_v57 = vadd.f32 %v2434_v17, %v1041_v53  ;;  %919 = vst.msk [vmem:[#allocation2 + $0x30] sm:$0xff] %vm379_vm5, %v911_v52  ;;  %v909_v58 = vadd.f32 %v901_v54, %v882_v46  ;;  %v2886_v62 = vpop.f32.mrf.mxu0 }
 0x168   : > { %v1039_v59 = vld [vmem:[#allocation2] sm:$0xff]  ;;  %v904_v60 = vld [vmem:[#allocation2 + $0x38] sm:$0xff]  ;;  %v2444_v61 = vpop.f32.mrf.mxu1 }
 0x169   : > { %1057 = vst.msk [vmem:[#allocation2 + $0x10] sm:$0xff] %vm379_vm5, %v1049_v57  ;;  %v1047_v63 = vadd.f32 %v1039_v59, %v1008_v22  ;;  %917 = vst.msk [vmem:[#allocation2 + $0x20] sm:$0xff] %vm379_vm5, %v909_v58  ;;  %v912_v2 = vadd.f32 %v2429_v50, %v904_v60  ;;  %v2890_v4 = vpop.f32.mrf.mxu0 }
 0x16a   : > { %v1042_v0 = vld [vmem:[#allocation2 + $0x18] sm:$0xff]  ;;  %v902_v1 = vld [vmem:[#allocation2 + $0x28] sm:$0xff]  ;;  %v1262_v3 = vpop.f32.mrf.mxu1 }
 0x16b   : > { %1055 = vst.msk [vmem:[#allocation2] sm:$0xff] %vm379_vm5, %v1047_v63  ;;  %v1050_v6 = vadd.f32 %v2435_v26, %v1042_v0  ;;  %920 = vst.msk [vmem:[#allocation2 + $0x38] sm:$0xff] %vm379_vm5, %v912_v2  ;;  %v910_v7 = vadd.f32 %v902_v1, %v885_v55  ;;  %v2896_v13 = vpop.f32.mrf.mxu0 }
 0x16c   : > { %v1040_v8 = vld [vmem:[#allocation2 + $0x8] sm:$0xff]  ;;  %v2445_v9 = vpop.f32.mrf.mxu1 }
 0x16d   : > { %1058 = vst.msk [vmem:[#allocation2 + $0x18] sm:$0xff] %vm379_vm5, %v1050_v6  ;;  %v1048_v10 = vadd.f32 %v1040_v8, %v1011_v31  ;;  %918 = vst.msk [vmem:[#allocation2 + $0x28] sm:$0xff] %vm379_vm5, %v910_v7  ;;  %v2458_v23 = vpop.f32.mrf.mxu0 }
 0x16e   : > { %v1045_v11 = vld [vmem:[#allocation2 + $0x30] sm:$0xff]  ;;  %v1265_v12 = vpop.f32.mrf.mxu1 }
 0x16f   : > { %1056 = vst.msk [vmem:[#allocation2 + $0x8] sm:$0xff] %vm379_vm5, %v1048_v10  ;;  %v1053_v14 = vadd.f32 %v2438_v36, %v1045_v11  ;;  %v1413_v33 = vpop.f32.mrf.mxu0 }
 0x170   : > { %v1043_v15 = vld [vmem:[#allocation2 + $0x20] sm:$0xff]  ;;  %v1295_v16 = vld [vmem:[#allocation2 + $0x10] sm:$0xff]  ;;  %v2448_v17 = vpop.f32.mrf.mxu1 }
 0x171   : > { %1061 = vst.msk [vmem:[#allocation2 + $0x30] sm:$0xff] %vm379_vm5, %v1053_v14  ;;  %v1051_v18 = vadd.f32 %v1043_v15, %v1024_v5  ;;  %v1303_v19 = vadd.f32 %v2444_v61, %v1295_v16  ;;  %v2459_v39 = vpop.f32.mrf.mxu0 }
 0x172   : > { %v1046_v20 = vld [vmem:[#allocation2 + $0x38] sm:$0xff]  ;;  %v1293_v21 = vld [vmem:[#allocation2] sm:$0xff]  ;;  %v1278_v22 = vpop.f32.mrf.mxu1 }
 0x173   : > { %1059 = vst.msk [vmem:[#allocation2 + $0x20] sm:$0xff] %vm379_vm5, %v1051_v18  ;;  %v1054_v24 = vadd.f32 %v2439_v47, %v1046_v20  ;;  %1311 = vst.msk [vmem:[#allocation2 + $0x10] sm:$0xff] %vm379_vm5, %v1303_v19  ;;  %v1301_v25 = vadd.f32 %v1293_v21, %v1262_v3  ;;  %v1416_v50 = vpop.f32.mrf.mxu0 }
 0x174   : > { %v1044_v26 = vld [vmem:[#allocation2 + $0x28] sm:$0xff]  ;;  %v1296_v27 = vld [vmem:[#allocation2 + $0x18] sm:$0xff]  ;;  %v2449_v28 = vpop.f32.mrf.mxu1 }
 0x175   : > { %1062 = vst.msk [vmem:[#allocation2 + $0x38] sm:$0xff] %vm379_vm5, %v1054_v24  ;;  %v1052_v29 = vadd.f32 %v1044_v26, %v1027_v51  ;;  %1309 = vst.msk [vmem:[#allocation2] sm:$0xff] %vm379_vm5, %v1301_v25  ;;  %v1304_v30 = vadd.f32 %v2445_v9, %v1296_v27 }
 0x176   : > { %v1294_v31 = vld [vmem:[#allocation2 + $0x8] sm:$0xff]  ;;  %v1281_v32 = vpop.f32.mrf.mxu1 }
 0x177   : > { %1060 = vst.msk [vmem:[#allocation2 + $0x28] sm:$0xff] %vm379_vm5, %v1052_v29  ;;  %1312 = vst.msk [vmem:[#allocation2 + $0x18] sm:$0xff] %vm379_vm5, %v1304_v30  ;;  %v1302_v34 = vadd.f32 %v1294_v31, %v1265_v12 }
 0x178   : > { %v1299_v35 = vld [vmem:[#allocation2 + $0x30] sm:$0xff]  ;;  %v2464_v44 = vpop.f32.mrf.mxu1 }
 0x179   : > { %1310 = vst.msk [vmem:[#allocation2 + $0x8] sm:$0xff] %vm379_vm5, %v1302_v34  ;;  %v1307_v36 = vadd.f32 %v2448_v17, %v1299_v35 }
 0x17a   : > { %v1297_v37 = vld [vmem:[#allocation2 + $0x20] sm:$0xff]  ;;  %v1430_v38 = vld [vmem:[#allocation2 + $0x10] sm:$0xff]  ;;  %v1539_v40 = vpop.f32.mrf.mxu1 }
 0x17b   : > { %1315 = vst.msk [vmem:[#allocation2 + $0x30] sm:$0xff] %vm379_vm5, %v1307_v36  ;;  %v1305_v41 = vadd.f32 %v1297_v37, %v1278_v22  ;;  %v1438_v5 = vadd.f32 %v2883_v56, %v1430_v38  ;;  %v2474_v56 = vpop.f32.mrf.mxu0 }
 0x17c   : > { %v1300_v42 = vld [vmem:[#allocation2 + $0x38] sm:$0xff]  ;;  %v1428_v43 = vld [vmem:[#allocation2] sm:$0xff]  ;;  %v2465_v45 = vpop.f32.mrf.mxu1 }
 0x17d   : > { %1313 = vst.msk [vmem:[#allocation2 + $0x20] sm:$0xff] %vm379_vm5, %v1305_v41  ;;  %1446 = vst.msk [vmem:[#allocation2 + $0x10] sm:$0xff] %vm379_vm5, %v1438_v5  ;;  %v1308_v46 = vadd.f32 %v2449_v28, %v1300_v42  ;;  %v1436_v47 = vadd.f32 %v1428_v43, %v2886_v62  ;;  %v1785_v2 = vpop.f32.mrf.mxu0 }
 0x17e   : > { %v1298_v48 = vld [vmem:[#allocation2 + $0x28] sm:$0xff]  ;;  %v1431_v49 = vld [vmem:[#allocation2 + $0x18] sm:$0xff]  ;;  %v1542_v51 = vpop.f32.mrf.mxu1 }
 0x17f   : > { %1316 = vst.msk [vmem:[#allocation2 + $0x38] sm:$0xff] %vm379_vm5, %v1308_v46  ;;  %1444 = vst.msk [vmem:[#allocation2] sm:$0xff] %vm379_vm5, %v1436_v47  ;;  %v1306_v52 = vadd.f32 %v1298_v48, %v1281_v32  ;;  %v1439_v53 = vadd.f32 %v2890_v4, %v1431_v49  ;;  %v2475_v11 = vpop.f32.mrf.mxu0  ;;  %v2296_v48 = vld [vmem:[%s3007_s3] ss:$0 sm:$0xff] }
 0x180   : > { %v1429_v54 = vld [vmem:[#allocation2 + $0x8] sm:$0xff]  ;;  %v2468_v55 = vpop.f32.mrf.mxu1 }
 0x181   : > { %1314 = vst.msk [vmem:[#allocation2 + $0x28] sm:$0xff] %vm379_vm5, %v1306_v52  ;;  %1447 = vst.msk [vmem:[#allocation2 + $0x18] sm:$0xff] %vm379_vm5, %v1439_v53  ;;  %v1437_v57 = vadd.f32 %v1429_v54, %v2896_v13  ;;  %v1788_v21 = vpop.f32.mrf.mxu0  ;;  %v2297_v54 = vld [vmem:[%s3008_s4] ss:$0 sm:$0xff] }
 0x182   : > { %v1434_v58 = vld [vmem:[#allocation2 + $0x30] sm:$0xff]  ;;  %v1555_v59 = vpop.f32.mrf.mxu1 }
 0x183   : > { %1445 = vst.msk [vmem:[#allocation2 + $0x8] sm:$0xff] %vm379_vm5, %v1437_v57  ;;  %v1442_v60 = vadd.f32 %v2458_v23, %v1434_v58 }
 0x184   : > { %v1432_v61 = vld [vmem:[#allocation2 + $0x20] sm:$0xff]  ;;  %v1572_v62 = vld [vmem:[#allocation2 + $0x10] sm:$0xff]  ;;  %v2469_v63 = vpop.f32.mrf.mxu1 }
 0x185   : > { %1450 = vst.msk [vmem:[#allocation2 + $0x30] sm:$0xff] %vm379_vm5, %v1442_v60  ;;  %v1440_v0 = vadd.f32 %v1432_v61, %v1413_v33  ;;  %v1580_v1 = vadd.f32 %v2464_v44, %v1572_v62  ;;  %v2478_v33 = vpop.f32.mrf.mxu0 }
 0x186   : > { %v1435_v3 = vld [vmem:[#allocation2 + $0x38] sm:$0xff]  ;;  %v1570_v4 = vld [vmem:[#allocation2] sm:$0xff]  ;;  %v1558_v6 = vpop.f32.mrf.mxu1 }
 0x187   : > { %1448 = vst.msk [vmem:[#allocation2 + $0x20] sm:$0xff] %vm379_vm5, %v1440_v0  ;;  %1588 = vst.msk [vmem:[#allocation2 + $0x10] sm:$0xff] %vm379_vm5, %v1580_v1  ;;  %v1443_v7 = vadd.f32 %v2459_v39, %v1435_v3  ;;  %v1578_v8 = vadd.f32 %v1570_v4, %v1539_v40  ;;  %v1801_v43 = vpop.f32.mrf.mxu0 }
 0x188   : > { %v1433_v9 = vld [vmem:[#allocation2 + $0x28] sm:$0xff]  ;;  %v1573_v10 = vld [vmem:[#allocation2 + $0x18] sm:$0xff]  ;;  %v2484_v12 = vpop.f32.mrf.mxu1 }
 0x189   : > { %1451 = vst.msk [vmem:[#allocation2 + $0x38] sm:$0xff] %vm379_vm5, %v1443_v7  ;;  %1586 = vst.msk [vmem:[#allocation2] sm:$0xff] %vm379_vm5, %v1578_v8  ;;  %v1441_v13 = vadd.f32 %v1433_v9, %v1416_v50  ;;  %v1581_v14 = vadd.f32 %v2465_v45, %v1573_v10  ;;  %v2334_v15 = vpack.c.bf16 %v2484_v12, %v2484_v12 }
 0x18a   : > { %v1571_v16 = vld [vmem:[#allocation2 + $0x8] sm:$0xff]  ;;  %v2013_v17 = vpop.f32.mrf.mxu1 }
 0x18b   : > { %1449 = vst.msk [vmem:[#allocation2 + $0x28] sm:$0xff] %vm379_vm5, %v1441_v13  ;;  %1589 = vst.msk [vmem:[#allocation2 + $0x18] sm:$0xff] %vm379_vm5, %v1581_v14  ;;  %v1579_v18 = vadd.f32 %v1571_v16, %v1542_v51  ;;  %v2332_v19 = vpack.c.bf16 %v2013_v17, %v2013_v17 }
 0x18c   : > { %2078 = vst.msk [vmem:[%s2937_s9 + $0x8] sm:$0xf] %vm1918_vm6, %v2334_v15  ;;  %v1576_v20 = vld [vmem:[#allocation2 + $0x30] sm:$0xff]  ;;  %v2485_v22 = vpop.f32.mrf.mxu1 }
 0x18d   : > { %1587 = vst.msk [vmem:[#allocation2 + $0x8] sm:$0xff] %vm379_vm5, %v1579_v18  ;;  %v1584_v23 = vadd.f32 %v2468_v55, %v1576_v20  ;;  %v2335_v24 = vpack.c.bf16 %v2485_v22, %v2485_v22 }
 0x18e   : > { %2076 = vst.msk [vmem:[%s2937_s9] sm:$0xf] %vm1918_vm6, %v2332_v19  ;;  %v1574_v25 = vld [vmem:[#allocation2 + $0x20] sm:$0xff]  ;;  %v1818_v26 = vld [vmem:[#allocation2 + $0x10] sm:$0xff]  ;;  %v2016_v27 = vpop.f32.mrf.mxu1 }
 0x18f   : > { %1592 = vst.msk [vmem:[#allocation2 + $0x30] sm:$0xff] %vm379_vm5, %v1584_v23  ;;  %v1582_v28 = vadd.f32 %v1574_v25, %v1555_v59  ;;  %v1826_v29 = vadd.f32 %v2474_v56, %v1818_v26  ;;  %v2333_v30 = vpack.c.bf16 %v2016_v27, %v2016_v27  ;;  %v2479_v56 = vpop.f32.mrf.mxu0 }
 0x190   : > { %2079 = vst.msk [vmem:[%s2937_s9 + $0xc] sm:$0xf] %vm1918_vm6, %v2335_v24  ;;  %v1577_v31 = vld [vmem:[#allocation2 + $0x38] sm:$0xff]  ;;  %v1816_v32 = vld [vmem:[#allocation2] sm:$0xff]  ;;  %v2488_v34 = vpop.f32.mrf.mxu1 }
 0x191   : > { %1590 = vst.msk [vmem:[#allocation2 + $0x20] sm:$0xff] %vm379_vm5, %v1582_v28  ;;  %1834 = vst.msk [vmem:[#allocation2 + $0x10] sm:$0xff] %vm379_vm5, %v1826_v29  ;;  %v1585_v35 = vadd.f32 %v2469_v63, %v1577_v31  ;;  %v1824_v44 = vadd.f32 %v1816_v32, %v1785_v2  ;;  %v2338_v36 = vpack.c.bf16 %v2488_v34, %v2488_v34  ;;  %v1804_v0 = vpop.f32.mrf.mxu0 }
 0x192   : > { %2077 = vst.msk [vmem:[%s2937_s9 + $0x4] sm:$0xf] %vm1918_vm6, %v2333_v30  ;;  %v1575_v37 = vld [vmem:[#allocation2 + $0x28] sm:$0xff]  ;;  %v1819_v38 = vld [vmem:[#allocation2 + $0x18] sm:$0xff]  ;;  %v2029_v39 = vpop.f32.mrf.mxu1 }
 0x193   : > { %1593 = vst.msk [vmem:[#allocation2 + $0x38] sm:$0xff] %vm379_vm5, %v1585_v35  ;;  %1832 = vst.msk [vmem:[#allocation2] sm:$0xff] %vm379_vm5, %v1824_v44  ;;  %v1583_v40 = vadd.f32 %v1575_v37, %v1558_v6  ;;  %v1827_v41 = vadd.f32 %v2475_v11, %v1819_v38  ;;  %v2336_v5 = vpack.c.bf16 %v2029_v39, %v2029_v39 }
 0x194   : > { %2082 = vst.msk [vmem:[%s2937_s9 + $0x18] sm:$0xf] %vm1918_vm6, %v2338_v36  ;;  %v1817_v42 = vld [vmem:[#allocation2 + $0x8] sm:$0xff]  ;;  %v2489_v45 = vpop.f32.mrf.mxu1 }
 0x195   : > { %1591 = vst.msk [vmem:[#allocation2 + $0x28] sm:$0xff] %vm379_vm5, %v1583_v40  ;;  %1835 = vst.msk [vmem:[#allocation2 + $0x18] sm:$0xff] %vm379_vm5, %v1827_v41  ;;  %v1825_v46 = vadd.f32 %v1817_v42, %v1788_v21  ;;  %v2339_v47 = vpack.c.bf16 %v2489_v45, %v2489_v45 }
 0x196   : > { %2080 = vst.msk [vmem:[%s2937_s9 + $0x10] sm:$0xf] %vm1918_vm6, %v2336_v5  ;;  %v1822_v49 = vld [vmem:[#allocation2 + $0x30] sm:$0xff]  ;;  %v2032_v50 = vpop.f32.mrf.mxu1 }
 0x197   : > { %1833 = vst.msk [vmem:[#allocation2 + $0x8] sm:$0xff] %vm379_vm5, %v1825_v46  ;;  %v1830_v51 = vadd.f32 %v2478_v33, %v1822_v49  ;;  %v2337_v52 = vpack.c.bf16 %v2032_v50, %v2032_v50 }
 0x198   : > { %2083 = vst.msk [vmem:[%s2937_s9 + $0x1c] sm:$0xf] %vm1918_vm6, %v2339_v47  ;;  %v1842_v53 = vld [vmem:[#allocation2 + $0x10] sm:$0xff]  ;;  %v1820_v55 = vld [vmem:[#allocation2 + $0x20] sm:$0xff] }
 0x199   : > { %v1857_v57 = vmul.f32 %v2296_v48, %v1842_v53  ;;  %1838 = vst.msk [vmem:[#allocation2 + $0x30] sm:$0xff] %vm379_vm5, %v1830_v51  ;;  %v1828_v58 = vadd.f32 %v1820_v55, %v1801_v43 }
 0x19a   : > { %2081 = vst.msk [vmem:[%s2937_s9 + $0x14] sm:$0xf] %vm1918_vm6, %v2337_v52  ;;  %v1840_v59 = vld [vmem:[#allocation2] sm:$0xff]  ;;  %v1823_v60 = vld [vmem:[#allocation2 + $0x38] sm:$0xff] }
 0x19b   : > { %v1872_v61 = vadd.f32 %v2297_v54, %v1857_v57  ;;  %v1855_v62 = vmul.f32 %v2296_v48, %v1840_v59  ;;  %1836 = vst.msk [vmem:[#allocation2 + $0x20] sm:$0xff] %vm379_vm5, %v1828_v58  ;;  %v1831_v63 = vadd.f32 %v2479_v56, %v1823_v60 }
 0x19c   : > { %v1843_v2 = vld [vmem:[#allocation2 + $0x18] sm:$0xff]  ;;  %v1821_v1 = vld [vmem:[#allocation2 + $0x28] sm:$0xff] }
 0x19d   : > { %v1880_v3 = vmax.f32 %v1872_v61, 0.0  ;;  %v1870_v4 = vadd.f32 %v2297_v54, %v1855_v62  ;;  %v1858_v6 = vmul.f32 %v2296_v48, %v1843_v2  ;;  %1839 = vst.msk [vmem:[#allocation2 + $0x38] sm:$0xff] %vm379_vm5, %v1831_v63  ;;  %v1829_v7 = vadd.f32 %v1821_v1, %v1804_v0 }
 0x19e   : > { %v1841_v8 = vld [vmem:[#allocation2 + $0x8] sm:$0xff] }
 0x19f   : > { %v2326_v9 = vpack.c.bf16 %v1880_v3, %v1880_v3  ;;  %v1878_v10 = vmax.f32 %v1870_v4, 0.0  ;;  %v1873_v11 = vadd.f32 %v2297_v54, %v1858_v6  ;;  %v1856_v12 = vmul.f32 %v2296_v48, %v1841_v8  ;;  %1837 = vst.msk [vmem:[#allocation2 + $0x28] sm:$0xff] %vm379_vm5, %v1829_v7 }
 0x1a0   : > { %v1846_v13 = vld [vmem:[#allocation2 + $0x30] sm:$0xff] }
 0x1a1   : > { %v2324_v14 = vpack.c.bf16 %v1878_v10, %v1878_v10  ;;  %v1881_v15 = vmax.f32 %v1873_v11, 0.0  ;;  %v1871_v16 = vadd.f32 %v2297_v54, %v1856_v12  ;;  %v1861_v17 = vmul.f32 %v2296_v48, %v1846_v13  ;;  %1921 = vst.msk [vmem:[%s2982_s16 + $0x8] sm:$0xf] %vm1918_vm6, %v2326_v9 }
 0x1a2   : > { %v1844_v18 = vld [vmem:[#allocation2 + $0x20] sm:$0xff] }
 0x1a3   : > { %v2327_v19 = vpack.c.bf16 %v1881_v15, %v1881_v15  ;;  %v1879_v20 = vmax.f32 %v1871_v16, 0.0  ;;  %v1876_v21 = vadd.f32 %v2297_v54, %v1861_v17  ;;  %v1859_v22 = vmul.f32 %v2296_v48, %v1844_v18  ;;  %1919 = vst.msk [vmem:[%s2982_s16] sm:$0xf] %vm1918_vm6, %v2324_v14 }
 0x1a4   : > { %v1847_v23 = vld [vmem:[#allocation2 + $0x38] sm:$0xff] }
 0x1a5   : > { %v2325_v24 = vpack.c.bf16 %v1879_v20, %v1879_v20  ;;  %v1884_v25 = vmax.f32 %v1876_v21, 0.0  ;;  %v1874_v26 = vadd.f32 %v2297_v54, %v1859_v22  ;;  %v1862_v27 = vmul.f32 %v2296_v48, %v1847_v23  ;;  %1922 = vst.msk [vmem:[%s2982_s16 + $0xc] sm:$0xf] %vm1918_vm6, %v2327_v19 }
 0x1a6   : > { %v1845_v28 = vld [vmem:[#allocation2 + $0x28] sm:$0xff] }
 0x1a7   : > { %v2330_v29 = vpack.c.bf16 %v1884_v25, %v1884_v25  ;;  %v1882_v30 = vmax.f32 %v1874_v26, 0.0  ;;  %v1877_v31 = vadd.f32 %v2297_v54, %v1862_v27  ;;  %v1860_v32 = vmul.f32 %v2296_v48, %v1845_v28  ;;  %1920 = vst.msk [vmem:[%s2982_s16 + $0x4] sm:$0xf] %vm1918_vm6, %v2325_v24 }
 0x1a9   : > { %v2328_v33 = vpack.c.bf16 %v1882_v30, %v1882_v30  ;;  %v1885_v34 = vmax.f32 %v1877_v31, 0.0  ;;  %v1875_v35 = vadd.f32 %v2297_v54, %v1860_v32  ;;  %1925 = vst.msk [vmem:[%s2982_s16 + $0x18] sm:$0xf] %vm1918_vm6, %v2330_v29 }
 0x1ab   : > { %v2331_v44 = vpack.c.bf16 %v1885_v34, %v1885_v34  ;;  %v1883_v36 = vmax.f32 %v1875_v35, 0.0  ;;  %1923 = vst.msk [vmem:[%s2982_s16 + $0x10] sm:$0xf] %vm1918_vm6, %v2328_v33 }
 0x1ad   : > { %v2329_v37 = vpack.c.bf16 %v1883_v36, %v1883_v36  ;;  %1926 = vst.msk [vmem:[%s2982_s16 + $0x1c] sm:$0xf] %vm1918_vm6, %v2331_v44 }
 0x1af   : > { %1924 = vst.msk [vmem:[%s2982_s16 + $0x14] sm:$0xf] %vm1918_vm6, %v2329_v37 }
 0x1b0 PF: > { %s17_s21 = sadd.s32 1, %s2546_s21  }
 0x1b1   : > { %p14_p5 = scmp.ge.s32.totalorder %s17_s21, 4  }
 0x1b3   :  { %16 = sbr.rel (!%p14_p5) target bundleno = 1 (0x1), region = 91 }

// kernel: _lambda_.9
= control target key start
LH: loop header
LB: loop body
LE: loop exit
PB: predicated region body
PF: predicated region fallthrough
CT: control target
= control target key end

     0   :  { %s2442_s12 = smov 0   ;;  %s2898_s0 = inlined_call_operand.vmem [shape: bf16[2,10,10,8], index: 0, kind: input, shape index: {}]   ;;  %s2899_s1 = inlined_call_operand.vmem [shape: bf16[9,8,8], index: 1, kind: input, shape index: {}]   ;;  %s2900_s2 = inlined_call_operand.vmem [shape: bf16[128,8], index: 2, kind: input, shape index: {}]   ;;  %s2901_s3 = inlined_call_operand.vmem [shape: bf16[128,8], index: 3, kind: output, shape index: {}]  }
   0x1 LB: > { %s2448_s13 = sadd.s32 4294967295, %s2420_s12   ;;  %p2019_p0 = scmp.ge.s32.totalorder %s2420_s12, 1  ;;  %s2420_s12 = sphi %s2442_s12, %s13_s12  }
   0x2   : > { %p148_p1 = scmp.lt.s32.totalorder %s2420_s12, 3 }
   0x4   : > { %p149_p2 = pnand %p2019_p0, %p148_p1 }
   0x5   : > { %p177_p3 = scmp.lt.s32.totalorder (!%p149_p2), %s2448_s13, 1  ;;  %s2021_s10 = sshll.u32 (!%p149_p2), %s2448_s13, 3 }
   0x6   : > { %152 = sbr.rel (%p149_p2) target bundleno = 333 (0x14d), region = 32  ;;  %p183_p4 = scmp.lt.s32.totalorder (!%p149_p2), %s2021_s10, 15 }
   0xb   : > { %v203_v0 = vld [vmem:[%s2899_s1] sm:$0xf]  ;;  %vm237_vm0 = vcmask 1043456   ;;  %v2033_v2 = vld [vmem:[%s2899_s1 + $0x4] sm:$0xf]  ;;  %s178_s18 = scalar_select %p177_p3, %s2448_s13, 1 }
   0xc   : > { %2384 = vmatprep.subr.msk.bf16.mxu1 %vm237_vm0, %v203_v0  ;;  %2383 = vmatprep.subr.msk.bf16.mxu0 %vm237_vm0, %v203_v0  ;;  %v239_v1 = vsel %vm237_vm0, %v203_v0, 0  ;;  %v2050_v3 = vld [vmem:[%s2899_s1 + $0x8] sm:$0xf]  ;;  %v2067_v4 = vld [vmem:[%s2899_s1 + $0xc] sm:$0xf]  ;;  %vm224_vm1 = vcmask 64512  }
   0xd   : > { %2382 = vmatpush3.bf16.msra.mxu1 %v239_v1  ;;  %2292 = vmatpush3.bf16.msra.mxu0 %v239_v1  ;;  %v2092_v5 = vld [vmem:[%s2899_s1 + $0x10] sm:$0xf]  ;;  %s2393_s25 = smul.u32 80, %s178_s18  ;;  %v472_v6 = vsel %vm237_vm0, %v2033_v2, 0  ;;  %vm330_vm2 = vsmask.f32 3328 }
   0xe   : > { %2385 = vmatprep.subr.msk.bf16.mxu1 %vm237_vm0, %v2033_v2  ;;  %2386 = vmatprep.subr.msk.bf16.mxu0 %vm237_vm0, %v2050_v3  ;;  %vm331_vm3 = vsmask.f32 7440  ;;  %v657_v7 = vsel %vm237_vm0, %v2050_v3, 0  ;;  %v2482_v8 = vsel %vm237_vm0, %v2067_v4, 0  ;;  %v2485_v9 = vsel %vm237_vm0, %v2092_v5, 0  ;;  %s2907_s10 = smov (!%p183_p4, %s2021_s10), 15 }
   0xf   : > { %s2478_s28 = scalar_lea.vmem %s2898_s0, %s2393_s25  ;;  %vm595_vm4 = vcmask 1042432   ;;  %vm596_vm5 = vcmask 1046532   ;;  %vm2508_vm6 = vmor %vm330_vm2, %vm331_vm3  ;;  %s2022_s11 = sshll.u32 %s2907_s10, 2  ;;  %vm1938_vm8 = vcmask 60416  }
  0x10   : > { %v2402_v10 = vld [vmem:[%s2478_s28 + $0x20] ss:$8 sps:$4 sm:$0xff]   ;;  %v2404_v12 = vld [vmem:[%s2478_s28 + $0x30] ss:$8 sps:$4 sm:$0xff]   ;;  %v315_v15 = vld [vmem:[%s2478_s28 + $0x4] sm:$0x1]  ;;  %s2854_s15 = scalar_lea.vmem %s2900_s2, %s2022_s11  ;;  %s2871_s18 = scalar_lea.vmem %s2901_s3, %s2022_s11 }
  0x11   : > { %v2403_v11 = vld [vmem:[%s2478_s28] ss:$8 sps:$4 sm:$0xff]   ;;  %2297 = vmatprep.mubr.msk.bf16.mxu1 %vm224_vm1, %v2402_v10  ;;  %v2405_v13 = vld [vmem:[%s2478_s28 + $0x10] ss:$8 sps:$4 sm:$0xff]   ;;  %v317_v17 = vld [vmem:[%s2478_s28 + $0xc] sm:$0x1] }
  0x12   : > { %2293 = vmatprep.mubr.msk.bf16.mxu0 %vm224_vm1, %v2403_v11  ;;  %2298 = vmatmul.mubr.msk.bf16.vlgmr.msra.gmra.mxu1 %vm224_vm1, %v2404_v12  ;;  %v314_v14 = vld [vmem:[%s2478_s28] sm:$0xf]  ;;  %v316_v16 = vld [vmem:[%s2478_s28 + $0x8] sm:$0xf]  ;;  %v343_v20 = vshll.u32 %v315_v15, 16  ;;  %v357_v23 = vshll.u32 %v317_v17, 16  ;;  %vm2517_vm7 = vmor %vm595_vm4, %vm596_vm5 }
  0x13   : > { %2294 = vmatmul.mubr.msk.bf16.vlgmr.msra.gmra.mxu0 %vm224_vm1, %v2405_v13  ;;  %2302 = vmatpush3.bf16.msra.mxu1 %v472_v6  ;;  %v334_v18 = vshrl.u32 %v314_v14, 16  ;;  %v337_v19 = vshll.u32 %v314_v14, 16  ;;  %v348_v21 = vshrl.u32 %v316_v16, 16  ;;  %v351_v22 = vshll.u32 %v316_v16, 16  ;;  %v318_v24 = vld [vmem:[%s2478_s28 + $0x10] sm:$0xf] }
  0x14   : > { %v319_v25 = vld [vmem:[%s2478_s28 + $0x14] sm:$0x1]  ;;  %2312 = vmatpush3.bf16.msra.mxu0 %v657_v7  ;;  %2387 = vmatprep.subr.msk.bf16.mxu1 %vm237_vm0, %v2067_v4  ;;  %v345_v28 = vrot.slane %v343_v20, 5  ;;  %v320_v30 = vld [vmem:[%s2478_s28 + $0x18] sm:$0xf]  ;;  %v359_v32 = vrot.slane %v357_v23, 5 }
  0x15   : > { %v336_v26 = vrot.slane %v334_v18, 4  ;;  %v339_v27 = vrot.slane %v337_v19, 5  ;;  %v350_v29 = vrot.slane %v348_v21, 4  ;;  %2388 = vmatprep.subr.msk.bf16.mxu0 %vm237_vm0, %v2092_v5  ;;  %v353_v31 = vrot.slane %v351_v22, 5  ;;  %v321_v33 = vld [vmem:[%s2478_s28 + $0x1c] sm:$0x1] }
  0x16   : > { %v362_v34 = vshrl.u32 %v318_v24, 16  ;;  %v365_v35 = vshll.u32 %v318_v24, 16  ;;  %v371_v37 = vshll.u32 %v319_v25, 16  ;;  %v376_v38 = vshrl.u32 %v320_v30, 16  ;;  %v563_v40 = vld [vmem:[%s2478_s28] sm:$0xe] }
  0x17   : > { %v340_v36 = vor.u32 %v339_v27, %v336_v26  ;;  %v379_v39 = vshll.u32 %v320_v30, 16  ;;  %v354_v42 = vor.u32 %v353_v31, %v350_v29  ;;  %v385_v45 = vshll.u32 %v321_v33, 16  ;;  %v564_v46 = vld [vmem:[%s2478_s28 + $0x4] sm:$0x1]  ;;  %v565_v51 = vld [vmem:[%s2478_s28 + $0x8] sm:$0xe] }
  0x18   : > { %v364_v43 = vrot.slane %v362_v34, 4  ;;  %v367_v44 = vrot.slane %v365_v35, 5  ;;  %v373_v48 = vrot.slane %v371_v37, 5  ;;  %v378_v49 = vrot.slane %v376_v38, 4  ;;  %v566_v55 = vld [vmem:[%s2478_s28 + $0xc] sm:$0x1] }
  0x19   : > { %v341_v47 = vrot.slane %v340_v36, 4  ;;  %v381_v50 = vrot.slane %v379_v39, 5  ;;  %v355_v52 = vrot.slane %v354_v42, 4  ;;  %v387_v54 = vrot.slane %v385_v45, 5  ;;  %v567_v62 = vld [vmem:[%s2478_s28 + $0x10] sm:$0xe] }
  0x1a   : > { %v368_v53 = vor.u32 %v367_v44, %v364_v43  ;;  %v2042_v57 = vrot.slane %v563_v40, 9  ;;  %v600_v60 = vrot.slane %v564_v46, 5  ;;  %v2043_v61 = vrot.slane %v565_v51, 9  ;;  %v568_v63 = vld [vmem:[%s2478_s28 + $0x14] sm:$0x1] }
  0x1b   : > { %v346_v58 = vsel %vm2508_vm6, %v341_v47, %v345_v28  ;;  %v382_v59 = vor.u32 %v381_v50, %v378_v49  ;;  %v360_v0 = vsel %vm2508_vm6, %v355_v52, %v359_v32  ;;  %v604_v2 = vrot.slane %v566_v55, 5  ;;  %v569_v3 = vld [vmem:[%s2478_s28 + $0x18] sm:$0xe]  ;;  %v570_v4 = vld [vmem:[%s2478_s28 + $0x1c] sm:$0x1] }
  0x1c   : > { %v369_v1 = vrot.slane %v368_v53, 4  ;;  %v2034_v5 = vcombine.low %v346_v58, %v360_v0  ;;  %v601_v7 = vsel %vm2517_vm7, %v2042_v57, %v600_v60  ;;  %v2044_v10 = vrot.slane %v567_v62, 9  ;;  %v322_v11 = vld [vmem:[%s2478_s28 + $0x20] sm:$0xf]  ;;  %v323_v12 = vld [vmem:[%s2478_s28 + $0x24] sm:$0x1] }
  0x1d   : > { %v383_v6 = vrot.slane %v382_v59, 4  ;;  %v605_v14 = vsel %vm2517_vm7, %v2043_v61, %v604_v2  ;;  %v608_v15 = vrot.slane %v568_v63, 5  ;;  %v2045_v16 = vrot.slane %v569_v3, 9  ;;  %v324_v17 = vld [vmem:[%s2478_s28 + $0x28] sm:$0xf] }
  0x1e   : > { %v374_v13 = vsel %vm2508_vm6, %v369_v1, %v373_v48  ;;  %2303 = vmatprep.mubr.msk.bf16.mxu1 %vm224_vm1, %v2034_v5  ;;  %v2051_v19 = vcombine.low %v601_v7, %v605_v14  ;;  %v612_v20 = vrot.slane %v570_v4, 5  ;;  %v325_v21 = vld [vmem:[%s2478_s28 + $0x2c] sm:$0x1]  ;;  %v390_v22 = vshrl.u32 %v322_v11, 16  ;;  %v326_v23 = vld [vmem:[%s2478_s28 + $0x30] sm:$0xf] }
  0x1f   : > { %v388_v18 = vsel %vm2508_vm6, %v383_v6, %v387_v54  ;;  %v2546_v24 = vld [vmem:[%s2899_s1 + $0x14] sm:$0xf]  ;;  %v609_v26 = vsel %vm2517_vm7, %v2044_v10, %v608_v15  ;;  %v393_v27 = vshll.u32 %v322_v11, 16  ;;  %v399_v28 = vshll.u32 %v323_v12, 16  ;;  %v328_v30 = vld [vmem:[%s2478_s28 + $0x38] sm:$0xf] }
  0x20   : > { %v2035_v25 = vcombine.low %v374_v13, %v388_v18  ;;  %v327_v29 = vld [vmem:[%s2478_s28 + $0x34] sm:$0x1]  ;;  %2313 = vmatprep.mubr.msk.bf16.mxu0 %vm224_vm1, %v2051_v19  ;;  %v613_v31 = vsel %vm2517_vm7, %v2045_v16, %v612_v20  ;;  %v392_v32 = vrot.slane %v390_v22, 4  ;;  %v404_v33 = vshrl.u32 %v324_v17, 16  ;;  %v329_v35 = vld [vmem:[%s2478_s28 + $0x3c] sm:$0x1] }
  0x21   : > { %v407_v34 = vshll.u32 %v324_v17, 16  ;;  %v2559_v36 = vld [vmem:[%s2899_s1 + $0x18] sm:$0xf]  ;;  %v2052_v37 = vcombine.low %v609_v26, %v613_v31  ;;  %v395_v38 = vrot.slane %v393_v27, 5  ;;  %v401_v39 = vrot.slane %v399_v28, 5 }
  0x22   : > { %2304 = vmatmul.mubr.msk.bf16.vlgmr.msra.gmra.mxu1 %vm224_vm1, %v2035_v25  ;;  %v413_v40 = vshll.u32 %v325_v21, 16  ;;  %v571_v42 = vld [vmem:[%s2478_s28 + $0x20] sm:$0xe]  ;;  %v406_v43 = vrot.slane %v404_v33, 4  ;;  %v418_v45 = vshrl.u32 %v326_v23, 16  ;;  %v421_v46 = vshll.u32 %v326_v23, 16 }
  0x23   : > { %2322 = vmatpush3.bf16.msra.mxu1 %v2482_v8  ;;  %v409_v44 = vrot.slane %v407_v34, 5  ;;  %v572_v47 = vld [vmem:[%s2478_s28 + $0x24] sm:$0x1]  ;;  %v573_v48 = vld [vmem:[%s2478_s28 + $0x28] sm:$0xe]  ;;  %2314 = vmatmul.mubr.msk.bf16.vlgmr.msra.gmra.mxu0 %vm224_vm1, %v2052_v37  ;;  %v396_v49 = vor.u32 %v395_v38, %v392_v32  ;;  %v427_v51 = vshll.u32 %v327_v29, 16 }
  0x24   : > { %v415_v50 = vrot.slane %v413_v40, 5  ;;  %v432_v52 = vshrl.u32 %v328_v30, 16  ;;  %v574_v53 = vld [vmem:[%s2478_s28 + $0x2c] sm:$0x1]  ;;  %2389 = vmatprep.subr.msk.bf16.mxu1 %vm237_vm0, %v2546_v24  ;;  %v420_v8 = vrot.slane %v418_v45, 4  ;;  %v423_v55 = vrot.slane %v421_v46, 5  ;;  %2332 = vmatpush3.bf16.msra.mxu0 %v2485_v9 }
  0x25   : > { %v410_v54 = vor.u32 %v409_v44, %v406_v43  ;;  %v435_v57 = vshll.u32 %v328_v30, 16  ;;  %v575_v58 = vld [vmem:[%s2478_s28 + $0x30] sm:$0xe]  ;;  %v397_v59 = vrot.slane %v396_v49, 4  ;;  %v429_v60 = vrot.slane %v427_v51, 5  ;;  %2390 = vmatprep.subr.msk.bf16.mxu0 %vm237_vm0, %v2559_v36 }
  0x26   : > { %v434_v61 = vrot.slane %v432_v52, 4  ;;  %v441_v62 = vshll.u32 %v329_v35, 16  ;;  %v576_v63 = vld [vmem:[%s2478_s28 + $0x34] sm:$0x1]  ;;  %v424_v1 = vor.u32 %v423_v55, %v420_v8  ;;  %v2046_v3 = vrot.slane %v571_v42, 9 }
  0x27   : > { %v411_v0 = vrot.slane %v410_v54, 4  ;;  %v437_v2 = vrot.slane %v435_v57, 5  ;;  %v577_v4 = vld [vmem:[%s2478_s28 + $0x38] sm:$0xe]  ;;  %v402_v5 = vsel %vm2508_vm6, %v397_v59, %v401_v39  ;;  %v616_v7 = vrot.slane %v572_v47, 5 }
  0x28   : > { %v443_v6 = vrot.slane %v441_v62, 5  ;;  %v2047_v9 = vrot.slane %v573_v48, 9  ;;  %v578_v10 = vld [vmem:[%s2478_s28 + $0x3c] sm:$0x1]  ;;  %v425_v12 = vrot.slane %v424_v1, 4  ;;  %v620_v14 = vrot.slane %v574_v53, 5 }
  0x29   : > { %v416_v11 = vsel %vm2508_vm6, %v411_v0, %v415_v50  ;;  %v438_v13 = vor.u32 %v437_v2, %v434_v61  ;;  %v617_v16 = vsel %vm2517_vm7, %v2046_v3, %v616_v7  ;;  %v2048_v17 = vrot.slane %v575_v58, 9  ;;  %v2593_v27 = vld [vmem:[%s2899_s1 + $0x1c] sm:$0xf]  ;;  %v2406_v29 = vld [vmem:[%s2478_s28 + $0x8] ss:$8 sps:$4 sm:$0xff]  }
  0x2a   : > { %v2036_v15 = vcombine.low %v402_v5, %v416_v11  ;;  %v624_v18 = vrot.slane %v576_v63, 5  ;;  %v430_v19 = vsel %vm2508_vm6, %v425_v12, %v429_v60  ;;  %v621_v21 = vsel %vm2517_vm7, %v2047_v9, %v620_v14  ;;  %v2076_v30 = vld [vmem:[%s2478_s28 + $0x8] sm:$0xf]  ;;  %v2077_v31 = vld [vmem:[%s2478_s28 + $0xc] sm:$0x1] }
  0x2b   : > { %v439_v20 = vrot.slane %v438_v13, 4  ;;  %v2049_v22 = vrot.slane %v577_v4, 9  ;;  %v2053_v23 = vcombine.low %v617_v16, %v621_v21  ;;  %v628_v26 = vrot.slane %v578_v10, 5  ;;  %v2078_v34 = vld [vmem:[%s2478_s28 + $0x10] sm:$0xf] }
  0x2c   : > { %2307 = vmatprep.mubr.msk.bf16.mxu1 %vm224_vm1, %v2036_v15  ;;  %v625_v25 = vsel %vm2517_vm7, %v2048_v17, %v624_v18  ;;  %v2079_v35 = vld [vmem:[%s2478_s28 + $0x14] sm:$0x1]  ;;  %v900_v37 = vshrl.u32 %v2076_v30, 16  ;;  %v903_v38 = vshll.u32 %v2076_v30, 16  ;;  %v909_v40 = vshll.u32 %v2077_v31, 16 }
  0x2d   : > { %v444_v28 = vsel %vm2508_vm6, %v439_v20, %v443_v6  ;;  %2317 = vmatprep.mubr.msk.bf16.mxu0 %vm224_vm1, %v2053_v23  ;;  %v629_v33 = vsel %vm2517_vm7, %v2049_v22, %v628_v26  ;;  %v914_v42 = vshrl.u32 %v2078_v34, 16  ;;  %v917_v43 = vshll.u32 %v2078_v34, 16  ;;  %v2407_v52 = vld [vmem:[%s2478_s28 + $0x18] ss:$8 sps:$4 sm:$0xff]   ;;  %v2081_v55 = vld [vmem:[%s2478_s28 + $0x1c] sm:$0x1] }
  0x2e   : > { %v2037_v32 = vcombine.low %v430_v19, %v444_v28  ;;  %v2054_v39 = vcombine.low %v625_v25, %v629_v33  ;;  %v902_v44 = vrot.slane %v900_v37, 4  ;;  %v905_v45 = vrot.slane %v903_v38, 5  ;;  %v2080_v8 = vld [vmem:[%s2478_s28 + $0x18] sm:$0xf]  ;;  %v2408_v57 = vld [vmem:[%s2478_s28 + $0x28] ss:$8 sps:$4 sm:$0xff]  }
  0x2f   : > { %v923_v46 = vshll.u32 %v2079_v35, 16  ;;  %v1220_v47 = vsel %vm237_vm0, %v2546_v24, 0  ;;  %v916_v48 = vrot.slane %v914_v42, 4  ;;  %v919_v49 = vrot.slane %v917_v43, 5  ;;  %v2082_v59 = vld [vmem:[%s2478_s28 + $0x20] sm:$0xf] }
  0x30   : > { %2308 = vmatmul.mubr.msk.bf16.gmra.mxu1 %vm224_vm1, %v2037_v32  ;;  %2318 = vmatmul.mubr.msk.bf16.gmra.mxu0 %vm224_vm1, %v2054_v39  ;;  %v2612_v50 = vsel %vm237_vm0, %v2559_v36, 0  ;;  %v2616_v51 = vsel %vm237_vm0, %v2593_v27, 0  ;;  %v906_v53 = vor.u32 %v905_v45, %v902_v44  ;;  %v911_v54 = vrot.slane %v909_v40, 5  ;;  %v2083_v60 = vld [vmem:[%s2478_s28 + $0x24] sm:$0x1] }
  0x31   : > { %2323 = vmatprep.mubr.msk.bf16.mxu1 %vm224_vm1, %v2406_v29  ;;  %v925_v24 = vrot.slane %v923_v46, 5  ;;  %v920_v58 = vor.u32 %v919_v49, %v916_v48  ;;  %v928_v61 = vshrl.u32 %v2080_v8, 16  ;;  %v931_v36 = vshll.u32 %v2080_v8, 16  ;;  %v2084_v2 = vld [vmem:[%s2478_s28 + $0x28] sm:$0xf] }
  0x32   : > { %v907_v62 = vrot.slane %v906_v53, 4  ;;  %v937_v63 = vshll.u32 %v2081_v55, 16  ;;  %v942_v0 = vshrl.u32 %v2082_v59, 16  ;;  %v945_v1 = vshll.u32 %v2082_v59, 16  ;;  %v2085_v7 = vld [vmem:[%s2478_s28 + $0x2c] sm:$0x1] }
  0x33   : > { %v921_v3 = vrot.slane %v920_v58, 4  ;;  %v930_v4 = vrot.slane %v928_v61, 4  ;;  %v933_v5 = vrot.slane %v931_v36, 5  ;;  %v951_v6 = vshll.u32 %v2083_v60, 16  ;;  %v2086_v13 = vld [vmem:[%s2478_s28 + $0x30] sm:$0xf] }
  0x34   : > { %v912_v9 = vsel %vm2508_vm6, %v907_v62, %v911_v54  ;;  %v939_v10 = vrot.slane %v937_v63, 5  ;;  %v944_v11 = vrot.slane %v942_v0, 4  ;;  %v947_v12 = vrot.slane %v945_v1, 5  ;;  %v2087_v17 = vld [vmem:[%s2478_s28 + $0x34] sm:$0x1] }
  0x35   : > { %v926_v14 = vsel %vm2508_vm6, %v921_v3, %v925_v24  ;;  %v934_v15 = vor.u32 %v933_v5, %v930_v4  ;;  %v953_v16 = vrot.slane %v951_v6, 5  ;;  %v956_v18 = vshrl.u32 %v2084_v2, 16  ;;  %v2088_v23 = vld [vmem:[%s2478_s28 + $0x38] sm:$0xf]  ;;  %v2089_v30 = vld [vmem:[%s2478_s28 + $0x3c] sm:$0x1] }
  0x36   : > { %v2093_v19 = vcombine.low %v912_v9, %v926_v14  ;;  %v948_v20 = vor.u32 %v947_v12, %v944_v11  ;;  %v959_v21 = vshll.u32 %v2084_v2, 16  ;;  %v965_v22 = vshll.u32 %v2085_v7, 16  ;;  %v2409_v31 = vld [vmem:[%s2478_s28 + $0x38] ss:$8 sps:$4 sm:$0xff]   ;;  %v2091_v42 = vld [vmem:[%s2478_s28 + $0x44] sm:$0x1] }
  0x37   : > { %v935_v25 = vrot.slane %v934_v15, 4  ;;  %v958_v26 = vrot.slane %v956_v18, 4  ;;  %v970_v28 = vshrl.u32 %v2086_v13, 16  ;;  %v973_v29 = vshll.u32 %v2086_v13, 16  ;;  %v2090_v37 = vld [vmem:[%s2478_s28 + $0x40] sm:$0xf] }
  0x38   : > { %2324 = vmatmul.mubr.msk.bf16.vlgmr.msra.gmra.mxu1 %vm224_vm1, %v2407_v52  ;;  %2333 = vmatprep.mubr.msk.bf16.mxu0 %vm224_vm1, %v2093_v19  ;;  %v949_v32 = vrot.slane %v948_v20, 4  ;;  %v961_v33 = vrot.slane %v959_v21, 5  ;;  %v967_v34 = vrot.slane %v965_v22, 5  ;;  %v979_v35 = vshll.u32 %v2087_v17, 16  ;;  %v2101_v48 = vld [vmem:[%s2478_s28 + $0x8] sm:$0xe] }
  0x39   : > { %2327 = vmatprep.mubr.msk.bf16.mxu1 %vm224_vm1, %v2408_v57  ;;  %2342 = vmatpush3.bf16.msra.mxu1 %v1220_v47  ;;  %v940_v38 = vsel %vm2508_vm6, %v935_v25, %v939_v10  ;;  %v972_v39 = vrot.slane %v970_v28, 4  ;;  %v975_v40 = vrot.slane %v973_v29, 5  ;;  %v984_v43 = vshrl.u32 %v2088_v23, 16  ;;  %v2651_v49 = vld [vmem:[%s2899_s1 + $0x20] sm:$0xf] }
  0x3a   : > { %2391 = vmatprep.subr.msk.bf16.mxu1 %vm237_vm0, %v2593_v27  ;;  %v954_v44 = vsel %vm2508_vm6, %v949_v32, %v953_v16  ;;  %v962_v45 = vor.u32 %v961_v33, %v958_v26  ;;  %v981_v46 = vrot.slane %v979_v35, 5  ;;  %v987_v47 = vshll.u32 %v2088_v23, 16  ;;  %v2102_v27 = vld [vmem:[%s2478_s28 + $0xc] sm:$0x1]  ;;  %v2103_v8 = vld [vmem:[%s2478_s28 + $0x10] sm:$0xe] }
  0x3b   : > { %v2094_v52 = vcombine.low %v940_v38, %v954_v44  ;;  %v976_v53 = vor.u32 %v975_v40, %v972_v39  ;;  %v986_v54 = vrot.slane %v984_v43, 4  ;;  %v993_v24 = vshll.u32 %v2089_v30, 16  ;;  %v2104_v55 = vld [vmem:[%s2478_s28 + $0x14] sm:$0x1]  ;;  %v2105_v61 = vld [vmem:[%s2478_s28 + $0x18] sm:$0xe] }
  0x3c   : > { %v963_v57 = vrot.slane %v962_v45, 4  ;;  %v989_v58 = vrot.slane %v987_v47, 5  ;;  %v998_v59 = vshrl.u32 %v2090_v37, 16  ;;  %v1001_v60 = vshll.u32 %v2090_v37, 16  ;;  %v2106_v36 = vld [vmem:[%s2478_s28 + $0x1c] sm:$0x1] }
  0x3d   : > { %v2107_v62 = vld [vmem:[%s2478_s28 + $0x20] sm:$0xe]  ;;  %2334 = vmatmul.mubr.msk.bf16.vlgmr.msra.gmra.mxu0 %vm224_vm1, %v2094_v52  ;;  %v977_v63 = vrot.slane %v976_v53, 4  ;;  %v995_v0 = vrot.slane %v993_v24, 5  ;;  %v1007_v1 = vshll.u32 %v2091_v42, 16  ;;  %v2117_v2 = vrot.slane %v2101_v48, 9 }
  0x3e   : > { %v2108_v3 = vld [vmem:[%s2478_s28 + $0x24] sm:$0x1]  ;;  %v968_v4 = vsel %vm2508_vm6, %v963_v57, %v967_v34  ;;  %v990_v5 = vor.u32 %v989_v58, %v986_v54  ;;  %v1000_v6 = vrot.slane %v998_v59, 4  ;;  %v1003_v7 = vrot.slane %v1001_v60, 5  ;;  %2352 = vmatpush3.bf16.msra.mxu0 %v2612_v50  ;;  %v2109_v9 = vld [vmem:[%s2478_s28 + $0x28] sm:$0xe] }
  0x3f   : > { %v2110_v10 = vld [vmem:[%s2478_s28 + $0x2c] sm:$0x1]  ;;  %v982_v11 = vsel %vm2508_vm6, %v977_v63, %v981_v46  ;;  %v1009_v12 = vrot.slane %v1007_v1, 5  ;;  %v1163_v13 = vrot.slane %v2102_v27, 5  ;;  %v2118_v14 = vrot.slane %v2103_v8, 9  ;;  %2392 = vmatprep.subr.msk.bf16.mxu0 %vm237_vm0, %v2651_v49 }
  0x40   : > { %2328 = vmatmul.mubr.msk.bf16.gmra.mxu1 %vm224_vm1, %v2409_v31  ;;  %v2111_v15 = vld [vmem:[%s2478_s28 + $0x30] sm:$0xe]  ;;  %v2095_v16 = vcombine.low %v968_v4, %v982_v11  ;;  %v991_v17 = vrot.slane %v990_v5, 4  ;;  %v1004_v18 = vor.u32 %v1003_v7, %v1000_v6  ;;  %v1167_v19 = vrot.slane %v2104_v55, 5  ;;  %v2112_v50 = vld [vmem:[%s2478_s28 + $0x34] sm:$0x1] }
  0x41   : > { %v2113_v20 = vld [vmem:[%s2478_s28 + $0x38] sm:$0xe]  ;;  %v1164_v21 = vsel %vm2517_vm7, %v2117_v2, %v1163_v13  ;;  %v2119_v22 = vrot.slane %v2105_v61, 9  ;;  %v1171_v23 = vrot.slane %v2106_v36, 5  ;;  %v2120_v25 = vrot.slane %v2107_v62, 9 }
  0x42   : > { %v2114_v26 = vld [vmem:[%s2478_s28 + $0x3c] sm:$0x1]  ;;  %2337 = vmatprep.mubr.msk.bf16.mxu0 %vm224_vm1, %v2095_v16  ;;  %v996_v28 = vsel %vm2508_vm6, %v991_v17, %v995_v0  ;;  %v1005_v29 = vrot.slane %v1004_v18, 4  ;;  %v1168_v30 = vsel %vm2517_vm7, %v2118_v14, %v1167_v19  ;;  %v1175_v31 = vrot.slane %v2108_v3, 5  ;;  %v2115_v32 = vld [vmem:[%s2478_s28 + $0x40] sm:$0xe] }
  0x43   : > { %v2116_v33 = vld [vmem:[%s2478_s28 + $0x44] sm:$0x1]  ;;  %v2126_v34 = vcombine.low %v1164_v21, %v1168_v30  ;;  %v1172_v35 = vsel %vm2517_vm7, %v2119_v22, %v1171_v23  ;;  %v2121_v37 = vrot.slane %v2109_v9, 9  ;;  %v1179_v38 = vrot.slane %v2110_v10, 5  ;;  %v2410_v44 = vld [vmem:[%s2478_s28 + $0x10] ss:$8 sps:$4 sm:$0xff]  }
  0x44   : > { %v1010_v39 = vsel %vm2508_vm6, %v1005_v29, %v1009_v12  ;;  %v1176_v40 = vsel %vm2517_vm7, %v2120_v25, %v1175_v31  ;;  %v2122_v42 = vrot.slane %v2111_v15, 9  ;;  %v1183_v43 = vrot.slane %v2112_v50, 5  ;;  %v2151_v57 = vld [vmem:[%s2478_s28 + $0x10] sm:$0xf]  ;;  %v2411_v59 = vld [vmem:[%s2478_s28 + $0x20] ss:$8 sps:$4 sm:$0xff]  }
  0x45   : > { %v2096_v45 = vcombine.low %v996_v28, %v1010_v39  ;;  %2343 = vmatprep.mubr.msk.bf16.mxu1 %vm224_vm1, %v2126_v34  ;;  %v2127_v46 = vcombine.low %v1172_v35, %v1176_v40  ;;  %v1180_v47 = vsel %vm2517_vm7, %v2121_v37, %v1179_v38  ;;  %v2123_v48 = vrot.slane %v2113_v20, 9  ;;  %v2152_v60 = vld [vmem:[%s2478_s28 + $0x14] sm:$0x1]  ;;  %v2153_v61 = vld [vmem:[%s2478_s28 + $0x18] sm:$0xf] }
  0x46   : > { %v1184_v27 = vsel %vm2517_vm7, %v2122_v42, %v1183_v43  ;;  %v1187_v52 = vrot.slane %v2114_v26, 5  ;;  %v2124_v53 = vrot.slane %v2115_v32, 9  ;;  %v1191_v54 = vrot.slane %v2116_v33, 5  ;;  %v2154_v36 = vld [vmem:[%s2478_s28 + $0x1c] sm:$0x1] }
  0x47   : > { %2338 = vmatmul.mubr.msk.bf16.gmra.mxu0 %vm224_vm1, %v2096_v45  ;;  %v2128_v24 = vcombine.low %v1180_v47, %v1184_v27  ;;  %v1783_v58 = vsel %vm237_vm0, %v2651_v49, 0  ;;  %v2412_v62 = vld [vmem:[%s2478_s28 + $0x30] ss:$8 sps:$4 sm:$0xff]   ;;  %v1463_v63 = vshrl.u32 %v2151_v57, 16  ;;  %v1466_v0 = vshll.u32 %v2151_v57, 16 }
  0x48   : > { %2344 = vmatmul.mubr.msk.bf16.vlgmr.msra.gmra.mxu1 %vm224_vm1, %v2127_v46  ;;  %v1188_v8 = vsel %vm2517_vm7, %v2123_v48, %v1187_v52  ;;  %v1192_v55 = vsel %vm2517_vm7, %v2124_v53, %v1191_v54  ;;  %2353 = vmatprep.mubr.msk.bf16.mxu0 %vm224_vm1, %v2410_v44  ;;  %v1472_v1 = vshll.u32 %v2152_v60, 16  ;;  %v1477_v2 = vshrl.u32 %v2153_v61, 16  ;;  %v2155_v3 = vld [vmem:[%s2478_s28 + $0x20] sm:$0xf]  ;;  %v2156_v6 = vld [vmem:[%s2478_s28 + $0x24] sm:$0x1] }
  0x49   : > { %2362 = vmatpush3.bf16.msra.mxu1 %v2616_v51  ;;  %2347 = vmatprep.mubr.msk.bf16.mxu1 %vm224_vm1, %v2128_v24  ;;  %v2129_v51 = vcombine.low %v1188_v8, %v1192_v55  ;;  %v1480_v4 = vshll.u32 %v2153_v61, 16  ;;  %v1486_v5 = vshll.u32 %v2154_v36, 16  ;;  %v2157_v49 = vld [vmem:[%s2478_s28 + $0x28] sm:$0xf]  ;;  %v1465_v7 = vrot.slane %v1463_v63, 4 }
  0x4a   : > { %v1468_v9 = vrot.slane %v1466_v0, 5  ;;  %v1474_v10 = vrot.slane %v1472_v1, 5  ;;  %v1479_v11 = vrot.slane %v1477_v2, 4  ;;  %v2158_v12 = vld [vmem:[%s2478_s28 + $0x2c] sm:$0x1]  ;;  %v1491_v15 = vshrl.u32 %v2155_v3, 16 }
  0x4b   : > { %v1482_v13 = vrot.slane %v1480_v4, 5  ;;  %v1488_v14 = vrot.slane %v1486_v5, 5  ;;  %v1494_v16 = vshll.u32 %v2155_v3, 16  ;;  %v1500_v18 = vshll.u32 %v2156_v6, 16  ;;  %v2159_v20 = vld [vmem:[%s2478_s28 + $0x30] sm:$0xf] }
  0x4c   : > { %v1469_v17 = vor.u32 %v1468_v9, %v1465_v7  ;;  %v1505_v19 = vshrl.u32 %v2157_v49, 16  ;;  %v1508_v50 = vshll.u32 %v2157_v49, 16  ;;  %v1493_v22 = vrot.slane %v1491_v15, 4  ;;  %v2160_v26 = vld [vmem:[%s2478_s28 + $0x34] sm:$0x1] }
  0x4d   : > { %v1483_v21 = vor.u32 %v1482_v13, %v1479_v11  ;;  %v1496_v23 = vrot.slane %v1494_v16, 5  ;;  %v1514_v25 = vshll.u32 %v2158_v12, 16  ;;  %v1502_v29 = vrot.slane %v1500_v18, 5  ;;  %v2161_v32 = vld [vmem:[%s2478_s28 + $0x38] sm:$0xf] }
  0x4e   : > { %v1470_v28 = vrot.slane %v1469_v17, 4  ;;  %v1507_v30 = vrot.slane %v1505_v19, 4  ;;  %v1510_v31 = vrot.slane %v1508_v50, 5  ;;  %v2413_v33 = vld [vmem:[%s2478_s28 + $0x40] ss:$8 sps:$4 sm:$0xff]   ;;  %v1519_v38 = vshrl.u32 %v2159_v20, 16 }
  0x4f   : > { %2354 = vmatmul.mubr.msk.bf16.vlgmr.msra.gmra.mxu0 %vm224_vm1, %v2411_v59  ;;  %v1484_v34 = vrot.slane %v1483_v21, 4  ;;  %v1497_v35 = vor.u32 %v1496_v23, %v1493_v22  ;;  %v1516_v37 = vrot.slane %v1514_v25, 5  ;;  %v2162_v42 = vld [vmem:[%s2478_s28 + $0x3c] sm:$0x1]  ;;  %v1522_v43 = vshll.u32 %v2159_v20, 16 }
  0x50   : > { %2348 = vmatmul.mubr.msk.bf16.gmra.mxu1 %vm224_vm1, %v2129_v51  ;;  %2357 = vmatprep.mubr.msk.bf16.mxu0 %vm224_vm1, %v2412_v62  ;;  %v1475_v39 = vsel %vm2508_vm6, %v1470_v28, %v1474_v10  ;;  %v1511_v40 = vor.u32 %v1510_v31, %v1507_v30  ;;  %v1528_v44 = vshll.u32 %v2160_v26, 16  ;;  %v2163_v45 = vld [vmem:[%s2478_s28 + $0x40] sm:$0xf]  ;;  %v1521_v48 = vrot.slane %v1519_v38, 4  ;;  %v2164_v52 = vld [vmem:[%s2478_s28 + $0x44] sm:$0x1] }
  0x51   : > { %2372 = vmatpush3.bf16.msra.mxu0 %v1783_v58  ;;  %v1489_v46 = vsel %vm2508_vm6, %v1484_v34, %v1488_v14  ;;  %v1498_v47 = vrot.slane %v1497_v35, 4  ;;  %v1533_v27 = vshrl.u32 %v2161_v32, 16  ;;  %v1524_v24 = vrot.slane %v1522_v43, 5  ;;  %v2165_v55 = vld [vmem:[%s2478_s28 + $0x48] sm:$0xf] }
  0x52   : > { %v2168_v53 = vcombine.low %v1475_v39, %v1489_v46  ;;  %v1512_v54 = vrot.slane %v1511_v40, 4  ;;  %v1530_v8 = vrot.slane %v1528_v44, 5  ;;  %v1536_v59 = vshll.u32 %v2161_v32, 16  ;;  %v2166_v61 = vld [vmem:[%s2478_s28 + $0x4c] sm:$0x1] }
  0x53   : > { %v1503_v57 = vsel %vm2508_vm6, %v1498_v47, %v1502_v29  ;;  %v1535_v58 = vrot.slane %v1533_v27, 4  ;;  %v1542_v60 = vshll.u32 %v2162_v42, 16  ;;  %v1525_v62 = vor.u32 %v1524_v24, %v1521_v48  ;;  %v2176_v1 = vld [vmem:[%s2478_s28 + $0x10] sm:$0xe]  ;;  %v2177_v2 = vld [vmem:[%s2478_s28 + $0x14] sm:$0x1] }
  0x54   : > { %2363 = vmatprep.mubr.msk.bf16.mxu1 %vm224_vm1, %v2168_v53  ;;  %v1517_v36 = vsel %vm2508_vm6, %v1512_v54, %v1516_v37  ;;  %v1547_v63 = vshrl.u32 %v2163_v45, 16  ;;  %v1550_v0 = vshll.u32 %v2163_v45, 16  ;;  %v1538_v51 = vrot.slane %v1536_v59, 5  ;;  %v2178_v6 = vld [vmem:[%s2478_s28 + $0x18] sm:$0xe] }
  0x55   : > { %v2169_v3 = vcombine.low %v1503_v57, %v1517_v36  ;;  %v1544_v4 = vrot.slane %v1542_v60, 5  ;;  %v1556_v5 = vshll.u32 %v2164_v52, 16  ;;  %v2179_v49 = vld [vmem:[%s2478_s28 + $0x1c] sm:$0x1]  ;;  %v1526_v7 = vrot.slane %v1525_v62, 4 }
  0x56   : > { %v1549_v9 = vrot.slane %v1547_v63, 4  ;;  %v1552_v10 = vrot.slane %v1550_v0, 5  ;;  %v1561_v11 = vshrl.u32 %v2165_v55, 16  ;;  %v2180_v12 = vld [vmem:[%s2478_s28 + $0x20] sm:$0xe]  ;;  %v1539_v13 = vor.u32 %v1538_v51, %v1535_v58 }
  0x57   : > { %2358 = vmatmul.mubr.msk.bf16.gmra.mxu0 %vm224_vm1, %v2413_v33  ;;  %v1558_v14 = vrot.slane %v1556_v5, 5  ;;  %v1564_v15 = vshll.u32 %v2165_v55, 16  ;;  %v1570_v16 = vshll.u32 %v2166_v61, 16  ;;  %v2181_v17 = vld [vmem:[%s2478_s28 + $0x24] sm:$0x1]  ;;  %v1531_v18 = vsel %vm2508_vm6, %v1526_v7, %v1530_v8 }
  0x58   : > { %2364 = vmatmul.mubr.msk.bf16.vlgmr.msra.gmra.mxu1 %vm224_vm1, %v2169_v3  ;;  %v1553_v19 = vor.u32 %v1552_v10, %v1549_v9  ;;  %v1563_v50 = vrot.slane %v1561_v11, 4  ;;  %v2192_v20 = vrot.slane %v2176_v1, 9  ;;  %v2182_v21 = vld [vmem:[%s2478_s28 + $0x28] sm:$0xe]  ;;  %v2183_v22 = vld [vmem:[%s2478_s28 + $0x2c] sm:$0x1] }
  0x59   : > { %v1540_v23 = vrot.slane %v1539_v13, 4  ;;  %v1566_v25 = vrot.slane %v1564_v15, 5  ;;  %v1572_v26 = vrot.slane %v1570_v16, 5  ;;  %v1726_v28 = vrot.slane %v2177_v2, 5  ;;  %v2184_v29 = vld [vmem:[%s2478_s28 + $0x30] sm:$0xe] }
  0x5a   : > { %v1554_v30 = vrot.slane %v1553_v19, 4  ;;  %v2193_v31 = vrot.slane %v2178_v6, 9  ;;  %v1730_v32 = vrot.slane %v2179_v49, 5  ;;  %v2194_v33 = vrot.slane %v2180_v12, 9  ;;  %v2185_v34 = vld [vmem:[%s2478_s28 + $0x34] sm:$0x1] }
  0x5b   : > { %v1545_v35 = vsel %vm2508_vm6, %v1540_v23, %v1544_v4  ;;  %v1567_v37 = vor.u32 %v1566_v25, %v1563_v50  ;;  %v1727_v38 = vsel %vm2517_vm7, %v2192_v20, %v1726_v28  ;;  %v1734_v39 = vrot.slane %v2181_v17, 5  ;;  %v2186_v40 = vld [vmem:[%s2478_s28 + $0x38] sm:$0xe]  ;;  %v2187_v42 = vld [vmem:[%s2478_s28 + $0x3c] sm:$0x1] }
  0x5c   : > { %v2170_v43 = vcombine.low %v1531_v18, %v1545_v35  ;;  %v1559_v44 = vsel %vm2508_vm6, %v1554_v30, %v1558_v14  ;;  %v1731_v45 = vsel %vm2517_vm7, %v2193_v31, %v1730_v32  ;;  %v2195_v46 = vrot.slane %v2182_v21, 9  ;;  %v2188_v47 = vld [vmem:[%s2478_s28 + $0x40] sm:$0xe]  ;;  %v2189_v48 = vld [vmem:[%s2478_s28 + $0x44] sm:$0x1] }
  0x5d   : > { %v1568_v27 = vrot.slane %v1567_v37, 4  ;;  %v2201_v52 = vcombine.low %v1727_v38, %v1731_v45  ;;  %v1735_v53 = vsel %vm2517_vm7, %v2194_v33, %v1734_v39  ;;  %v1738_v54 = vrot.slane %v2183_v22, 5  ;;  %v2190_v24 = vld [vmem:[%s2478_s28 + $0x48] sm:$0xe]  ;;  %v2191_v59 = vld [vmem:[%s2478_s28 + $0x4c] sm:$0x1] }
  0x5e   : > { %2367 = vmatprep.mubr.msk.bf16.mxu1 %vm224_vm1, %v2170_v43  ;;  %v2196_v8 = vrot.slane %v2184_v29, 9  ;;  %v1742_v55 = vrot.slane %v2185_v34, 5  ;;  %v2197_v57 = vrot.slane %v2186_v40, 9  ;;  %v1746_v58 = vrot.slane %v2187_v42, 5 }
  0x5f   : > { %v1573_v60 = vsel %vm2508_vm6, %v1568_v27, %v1572_v26  ;;  %2373 = vmatprep.mubr.msk.bf16.mxu0 %vm224_vm1, %v2201_v52  ;;  %v1739_v61 = vsel %vm2517_vm7, %v2195_v46, %v1738_v54  ;;  %v2198_v36 = vrot.slane %v2188_v47, 9  ;;  %v1750_v62 = vrot.slane %v2189_v48, 5 }
  0x60   : > { %v2171_v63 = vcombine.low %v1559_v44, %v1573_v60  ;;  %v2202_v0 = vcombine.low %v1735_v53, %v1739_v61  ;;  %v1743_v1 = vsel %vm2517_vm7, %v2196_v8, %v1742_v55  ;;  %v1747_v2 = vsel %vm2517_vm7, %v2197_v57, %v1746_v58 }
  0x61   : > { %v2203_v3 = vcombine.low %v1743_v1, %v1747_v2  ;;  %v2199_v51 = vrot.slane %v2190_v24, 9  ;;  %v1754_v4 = vrot.slane %v2191_v59, 5  ;;  %v1751_v41 = vsel %vm2517_vm7, %v2198_v36, %v1750_v62 }
  0x62   : > { %2368 = vmatmul.mubr.msk.bf16.gmra.mxu1 %vm224_vm1, %v2171_v63  ;;  %2374 = vmatmul.mubr.msk.bf16.vlgmr.msra.gmra.mxu0 %vm224_vm1, %v2202_v0 }
  0x63   : > { %2377 = vmatprep.mubr.msk.bf16.mxu0 %vm224_vm1, %v2203_v3  ;;  %v1755_v5 = vsel %vm2517_vm7, %v2199_v51, %v1754_v4 }
  0x64   : > { %v2204_v6 = vcombine.low %v1751_v41, %v1755_v5 }
  0x6a   : > { %2378 = vmatmul.mubr.msk.bf16.gmra.mxu0 %vm224_vm1, %v2204_v6 }
  0xd2   : > { %v2299_v49 = vpop.f32.mrf.mxu1 }
  0xd3   : > { %312 = vst.msk [vmem:[#allocation2 + $0x30] sm:$0xff] %vm224_vm1, %v2299_v49  ;;  %v2295_v7 = vpop.f32.mrf.mxu0 }
  0xd4   : > { %308 = vst.msk [vmem:[#allocation2 + $0x10] sm:$0xff] %vm224_vm1, %v2295_v7  ;;  %v291_v9 = vpop.f32.mrf.mxu1 }
  0xd5   : > { %310 = vst.msk [vmem:[#allocation2 + $0x20] sm:$0xff] %vm224_vm1, %v291_v9  ;;  %v275_v10 = vpop.f32.mrf.mxu0 }
  0xd6   : > { %306 = vst.msk [vmem:[#allocation2] sm:$0xff] %vm224_vm1, %v275_v10  ;;  %v2300_v11 = vpop.f32.mrf.mxu1 }
  0xd7   : > { %313 = vst.msk [vmem:[#allocation2 + $0x38] sm:$0xff] %vm224_vm1, %v2300_v11  ;;  %v2296_v56 = vpop.f32.mrf.mxu0 }
  0xd8   : > { %309 = vst.msk [vmem:[#allocation2 + $0x18] sm:$0xff] %vm224_vm1, %v2296_v56  ;;  %v294_v12 = vpop.f32.mrf.mxu1 }
  0xd9   : > { %311 = vst.msk [vmem:[#allocation2 + $0x28] sm:$0xff] %vm224_vm1, %v294_v12  ;;  %v278_v13 = vpop.f32.mrf.mxu0 }
  0xda   : > { %307 = vst.msk [vmem:[#allocation2 + $0x8] sm:$0xff] %vm224_vm1, %v278_v13  ;;  %v545_v37 = vld [vmem:[#allocation2 + $0x30] sm:$0xff] }
  0xdb   : > { %v541_v14 = vld [vmem:[#allocation2 + $0x10] sm:$0xff] }
  0xdc   : > { %v543_v44 = vld [vmem:[#allocation2 + $0x20] sm:$0xff] }
  0xdd   : > { %v539_v16 = vld [vmem:[#allocation2] sm:$0xff] }
  0xde   : > { %v546_v27 = vld [vmem:[#allocation2 + $0x38] sm:$0xff] }
  0xdf   : > { %v542_v19 = vld [vmem:[#allocation2 + $0x18] sm:$0xff] }
  0xe0   : > { %v544_v24 = vld [vmem:[#allocation2 + $0x28] sm:$0xff] }
  0xe1   : > { %v540_v22 = vld [vmem:[#allocation2 + $0x8] sm:$0xff] }
  0xe2   : > { %v2305_v15 = vpop.f32.mrf.mxu1 }
  0xe3   : > { %v549_v17 = vadd.f32 %v2305_v15, %v541_v14  ;;  %v2315_v50 = vpop.f32.mrf.mxu0 }
  0xe4   : > { %v508_v18 = vpop.f32.mrf.mxu1 }
  0xe5   : > { %557 = vst.msk [vmem:[#allocation2 + $0x10] sm:$0xff] %vm224_vm1, %v549_v17  ;;  %v547_v20 = vadd.f32 %v539_v16, %v508_v18  ;;  %v693_v23 = vpop.f32.mrf.mxu0 }
  0xe6   : > { %v2306_v21 = vpop.f32.mrf.mxu1 }
  0xe7   : > { %555 = vst.msk [vmem:[#allocation2] sm:$0xff] %vm224_vm1, %v547_v20  ;;  %v550_v25 = vadd.f32 %v2306_v21, %v542_v19  ;;  %v2316_v29 = vpop.f32.mrf.mxu0 }
  0xe8   : > { %v511_v26 = vpop.f32.mrf.mxu1 }
  0xe9   : > { %558 = vst.msk [vmem:[#allocation2 + $0x18] sm:$0xff] %vm224_vm1, %v550_v25  ;;  %v548_v28 = vadd.f32 %v540_v22, %v511_v26  ;;  %v696_v32 = vpop.f32.mrf.mxu0 }
  0xeb   : > { %556 = vst.msk [vmem:[#allocation2 + $0x8] sm:$0xff] %vm224_vm1, %v548_v28 }
  0xec   : > { %v726_v30 = vld [vmem:[#allocation2 + $0x10] sm:$0xff] }
  0xed   : > { %v734_v31 = vadd.f32 %v2315_v50, %v726_v30 }
  0xee   : > { %v724_v33 = vld [vmem:[#allocation2] sm:$0xff] }
  0xef   : > { %742 = vst.msk [vmem:[#allocation2 + $0x10] sm:$0xff] %vm224_vm1, %v734_v31  ;;  %v732_v34 = vadd.f32 %v724_v33, %v693_v23 }
  0xf0   : > { %v2309_v35 = vpop.f32.mrf.mxu1  ;;  %v727_v38 = vld [vmem:[#allocation2 + $0x18] sm:$0xff]  ;;  %v2319_v42 = vpop.f32.mrf.mxu0 }
  0xf1   : > { %740 = vst.msk [vmem:[#allocation2] sm:$0xff] %vm224_vm1, %v732_v34  ;;  %v553_v39 = vadd.f32 %v2309_v35, %v545_v37  ;;  %v735_v40 = vadd.f32 %v2316_v29, %v727_v38 }
  0xf2   : > { %v524_v43 = vpop.f32.mrf.mxu1  ;;  %v725_v45 = vld [vmem:[#allocation2 + $0x8] sm:$0xff]  ;;  %v709_v53 = vpop.f32.mrf.mxu0 }
  0xf3   : > { %561 = vst.msk [vmem:[#allocation2 + $0x30] sm:$0xff] %vm224_vm1, %v553_v39  ;;  %743 = vst.msk [vmem:[#allocation2 + $0x18] sm:$0xff] %vm224_vm1, %v735_v40  ;;  %v551_v46 = vadd.f32 %v543_v44, %v524_v43  ;;  %v733_v47 = vadd.f32 %v725_v45, %v696_v32 }
  0xf4   : > { %v2310_v48 = vpop.f32.mrf.mxu1  ;;  %v2320_v59 = vpop.f32.mrf.mxu0 }
  0xf5   : > { %559 = vst.msk [vmem:[#allocation2 + $0x20] sm:$0xff] %vm224_vm1, %v551_v46  ;;  %741 = vst.msk [vmem:[#allocation2 + $0x8] sm:$0xff] %vm224_vm1, %v733_v47  ;;  %v554_v52 = vadd.f32 %v2310_v48, %v546_v27 }
  0xf6   : > { %v527_v54 = vpop.f32.mrf.mxu1  ;;  %v861_v8 = vld [vmem:[#allocation2 + $0x10] sm:$0xff]  ;;  %v712_v4 = vpop.f32.mrf.mxu0 }
  0xf7   : > { %562 = vst.msk [vmem:[#allocation2 + $0x38] sm:$0xff] %vm224_vm1, %v554_v52  ;;  %v552_v55 = vadd.f32 %v544_v24, %v527_v54 }
  0xf8   : > { %v2325_v57 = vpop.f32.mrf.mxu1  ;;  %v859_v58 = vld [vmem:[#allocation2] sm:$0xff] }
  0xf9   : > { %560 = vst.msk [vmem:[#allocation2 + $0x28] sm:$0xff] %vm224_vm1, %v552_v55  ;;  %v869_v60 = vadd.f32 %v2325_v57, %v861_v8 }
  0xfa   : > { %v730_v61 = vld [vmem:[#allocation2 + $0x30] sm:$0xff]  ;;  %v828_v36 = vpop.f32.mrf.mxu1  ;;  %v862_v62 = vld [vmem:[#allocation2 + $0x18] sm:$0xff] }
  0xfb   : > { %v738_v63 = vadd.f32 %v2319_v42, %v730_v61  ;;  %877 = vst.msk [vmem:[#allocation2 + $0x10] sm:$0xff] %vm224_vm1, %v869_v60  ;;  %v867_v0 = vadd.f32 %v859_v58, %v828_v36 }
  0xfc   : > { %v728_v1 = vld [vmem:[#allocation2 + $0x20] sm:$0xff]  ;;  %v2326_v2 = vpop.f32.mrf.mxu1  ;;  %v860_v3 = vld [vmem:[#allocation2 + $0x8] sm:$0xff] }
  0xfd   : > { %746 = vst.msk [vmem:[#allocation2 + $0x30] sm:$0xff] %vm224_vm1, %v738_v63  ;;  %v736_v51 = vadd.f32 %v728_v1, %v709_v53  ;;  %875 = vst.msk [vmem:[#allocation2] sm:$0xff] %vm224_vm1, %v867_v0  ;;  %v870_v41 = vadd.f32 %v2326_v2, %v862_v62  ;;  %v2335_v9 = vpop.f32.mrf.mxu0 }
  0xfe   : > { %v731_v5 = vld [vmem:[#allocation2 + $0x38] sm:$0xff]  ;;  %v831_v6 = vpop.f32.mrf.mxu1 }
  0xff   : > { %744 = vst.msk [vmem:[#allocation2 + $0x20] sm:$0xff] %vm224_vm1, %v736_v51  ;;  %v739_v49 = vadd.f32 %v2320_v59, %v731_v5  ;;  %878 = vst.msk [vmem:[#allocation2 + $0x18] sm:$0xff] %vm224_vm1, %v870_v41  ;;  %v868_v7 = vadd.f32 %v860_v3, %v831_v6  ;;  %v1074_v12 = vpop.f32.mrf.mxu0 }
 0x100   : > { %v729_v10 = vld [vmem:[#allocation2 + $0x28] sm:$0xff]  ;;  %v2329_v11 = vpop.f32.mrf.mxu1 }
 0x101   : > { %747 = vst.msk [vmem:[#allocation2 + $0x38] sm:$0xff] %vm224_vm1, %v739_v49  ;;  %v737_v56 = vadd.f32 %v729_v10, %v712_v4  ;;  %876 = vst.msk [vmem:[#allocation2 + $0x8] sm:$0xff] %vm224_vm1, %v868_v7  ;;  %v2336_v16 = vpop.f32.mrf.mxu0 }
 0x102   : > { %v1107_v13 = vld [vmem:[#allocation2 + $0x10] sm:$0xff]  ;;  %v844_v14 = vpop.f32.mrf.mxu1 }
 0x103   : > { %745 = vst.msk [vmem:[#allocation2 + $0x28] sm:$0xff] %vm224_vm1, %v737_v56  ;;  %v1115_v15 = vadd.f32 %v2335_v9, %v1107_v13  ;;  %v1077_v21 = vpop.f32.mrf.mxu0 }
 0x104   : > { %v865_v17 = vld [vmem:[#allocation2 + $0x30] sm:$0xff]  ;;  %v1105_v18 = vld [vmem:[#allocation2] sm:$0xff]  ;;  %v2330_v19 = vpop.f32.mrf.mxu1 }
 0x105   : > { %v873_v50 = vadd.f32 %v2329_v11, %v865_v17  ;;  %1123 = vst.msk [vmem:[#allocation2 + $0x10] sm:$0xff] %vm224_vm1, %v1115_v15  ;;  %v1113_v20 = vadd.f32 %v1105_v18, %v1074_v12 }
 0x106   : > { %v863_v22 = vld [vmem:[#allocation2 + $0x20] sm:$0xff]  ;;  %v1108_v23 = vld [vmem:[#allocation2 + $0x18] sm:$0xff]  ;;  %v847_v28 = vpop.f32.mrf.mxu1 }
 0x107   : > { %881 = vst.msk [vmem:[#allocation2 + $0x30] sm:$0xff] %vm224_vm1, %v873_v50  ;;  %v871_v25 = vadd.f32 %v863_v22, %v844_v14  ;;  %1121 = vst.msk [vmem:[#allocation2] sm:$0xff] %vm224_vm1, %v1113_v20  ;;  %v1116_v26 = vadd.f32 %v2336_v16, %v1108_v23  ;;  %v2339_v33 = vpop.f32.mrf.mxu0 }
 0x108   : > { %v866_v29 = vld [vmem:[#allocation2 + $0x38] sm:$0xff]  ;;  %v1106_v30 = vld [vmem:[#allocation2 + $0x8] sm:$0xff]  ;;  %v2345_v34 = vpop.f32.mrf.mxu1 }
 0x109   : > { %879 = vst.msk [vmem:[#allocation2 + $0x20] sm:$0xff] %vm224_vm1, %v871_v25  ;;  %v874_v31 = vadd.f32 %v2330_v19, %v866_v29  ;;  %1124 = vst.msk [vmem:[#allocation2 + $0x18] sm:$0xff] %vm224_vm1, %v1116_v26  ;;  %v1114_v32 = vadd.f32 %v1106_v30, %v1077_v21  ;;  %v1090_v38 = vpop.f32.mrf.mxu0 }
 0x10a   : > { %v864_v35 = vld [vmem:[#allocation2 + $0x28] sm:$0xff]  ;;  %v1256_v39 = vpop.f32.mrf.mxu1 }
 0x10b   : > { %882 = vst.msk [vmem:[#allocation2 + $0x38] sm:$0xff] %vm224_vm1, %v874_v31  ;;  %v872_v37 = vadd.f32 %v864_v35, %v847_v28  ;;  %1122 = vst.msk [vmem:[#allocation2 + $0x8] sm:$0xff] %vm224_vm1, %v1114_v32  ;;  %v2340_v43 = vpop.f32.mrf.mxu0 }
 0x10c   : > { %v1289_v40 = vld [vmem:[#allocation2 + $0x10] sm:$0xff]  ;;  %v2346_v44 = vpop.f32.mrf.mxu1 }
 0x10d   : > { %880 = vst.msk [vmem:[#allocation2 + $0x28] sm:$0xff] %vm224_vm1, %v872_v37  ;;  %v1297_v42 = vadd.f32 %v2345_v34, %v1289_v40  ;;  %v1093_v27 = vpop.f32.mrf.mxu0 }
 0x10e   : > { %v1111_v45 = vld [vmem:[#allocation2 + $0x30] sm:$0xff]  ;;  %v1287_v46 = vld [vmem:[#allocation2] sm:$0xff]  ;;  %v1259_v52 = vpop.f32.mrf.mxu1 }
 0x10f   : > { %v1119_v47 = vadd.f32 %v2339_v33, %v1111_v45  ;;  %1305 = vst.msk [vmem:[#allocation2 + $0x10] sm:$0xff] %vm224_vm1, %v1297_v42  ;;  %v1295_v48 = vadd.f32 %v1287_v46, %v1256_v39  ;;  %v2355_v57 = vpop.f32.mrf.mxu0 }
 0x110   : > { %v1109_v53 = vld [vmem:[#allocation2 + $0x20] sm:$0xff]  ;;  %v1290_v54 = vld [vmem:[#allocation2 + $0x18] sm:$0xff]  ;;  %v2349_v55 = vpop.f32.mrf.mxu1 }
 0x111   : > { %1127 = vst.msk [vmem:[#allocation2 + $0x30] sm:$0xff] %vm224_vm1, %v1119_v47  ;;  %v1117_v24 = vadd.f32 %v1109_v53, %v1090_v38  ;;  %1303 = vst.msk [vmem:[#allocation2] sm:$0xff] %vm224_vm1, %v1295_v48  ;;  %v1298_v8 = vadd.f32 %v2346_v44, %v1290_v54  ;;  %v1391_v62 = vpop.f32.mrf.mxu0 }
 0x112   : > { %v1112_v58 = vld [vmem:[#allocation2 + $0x38] sm:$0xff]  ;;  %v1288_v59 = vld [vmem:[#allocation2 + $0x8] sm:$0xff]  ;;  %v1272_v36 = vpop.f32.mrf.mxu1 }
 0x113   : > { %1125 = vst.msk [vmem:[#allocation2 + $0x20] sm:$0xff] %vm224_vm1, %v1117_v24  ;;  %v1120_v60 = vadd.f32 %v2340_v43, %v1112_v58  ;;  %1306 = vst.msk [vmem:[#allocation2 + $0x18] sm:$0xff] %vm224_vm1, %v1298_v8  ;;  %v1296_v61 = vadd.f32 %v1288_v59, %v1259_v52  ;;  %v2356_v2 = vpop.f32.mrf.mxu0  ;;  %v2243_v59 = vld [vmem:[%s2854_s15 + $0x8] sm:$0xff]  }
 0x114   : > { %v1110_v63 = vld [vmem:[#allocation2 + $0x28] sm:$0xff]  ;;  %v2350_v1 = vpop.f32.mrf.mxu1 }
 0x115   : > { %1128 = vst.msk [vmem:[#allocation2 + $0x38] sm:$0xff] %vm224_vm1, %v1120_v60  ;;  %v1118_v0 = vadd.f32 %v1110_v63, %v1093_v27  ;;  %1304 = vst.msk [vmem:[#allocation2 + $0x8] sm:$0xff] %vm224_vm1, %v1296_v61  ;;  %v1394_v4 = vpop.f32.mrf.mxu0 }
 0x116   : > { %v1424_v3 = vld [vmem:[#allocation2 + $0x10] sm:$0xff]  ;;  %v1275_v7 = vpop.f32.mrf.mxu1 }
 0x117   : > { %1126 = vst.msk [vmem:[#allocation2 + $0x28] sm:$0xff] %vm224_vm1, %v1118_v0  ;;  %v1432_v51 = vadd.f32 %v2355_v57, %v1424_v3  ;;  %v2359_v9 = vpop.f32.mrf.mxu0  ;;  %v2228_v0 = vld [vmem:[%s2854_s15] sm:$0xff]   ;;  %v2233_v3 = vunpack.c.l.bf16 %v2243_v59 }
 0x118   : > { %v1293_v41 = vld [vmem:[#allocation2 + $0x30] sm:$0xff]  ;;  %v1422_v5 = vld [vmem:[#allocation2] sm:$0xff]  ;;  %v2365_v13 = vpop.f32.mrf.mxu1 }
 0x119   : > { %v1301_v6 = vadd.f32 %v2349_v55, %v1293_v41  ;;  %1440 = vst.msk [vmem:[#allocation2 + $0x10] sm:$0xff] %vm224_vm1, %v1432_v51  ;;  %v1430_v49 = vadd.f32 %v1422_v5, %v1391_v62  ;;  %v1407_v16 = vpop.f32.mrf.mxu0 }
 0x11a   : > { %v1291_v10 = vld [vmem:[#allocation2 + $0x20] sm:$0xff]  ;;  %v1425_v11 = vld [vmem:[#allocation2 + $0x18] sm:$0xff]  ;;  %v1637_v19 = vpop.f32.mrf.mxu1 }
 0x11b   : > { %1309 = vst.msk [vmem:[#allocation2 + $0x30] sm:$0xff] %vm224_vm1, %v1301_v6  ;;  %v1299_v56 = vadd.f32 %v1291_v10, %v1272_v36  ;;  %1438 = vst.msk [vmem:[#allocation2] sm:$0xff] %vm224_vm1, %v1430_v49  ;;  %v1433_v12 = vadd.f32 %v2356_v2, %v1425_v11  ;;  %v2360_v23 = vpop.f32.mrf.mxu0  ;;  %v2229_v6 = vunpack.c.l.bf16 %v2228_v0  ;;  %v2234_v11 = vunpack.c.h.bf16 %v2243_v59 }
 0x11c   : > { %v1294_v14 = vld [vmem:[#allocation2 + $0x38] sm:$0xff]  ;;  %v1423_v15 = vld [vmem:[#allocation2 + $0x8] sm:$0xff]  ;;  %v2366_v21 = vpop.f32.mrf.mxu1 }
 0x11d   : > { %1307 = vst.msk [vmem:[#allocation2 + $0x20] sm:$0xff] %vm224_vm1, %v1299_v56  ;;  %v1302_v17 = vadd.f32 %v2350_v1, %v1294_v14  ;;  %1441 = vst.msk [vmem:[#allocation2 + $0x18] sm:$0xff] %vm224_vm1, %v1433_v12  ;;  %v1431_v18 = vadd.f32 %v1423_v15, %v1394_v4  ;;  %v1410_v33 = vpop.f32.mrf.mxu0  ;;  %v2230_v15 = vunpack.c.h.bf16 %v2228_v0 }
 0x11e   : > { %v1292_v50 = vld [vmem:[#allocation2 + $0x28] sm:$0xff]  ;;  %v1640_v29 = vpop.f32.mrf.mxu1 }
 0x11f   : > { %1310 = vst.msk [vmem:[#allocation2 + $0x38] sm:$0xff] %vm224_vm1, %v1302_v17  ;;  %v1300_v20 = vadd.f32 %v1292_v50, %v1275_v7  ;;  %1439 = vst.msk [vmem:[#allocation2 + $0x8] sm:$0xff] %vm224_vm1, %v1431_v18 }
 0x120   : > { %v1670_v22 = vld [vmem:[#allocation2 + $0x10] sm:$0xff] }
 0x121   : > { %1308 = vst.msk [vmem:[#allocation2 + $0x28] sm:$0xff] %vm224_vm1, %v1300_v20  ;;  %v1678_v25 = vadd.f32 %v2365_v13, %v1670_v22 }
 0x122   : > { %v1428_v26 = vld [vmem:[#allocation2 + $0x30] sm:$0xff]  ;;  %v1668_v28 = vld [vmem:[#allocation2] sm:$0xff]  ;;  %v2369_v40 = vpop.f32.mrf.mxu1  ;;  %v2375_v42 = vpop.f32.mrf.mxu0 }
 0x123   : > { %v1436_v30 = vadd.f32 %v2359_v9, %v1428_v26  ;;  %1686 = vst.msk [vmem:[#allocation2 + $0x10] sm:$0xff] %vm224_vm1, %v1678_v25  ;;  %v1676_v31 = vadd.f32 %v1668_v28, %v1637_v19 }
 0x124   : > { %v1426_v32 = vld [vmem:[#allocation2 + $0x20] sm:$0xff]  ;;  %v1671_v34 = vld [vmem:[#allocation2 + $0x18] sm:$0xff]  ;;  %v1819_v46 = vpop.f32.mrf.mxu0  ;;  %v1653_v48 = vpop.f32.mrf.mxu1 }
 0x125   : > { %1444 = vst.msk [vmem:[#allocation2 + $0x30] sm:$0xff] %vm224_vm1, %v1436_v30  ;;  %v1434_v35 = vadd.f32 %v1426_v32, %v1407_v16  ;;  %1684 = vst.msk [vmem:[#allocation2] sm:$0xff] %vm224_vm1, %v1676_v31  ;;  %v1679_v37 = vadd.f32 %v2366_v21, %v1671_v34  ;;  %v2244_v30 = vld [vmem:[%s2854_s15 + $0x10] sm:$0xff]  }
 0x126   : > { %v1429_v38 = vld [vmem:[#allocation2 + $0x38] sm:$0xff]  ;;  %v1669_v39 = vld [vmem:[#allocation2 + $0x8] sm:$0xff]  ;;  %v2376_v52 = vpop.f32.mrf.mxu0  ;;  %v2370_v60 = vpop.f32.mrf.mxu1 }
 0x127   : > { %1442 = vst.msk [vmem:[#allocation2 + $0x20] sm:$0xff] %vm224_vm1, %v1434_v35  ;;  %v1437_v43 = vadd.f32 %v2360_v23, %v1429_v38  ;;  %1687 = vst.msk [vmem:[#allocation2 + $0x18] sm:$0xff] %vm224_vm1, %v1679_v37  ;;  %v1677_v44 = vadd.f32 %v1669_v39, %v1640_v29  ;;  %v2245_v23 = vld [vmem:[%s2854_s15 + $0x18] sm:$0xff]   ;;  %v2237_v37 = vunpack.c.l.bf16 %v2244_v30 }
 0x128   : > { %v1427_v45 = vld [vmem:[#allocation2 + $0x28] sm:$0xff]  ;;  %v1822_v8 = vpop.f32.mrf.mxu0  ;;  %v1656_v41 = vpop.f32.mrf.mxu1  ;;  %v2241_v34 = vunpack.c.l.bf16 %v2245_v23 }
 0x129   : > { %1445 = vst.msk [vmem:[#allocation2 + $0x38] sm:$0xff] %vm224_vm1, %v1437_v43  ;;  %v1435_v47 = vadd.f32 %v1427_v45, %v1410_v33  ;;  %1685 = vst.msk [vmem:[#allocation2 + $0x8] sm:$0xff] %vm224_vm1, %v1677_v44  ;;  %v2238_v45 = vunpack.c.h.bf16 %v2244_v30 }
 0x12a   : > { %v1852_v27 = vld [vmem:[#allocation2 + $0x10] sm:$0xff]  ;;  %v2379_v2 = vpop.f32.mrf.mxu0 }
 0x12b   : > { %1443 = vst.msk [vmem:[#allocation2 + $0x28] sm:$0xff] %vm224_vm1, %v1435_v47  ;;  %v1860_v53 = vadd.f32 %v2375_v42, %v1852_v27 }
 0x12c   : > { %v1674_v54 = vld [vmem:[#allocation2 + $0x30] sm:$0xff]  ;;  %v1850_v24 = vld [vmem:[#allocation2] sm:$0xff]  ;;  %v1835_v9 = vpop.f32.mrf.mxu0 }
 0x12d   : > { %v1682_v55 = vadd.f32 %v2369_v40, %v1674_v54  ;;  %1868 = vst.msk [vmem:[#allocation2 + $0x10] sm:$0xff] %vm224_vm1, %v1860_v53  ;;  %v1858_v57 = vadd.f32 %v1850_v24, %v1819_v46  ;;  %v2242_v40 = vunpack.c.h.bf16 %v2245_v23 }
 0x12e   : > { %v1672_v58 = vld [vmem:[#allocation2 + $0x20] sm:$0xff]  ;;  %v1853_v61 = vld [vmem:[#allocation2 + $0x18] sm:$0xff]  ;;  %v2380_v19 = vpop.f32.mrf.mxu0 }
 0x12f   : > { %1690 = vst.msk [vmem:[#allocation2 + $0x30] sm:$0xff] %vm224_vm1, %v1682_v55  ;;  %v1680_v36 = vadd.f32 %v1672_v58, %v1653_v48  ;;  %1866 = vst.msk [vmem:[#allocation2] sm:$0xff] %vm224_vm1, %v1858_v57  ;;  %v1861_v62 = vadd.f32 %v2376_v52, %v1853_v61 }
 0x130   : > { %v1675_v63 = vld [vmem:[#allocation2 + $0x38] sm:$0xff]  ;;  %v1851_v1 = vld [vmem:[#allocation2 + $0x8] sm:$0xff]  ;;  %v1838_v31 = vpop.f32.mrf.mxu0 }
 0x131   : > { %1688 = vst.msk [vmem:[#allocation2 + $0x20] sm:$0xff] %vm224_vm1, %v1680_v36  ;;  %v1683_v51 = vadd.f32 %v2370_v60, %v1675_v63  ;;  %1869 = vst.msk [vmem:[#allocation2 + $0x18] sm:$0xff] %vm224_vm1, %v1861_v62  ;;  %v1859_v4 = vadd.f32 %v1851_v1, %v1822_v8 }
 0x132   : > { %v1673_v5 = vld [vmem:[#allocation2 + $0x28] sm:$0xff] }
 0x133   : > { %1691 = vst.msk [vmem:[#allocation2 + $0x38] sm:$0xff] %vm224_vm1, %v1683_v51  ;;  %v1681_v49 = vadd.f32 %v1673_v5, %v1656_v41  ;;  %1867 = vst.msk [vmem:[#allocation2 + $0x8] sm:$0xff] %vm224_vm1, %v1859_v4 }
 0x134   : > { %v1876_v7 = vld [vmem:[#allocation2 + $0x10] sm:$0xff] }
 0x135   : > { %v1900_v10 = vadd.f32 %v2233_v3, %v1876_v7  ;;  %1689 = vst.msk [vmem:[#allocation2 + $0x28] sm:$0xff] %vm224_vm1, %v1681_v49 }
 0x136   : > { %v1874_v56 = vld [vmem:[#allocation2] sm:$0xff]  ;;  %v1856_v12 = vld [vmem:[#allocation2 + $0x30] sm:$0xff] }
 0x137   : > { %v2221_v13 = vpack.c.bf16 %v1900_v10, %v1900_v10  ;;  %v1898_v14 = vadd.f32 %v2229_v6, %v1874_v56  ;;  %v1864_v16 = vadd.f32 %v2379_v2, %v1856_v12 }
 0x138   : > { %v1877_v17 = vld [vmem:[#allocation2 + $0x18] sm:$0xff]  ;;  %v1854_v18 = vld [vmem:[#allocation2 + $0x20] sm:$0xff] }
 0x139   : > { %1941 = vst.msk [vmem:[%s2871_s18 + $0x8] sm:$0xf] %vm1938_vm8, %v2221_v13  ;;  %v2219_v50 = vpack.c.bf16 %v1898_v14, %v1898_v14  ;;  %v1901_v20 = vadd.f32 %v2234_v11, %v1877_v17  ;;  %v1862_v21 = vadd.f32 %v1854_v18, %v1835_v9 }
 0x13a   : > { %1872 = vst.msk [vmem:[#allocation2 + $0x30] sm:$0xff] %vm224_vm1, %v1864_v16  ;;  %v1875_v22 = vld [vmem:[#allocation2 + $0x8] sm:$0xff]  ;;  %v1857_v25 = vld [vmem:[#allocation2 + $0x38] sm:$0xff] }
 0x13b   : > { %1939 = vst.msk [vmem:[%s2871_s18] sm:$0xf] %vm1938_vm8, %v2219_v50  ;;  %v2222_v26 = vpack.c.bf16 %v1901_v20, %v1901_v20  ;;  %v1899_v28 = vadd.f32 %v2230_v15, %v1875_v22  ;;  %v1865_v29 = vadd.f32 %v2380_v19, %v1857_v25 }
 0x13c   : > { %1870 = vst.msk [vmem:[#allocation2 + $0x20] sm:$0xff] %vm224_vm1, %v1862_v21  ;;  %v1855_v32 = vld [vmem:[#allocation2 + $0x28] sm:$0xff] }
 0x13d   : > { %1942 = vst.msk [vmem:[%s2871_s18 + $0xc] sm:$0xf] %vm1938_vm8, %v2222_v26  ;;  %v2220_v33 = vpack.c.bf16 %v1899_v28, %v1899_v28  ;;  %v1863_v35 = vadd.f32 %v1855_v32, %v1838_v31 }
 0x13e   : > { %1873 = vst.msk [vmem:[#allocation2 + $0x38] sm:$0xff] %vm224_vm1, %v1865_v29 }
 0x13f   : > { %1940 = vst.msk [vmem:[%s2871_s18 + $0x4] sm:$0xf] %vm1938_vm8, %v2220_v33 }
 0x140   : > { %1871 = vst.msk [vmem:[#allocation2 + $0x28] sm:$0xff] %vm224_vm1, %v1863_v35 }
 0x141   : > { %v1880_v38 = vld [vmem:[#allocation2 + $0x30] sm:$0xff] }
 0x142   : > { %v1904_v39 = vadd.f32 %v2241_v34, %v1880_v38 }
 0x143   : > { %v1878_v42 = vld [vmem:[#allocation2 + $0x20] sm:$0xff] }
 0x144   : > { %v2225_v43 = vpack.c.bf16 %v1904_v39, %v1904_v39  ;;  %v1902_v44 = vadd.f32 %v2237_v37, %v1878_v42 }
 0x145   : > { %v1881_v46 = vld [vmem:[#allocation2 + $0x38] sm:$0xff] }
 0x146   : > { %1945 = vst.msk [vmem:[%s2871_s18 + $0x18] sm:$0xf] %vm1938_vm8, %v2225_v43  ;;  %v2223_v47 = vpack.c.bf16 %v1902_v44, %v1902_v44  ;;  %v1905_v48 = vadd.f32 %v2242_v40, %v1881_v46 }
 0x147   : > { %v1879_v27 = vld [vmem:[#allocation2 + $0x28] sm:$0xff] }
 0x148   : > { %1943 = vst.msk [vmem:[%s2871_s18 + $0x10] sm:$0xf] %vm1938_vm8, %v2223_v47  ;;  %v2226_v52 = vpack.c.bf16 %v1905_v48, %v1905_v48  ;;  %v1903_v53 = vadd.f32 %v2238_v45, %v1879_v27 }
 0x14a   : > { %1946 = vst.msk [vmem:[%s2871_s18 + $0x1c] sm:$0xf] %vm1938_vm8, %v2226_v52  ;;  %v2224_v54 = vpack.c.bf16 %v1903_v53, %v1903_v53 }
 0x14c   : > { %1944 = vst.msk [vmem:[%s2871_s18 + $0x14] sm:$0xf] %vm1938_vm8, %v2224_v54 }
 0x14d PF: > { %s13_s12 = sadd.s32 1, %s2420_s12  }
 0x14e   : > { %p10_p5 = scmp.ge.s32.totalorder %s13_s12, 4  }
 0x150   :  { %12 = sbr.rel (!%p10_p5) target bundleno = 1 (0x1), region = 75 }

// kernel: _lambda_.8
= control target key start
LH: loop header
LB: loop body
LE: loop exit
PB: predicated region body
PF: predicated region fallthrough
CT: control target
= control target key end

     0   :  { %s2435_s15 = smov 0   ;;  %s2891_s0 = inlined_call_operand.vmem [shape: bf16[2,10,10,8], index: 0, kind: input, shape index: {}]   ;;  %s2892_s1 = inlined_call_operand.vmem [shape: bf16[9,8,8], index: 1, kind: input, shape index: {}]   ;;  %s2893_s2 = inlined_call_operand.vmem [shape: f32[1,8], index: 2, kind: input, shape index: {}]   ;;  %s2894_s3 = inlined_call_operand.vmem [shape: f32[1,8], index: 3, kind: input, shape index: {}]   ;;  %s2895_s4 = inlined_call_operand.vmem [shape: bf16[128,8], index: 4, kind: output, shape index: {}]  }
   0x1 LB: > { %s2441_s16 = sadd.s32 4294967295, %s2408_s15   ;;  %p2026_p0 = scmp.ge.s32.totalorder %s2408_s15, 1  ;;  %s2408_s15 = sphi %s2435_s15, %s14_s15  }
   0x2   : > { %p162_p1 = scmp.lt.s32.totalorder %s2408_s15, 3 }
   0x4   : > { %p163_p2 = pnand %p2026_p0, %p162_p1 }
   0x5   : > { %p188_p3 = scmp.lt.s32.totalorder (!%p163_p2), %s2441_s16, 1  ;;  %s2028_s14 = sshll.u32 (!%p163_p2), %s2441_s16, 3 }
   0x6   : > { %166 = sbr.rel (%p163_p2) target bundleno = 337 (0x151), region = 36  ;;  %p194_p4 = scmp.lt.s32.totalorder (!%p163_p2), %s2028_s14, 15 }
   0xb   : > { %v208_v0 = vld [vmem:[%s2892_s1] sm:$0xf]  ;;  %vm242_vm0 = vcmask 1043456   ;;  %v2038_v2 = vld [vmem:[%s2892_s1 + $0x4] sm:$0xf]  ;;  %s189_s21 = scalar_select %p188_p3, %s2441_s16, 1 }
   0xc   : > { %2372 = vmatprep.subr.msk.bf16.mxu1 %vm242_vm0, %v208_v0  ;;  %2371 = vmatprep.subr.msk.bf16.mxu0 %vm242_vm0, %v208_v0  ;;  %v244_v1 = vsel %vm242_vm0, %v208_v0, 0  ;;  %v2055_v3 = vld [vmem:[%s2892_s1 + $0x8] sm:$0xf]  ;;  %v2072_v4 = vld [vmem:[%s2892_s1 + $0xc] sm:$0xf]  ;;  %vm229_vm1 = vcmask 64512  }
   0xd   : > { %2370 = vmatpush3.bf16.msra.mxu1 %v244_v1  ;;  %2280 = vmatpush3.bf16.msra.mxu0 %v244_v1  ;;  %v2097_v5 = vld [vmem:[%s2892_s1 + $0x10] sm:$0xf]  ;;  %s2381_s28 = smul.u32 80, %s189_s21  ;;  %v477_v6 = vsel %vm242_vm0, %v2038_v2, 0  ;;  %vm335_vm2 = vsmask.f32 3328 }
   0xe   : > { %2373 = vmatprep.subr.msk.bf16.mxu1 %vm242_vm0, %v2038_v2  ;;  %2374 = vmatprep.subr.msk.bf16.mxu0 %vm242_vm0, %v2055_v3  ;;  %vm336_vm3 = vsmask.f32 7440  ;;  %v662_v7 = vsel %vm242_vm0, %v2055_v3, 0  ;;  %v2475_v8 = vsel %vm242_vm0, %v2072_v4, 0  ;;  %v2478_v9 = vsel %vm242_vm0, %v2097_v5, 0  ;;  %s2901_s14 = smov (!%p194_p4, %s2028_s14), 15 }
   0xf   : > { %s2471_s5 = scalar_lea.vmem %s2891_s0, %s2381_s28  ;;  %vm600_vm4 = vcmask 1042432   ;;  %vm601_vm5 = vcmask 1046532   ;;  %vm2501_vm6 = vmor %vm335_vm2, %vm336_vm3  ;;  %s2029_s20 = sshll.u32 %s2901_s14, 2  ;;  %vm1957_vm8 = vcmask 60416  }
  0x10   : > { %v2390_v10 = vld [vmem:[%s2471_s5 + $0x20] ss:$8 sps:$4 sm:$0xff]   ;;  %v2392_v12 = vld [vmem:[%s2471_s5 + $0x30] ss:$8 sps:$4 sm:$0xff]   ;;  %v320_v15 = vld [vmem:[%s2471_s5 + $0x4] sm:$0x1]  ;;  %s2862_s23 = scalar_lea.vmem %s2895_s4, %s2029_s20 }
  0x11   : > { %v2391_v11 = vld [vmem:[%s2471_s5] ss:$8 sps:$4 sm:$0xff]   ;;  %2285 = vmatprep.mubr.msk.bf16.mxu1 %vm229_vm1, %v2390_v10  ;;  %v2393_v13 = vld [vmem:[%s2471_s5 + $0x10] ss:$8 sps:$4 sm:$0xff]   ;;  %v322_v17 = vld [vmem:[%s2471_s5 + $0xc] sm:$0x1] }
  0x12   : > { %2281 = vmatprep.mubr.msk.bf16.mxu0 %vm229_vm1, %v2391_v11  ;;  %2286 = vmatmul.mubr.msk.bf16.vlgmr.msra.gmra.mxu1 %vm229_vm1, %v2392_v12  ;;  %v319_v14 = vld [vmem:[%s2471_s5] sm:$0xf]  ;;  %v321_v16 = vld [vmem:[%s2471_s5 + $0x8] sm:$0xf]  ;;  %v348_v20 = vshll.u32 %v320_v15, 16  ;;  %v362_v23 = vshll.u32 %v322_v17, 16  ;;  %vm2510_vm7 = vmor %vm600_vm4, %vm601_vm5 }
  0x13   : > { %2282 = vmatmul.mubr.msk.bf16.vlgmr.msra.gmra.mxu0 %vm229_vm1, %v2393_v13  ;;  %2290 = vmatpush3.bf16.msra.mxu1 %v477_v6  ;;  %v339_v18 = vshrl.u32 %v319_v14, 16  ;;  %v342_v19 = vshll.u32 %v319_v14, 16  ;;  %v353_v21 = vshrl.u32 %v321_v16, 16  ;;  %v356_v22 = vshll.u32 %v321_v16, 16  ;;  %v323_v24 = vld [vmem:[%s2471_s5 + $0x10] sm:$0xf] }
  0x14   : > { %v324_v25 = vld [vmem:[%s2471_s5 + $0x14] sm:$0x1]  ;;  %2300 = vmatpush3.bf16.msra.mxu0 %v662_v7  ;;  %2375 = vmatprep.subr.msk.bf16.mxu1 %vm242_vm0, %v2072_v4  ;;  %v350_v28 = vrot.slane %v348_v20, 5  ;;  %v325_v30 = vld [vmem:[%s2471_s5 + $0x18] sm:$0xf]  ;;  %v364_v32 = vrot.slane %v362_v23, 5 }
  0x15   : > { %v341_v26 = vrot.slane %v339_v18, 4  ;;  %v344_v27 = vrot.slane %v342_v19, 5  ;;  %v355_v29 = vrot.slane %v353_v21, 4  ;;  %2376 = vmatprep.subr.msk.bf16.mxu0 %vm242_vm0, %v2097_v5  ;;  %v358_v31 = vrot.slane %v356_v22, 5  ;;  %v326_v33 = vld [vmem:[%s2471_s5 + $0x1c] sm:$0x1] }
  0x16   : > { %v367_v34 = vshrl.u32 %v323_v24, 16  ;;  %v370_v35 = vshll.u32 %v323_v24, 16  ;;  %v376_v37 = vshll.u32 %v324_v25, 16  ;;  %v381_v38 = vshrl.u32 %v325_v30, 16  ;;  %v568_v40 = vld [vmem:[%s2471_s5] sm:$0xe] }
  0x17   : > { %v345_v36 = vor.u32 %v344_v27, %v341_v26  ;;  %v384_v39 = vshll.u32 %v325_v30, 16  ;;  %v359_v42 = vor.u32 %v358_v31, %v355_v29  ;;  %v390_v45 = vshll.u32 %v326_v33, 16  ;;  %v569_v46 = vld [vmem:[%s2471_s5 + $0x4] sm:$0x1]  ;;  %v570_v51 = vld [vmem:[%s2471_s5 + $0x8] sm:$0xe] }
  0x18   : > { %v369_v43 = vrot.slane %v367_v34, 4  ;;  %v372_v44 = vrot.slane %v370_v35, 5  ;;  %v378_v48 = vrot.slane %v376_v37, 5  ;;  %v383_v49 = vrot.slane %v381_v38, 4  ;;  %v571_v55 = vld [vmem:[%s2471_s5 + $0xc] sm:$0x1] }
  0x19   : > { %v346_v47 = vrot.slane %v345_v36, 4  ;;  %v386_v50 = vrot.slane %v384_v39, 5  ;;  %v360_v52 = vrot.slane %v359_v42, 4  ;;  %v392_v54 = vrot.slane %v390_v45, 5  ;;  %v572_v62 = vld [vmem:[%s2471_s5 + $0x10] sm:$0xe] }
  0x1a   : > { %v373_v53 = vor.u32 %v372_v44, %v369_v43  ;;  %v2047_v57 = vrot.slane %v568_v40, 9  ;;  %v605_v60 = vrot.slane %v569_v46, 5  ;;  %v2048_v61 = vrot.slane %v570_v51, 9  ;;  %v573_v63 = vld [vmem:[%s2471_s5 + $0x14] sm:$0x1] }
  0x1b   : > { %v351_v58 = vsel %vm2501_vm6, %v346_v47, %v350_v28  ;;  %v387_v59 = vor.u32 %v386_v50, %v383_v49  ;;  %v365_v0 = vsel %vm2501_vm6, %v360_v52, %v364_v32  ;;  %v609_v2 = vrot.slane %v571_v55, 5  ;;  %v574_v3 = vld [vmem:[%s2471_s5 + $0x18] sm:$0xe]  ;;  %v575_v4 = vld [vmem:[%s2471_s5 + $0x1c] sm:$0x1] }
  0x1c   : > { %v374_v1 = vrot.slane %v373_v53, 4  ;;  %v2039_v5 = vcombine.low %v351_v58, %v365_v0  ;;  %v606_v7 = vsel %vm2510_vm7, %v2047_v57, %v605_v60  ;;  %v2049_v10 = vrot.slane %v572_v62, 9  ;;  %v327_v11 = vld [vmem:[%s2471_s5 + $0x20] sm:$0xf]  ;;  %v328_v12 = vld [vmem:[%s2471_s5 + $0x24] sm:$0x1] }
  0x1d   : > { %v388_v6 = vrot.slane %v387_v59, 4  ;;  %v610_v14 = vsel %vm2510_vm7, %v2048_v61, %v609_v2  ;;  %v613_v15 = vrot.slane %v573_v63, 5  ;;  %v2050_v16 = vrot.slane %v574_v3, 9  ;;  %v329_v17 = vld [vmem:[%s2471_s5 + $0x28] sm:$0xf] }
  0x1e   : > { %v379_v13 = vsel %vm2501_vm6, %v374_v1, %v378_v48  ;;  %2291 = vmatprep.mubr.msk.bf16.mxu1 %vm229_vm1, %v2039_v5  ;;  %v2056_v19 = vcombine.low %v606_v7, %v610_v14  ;;  %v617_v20 = vrot.slane %v575_v4, 5  ;;  %v330_v21 = vld [vmem:[%s2471_s5 + $0x2c] sm:$0x1]  ;;  %v395_v22 = vshrl.u32 %v327_v11, 16  ;;  %v331_v23 = vld [vmem:[%s2471_s5 + $0x30] sm:$0xf] }
  0x1f   : > { %v393_v18 = vsel %vm2501_vm6, %v388_v6, %v392_v54  ;;  %v2539_v24 = vld [vmem:[%s2892_s1 + $0x14] sm:$0xf]  ;;  %v614_v26 = vsel %vm2510_vm7, %v2049_v10, %v613_v15  ;;  %v398_v27 = vshll.u32 %v327_v11, 16  ;;  %v404_v28 = vshll.u32 %v328_v12, 16  ;;  %v333_v30 = vld [vmem:[%s2471_s5 + $0x38] sm:$0xf] }
  0x20   : > { %v2040_v25 = vcombine.low %v379_v13, %v393_v18  ;;  %v332_v29 = vld [vmem:[%s2471_s5 + $0x34] sm:$0x1]  ;;  %2301 = vmatprep.mubr.msk.bf16.mxu0 %vm229_vm1, %v2056_v19  ;;  %v618_v31 = vsel %vm2510_vm7, %v2050_v16, %v617_v20  ;;  %v397_v32 = vrot.slane %v395_v22, 4  ;;  %v409_v33 = vshrl.u32 %v329_v17, 16  ;;  %v334_v35 = vld [vmem:[%s2471_s5 + $0x3c] sm:$0x1] }
  0x21   : > { %v412_v34 = vshll.u32 %v329_v17, 16  ;;  %v2552_v36 = vld [vmem:[%s2892_s1 + $0x18] sm:$0xf]  ;;  %v2057_v37 = vcombine.low %v614_v26, %v618_v31  ;;  %v400_v38 = vrot.slane %v398_v27, 5  ;;  %v406_v39 = vrot.slane %v404_v28, 5 }
  0x22   : > { %2292 = vmatmul.mubr.msk.bf16.vlgmr.msra.gmra.mxu1 %vm229_vm1, %v2040_v25  ;;  %v418_v40 = vshll.u32 %v330_v21, 16  ;;  %v576_v42 = vld [vmem:[%s2471_s5 + $0x20] sm:$0xe]  ;;  %v411_v43 = vrot.slane %v409_v33, 4  ;;  %v423_v45 = vshrl.u32 %v331_v23, 16  ;;  %v426_v46 = vshll.u32 %v331_v23, 16 }
  0x23   : > { %2310 = vmatpush3.bf16.msra.mxu1 %v2475_v8  ;;  %v414_v44 = vrot.slane %v412_v34, 5  ;;  %v577_v47 = vld [vmem:[%s2471_s5 + $0x24] sm:$0x1]  ;;  %v578_v48 = vld [vmem:[%s2471_s5 + $0x28] sm:$0xe]  ;;  %2302 = vmatmul.mubr.msk.bf16.vlgmr.msra.gmra.mxu0 %vm229_vm1, %v2057_v37  ;;  %v401_v49 = vor.u32 %v400_v38, %v397_v32  ;;  %v432_v51 = vshll.u32 %v332_v29, 16 }
  0x24   : > { %v420_v50 = vrot.slane %v418_v40, 5  ;;  %v437_v52 = vshrl.u32 %v333_v30, 16  ;;  %v579_v53 = vld [vmem:[%s2471_s5 + $0x2c] sm:$0x1]  ;;  %2377 = vmatprep.subr.msk.bf16.mxu1 %vm242_vm0, %v2539_v24  ;;  %v425_v8 = vrot.slane %v423_v45, 4  ;;  %v428_v55 = vrot.slane %v426_v46, 5  ;;  %2320 = vmatpush3.bf16.msra.mxu0 %v2478_v9 }
  0x25   : > { %v415_v54 = vor.u32 %v414_v44, %v411_v43  ;;  %v440_v57 = vshll.u32 %v333_v30, 16  ;;  %v580_v58 = vld [vmem:[%s2471_s5 + $0x30] sm:$0xe]  ;;  %v402_v59 = vrot.slane %v401_v49, 4  ;;  %v434_v60 = vrot.slane %v432_v51, 5  ;;  %2378 = vmatprep.subr.msk.bf16.mxu0 %vm242_vm0, %v2552_v36 }
  0x26   : > { %v439_v61 = vrot.slane %v437_v52, 4  ;;  %v446_v62 = vshll.u32 %v334_v35, 16  ;;  %v581_v63 = vld [vmem:[%s2471_s5 + $0x34] sm:$0x1]  ;;  %v429_v1 = vor.u32 %v428_v55, %v425_v8  ;;  %v2051_v3 = vrot.slane %v576_v42, 9 }
  0x27   : > { %v416_v0 = vrot.slane %v415_v54, 4  ;;  %v442_v2 = vrot.slane %v440_v57, 5  ;;  %v582_v4 = vld [vmem:[%s2471_s5 + $0x38] sm:$0xe]  ;;  %v407_v5 = vsel %vm2501_vm6, %v402_v59, %v406_v39  ;;  %v621_v7 = vrot.slane %v577_v47, 5 }
  0x28   : > { %v448_v6 = vrot.slane %v446_v62, 5  ;;  %v2052_v9 = vrot.slane %v578_v48, 9  ;;  %v583_v10 = vld [vmem:[%s2471_s5 + $0x3c] sm:$0x1]  ;;  %v430_v12 = vrot.slane %v429_v1, 4  ;;  %v625_v14 = vrot.slane %v579_v53, 5 }
  0x29   : > { %v421_v11 = vsel %vm2501_vm6, %v416_v0, %v420_v50  ;;  %v443_v13 = vor.u32 %v442_v2, %v439_v61  ;;  %v622_v16 = vsel %vm2510_vm7, %v2051_v3, %v621_v7  ;;  %v2053_v17 = vrot.slane %v580_v58, 9  ;;  %v2586_v27 = vld [vmem:[%s2892_s1 + $0x1c] sm:$0xf]  ;;  %v2394_v29 = vld [vmem:[%s2471_s5 + $0x8] ss:$8 sps:$4 sm:$0xff]  }
  0x2a   : > { %v2041_v15 = vcombine.low %v407_v5, %v421_v11  ;;  %v629_v18 = vrot.slane %v581_v63, 5  ;;  %v435_v19 = vsel %vm2501_vm6, %v430_v12, %v434_v60  ;;  %v626_v21 = vsel %vm2510_vm7, %v2052_v9, %v625_v14  ;;  %v2081_v30 = vld [vmem:[%s2471_s5 + $0x8] sm:$0xf]  ;;  %v2082_v31 = vld [vmem:[%s2471_s5 + $0xc] sm:$0x1] }
  0x2b   : > { %v444_v20 = vrot.slane %v443_v13, 4  ;;  %v2054_v22 = vrot.slane %v582_v4, 9  ;;  %v2058_v23 = vcombine.low %v622_v16, %v626_v21  ;;  %v633_v26 = vrot.slane %v583_v10, 5  ;;  %v2083_v34 = vld [vmem:[%s2471_s5 + $0x10] sm:$0xf] }
  0x2c   : > { %2295 = vmatprep.mubr.msk.bf16.mxu1 %vm229_vm1, %v2041_v15  ;;  %v630_v25 = vsel %vm2510_vm7, %v2053_v17, %v629_v18  ;;  %v2084_v35 = vld [vmem:[%s2471_s5 + $0x14] sm:$0x1]  ;;  %v905_v37 = vshrl.u32 %v2081_v30, 16  ;;  %v908_v38 = vshll.u32 %v2081_v30, 16  ;;  %v914_v40 = vshll.u32 %v2082_v31, 16 }
  0x2d   : > { %v449_v28 = vsel %vm2501_vm6, %v444_v20, %v448_v6  ;;  %2305 = vmatprep.mubr.msk.bf16.mxu0 %vm229_vm1, %v2058_v23  ;;  %v634_v33 = vsel %vm2510_vm7, %v2054_v22, %v633_v26  ;;  %v919_v42 = vshrl.u32 %v2083_v34, 16  ;;  %v922_v43 = vshll.u32 %v2083_v34, 16  ;;  %v2395_v52 = vld [vmem:[%s2471_s5 + $0x18] ss:$8 sps:$4 sm:$0xff]   ;;  %v2086_v55 = vld [vmem:[%s2471_s5 + $0x1c] sm:$0x1] }
  0x2e   : > { %v2042_v32 = vcombine.low %v435_v19, %v449_v28  ;;  %v2059_v39 = vcombine.low %v630_v25, %v634_v33  ;;  %v907_v44 = vrot.slane %v905_v37, 4  ;;  %v910_v45 = vrot.slane %v908_v38, 5  ;;  %v2085_v8 = vld [vmem:[%s2471_s5 + $0x18] sm:$0xf]  ;;  %v2396_v57 = vld [vmem:[%s2471_s5 + $0x28] ss:$8 sps:$4 sm:$0xff]  }
  0x2f   : > { %v928_v46 = vshll.u32 %v2084_v35, 16  ;;  %v1225_v47 = vsel %vm242_vm0, %v2539_v24, 0  ;;  %v921_v48 = vrot.slane %v919_v42, 4  ;;  %v924_v49 = vrot.slane %v922_v43, 5  ;;  %v2087_v59 = vld [vmem:[%s2471_s5 + $0x20] sm:$0xf] }
  0x30   : > { %2296 = vmatmul.mubr.msk.bf16.gmra.mxu1 %vm229_vm1, %v2042_v32  ;;  %2306 = vmatmul.mubr.msk.bf16.gmra.mxu0 %vm229_vm1, %v2059_v39  ;;  %v2605_v50 = vsel %vm242_vm0, %v2552_v36, 0  ;;  %v2609_v51 = vsel %vm242_vm0, %v2586_v27, 0  ;;  %v911_v53 = vor.u32 %v910_v45, %v907_v44  ;;  %v916_v54 = vrot.slane %v914_v40, 5  ;;  %v2088_v60 = vld [vmem:[%s2471_s5 + $0x24] sm:$0x1] }
  0x31   : > { %2311 = vmatprep.mubr.msk.bf16.mxu1 %vm229_vm1, %v2394_v29  ;;  %v930_v24 = vrot.slane %v928_v46, 5  ;;  %v925_v58 = vor.u32 %v924_v49, %v921_v48  ;;  %v933_v61 = vshrl.u32 %v2085_v8, 16  ;;  %v936_v36 = vshll.u32 %v2085_v8, 16  ;;  %v2089_v2 = vld [vmem:[%s2471_s5 + $0x28] sm:$0xf] }
  0x32   : > { %v912_v62 = vrot.slane %v911_v53, 4  ;;  %v942_v63 = vshll.u32 %v2086_v55, 16  ;;  %v947_v0 = vshrl.u32 %v2087_v59, 16  ;;  %v950_v1 = vshll.u32 %v2087_v59, 16  ;;  %v2090_v7 = vld [vmem:[%s2471_s5 + $0x2c] sm:$0x1] }
  0x33   : > { %v926_v3 = vrot.slane %v925_v58, 4  ;;  %v935_v4 = vrot.slane %v933_v61, 4  ;;  %v938_v5 = vrot.slane %v936_v36, 5  ;;  %v956_v6 = vshll.u32 %v2088_v60, 16  ;;  %v2091_v13 = vld [vmem:[%s2471_s5 + $0x30] sm:$0xf] }
  0x34   : > { %v917_v9 = vsel %vm2501_vm6, %v912_v62, %v916_v54  ;;  %v944_v10 = vrot.slane %v942_v63, 5  ;;  %v949_v11 = vrot.slane %v947_v0, 4  ;;  %v952_v12 = vrot.slane %v950_v1, 5  ;;  %v2092_v17 = vld [vmem:[%s2471_s5 + $0x34] sm:$0x1] }
  0x35   : > { %v931_v14 = vsel %vm2501_vm6, %v926_v3, %v930_v24  ;;  %v939_v15 = vor.u32 %v938_v5, %v935_v4  ;;  %v958_v16 = vrot.slane %v956_v6, 5  ;;  %v961_v18 = vshrl.u32 %v2089_v2, 16  ;;  %v2093_v23 = vld [vmem:[%s2471_s5 + $0x38] sm:$0xf]  ;;  %v2094_v30 = vld [vmem:[%s2471_s5 + $0x3c] sm:$0x1] }
  0x36   : > { %v2098_v19 = vcombine.low %v917_v9, %v931_v14  ;;  %v953_v20 = vor.u32 %v952_v12, %v949_v11  ;;  %v964_v21 = vshll.u32 %v2089_v2, 16  ;;  %v970_v22 = vshll.u32 %v2090_v7, 16  ;;  %v2397_v31 = vld [vmem:[%s2471_s5 + $0x38] ss:$8 sps:$4 sm:$0xff]   ;;  %v2096_v42 = vld [vmem:[%s2471_s5 + $0x44] sm:$0x1] }
  0x37   : > { %v940_v25 = vrot.slane %v939_v15, 4  ;;  %v963_v26 = vrot.slane %v961_v18, 4  ;;  %v975_v28 = vshrl.u32 %v2091_v13, 16  ;;  %v978_v29 = vshll.u32 %v2091_v13, 16  ;;  %v2095_v37 = vld [vmem:[%s2471_s5 + $0x40] sm:$0xf] }
  0x38   : > { %2312 = vmatmul.mubr.msk.bf16.vlgmr.msra.gmra.mxu1 %vm229_vm1, %v2395_v52  ;;  %2321 = vmatprep.mubr.msk.bf16.mxu0 %vm229_vm1, %v2098_v19  ;;  %v954_v32 = vrot.slane %v953_v20, 4  ;;  %v966_v33 = vrot.slane %v964_v21, 5  ;;  %v972_v34 = vrot.slane %v970_v22, 5  ;;  %v984_v35 = vshll.u32 %v2092_v17, 16  ;;  %v2106_v48 = vld [vmem:[%s2471_s5 + $0x8] sm:$0xe] }
  0x39   : > { %2315 = vmatprep.mubr.msk.bf16.mxu1 %vm229_vm1, %v2396_v57  ;;  %2330 = vmatpush3.bf16.msra.mxu1 %v1225_v47  ;;  %v945_v38 = vsel %vm2501_vm6, %v940_v25, %v944_v10  ;;  %v977_v39 = vrot.slane %v975_v28, 4  ;;  %v980_v40 = vrot.slane %v978_v29, 5  ;;  %v989_v43 = vshrl.u32 %v2093_v23, 16  ;;  %v2644_v49 = vld [vmem:[%s2892_s1 + $0x20] sm:$0xf] }
  0x3a   : > { %2379 = vmatprep.subr.msk.bf16.mxu1 %vm242_vm0, %v2586_v27  ;;  %v959_v44 = vsel %vm2501_vm6, %v954_v32, %v958_v16  ;;  %v967_v45 = vor.u32 %v966_v33, %v963_v26  ;;  %v986_v46 = vrot.slane %v984_v35, 5  ;;  %v992_v47 = vshll.u32 %v2093_v23, 16  ;;  %v2107_v27 = vld [vmem:[%s2471_s5 + $0xc] sm:$0x1]  ;;  %v2108_v8 = vld [vmem:[%s2471_s5 + $0x10] sm:$0xe] }
  0x3b   : > { %v2099_v52 = vcombine.low %v945_v38, %v959_v44  ;;  %v981_v53 = vor.u32 %v980_v40, %v977_v39  ;;  %v991_v54 = vrot.slane %v989_v43, 4  ;;  %v998_v24 = vshll.u32 %v2094_v30, 16  ;;  %v2109_v55 = vld [vmem:[%s2471_s5 + $0x14] sm:$0x1]  ;;  %v2110_v61 = vld [vmem:[%s2471_s5 + $0x18] sm:$0xe] }
  0x3c   : > { %v968_v57 = vrot.slane %v967_v45, 4  ;;  %v994_v58 = vrot.slane %v992_v47, 5  ;;  %v1003_v59 = vshrl.u32 %v2095_v37, 16  ;;  %v1006_v60 = vshll.u32 %v2095_v37, 16  ;;  %v2111_v36 = vld [vmem:[%s2471_s5 + $0x1c] sm:$0x1] }
  0x3d   : > { %v2112_v62 = vld [vmem:[%s2471_s5 + $0x20] sm:$0xe]  ;;  %2322 = vmatmul.mubr.msk.bf16.vlgmr.msra.gmra.mxu0 %vm229_vm1, %v2099_v52  ;;  %v982_v63 = vrot.slane %v981_v53, 4  ;;  %v1000_v0 = vrot.slane %v998_v24, 5  ;;  %v1012_v1 = vshll.u32 %v2096_v42, 16  ;;  %v2122_v2 = vrot.slane %v2106_v48, 9 }
  0x3e   : > { %v2113_v3 = vld [vmem:[%s2471_s5 + $0x24] sm:$0x1]  ;;  %v973_v4 = vsel %vm2501_vm6, %v968_v57, %v972_v34  ;;  %v995_v5 = vor.u32 %v994_v58, %v991_v54  ;;  %v1005_v6 = vrot.slane %v1003_v59, 4  ;;  %v1008_v7 = vrot.slane %v1006_v60, 5  ;;  %2340 = vmatpush3.bf16.msra.mxu0 %v2605_v50  ;;  %v2114_v9 = vld [vmem:[%s2471_s5 + $0x28] sm:$0xe] }
  0x3f   : > { %v2115_v10 = vld [vmem:[%s2471_s5 + $0x2c] sm:$0x1]  ;;  %v987_v11 = vsel %vm2501_vm6, %v982_v63, %v986_v46  ;;  %v1014_v12 = vrot.slane %v1012_v1, 5  ;;  %v1168_v13 = vrot.slane %v2107_v27, 5  ;;  %v2123_v14 = vrot.slane %v2108_v8, 9  ;;  %2380 = vmatprep.subr.msk.bf16.mxu0 %vm242_vm0, %v2644_v49 }
  0x40   : > { %2316 = vmatmul.mubr.msk.bf16.gmra.mxu1 %vm229_vm1, %v2397_v31  ;;  %v2116_v15 = vld [vmem:[%s2471_s5 + $0x30] sm:$0xe]  ;;  %v2100_v16 = vcombine.low %v973_v4, %v987_v11  ;;  %v996_v17 = vrot.slane %v995_v5, 4  ;;  %v1009_v18 = vor.u32 %v1008_v7, %v1005_v6  ;;  %v1172_v19 = vrot.slane %v2109_v55, 5  ;;  %v2117_v50 = vld [vmem:[%s2471_s5 + $0x34] sm:$0x1] }
  0x41   : > { %v2118_v20 = vld [vmem:[%s2471_s5 + $0x38] sm:$0xe]  ;;  %v1169_v21 = vsel %vm2510_vm7, %v2122_v2, %v1168_v13  ;;  %v2124_v22 = vrot.slane %v2110_v61, 9  ;;  %v1176_v23 = vrot.slane %v2111_v36, 5  ;;  %v2125_v25 = vrot.slane %v2112_v62, 9 }
  0x42   : > { %v2119_v26 = vld [vmem:[%s2471_s5 + $0x3c] sm:$0x1]  ;;  %2325 = vmatprep.mubr.msk.bf16.mxu0 %vm229_vm1, %v2100_v16  ;;  %v1001_v28 = vsel %vm2501_vm6, %v996_v17, %v1000_v0  ;;  %v1010_v29 = vrot.slane %v1009_v18, 4  ;;  %v1173_v30 = vsel %vm2510_vm7, %v2123_v14, %v1172_v19  ;;  %v1180_v31 = vrot.slane %v2113_v3, 5  ;;  %v2120_v32 = vld [vmem:[%s2471_s5 + $0x40] sm:$0xe] }
  0x43   : > { %v2121_v33 = vld [vmem:[%s2471_s5 + $0x44] sm:$0x1]  ;;  %v2131_v34 = vcombine.low %v1169_v21, %v1173_v30  ;;  %v1177_v35 = vsel %vm2510_vm7, %v2124_v22, %v1176_v23  ;;  %v2126_v37 = vrot.slane %v2114_v9, 9  ;;  %v1184_v38 = vrot.slane %v2115_v10, 5  ;;  %v2398_v44 = vld [vmem:[%s2471_s5 + $0x10] ss:$8 sps:$4 sm:$0xff]  }
  0x44   : > { %v1015_v39 = vsel %vm2501_vm6, %v1010_v29, %v1014_v12  ;;  %v1181_v40 = vsel %vm2510_vm7, %v2125_v25, %v1180_v31  ;;  %v2127_v42 = vrot.slane %v2116_v15, 9  ;;  %v1188_v43 = vrot.slane %v2117_v50, 5  ;;  %v2156_v57 = vld [vmem:[%s2471_s5 + $0x10] sm:$0xf]  ;;  %v2399_v59 = vld [vmem:[%s2471_s5 + $0x20] ss:$8 sps:$4 sm:$0xff]  }
  0x45   : > { %v2101_v45 = vcombine.low %v1001_v28, %v1015_v39  ;;  %2331 = vmatprep.mubr.msk.bf16.mxu1 %vm229_vm1, %v2131_v34  ;;  %v2132_v46 = vcombine.low %v1177_v35, %v1181_v40  ;;  %v1185_v47 = vsel %vm2510_vm7, %v2126_v37, %v1184_v38  ;;  %v2128_v48 = vrot.slane %v2118_v20, 9  ;;  %v2157_v60 = vld [vmem:[%s2471_s5 + $0x14] sm:$0x1]  ;;  %v2158_v61 = vld [vmem:[%s2471_s5 + $0x18] sm:$0xf] }
  0x46   : > { %v1189_v27 = vsel %vm2510_vm7, %v2127_v42, %v1188_v43  ;;  %v1192_v52 = vrot.slane %v2119_v26, 5  ;;  %v2129_v53 = vrot.slane %v2120_v32, 9  ;;  %v1196_v54 = vrot.slane %v2121_v33, 5  ;;  %v2159_v36 = vld [vmem:[%s2471_s5 + $0x1c] sm:$0x1] }
  0x47   : > { %2326 = vmatmul.mubr.msk.bf16.gmra.mxu0 %vm229_vm1, %v2101_v45  ;;  %v2133_v24 = vcombine.low %v1185_v47, %v1189_v27  ;;  %v1788_v58 = vsel %vm242_vm0, %v2644_v49, 0  ;;  %v2400_v62 = vld [vmem:[%s2471_s5 + $0x30] ss:$8 sps:$4 sm:$0xff]   ;;  %v1468_v63 = vshrl.u32 %v2156_v57, 16  ;;  %v1471_v0 = vshll.u32 %v2156_v57, 16 }
  0x48   : > { %2332 = vmatmul.mubr.msk.bf16.vlgmr.msra.gmra.mxu1 %vm229_vm1, %v2132_v46  ;;  %v1193_v8 = vsel %vm2510_vm7, %v2128_v48, %v1192_v52  ;;  %v1197_v55 = vsel %vm2510_vm7, %v2129_v53, %v1196_v54  ;;  %2341 = vmatprep.mubr.msk.bf16.mxu0 %vm229_vm1, %v2398_v44  ;;  %v1477_v1 = vshll.u32 %v2157_v60, 16  ;;  %v1482_v2 = vshrl.u32 %v2158_v61, 16  ;;  %v2160_v3 = vld [vmem:[%s2471_s5 + $0x20] sm:$0xf]  ;;  %v2161_v6 = vld [vmem:[%s2471_s5 + $0x24] sm:$0x1] }
  0x49   : > { %2350 = vmatpush3.bf16.msra.mxu1 %v2609_v51  ;;  %2335 = vmatprep.mubr.msk.bf16.mxu1 %vm229_vm1, %v2133_v24  ;;  %v2134_v51 = vcombine.low %v1193_v8, %v1197_v55  ;;  %v1485_v4 = vshll.u32 %v2158_v61, 16  ;;  %v1491_v5 = vshll.u32 %v2159_v36, 16  ;;  %v2162_v49 = vld [vmem:[%s2471_s5 + $0x28] sm:$0xf]  ;;  %v1470_v7 = vrot.slane %v1468_v63, 4 }
  0x4a   : > { %v1473_v9 = vrot.slane %v1471_v0, 5  ;;  %v1479_v10 = vrot.slane %v1477_v1, 5  ;;  %v1484_v11 = vrot.slane %v1482_v2, 4  ;;  %v2163_v12 = vld [vmem:[%s2471_s5 + $0x2c] sm:$0x1]  ;;  %v1496_v15 = vshrl.u32 %v2160_v3, 16 }
  0x4b   : > { %v1487_v13 = vrot.slane %v1485_v4, 5  ;;  %v1493_v14 = vrot.slane %v1491_v5, 5  ;;  %v1499_v16 = vshll.u32 %v2160_v3, 16  ;;  %v1505_v18 = vshll.u32 %v2161_v6, 16  ;;  %v2164_v20 = vld [vmem:[%s2471_s5 + $0x30] sm:$0xf] }
  0x4c   : > { %v1474_v17 = vor.u32 %v1473_v9, %v1470_v7  ;;  %v1510_v19 = vshrl.u32 %v2162_v49, 16  ;;  %v1513_v50 = vshll.u32 %v2162_v49, 16  ;;  %v1498_v22 = vrot.slane %v1496_v15, 4  ;;  %v2165_v26 = vld [vmem:[%s2471_s5 + $0x34] sm:$0x1] }
  0x4d   : > { %v1488_v21 = vor.u32 %v1487_v13, %v1484_v11  ;;  %v1501_v23 = vrot.slane %v1499_v16, 5  ;;  %v1519_v25 = vshll.u32 %v2163_v12, 16  ;;  %v1507_v29 = vrot.slane %v1505_v18, 5  ;;  %v2166_v32 = vld [vmem:[%s2471_s5 + $0x38] sm:$0xf] }
  0x4e   : > { %v1475_v28 = vrot.slane %v1474_v17, 4  ;;  %v1512_v30 = vrot.slane %v1510_v19, 4  ;;  %v1515_v31 = vrot.slane %v1513_v50, 5  ;;  %v2401_v33 = vld [vmem:[%s2471_s5 + $0x40] ss:$8 sps:$4 sm:$0xff]   ;;  %v1524_v38 = vshrl.u32 %v2164_v20, 16 }
  0x4f   : > { %2342 = vmatmul.mubr.msk.bf16.vlgmr.msra.gmra.mxu0 %vm229_vm1, %v2399_v59  ;;  %v1489_v34 = vrot.slane %v1488_v21, 4  ;;  %v1502_v35 = vor.u32 %v1501_v23, %v1498_v22  ;;  %v1521_v37 = vrot.slane %v1519_v25, 5  ;;  %v2167_v42 = vld [vmem:[%s2471_s5 + $0x3c] sm:$0x1]  ;;  %v1527_v43 = vshll.u32 %v2164_v20, 16 }
  0x50   : > { %2336 = vmatmul.mubr.msk.bf16.gmra.mxu1 %vm229_vm1, %v2134_v51  ;;  %2345 = vmatprep.mubr.msk.bf16.mxu0 %vm229_vm1, %v2400_v62  ;;  %v1480_v39 = vsel %vm2501_vm6, %v1475_v28, %v1479_v10  ;;  %v1516_v40 = vor.u32 %v1515_v31, %v1512_v30  ;;  %v1533_v44 = vshll.u32 %v2165_v26, 16  ;;  %v2168_v45 = vld [vmem:[%s2471_s5 + $0x40] sm:$0xf]  ;;  %v1526_v48 = vrot.slane %v1524_v38, 4  ;;  %v2169_v52 = vld [vmem:[%s2471_s5 + $0x44] sm:$0x1] }
  0x51   : > { %2360 = vmatpush3.bf16.msra.mxu0 %v1788_v58  ;;  %v1494_v46 = vsel %vm2501_vm6, %v1489_v34, %v1493_v14  ;;  %v1503_v47 = vrot.slane %v1502_v35, 4  ;;  %v1538_v27 = vshrl.u32 %v2166_v32, 16  ;;  %v1529_v24 = vrot.slane %v1527_v43, 5  ;;  %v2170_v55 = vld [vmem:[%s2471_s5 + $0x48] sm:$0xf] }
  0x52   : > { %v2173_v53 = vcombine.low %v1480_v39, %v1494_v46  ;;  %v1517_v54 = vrot.slane %v1516_v40, 4  ;;  %v1535_v8 = vrot.slane %v1533_v44, 5  ;;  %v1541_v59 = vshll.u32 %v2166_v32, 16  ;;  %v2171_v61 = vld [vmem:[%s2471_s5 + $0x4c] sm:$0x1] }
  0x53   : > { %v1508_v57 = vsel %vm2501_vm6, %v1503_v47, %v1507_v29  ;;  %v1540_v58 = vrot.slane %v1538_v27, 4  ;;  %v1547_v60 = vshll.u32 %v2167_v42, 16  ;;  %v1530_v62 = vor.u32 %v1529_v24, %v1526_v48  ;;  %v2181_v1 = vld [vmem:[%s2471_s5 + $0x10] sm:$0xe]  ;;  %v2182_v2 = vld [vmem:[%s2471_s5 + $0x14] sm:$0x1] }
  0x54   : > { %2351 = vmatprep.mubr.msk.bf16.mxu1 %vm229_vm1, %v2173_v53  ;;  %v1522_v36 = vsel %vm2501_vm6, %v1517_v54, %v1521_v37  ;;  %v1552_v63 = vshrl.u32 %v2168_v45, 16  ;;  %v1555_v0 = vshll.u32 %v2168_v45, 16  ;;  %v1543_v51 = vrot.slane %v1541_v59, 5  ;;  %v2183_v6 = vld [vmem:[%s2471_s5 + $0x18] sm:$0xe] }
  0x55   : > { %v2174_v3 = vcombine.low %v1508_v57, %v1522_v36  ;;  %v1549_v4 = vrot.slane %v1547_v60, 5  ;;  %v1561_v5 = vshll.u32 %v2169_v52, 16  ;;  %v2184_v49 = vld [vmem:[%s2471_s5 + $0x1c] sm:$0x1]  ;;  %v1531_v7 = vrot.slane %v1530_v62, 4 }
  0x56   : > { %v1554_v9 = vrot.slane %v1552_v63, 4  ;;  %v1557_v10 = vrot.slane %v1555_v0, 5  ;;  %v1566_v11 = vshrl.u32 %v2170_v55, 16  ;;  %v2185_v12 = vld [vmem:[%s2471_s5 + $0x20] sm:$0xe]  ;;  %v1544_v13 = vor.u32 %v1543_v51, %v1540_v58 }
  0x57   : > { %2346 = vmatmul.mubr.msk.bf16.gmra.mxu0 %vm229_vm1, %v2401_v33  ;;  %v1563_v14 = vrot.slane %v1561_v5, 5  ;;  %v1569_v15 = vshll.u32 %v2170_v55, 16  ;;  %v1575_v16 = vshll.u32 %v2171_v61, 16  ;;  %v2186_v17 = vld [vmem:[%s2471_s5 + $0x24] sm:$0x1]  ;;  %v1536_v18 = vsel %vm2501_vm6, %v1531_v7, %v1535_v8 }
  0x58   : > { %2352 = vmatmul.mubr.msk.bf16.vlgmr.msra.gmra.mxu1 %vm229_vm1, %v2174_v3  ;;  %v1558_v19 = vor.u32 %v1557_v10, %v1554_v9  ;;  %v1568_v50 = vrot.slane %v1566_v11, 4  ;;  %v2197_v20 = vrot.slane %v2181_v1, 9  ;;  %v2187_v21 = vld [vmem:[%s2471_s5 + $0x28] sm:$0xe]  ;;  %v2188_v22 = vld [vmem:[%s2471_s5 + $0x2c] sm:$0x1] }
  0x59   : > { %v1545_v23 = vrot.slane %v1544_v13, 4  ;;  %v1571_v25 = vrot.slane %v1569_v15, 5  ;;  %v1577_v26 = vrot.slane %v1575_v16, 5  ;;  %v1731_v28 = vrot.slane %v2182_v2, 5  ;;  %v2189_v29 = vld [vmem:[%s2471_s5 + $0x30] sm:$0xe] }
  0x5a   : > { %v1559_v30 = vrot.slane %v1558_v19, 4  ;;  %v2198_v31 = vrot.slane %v2183_v6, 9  ;;  %v1735_v32 = vrot.slane %v2184_v49, 5  ;;  %v2199_v33 = vrot.slane %v2185_v12, 9  ;;  %v2190_v34 = vld [vmem:[%s2471_s5 + $0x34] sm:$0x1] }
  0x5b   : > { %v1550_v35 = vsel %vm2501_vm6, %v1545_v23, %v1549_v4  ;;  %v1572_v37 = vor.u32 %v1571_v25, %v1568_v50  ;;  %v1732_v38 = vsel %vm2510_vm7, %v2197_v20, %v1731_v28  ;;  %v1739_v39 = vrot.slane %v2186_v17, 5  ;;  %v2191_v40 = vld [vmem:[%s2471_s5 + $0x38] sm:$0xe]  ;;  %v2192_v42 = vld [vmem:[%s2471_s5 + $0x3c] sm:$0x1] }
  0x5c   : > { %v2175_v43 = vcombine.low %v1536_v18, %v1550_v35  ;;  %v1564_v44 = vsel %vm2501_vm6, %v1559_v30, %v1563_v14  ;;  %v1736_v45 = vsel %vm2510_vm7, %v2198_v31, %v1735_v32  ;;  %v2200_v46 = vrot.slane %v2187_v21, 9  ;;  %v2193_v47 = vld [vmem:[%s2471_s5 + $0x40] sm:$0xe]  ;;  %v2194_v48 = vld [vmem:[%s2471_s5 + $0x44] sm:$0x1] }
  0x5d   : > { %v1573_v27 = vrot.slane %v1572_v37, 4  ;;  %v2206_v52 = vcombine.low %v1732_v38, %v1736_v45  ;;  %v1740_v53 = vsel %vm2510_vm7, %v2199_v33, %v1739_v39  ;;  %v1743_v54 = vrot.slane %v2188_v22, 5  ;;  %v2195_v24 = vld [vmem:[%s2471_s5 + $0x48] sm:$0xe]  ;;  %v2196_v59 = vld [vmem:[%s2471_s5 + $0x4c] sm:$0x1] }
  0x5e   : > { %2355 = vmatprep.mubr.msk.bf16.mxu1 %vm229_vm1, %v2175_v43  ;;  %v2201_v8 = vrot.slane %v2189_v29, 9  ;;  %v1747_v55 = vrot.slane %v2190_v34, 5  ;;  %v2202_v57 = vrot.slane %v2191_v40, 9  ;;  %v1751_v58 = vrot.slane %v2192_v42, 5 }
  0x5f   : > { %v1578_v60 = vsel %vm2501_vm6, %v1573_v27, %v1577_v26  ;;  %2361 = vmatprep.mubr.msk.bf16.mxu0 %vm229_vm1, %v2206_v52  ;;  %v1744_v61 = vsel %vm2510_vm7, %v2200_v46, %v1743_v54  ;;  %v2203_v36 = vrot.slane %v2193_v47, 9  ;;  %v1755_v62 = vrot.slane %v2194_v48, 5 }
  0x60   : > { %v2176_v63 = vcombine.low %v1564_v44, %v1578_v60  ;;  %v2207_v0 = vcombine.low %v1740_v53, %v1744_v61  ;;  %v1748_v1 = vsel %vm2510_vm7, %v2201_v8, %v1747_v55  ;;  %v1752_v2 = vsel %vm2510_vm7, %v2202_v57, %v1751_v58 }
  0x61   : > { %v2208_v3 = vcombine.low %v1748_v1, %v1752_v2  ;;  %v2204_v51 = vrot.slane %v2195_v24, 9  ;;  %v1759_v4 = vrot.slane %v2196_v59, 5  ;;  %v1756_v41 = vsel %vm2510_vm7, %v2203_v36, %v1755_v62 }
  0x62   : > { %2356 = vmatmul.mubr.msk.bf16.gmra.mxu1 %vm229_vm1, %v2176_v63  ;;  %2362 = vmatmul.mubr.msk.bf16.vlgmr.msra.gmra.mxu0 %vm229_vm1, %v2207_v0 }
  0x63   : > { %2365 = vmatprep.mubr.msk.bf16.mxu0 %vm229_vm1, %v2208_v3  ;;  %v1760_v5 = vsel %vm2510_vm7, %v2204_v51, %v1759_v4 }
  0x64   : > { %v2209_v6 = vcombine.low %v1756_v41, %v1760_v5 }
  0x6a   : > { %2366 = vmatmul.mubr.msk.bf16.gmra.mxu0 %vm229_vm1, %v2209_v6 }
  0xd2   : > { %v2287_v49 = vpop.f32.mrf.mxu1 }
  0xd3   : > { %317 = vst.msk [vmem:[#allocation2 + $0x30] sm:$0xff] %vm229_vm1, %v2287_v49  ;;  %v2283_v7 = vpop.f32.mrf.mxu0 }
  0xd4   : > { %313 = vst.msk [vmem:[#allocation2 + $0x10] sm:$0xff] %vm229_vm1, %v2283_v7  ;;  %v296_v9 = vpop.f32.mrf.mxu1 }
  0xd5   : > { %315 = vst.msk [vmem:[#allocation2 + $0x20] sm:$0xff] %vm229_vm1, %v296_v9  ;;  %v280_v10 = vpop.f32.mrf.mxu0 }
  0xd6   : > { %311 = vst.msk [vmem:[#allocation2] sm:$0xff] %vm229_vm1, %v280_v10  ;;  %v2288_v11 = vpop.f32.mrf.mxu1 }
  0xd7   : > { %318 = vst.msk [vmem:[#allocation2 + $0x38] sm:$0xff] %vm229_vm1, %v2288_v11  ;;  %v2284_v56 = vpop.f32.mrf.mxu0 }
  0xd8   : > { %314 = vst.msk [vmem:[#allocation2 + $0x18] sm:$0xff] %vm229_vm1, %v2284_v56  ;;  %v299_v12 = vpop.f32.mrf.mxu1 }
  0xd9   : > { %316 = vst.msk [vmem:[#allocation2 + $0x28] sm:$0xff] %vm229_vm1, %v299_v12  ;;  %v283_v13 = vpop.f32.mrf.mxu0 }
  0xda   : > { %312 = vst.msk [vmem:[#allocation2 + $0x8] sm:$0xff] %vm229_vm1, %v283_v13  ;;  %v550_v37 = vld [vmem:[#allocation2 + $0x30] sm:$0xff] }
  0xdb   : > { %v546_v14 = vld [vmem:[#allocation2 + $0x10] sm:$0xff] }
  0xdc   : > { %v548_v44 = vld [vmem:[#allocation2 + $0x20] sm:$0xff] }
  0xdd   : > { %v544_v16 = vld [vmem:[#allocation2] sm:$0xff] }
  0xde   : > { %v551_v27 = vld [vmem:[#allocation2 + $0x38] sm:$0xff] }
  0xdf   : > { %v547_v19 = vld [vmem:[#allocation2 + $0x18] sm:$0xff] }
  0xe0   : > { %v549_v24 = vld [vmem:[#allocation2 + $0x28] sm:$0xff] }
  0xe1   : > { %v545_v22 = vld [vmem:[#allocation2 + $0x8] sm:$0xff] }
  0xe2   : > { %v2293_v15 = vpop.f32.mrf.mxu1 }
  0xe3   : > { %v554_v17 = vadd.f32 %v2293_v15, %v546_v14  ;;  %v2303_v50 = vpop.f32.mrf.mxu0 }
  0xe4   : > { %v513_v18 = vpop.f32.mrf.mxu1 }
  0xe5   : > { %562 = vst.msk [vmem:[#allocation2 + $0x10] sm:$0xff] %vm229_vm1, %v554_v17  ;;  %v552_v20 = vadd.f32 %v544_v16, %v513_v18  ;;  %v698_v23 = vpop.f32.mrf.mxu0 }
  0xe6   : > { %v2294_v21 = vpop.f32.mrf.mxu1 }
  0xe7   : > { %560 = vst.msk [vmem:[#allocation2] sm:$0xff] %vm229_vm1, %v552_v20  ;;  %v555_v25 = vadd.f32 %v2294_v21, %v547_v19  ;;  %v2304_v29 = vpop.f32.mrf.mxu0 }
  0xe8   : > { %v516_v26 = vpop.f32.mrf.mxu1 }
  0xe9   : > { %563 = vst.msk [vmem:[#allocation2 + $0x18] sm:$0xff] %vm229_vm1, %v555_v25  ;;  %v553_v28 = vadd.f32 %v545_v22, %v516_v26  ;;  %v701_v32 = vpop.f32.mrf.mxu0 }
  0xeb   : > { %561 = vst.msk [vmem:[#allocation2 + $0x8] sm:$0xff] %vm229_vm1, %v553_v28 }
  0xec   : > { %v731_v30 = vld [vmem:[#allocation2 + $0x10] sm:$0xff] }
  0xed   : > { %v739_v31 = vadd.f32 %v2303_v50, %v731_v30 }
  0xee   : > { %v729_v33 = vld [vmem:[#allocation2] sm:$0xff] }
  0xef   : > { %747 = vst.msk [vmem:[#allocation2 + $0x10] sm:$0xff] %vm229_vm1, %v739_v31  ;;  %v737_v34 = vadd.f32 %v729_v33, %v698_v23 }
  0xf0   : > { %v2297_v35 = vpop.f32.mrf.mxu1  ;;  %v732_v38 = vld [vmem:[#allocation2 + $0x18] sm:$0xff]  ;;  %v2307_v42 = vpop.f32.mrf.mxu0 }
  0xf1   : > { %745 = vst.msk [vmem:[#allocation2] sm:$0xff] %vm229_vm1, %v737_v34  ;;  %v558_v39 = vadd.f32 %v2297_v35, %v550_v37  ;;  %v740_v40 = vadd.f32 %v2304_v29, %v732_v38 }
  0xf2   : > { %v529_v43 = vpop.f32.mrf.mxu1  ;;  %v730_v45 = vld [vmem:[#allocation2 + $0x8] sm:$0xff]  ;;  %v714_v53 = vpop.f32.mrf.mxu0 }
  0xf3   : > { %566 = vst.msk [vmem:[#allocation2 + $0x30] sm:$0xff] %vm229_vm1, %v558_v39  ;;  %748 = vst.msk [vmem:[#allocation2 + $0x18] sm:$0xff] %vm229_vm1, %v740_v40  ;;  %v556_v46 = vadd.f32 %v548_v44, %v529_v43  ;;  %v738_v47 = vadd.f32 %v730_v45, %v701_v32 }
  0xf4   : > { %v2298_v48 = vpop.f32.mrf.mxu1  ;;  %v2308_v59 = vpop.f32.mrf.mxu0 }
  0xf5   : > { %564 = vst.msk [vmem:[#allocation2 + $0x20] sm:$0xff] %vm229_vm1, %v556_v46  ;;  %746 = vst.msk [vmem:[#allocation2 + $0x8] sm:$0xff] %vm229_vm1, %v738_v47  ;;  %v559_v52 = vadd.f32 %v2298_v48, %v551_v27 }
  0xf6   : > { %v532_v54 = vpop.f32.mrf.mxu1  ;;  %v866_v8 = vld [vmem:[#allocation2 + $0x10] sm:$0xff]  ;;  %v717_v4 = vpop.f32.mrf.mxu0 }
  0xf7   : > { %567 = vst.msk [vmem:[#allocation2 + $0x38] sm:$0xff] %vm229_vm1, %v559_v52  ;;  %v557_v55 = vadd.f32 %v549_v24, %v532_v54 }
  0xf8   : > { %v2313_v57 = vpop.f32.mrf.mxu1  ;;  %v864_v58 = vld [vmem:[#allocation2] sm:$0xff] }
  0xf9   : > { %565 = vst.msk [vmem:[#allocation2 + $0x28] sm:$0xff] %vm229_vm1, %v557_v55  ;;  %v874_v60 = vadd.f32 %v2313_v57, %v866_v8 }
  0xfa   : > { %v735_v61 = vld [vmem:[#allocation2 + $0x30] sm:$0xff]  ;;  %v833_v36 = vpop.f32.mrf.mxu1  ;;  %v867_v62 = vld [vmem:[#allocation2 + $0x18] sm:$0xff] }
  0xfb   : > { %v743_v63 = vadd.f32 %v2307_v42, %v735_v61  ;;  %882 = vst.msk [vmem:[#allocation2 + $0x10] sm:$0xff] %vm229_vm1, %v874_v60  ;;  %v872_v0 = vadd.f32 %v864_v58, %v833_v36 }
  0xfc   : > { %v733_v1 = vld [vmem:[#allocation2 + $0x20] sm:$0xff]  ;;  %v2314_v2 = vpop.f32.mrf.mxu1  ;;  %v865_v3 = vld [vmem:[#allocation2 + $0x8] sm:$0xff] }
  0xfd   : > { %751 = vst.msk [vmem:[#allocation2 + $0x30] sm:$0xff] %vm229_vm1, %v743_v63  ;;  %v741_v51 = vadd.f32 %v733_v1, %v714_v53  ;;  %880 = vst.msk [vmem:[#allocation2] sm:$0xff] %vm229_vm1, %v872_v0  ;;  %v875_v41 = vadd.f32 %v2314_v2, %v867_v62  ;;  %v2323_v9 = vpop.f32.mrf.mxu0 }
  0xfe   : > { %v736_v5 = vld [vmem:[#allocation2 + $0x38] sm:$0xff]  ;;  %v836_v6 = vpop.f32.mrf.mxu1 }
  0xff   : > { %749 = vst.msk [vmem:[#allocation2 + $0x20] sm:$0xff] %vm229_vm1, %v741_v51  ;;  %v744_v49 = vadd.f32 %v2308_v59, %v736_v5  ;;  %883 = vst.msk [vmem:[#allocation2 + $0x18] sm:$0xff] %vm229_vm1, %v875_v41  ;;  %v873_v7 = vadd.f32 %v865_v3, %v836_v6  ;;  %v1079_v12 = vpop.f32.mrf.mxu0 }
 0x100   : > { %v734_v10 = vld [vmem:[#allocation2 + $0x28] sm:$0xff]  ;;  %v2317_v11 = vpop.f32.mrf.mxu1 }
 0x101   : > { %752 = vst.msk [vmem:[#allocation2 + $0x38] sm:$0xff] %vm229_vm1, %v744_v49  ;;  %v742_v56 = vadd.f32 %v734_v10, %v717_v4  ;;  %881 = vst.msk [vmem:[#allocation2 + $0x8] sm:$0xff] %vm229_vm1, %v873_v7  ;;  %v2324_v16 = vpop.f32.mrf.mxu0 }
 0x102   : > { %v1112_v13 = vld [vmem:[#allocation2 + $0x10] sm:$0xff]  ;;  %v849_v14 = vpop.f32.mrf.mxu1 }
 0x103   : > { %750 = vst.msk [vmem:[#allocation2 + $0x28] sm:$0xff] %vm229_vm1, %v742_v56  ;;  %v1120_v15 = vadd.f32 %v2323_v9, %v1112_v13  ;;  %v1082_v21 = vpop.f32.mrf.mxu0 }
 0x104   : > { %v870_v17 = vld [vmem:[#allocation2 + $0x30] sm:$0xff]  ;;  %v1110_v18 = vld [vmem:[#allocation2] sm:$0xff]  ;;  %v2318_v19 = vpop.f32.mrf.mxu1 }
 0x105   : > { %v878_v50 = vadd.f32 %v2317_v11, %v870_v17  ;;  %1128 = vst.msk [vmem:[#allocation2 + $0x10] sm:$0xff] %vm229_vm1, %v1120_v15  ;;  %v1118_v20 = vadd.f32 %v1110_v18, %v1079_v12 }
 0x106   : > { %v868_v22 = vld [vmem:[#allocation2 + $0x20] sm:$0xff]  ;;  %v1113_v23 = vld [vmem:[#allocation2 + $0x18] sm:$0xff]  ;;  %v852_v28 = vpop.f32.mrf.mxu1 }
 0x107   : > { %886 = vst.msk [vmem:[#allocation2 + $0x30] sm:$0xff] %vm229_vm1, %v878_v50  ;;  %v876_v25 = vadd.f32 %v868_v22, %v849_v14  ;;  %1126 = vst.msk [vmem:[#allocation2] sm:$0xff] %vm229_vm1, %v1118_v20  ;;  %v1121_v26 = vadd.f32 %v2324_v16, %v1113_v23  ;;  %v2327_v33 = vpop.f32.mrf.mxu0 }
 0x108   : > { %v871_v29 = vld [vmem:[#allocation2 + $0x38] sm:$0xff]  ;;  %v1111_v30 = vld [vmem:[#allocation2 + $0x8] sm:$0xff]  ;;  %v2333_v34 = vpop.f32.mrf.mxu1 }
 0x109   : > { %884 = vst.msk [vmem:[#allocation2 + $0x20] sm:$0xff] %vm229_vm1, %v876_v25  ;;  %v879_v31 = vadd.f32 %v2318_v19, %v871_v29  ;;  %1129 = vst.msk [vmem:[#allocation2 + $0x18] sm:$0xff] %vm229_vm1, %v1121_v26  ;;  %v1119_v32 = vadd.f32 %v1111_v30, %v1082_v21  ;;  %v1095_v38 = vpop.f32.mrf.mxu0 }
 0x10a   : > { %v869_v35 = vld [vmem:[#allocation2 + $0x28] sm:$0xff]  ;;  %v1261_v39 = vpop.f32.mrf.mxu1 }
 0x10b   : > { %887 = vst.msk [vmem:[#allocation2 + $0x38] sm:$0xff] %vm229_vm1, %v879_v31  ;;  %v877_v37 = vadd.f32 %v869_v35, %v852_v28  ;;  %1127 = vst.msk [vmem:[#allocation2 + $0x8] sm:$0xff] %vm229_vm1, %v1119_v32  ;;  %v2328_v43 = vpop.f32.mrf.mxu0 }
 0x10c   : > { %v1294_v40 = vld [vmem:[#allocation2 + $0x10] sm:$0xff]  ;;  %v2334_v44 = vpop.f32.mrf.mxu1 }
 0x10d   : > { %885 = vst.msk [vmem:[#allocation2 + $0x28] sm:$0xff] %vm229_vm1, %v877_v37  ;;  %v1302_v42 = vadd.f32 %v2333_v34, %v1294_v40  ;;  %v1098_v27 = vpop.f32.mrf.mxu0 }
 0x10e   : > { %v1116_v45 = vld [vmem:[#allocation2 + $0x30] sm:$0xff]  ;;  %v1292_v46 = vld [vmem:[#allocation2] sm:$0xff]  ;;  %v1264_v52 = vpop.f32.mrf.mxu1 }
 0x10f   : > { %v1124_v47 = vadd.f32 %v2327_v33, %v1116_v45  ;;  %1310 = vst.msk [vmem:[#allocation2 + $0x10] sm:$0xff] %vm229_vm1, %v1302_v42  ;;  %v1300_v48 = vadd.f32 %v1292_v46, %v1261_v39  ;;  %v2343_v57 = vpop.f32.mrf.mxu0 }
 0x110   : > { %v1114_v53 = vld [vmem:[#allocation2 + $0x20] sm:$0xff]  ;;  %v1295_v54 = vld [vmem:[#allocation2 + $0x18] sm:$0xff]  ;;  %v2337_v55 = vpop.f32.mrf.mxu1 }
 0x111   : > { %1132 = vst.msk [vmem:[#allocation2 + $0x30] sm:$0xff] %vm229_vm1, %v1124_v47  ;;  %v1122_v24 = vadd.f32 %v1114_v53, %v1095_v38  ;;  %1308 = vst.msk [vmem:[#allocation2] sm:$0xff] %vm229_vm1, %v1300_v48  ;;  %v1303_v8 = vadd.f32 %v2334_v44, %v1295_v54  ;;  %v1396_v62 = vpop.f32.mrf.mxu0 }
 0x112   : > { %v1117_v58 = vld [vmem:[#allocation2 + $0x38] sm:$0xff]  ;;  %v1293_v59 = vld [vmem:[#allocation2 + $0x8] sm:$0xff]  ;;  %v1277_v36 = vpop.f32.mrf.mxu1 }
 0x113   : > { %1130 = vst.msk [vmem:[#allocation2 + $0x20] sm:$0xff] %vm229_vm1, %v1122_v24  ;;  %v1125_v60 = vadd.f32 %v2328_v43, %v1117_v58  ;;  %1311 = vst.msk [vmem:[#allocation2 + $0x18] sm:$0xff] %vm229_vm1, %v1303_v8  ;;  %v1301_v61 = vadd.f32 %v1293_v59, %v1264_v52  ;;  %v2344_v2 = vpop.f32.mrf.mxu0 }
 0x114   : > { %v1115_v63 = vld [vmem:[#allocation2 + $0x28] sm:$0xff]  ;;  %v2338_v1 = vpop.f32.mrf.mxu1 }
 0x115   : > { %1133 = vst.msk [vmem:[#allocation2 + $0x38] sm:$0xff] %vm229_vm1, %v1125_v60  ;;  %v1123_v0 = vadd.f32 %v1115_v63, %v1098_v27  ;;  %1309 = vst.msk [vmem:[#allocation2 + $0x8] sm:$0xff] %vm229_vm1, %v1301_v61  ;;  %v1399_v4 = vpop.f32.mrf.mxu0 }
 0x116   : > { %v1429_v3 = vld [vmem:[#allocation2 + $0x10] sm:$0xff]  ;;  %v1280_v7 = vpop.f32.mrf.mxu1 }
 0x117   : > { %1131 = vst.msk [vmem:[#allocation2 + $0x28] sm:$0xff] %vm229_vm1, %v1123_v0  ;;  %v1437_v51 = vadd.f32 %v2343_v57, %v1429_v3  ;;  %v2347_v9 = vpop.f32.mrf.mxu0  ;;  %v2847_v3 = vld [vmem:[%s2893_s2] ss:$0 sm:$0xff] }
 0x118   : > { %v1298_v41 = vld [vmem:[#allocation2 + $0x30] sm:$0xff]  ;;  %v1427_v5 = vld [vmem:[#allocation2] sm:$0xff]  ;;  %v2353_v13 = vpop.f32.mrf.mxu1 }
 0x119   : > { %v1306_v6 = vadd.f32 %v2337_v55, %v1298_v41  ;;  %1445 = vst.msk [vmem:[#allocation2 + $0x10] sm:$0xff] %vm229_vm1, %v1437_v51  ;;  %v1435_v49 = vadd.f32 %v1427_v5, %v1396_v62  ;;  %v1412_v16 = vpop.f32.mrf.mxu0 }
 0x11a   : > { %v1296_v10 = vld [vmem:[#allocation2 + $0x20] sm:$0xff]  ;;  %v1430_v11 = vld [vmem:[#allocation2 + $0x18] sm:$0xff]  ;;  %v1642_v19 = vpop.f32.mrf.mxu1 }
 0x11b   : > { %1314 = vst.msk [vmem:[#allocation2 + $0x30] sm:$0xff] %vm229_vm1, %v1306_v6  ;;  %v1304_v56 = vadd.f32 %v1296_v10, %v1277_v36  ;;  %1443 = vst.msk [vmem:[#allocation2] sm:$0xff] %vm229_vm1, %v1435_v49  ;;  %v1438_v12 = vadd.f32 %v2344_v2, %v1430_v11  ;;  %v2348_v23 = vpop.f32.mrf.mxu0  ;;  %v2215_v6 = vld [vmem:[%s2894_s3] ss:$0 sm:$0xff] }
 0x11c   : > { %v1299_v14 = vld [vmem:[#allocation2 + $0x38] sm:$0xff]  ;;  %v1428_v15 = vld [vmem:[#allocation2 + $0x8] sm:$0xff]  ;;  %v2354_v21 = vpop.f32.mrf.mxu1 }
 0x11d   : > { %1312 = vst.msk [vmem:[#allocation2 + $0x20] sm:$0xff] %vm229_vm1, %v1304_v56  ;;  %v1307_v17 = vadd.f32 %v2338_v1, %v1299_v14  ;;  %1446 = vst.msk [vmem:[#allocation2 + $0x18] sm:$0xff] %vm229_vm1, %v1438_v12  ;;  %v1436_v18 = vadd.f32 %v1428_v15, %v1399_v4  ;;  %v1415_v33 = vpop.f32.mrf.mxu0 }
 0x11e   : > { %v1297_v50 = vld [vmem:[#allocation2 + $0x28] sm:$0xff]  ;;  %v1645_v29 = vpop.f32.mrf.mxu1 }
 0x11f   : > { %1315 = vst.msk [vmem:[#allocation2 + $0x38] sm:$0xff] %vm229_vm1, %v1307_v17  ;;  %v1305_v20 = vadd.f32 %v1297_v50, %v1280_v7  ;;  %1444 = vst.msk [vmem:[#allocation2 + $0x8] sm:$0xff] %vm229_vm1, %v1436_v18 }
 0x120   : > { %v1675_v22 = vld [vmem:[#allocation2 + $0x10] sm:$0xff] }
 0x121   : > { %1313 = vst.msk [vmem:[#allocation2 + $0x28] sm:$0xff] %vm229_vm1, %v1305_v20  ;;  %v1683_v25 = vadd.f32 %v2353_v13, %v1675_v22 }
 0x122   : > { %v1433_v26 = vld [vmem:[#allocation2 + $0x30] sm:$0xff]  ;;  %v1673_v28 = vld [vmem:[#allocation2] sm:$0xff]  ;;  %v2357_v40 = vpop.f32.mrf.mxu1  ;;  %v2363_v42 = vpop.f32.mrf.mxu0 }
 0x123   : > { %v1441_v30 = vadd.f32 %v2347_v9, %v1433_v26  ;;  %1691 = vst.msk [vmem:[#allocation2 + $0x10] sm:$0xff] %vm229_vm1, %v1683_v25  ;;  %v1681_v31 = vadd.f32 %v1673_v28, %v1642_v19 }
 0x124   : > { %v1431_v32 = vld [vmem:[#allocation2 + $0x20] sm:$0xff]  ;;  %v1676_v34 = vld [vmem:[#allocation2 + $0x18] sm:$0xff]  ;;  %v1824_v46 = vpop.f32.mrf.mxu0  ;;  %v1658_v48 = vpop.f32.mrf.mxu1 }
 0x125   : > { %1449 = vst.msk [vmem:[#allocation2 + $0x30] sm:$0xff] %vm229_vm1, %v1441_v30  ;;  %v1439_v35 = vadd.f32 %v1431_v32, %v1412_v16  ;;  %1689 = vst.msk [vmem:[#allocation2] sm:$0xff] %vm229_vm1, %v1681_v31  ;;  %v1684_v37 = vadd.f32 %v2354_v21, %v1676_v34 }
 0x126   : > { %v1434_v38 = vld [vmem:[#allocation2 + $0x38] sm:$0xff]  ;;  %v1674_v39 = vld [vmem:[#allocation2 + $0x8] sm:$0xff]  ;;  %v2364_v52 = vpop.f32.mrf.mxu0  ;;  %v2358_v59 = vpop.f32.mrf.mxu1 }
 0x127   : > { %1447 = vst.msk [vmem:[#allocation2 + $0x20] sm:$0xff] %vm229_vm1, %v1439_v35  ;;  %v1442_v43 = vadd.f32 %v2348_v23, %v1434_v38  ;;  %1692 = vst.msk [vmem:[#allocation2 + $0x18] sm:$0xff] %vm229_vm1, %v1684_v37  ;;  %v1682_v44 = vadd.f32 %v1674_v39, %v1645_v29 }
 0x128   : > { %v1432_v45 = vld [vmem:[#allocation2 + $0x28] sm:$0xff]  ;;  %v1827_v8 = vpop.f32.mrf.mxu0  ;;  %v1661_v51 = vpop.f32.mrf.mxu1 }
 0x129   : > { %1450 = vst.msk [vmem:[#allocation2 + $0x38] sm:$0xff] %vm229_vm1, %v1442_v43  ;;  %v1440_v47 = vadd.f32 %v1432_v45, %v1415_v33  ;;  %1690 = vst.msk [vmem:[#allocation2 + $0x8] sm:$0xff] %vm229_vm1, %v1682_v44 }
 0x12a   : > { %v1857_v27 = vld [vmem:[#allocation2 + $0x10] sm:$0xff]  ;;  %v2367_v0 = vpop.f32.mrf.mxu0 }
 0x12b   : > { %1448 = vst.msk [vmem:[#allocation2 + $0x28] sm:$0xff] %vm229_vm1, %v1440_v47  ;;  %v1865_v53 = vadd.f32 %v2363_v42, %v1857_v27 }
 0x12c   : > { %v1679_v54 = vld [vmem:[#allocation2 + $0x30] sm:$0xff]  ;;  %v1855_v24 = vld [vmem:[#allocation2] sm:$0xff]  ;;  %v1840_v49 = vpop.f32.mrf.mxu0 }
 0x12d   : > { %v1687_v55 = vadd.f32 %v2357_v40, %v1679_v54  ;;  %1873 = vst.msk [vmem:[#allocation2 + $0x10] sm:$0xff] %vm229_vm1, %v1865_v53  ;;  %v1863_v57 = vadd.f32 %v1855_v24, %v1824_v46 }
 0x12e   : > { %v1677_v58 = vld [vmem:[#allocation2 + $0x20] sm:$0xff]  ;;  %v1858_v60 = vld [vmem:[#allocation2 + $0x18] sm:$0xff]  ;;  %v2368_v15 = vpop.f32.mrf.mxu0 }
 0x12f   : > { %1695 = vst.msk [vmem:[#allocation2 + $0x30] sm:$0xff] %vm229_vm1, %v1687_v55  ;;  %v1685_v61 = vadd.f32 %v1677_v58, %v1658_v48  ;;  %1871 = vst.msk [vmem:[#allocation2] sm:$0xff] %vm229_vm1, %v1863_v57  ;;  %v1866_v36 = vadd.f32 %v2364_v52, %v1858_v60 }
 0x130   : > { %v1680_v62 = vld [vmem:[#allocation2 + $0x38] sm:$0xff]  ;;  %v1856_v63 = vld [vmem:[#allocation2 + $0x8] sm:$0xff]  ;;  %v1843_v28 = vpop.f32.mrf.mxu0 }
 0x131   : > { %1693 = vst.msk [vmem:[#allocation2 + $0x20] sm:$0xff] %vm229_vm1, %v1685_v61  ;;  %v1688_v1 = vadd.f32 %v2358_v59, %v1680_v62  ;;  %1874 = vst.msk [vmem:[#allocation2 + $0x18] sm:$0xff] %vm229_vm1, %v1866_v36  ;;  %v1864_v2 = vadd.f32 %v1856_v63, %v1827_v8 }
 0x132   : > { %v1678_v4 = vld [vmem:[#allocation2 + $0x28] sm:$0xff] }
 0x133   : > { %1696 = vst.msk [vmem:[#allocation2 + $0x38] sm:$0xff] %vm229_vm1, %v1688_v1  ;;  %v1686_v41 = vadd.f32 %v1678_v4, %v1661_v51  ;;  %1872 = vst.msk [vmem:[#allocation2 + $0x8] sm:$0xff] %vm229_vm1, %v1864_v2 }
 0x134   : > { %v1881_v5 = vld [vmem:[#allocation2 + $0x10] sm:$0xff] }
 0x135   : > { %v1896_v7 = vmul.f32 %v2847_v3, %v1881_v5  ;;  %1694 = vst.msk [vmem:[#allocation2 + $0x28] sm:$0xff] %vm229_vm1, %v1686_v41 }
 0x136   : > { %v1879_v9 = vld [vmem:[#allocation2] sm:$0xff]  ;;  %v1861_v10 = vld [vmem:[#allocation2 + $0x30] sm:$0xff] }
 0x137   : > { %v1911_v11 = vadd.f32 %v2215_v6, %v1896_v7  ;;  %v1894_v56 = vmul.f32 %v2847_v3, %v1879_v9  ;;  %v1869_v12 = vadd.f32 %v2367_v0, %v1861_v10 }
 0x138   : > { %v1882_v13 = vld [vmem:[#allocation2 + $0x18] sm:$0xff]  ;;  %v1859_v14 = vld [vmem:[#allocation2 + $0x20] sm:$0xff] }
 0x139   : > { %v1919_v16 = vmax.f32 %v1911_v11, 0.0  ;;  %v1909_v17 = vadd.f32 %v2215_v6, %v1894_v56  ;;  %v1897_v18 = vmul.f32 %v2847_v3, %v1882_v13  ;;  %1877 = vst.msk [vmem:[#allocation2 + $0x30] sm:$0xff] %vm229_vm1, %v1869_v12  ;;  %v1867_v19 = vadd.f32 %v1859_v14, %v1840_v49 }
 0x13a   : > { %v1880_v50 = vld [vmem:[#allocation2 + $0x8] sm:$0xff]  ;;  %v1862_v20 = vld [vmem:[#allocation2 + $0x38] sm:$0xff] }
 0x13b   : > { %v2228_v21 = vpack.c.bf16 %v1919_v16, %v1919_v16  ;;  %v1917_v22 = vmax.f32 %v1909_v17, 0.0  ;;  %v1912_v23 = vadd.f32 %v2215_v6, %v1897_v18  ;;  %v1895_v25 = vmul.f32 %v2847_v3, %v1880_v50  ;;  %1875 = vst.msk [vmem:[#allocation2 + $0x20] sm:$0xff] %vm229_vm1, %v1867_v19 }
 0x13c   : > { %v1870_v26 = vadd.f32 %v2368_v15, %v1862_v20  ;;  %v1860_v29 = vld [vmem:[#allocation2 + $0x28] sm:$0xff] }
 0x13d   : > { %1960 = vst.msk [vmem:[%s2862_s23 + $0x8] sm:$0xf] %vm1957_vm8, %v2228_v21  ;;  %v2226_v30 = vpack.c.bf16 %v1917_v22, %v1917_v22  ;;  %v1920_v31 = vmax.f32 %v1912_v23, 0.0  ;;  %v1910_v32 = vadd.f32 %v2215_v6, %v1895_v25  ;;  %v1868_v33 = vadd.f32 %v1860_v29, %v1843_v28 }
 0x13e   : > { %1878 = vst.msk [vmem:[#allocation2 + $0x38] sm:$0xff] %vm229_vm1, %v1870_v26 }
 0x13f   : > { %1958 = vst.msk [vmem:[%s2862_s23] sm:$0xf] %vm1957_vm8, %v2226_v30  ;;  %v2229_v34 = vpack.c.bf16 %v1920_v31, %v1920_v31  ;;  %v1918_v35 = vmax.f32 %v1910_v32, 0.0 }
 0x140   : > { %1876 = vst.msk [vmem:[#allocation2 + $0x28] sm:$0xff] %vm229_vm1, %v1868_v33  ;;  %v1885_v37 = vld [vmem:[#allocation2 + $0x30] sm:$0xff] }
 0x141   : > { %1961 = vst.msk [vmem:[%s2862_s23 + $0xc] sm:$0xf] %vm1957_vm8, %v2229_v34  ;;  %v2227_v38 = vpack.c.bf16 %v1918_v35, %v1918_v35  ;;  %v1900_v39 = vmul.f32 %v2847_v3, %v1885_v37 }
 0x142   : > { %v1883_v40 = vld [vmem:[#allocation2 + $0x20] sm:$0xff] }
 0x143   : > { %1959 = vst.msk [vmem:[%s2862_s23 + $0x4] sm:$0xf] %vm1957_vm8, %v2227_v38  ;;  %v1915_v42 = vadd.f32 %v2215_v6, %v1900_v39  ;;  %v1898_v43 = vmul.f32 %v2847_v3, %v1883_v40 }
 0x145   : > { %v1923_v44 = vmax.f32 %v1915_v42, 0.0  ;;  %v1913_v45 = vadd.f32 %v2215_v6, %v1898_v43  ;;  %v1886_v46 = vld [vmem:[#allocation2 + $0x38] sm:$0xff] }
 0x146   : > { %v1901_v47 = vmul.f32 %v2847_v3, %v1886_v46 }
 0x147   : > { %v1884_v48 = vld [vmem:[#allocation2 + $0x28] sm:$0xff]  ;;  %v2232_v27 = vpack.c.bf16 %v1923_v44, %v1923_v44  ;;  %v1921_v52 = vmax.f32 %v1913_v45, 0.0 }
 0x148   : > { %v1899_v53 = vmul.f32 %v2847_v3, %v1884_v48  ;;  %v1916_v54 = vadd.f32 %v2215_v6, %v1901_v47 }
 0x149   : > { %1964 = vst.msk [vmem:[%s2862_s23 + $0x18] sm:$0xf] %vm1957_vm8, %v2232_v27  ;;  %v2230_v24 = vpack.c.bf16 %v1921_v52, %v1921_v52 }
 0x14a   : > { %v1914_v8 = vadd.f32 %v2215_v6, %v1899_v53  ;;  %v1924_v55 = vmax.f32 %v1916_v54, 0.0 }
 0x14b   : > { %1962 = vst.msk [vmem:[%s2862_s23 + $0x10] sm:$0xf] %vm1957_vm8, %v2230_v24 }
 0x14c   : > { %v1922_v57 = vmax.f32 %v1914_v8, 0.0  ;;  %v2233_v58 = vpack.c.bf16 %v1924_v55, %v1924_v55 }
 0x14e   : > { %v2231_v59 = vpack.c.bf16 %v1922_v57, %v1922_v57  ;;  %1965 = vst.msk [vmem:[%s2862_s23 + $0x1c] sm:$0xf] %vm1957_vm8, %v2233_v58 }
 0x150   : > { %1963 = vst.msk [vmem:[%s2862_s23 + $0x14] sm:$0xf] %vm1957_vm8, %v2231_v59 }
 0x151 PF: > { %s14_s15 = sadd.s32 1, %s2408_s15  }
 0x152   : > { %p11_p5 = scmp.ge.s32.totalorder %s14_s15, 4  }
 0x154   :  { %13 = sbr.rel (!%p11_p5) target bundleno = 1 (0x1), region = 76 }

// kernel: _lambda_.7
= control target key start
LH: loop header
LB: loop body
LE: loop exit
PB: predicated region body
PF: predicated region fallthrough
CT: control target
= control target key end

     0   :  { %s2684_s21 = smov 0   ;;  %s3185_s0 = inlined_call_operand.vmem [shape: bf16[2,10,10,8], index: 0, kind: input, shape index: {}]   ;;  %s3186_s1 = inlined_call_operand.vmem [shape: bf16[9,8,8], index: 1, kind: input, shape index: {}]   ;;  %s3187_s2 = inlined_call_operand.vmem [shape: bf16[128,8], index: 2, kind: input, shape index: {}]   ;;  %s3188_s3 = inlined_call_operand.vmem [shape: f32[1,8], index: 3, kind: input, shape index: {}]   ;;  %s3189_s4 = inlined_call_operand.vmem [shape: f32[1,8], index: 4, kind: input, shape index: {}]   ;;  %s3190_s5 = inlined_call_operand.vmem [shape: bf16[128,8], index: 5, kind: output, shape index: {0}]   ;;  %s3191_s6 = inlined_call_operand.vmem [shape: bf16[128,8], index: 6, kind: output, shape index: {1}]  }
   0x1 LB: > { %s2690_s22 = sadd.s32 4294967295, %s2647_s21   ;;  %p2226_p0 = scmp.ge.s32.totalorder %s2647_s21, 1  ;;  %s2647_s21 = sphi %s2684_s21, %s17_s21  }
   0x2   : > { %p226_p1 = scmp.lt.s32.totalorder %s2647_s21, 3 }
   0x4   : > { %p227_p2 = pnand %p2226_p0, %p226_p1 }
   0x5   : > { %p266_p3 = scmp.lt.s32.totalorder (!%p227_p2), %s2690_s22, 1  ;;  %s2228_s24 = sshll.u32 (!%p227_p2), %s2690_s22, 3 }
   0x6   : > { %230 = sbr.rel (%p227_p2) target bundleno = 339 (0x153), region = 40  ;;  %p272_p4 = scmp.lt.s32.totalorder (!%p227_p2), %s2228_s24, 15 }
   0xb   : > { %v298_v0 = vld [vmem:[%s3186_s1] sm:$0xf]  ;;  %vm332_vm0 = vcmask 1043456   ;;  %v2242_v2 = vld [vmem:[%s3186_s1 + $0x4] sm:$0xf]  ;;  %s267_s27 = scalar_select %p266_p3, %s2690_s22, 1 }
   0xc   : > { %2611 = vmatprep.subr.msk.bf16.mxu1 %vm332_vm0, %v298_v0  ;;  %2610 = vmatprep.subr.msk.bf16.mxu0 %vm332_vm0, %v298_v0  ;;  %v334_v1 = vsel %vm332_vm0, %v298_v0, 0  ;;  %v2259_v3 = vld [vmem:[%s3186_s1 + $0x8] sm:$0xf]  ;;  %v2276_v4 = vld [vmem:[%s3186_s1 + $0xc] sm:$0xf]  ;;  %vm319_vm1 = vcmask 64512  }
   0xd   : > { %2609 = vmatpush3.bf16.msra.mxu1 %v334_v1  ;;  %2519 = vmatpush3.bf16.msra.mxu0 %v334_v1  ;;  %v2301_v5 = vld [vmem:[%s3186_s1 + $0x10] sm:$0xf]  ;;  %s2620_s10 = smul.u32 80, %s267_s27  ;;  %v567_v6 = vsel %vm332_vm0, %v2242_v2, 0  ;;  %vm425_vm2 = vsmask.f32 3328 }
   0xe   : > { %2612 = vmatprep.subr.msk.bf16.mxu1 %vm332_vm0, %v2242_v2  ;;  %2613 = vmatprep.subr.msk.bf16.mxu0 %vm332_vm0, %v2259_v3  ;;  %vm426_vm3 = vsmask.f32 7440  ;;  %v752_v7 = vsel %vm332_vm0, %v2259_v3, 0  ;;  %v2724_v8 = vsel %vm332_vm0, %v2276_v4, 0  ;;  %v2727_v9 = vsel %vm332_vm0, %v2301_v5, 0  ;;  %s3197_s24 = smov (!%p272_p4, %s2228_s24), 15 }
   0xf   : > { %s2720_s13 = scalar_lea.vmem %s3185_s0, %s2620_s10  ;;  %vm690_vm4 = vcmask 1042432   ;;  %vm691_vm5 = vcmask 1046532   ;;  %vm2750_vm6 = vmor %vm425_vm2, %vm426_vm3  ;;  %s3085_s22 = sshll.u32 %s3197_s24, 2  ;;  %vm2033_vm8 = vcmask 60416  }
  0x10   : > { %v2629_v10 = vld [vmem:[%s2720_s13 + $0x20] ss:$8 sps:$4 sm:$0xff]   ;;  %v2631_v12 = vld [vmem:[%s2720_s13 + $0x30] ss:$8 sps:$4 sm:$0xff]   ;;  %v410_v15 = vld [vmem:[%s2720_s13 + $0x4] sm:$0x1]  ;;  %s3094_s27 = scalar_lea.vmem %s3187_s2, %s3085_s22  ;;  %s3115_s8 = scalar_lea.vmem %s3190_s5, %s3085_s22 }
  0x11   : > { %v2630_v11 = vld [vmem:[%s2720_s13] ss:$8 sps:$4 sm:$0xff]   ;;  %2524 = vmatprep.mubr.msk.bf16.mxu1 %vm319_vm1, %v2629_v10  ;;  %v2632_v13 = vld [vmem:[%s2720_s13 + $0x10] ss:$8 sps:$4 sm:$0xff]   ;;  %v412_v17 = vld [vmem:[%s2720_s13 + $0xc] sm:$0x1] }
  0x12   : > { %2520 = vmatprep.mubr.msk.bf16.mxu0 %vm319_vm1, %v2630_v11  ;;  %2525 = vmatmul.mubr.msk.bf16.vlgmr.msra.gmra.mxu1 %vm319_vm1, %v2631_v12  ;;  %v409_v14 = vld [vmem:[%s2720_s13] sm:$0xf]  ;;  %v411_v16 = vld [vmem:[%s2720_s13 + $0x8] sm:$0xf]  ;;  %v438_v20 = vshll.u32 %v410_v15, 16  ;;  %v452_v23 = vshll.u32 %v412_v17, 16  ;;  %vm2759_vm7 = vmor %vm690_vm4, %vm691_vm5 }
  0x13   : > { %2521 = vmatmul.mubr.msk.bf16.vlgmr.msra.gmra.mxu0 %vm319_vm1, %v2632_v13  ;;  %2529 = vmatpush3.bf16.msra.mxu1 %v567_v6  ;;  %v429_v18 = vshrl.u32 %v409_v14, 16  ;;  %v432_v19 = vshll.u32 %v409_v14, 16  ;;  %v443_v21 = vshrl.u32 %v411_v16, 16  ;;  %v446_v22 = vshll.u32 %v411_v16, 16  ;;  %v413_v24 = vld [vmem:[%s2720_s13 + $0x10] sm:$0xf] }
  0x14   : > { %v414_v25 = vld [vmem:[%s2720_s13 + $0x14] sm:$0x1]  ;;  %2539 = vmatpush3.bf16.msra.mxu0 %v752_v7  ;;  %2614 = vmatprep.subr.msk.bf16.mxu1 %vm332_vm0, %v2276_v4  ;;  %v440_v28 = vrot.slane %v438_v20, 5  ;;  %v415_v30 = vld [vmem:[%s2720_s13 + $0x18] sm:$0xf]  ;;  %v454_v32 = vrot.slane %v452_v23, 5 }
  0x15   : > { %v431_v26 = vrot.slane %v429_v18, 4  ;;  %v434_v27 = vrot.slane %v432_v19, 5  ;;  %v445_v29 = vrot.slane %v443_v21, 4  ;;  %2615 = vmatprep.subr.msk.bf16.mxu0 %vm332_vm0, %v2301_v5  ;;  %v448_v31 = vrot.slane %v446_v22, 5  ;;  %v416_v33 = vld [vmem:[%s2720_s13 + $0x1c] sm:$0x1] }
  0x16   : > { %v457_v34 = vshrl.u32 %v413_v24, 16  ;;  %v460_v35 = vshll.u32 %v413_v24, 16  ;;  %v466_v37 = vshll.u32 %v414_v25, 16  ;;  %v471_v38 = vshrl.u32 %v415_v30, 16  ;;  %v658_v40 = vld [vmem:[%s2720_s13] sm:$0xe] }
  0x17   : > { %v435_v36 = vor.u32 %v434_v27, %v431_v26  ;;  %v474_v39 = vshll.u32 %v415_v30, 16  ;;  %v449_v42 = vor.u32 %v448_v31, %v445_v29  ;;  %v480_v45 = vshll.u32 %v416_v33, 16  ;;  %v659_v46 = vld [vmem:[%s2720_s13 + $0x4] sm:$0x1]  ;;  %v660_v51 = vld [vmem:[%s2720_s13 + $0x8] sm:$0xe] }
  0x18   : > { %v459_v43 = vrot.slane %v457_v34, 4  ;;  %v462_v44 = vrot.slane %v460_v35, 5  ;;  %v468_v48 = vrot.slane %v466_v37, 5  ;;  %v473_v49 = vrot.slane %v471_v38, 4  ;;  %v661_v55 = vld [vmem:[%s2720_s13 + $0xc] sm:$0x1] }
  0x19   : > { %v436_v47 = vrot.slane %v435_v36, 4  ;;  %v476_v50 = vrot.slane %v474_v39, 5  ;;  %v450_v52 = vrot.slane %v449_v42, 4  ;;  %v482_v54 = vrot.slane %v480_v45, 5  ;;  %v662_v62 = vld [vmem:[%s2720_s13 + $0x10] sm:$0xe] }
  0x1a   : > { %v463_v53 = vor.u32 %v462_v44, %v459_v43  ;;  %v2251_v57 = vrot.slane %v658_v40, 9  ;;  %v695_v60 = vrot.slane %v659_v46, 5  ;;  %v2252_v61 = vrot.slane %v660_v51, 9  ;;  %v663_v63 = vld [vmem:[%s2720_s13 + $0x14] sm:$0x1] }
  0x1b   : > { %v441_v58 = vsel %vm2750_vm6, %v436_v47, %v440_v28  ;;  %v477_v59 = vor.u32 %v476_v50, %v473_v49  ;;  %v455_v0 = vsel %vm2750_vm6, %v450_v52, %v454_v32  ;;  %v699_v2 = vrot.slane %v661_v55, 5  ;;  %v664_v3 = vld [vmem:[%s2720_s13 + $0x18] sm:$0xe]  ;;  %v665_v4 = vld [vmem:[%s2720_s13 + $0x1c] sm:$0x1] }
  0x1c   : > { %v464_v1 = vrot.slane %v463_v53, 4  ;;  %v2243_v5 = vcombine.low %v441_v58, %v455_v0  ;;  %v696_v7 = vsel %vm2759_vm7, %v2251_v57, %v695_v60  ;;  %v2253_v10 = vrot.slane %v662_v62, 9  ;;  %v417_v11 = vld [vmem:[%s2720_s13 + $0x20] sm:$0xf]  ;;  %v418_v12 = vld [vmem:[%s2720_s13 + $0x24] sm:$0x1] }
  0x1d   : > { %v478_v6 = vrot.slane %v477_v59, 4  ;;  %v700_v14 = vsel %vm2759_vm7, %v2252_v61, %v699_v2  ;;  %v703_v15 = vrot.slane %v663_v63, 5  ;;  %v2254_v16 = vrot.slane %v664_v3, 9  ;;  %v419_v17 = vld [vmem:[%s2720_s13 + $0x28] sm:$0xf] }
  0x1e   : > { %v469_v13 = vsel %vm2750_vm6, %v464_v1, %v468_v48  ;;  %2530 = vmatprep.mubr.msk.bf16.mxu1 %vm319_vm1, %v2243_v5  ;;  %v2260_v19 = vcombine.low %v696_v7, %v700_v14  ;;  %v707_v20 = vrot.slane %v665_v4, 5  ;;  %v420_v21 = vld [vmem:[%s2720_s13 + $0x2c] sm:$0x1]  ;;  %v485_v22 = vshrl.u32 %v417_v11, 16  ;;  %v421_v23 = vld [vmem:[%s2720_s13 + $0x30] sm:$0xf] }
  0x1f   : > { %v483_v18 = vsel %vm2750_vm6, %v478_v6, %v482_v54  ;;  %v2788_v24 = vld [vmem:[%s3186_s1 + $0x14] sm:$0xf]  ;;  %v704_v26 = vsel %vm2759_vm7, %v2253_v10, %v703_v15  ;;  %v488_v27 = vshll.u32 %v417_v11, 16  ;;  %v494_v28 = vshll.u32 %v418_v12, 16  ;;  %v423_v30 = vld [vmem:[%s2720_s13 + $0x38] sm:$0xf] }
  0x20   : > { %v2244_v25 = vcombine.low %v469_v13, %v483_v18  ;;  %v422_v29 = vld [vmem:[%s2720_s13 + $0x34] sm:$0x1]  ;;  %2540 = vmatprep.mubr.msk.bf16.mxu0 %vm319_vm1, %v2260_v19  ;;  %v708_v31 = vsel %vm2759_vm7, %v2254_v16, %v707_v20  ;;  %v487_v32 = vrot.slane %v485_v22, 4  ;;  %v499_v33 = vshrl.u32 %v419_v17, 16  ;;  %v424_v35 = vld [vmem:[%s2720_s13 + $0x3c] sm:$0x1] }
  0x21   : > { %v502_v34 = vshll.u32 %v419_v17, 16  ;;  %v2801_v36 = vld [vmem:[%s3186_s1 + $0x18] sm:$0xf]  ;;  %v2261_v37 = vcombine.low %v704_v26, %v708_v31  ;;  %v490_v38 = vrot.slane %v488_v27, 5  ;;  %v496_v39 = vrot.slane %v494_v28, 5 }
  0x22   : > { %2531 = vmatmul.mubr.msk.bf16.vlgmr.msra.gmra.mxu1 %vm319_vm1, %v2244_v25  ;;  %v508_v40 = vshll.u32 %v420_v21, 16  ;;  %v666_v42 = vld [vmem:[%s2720_s13 + $0x20] sm:$0xe]  ;;  %v501_v43 = vrot.slane %v499_v33, 4  ;;  %v513_v45 = vshrl.u32 %v421_v23, 16  ;;  %v516_v46 = vshll.u32 %v421_v23, 16 }
  0x23   : > { %2549 = vmatpush3.bf16.msra.mxu1 %v2724_v8  ;;  %v504_v44 = vrot.slane %v502_v34, 5  ;;  %v667_v47 = vld [vmem:[%s2720_s13 + $0x24] sm:$0x1]  ;;  %v668_v48 = vld [vmem:[%s2720_s13 + $0x28] sm:$0xe]  ;;  %2541 = vmatmul.mubr.msk.bf16.vlgmr.msra.gmra.mxu0 %vm319_vm1, %v2261_v37  ;;  %v491_v49 = vor.u32 %v490_v38, %v487_v32  ;;  %v522_v51 = vshll.u32 %v422_v29, 16 }
  0x24   : > { %v510_v50 = vrot.slane %v508_v40, 5  ;;  %v527_v52 = vshrl.u32 %v423_v30, 16  ;;  %v669_v53 = vld [vmem:[%s2720_s13 + $0x2c] sm:$0x1]  ;;  %2616 = vmatprep.subr.msk.bf16.mxu1 %vm332_vm0, %v2788_v24  ;;  %v515_v8 = vrot.slane %v513_v45, 4  ;;  %v518_v55 = vrot.slane %v516_v46, 5  ;;  %2559 = vmatpush3.bf16.msra.mxu0 %v2727_v9 }
  0x25   : > { %v505_v54 = vor.u32 %v504_v44, %v501_v43  ;;  %v530_v57 = vshll.u32 %v423_v30, 16  ;;  %v670_v58 = vld [vmem:[%s2720_s13 + $0x30] sm:$0xe]  ;;  %v492_v59 = vrot.slane %v491_v49, 4  ;;  %v524_v60 = vrot.slane %v522_v51, 5  ;;  %2617 = vmatprep.subr.msk.bf16.mxu0 %vm332_vm0, %v2801_v36 }
  0x26   : > { %v529_v61 = vrot.slane %v527_v52, 4  ;;  %v536_v62 = vshll.u32 %v424_v35, 16  ;;  %v671_v63 = vld [vmem:[%s2720_s13 + $0x34] sm:$0x1]  ;;  %v519_v1 = vor.u32 %v518_v55, %v515_v8  ;;  %v2255_v3 = vrot.slane %v666_v42, 9 }
  0x27   : > { %v506_v0 = vrot.slane %v505_v54, 4  ;;  %v532_v2 = vrot.slane %v530_v57, 5  ;;  %v672_v4 = vld [vmem:[%s2720_s13 + $0x38] sm:$0xe]  ;;  %v497_v5 = vsel %vm2750_vm6, %v492_v59, %v496_v39  ;;  %v711_v7 = vrot.slane %v667_v47, 5 }
  0x28   : > { %v538_v6 = vrot.slane %v536_v62, 5  ;;  %v2256_v9 = vrot.slane %v668_v48, 9  ;;  %v673_v10 = vld [vmem:[%s2720_s13 + $0x3c] sm:$0x1]  ;;  %v520_v12 = vrot.slane %v519_v1, 4  ;;  %v715_v14 = vrot.slane %v669_v53, 5 }
  0x29   : > { %v511_v11 = vsel %vm2750_vm6, %v506_v0, %v510_v50  ;;  %v533_v13 = vor.u32 %v532_v2, %v529_v61  ;;  %v712_v16 = vsel %vm2759_vm7, %v2255_v3, %v711_v7  ;;  %v2257_v17 = vrot.slane %v670_v58, 9  ;;  %v2835_v27 = vld [vmem:[%s3186_s1 + $0x1c] sm:$0xf]  ;;  %v2633_v29 = vld [vmem:[%s2720_s13 + $0x8] ss:$8 sps:$4 sm:$0xff]  }
  0x2a   : > { %v2245_v15 = vcombine.low %v497_v5, %v511_v11  ;;  %v719_v18 = vrot.slane %v671_v63, 5  ;;  %v525_v19 = vsel %vm2750_vm6, %v520_v12, %v524_v60  ;;  %v716_v21 = vsel %vm2759_vm7, %v2256_v9, %v715_v14  ;;  %v2285_v30 = vld [vmem:[%s2720_s13 + $0x8] sm:$0xf]  ;;  %v2286_v31 = vld [vmem:[%s2720_s13 + $0xc] sm:$0x1] }
  0x2b   : > { %v534_v20 = vrot.slane %v533_v13, 4  ;;  %v2258_v22 = vrot.slane %v672_v4, 9  ;;  %v2262_v23 = vcombine.low %v712_v16, %v716_v21  ;;  %v723_v26 = vrot.slane %v673_v10, 5  ;;  %v2287_v34 = vld [vmem:[%s2720_s13 + $0x10] sm:$0xf] }
  0x2c   : > { %2534 = vmatprep.mubr.msk.bf16.mxu1 %vm319_vm1, %v2245_v15  ;;  %v720_v25 = vsel %vm2759_vm7, %v2257_v17, %v719_v18  ;;  %v2288_v35 = vld [vmem:[%s2720_s13 + $0x14] sm:$0x1]  ;;  %v995_v37 = vshrl.u32 %v2285_v30, 16  ;;  %v998_v38 = vshll.u32 %v2285_v30, 16  ;;  %v1004_v40 = vshll.u32 %v2286_v31, 16 }
  0x2d   : > { %v539_v28 = vsel %vm2750_vm6, %v534_v20, %v538_v6  ;;  %2544 = vmatprep.mubr.msk.bf16.mxu0 %vm319_vm1, %v2262_v23  ;;  %v724_v33 = vsel %vm2759_vm7, %v2258_v22, %v723_v26  ;;  %v1009_v42 = vshrl.u32 %v2287_v34, 16  ;;  %v1012_v43 = vshll.u32 %v2287_v34, 16  ;;  %v2634_v52 = vld [vmem:[%s2720_s13 + $0x18] ss:$8 sps:$4 sm:$0xff]   ;;  %v2290_v55 = vld [vmem:[%s2720_s13 + $0x1c] sm:$0x1] }
  0x2e   : > { %v2246_v32 = vcombine.low %v525_v19, %v539_v28  ;;  %v2263_v39 = vcombine.low %v720_v25, %v724_v33  ;;  %v997_v44 = vrot.slane %v995_v37, 4  ;;  %v1000_v45 = vrot.slane %v998_v38, 5  ;;  %v2289_v8 = vld [vmem:[%s2720_s13 + $0x18] sm:$0xf]  ;;  %v2635_v57 = vld [vmem:[%s2720_s13 + $0x28] ss:$8 sps:$4 sm:$0xff]  }
  0x2f   : > { %v1018_v46 = vshll.u32 %v2288_v35, 16  ;;  %v1315_v47 = vsel %vm332_vm0, %v2788_v24, 0  ;;  %v1011_v48 = vrot.slane %v1009_v42, 4  ;;  %v1014_v49 = vrot.slane %v1012_v43, 5  ;;  %v2291_v59 = vld [vmem:[%s2720_s13 + $0x20] sm:$0xf] }
  0x30   : > { %2535 = vmatmul.mubr.msk.bf16.gmra.mxu1 %vm319_vm1, %v2246_v32  ;;  %2545 = vmatmul.mubr.msk.bf16.gmra.mxu0 %vm319_vm1, %v2263_v39  ;;  %v2854_v50 = vsel %vm332_vm0, %v2801_v36, 0  ;;  %v2858_v51 = vsel %vm332_vm0, %v2835_v27, 0  ;;  %v1001_v53 = vor.u32 %v1000_v45, %v997_v44  ;;  %v1006_v54 = vrot.slane %v1004_v40, 5  ;;  %v2292_v60 = vld [vmem:[%s2720_s13 + $0x24] sm:$0x1] }
  0x31   : > { %2550 = vmatprep.mubr.msk.bf16.mxu1 %vm319_vm1, %v2633_v29  ;;  %v1020_v24 = vrot.slane %v1018_v46, 5  ;;  %v1015_v58 = vor.u32 %v1014_v49, %v1011_v48  ;;  %v1023_v61 = vshrl.u32 %v2289_v8, 16  ;;  %v1026_v36 = vshll.u32 %v2289_v8, 16  ;;  %v2293_v2 = vld [vmem:[%s2720_s13 + $0x28] sm:$0xf] }
  0x32   : > { %v1002_v62 = vrot.slane %v1001_v53, 4  ;;  %v1032_v63 = vshll.u32 %v2290_v55, 16  ;;  %v1037_v0 = vshrl.u32 %v2291_v59, 16  ;;  %v1040_v1 = vshll.u32 %v2291_v59, 16  ;;  %v2294_v7 = vld [vmem:[%s2720_s13 + $0x2c] sm:$0x1] }
  0x33   : > { %v1016_v3 = vrot.slane %v1015_v58, 4  ;;  %v1025_v4 = vrot.slane %v1023_v61, 4  ;;  %v1028_v5 = vrot.slane %v1026_v36, 5  ;;  %v1046_v6 = vshll.u32 %v2292_v60, 16  ;;  %v2295_v13 = vld [vmem:[%s2720_s13 + $0x30] sm:$0xf] }
  0x34   : > { %v1007_v9 = vsel %vm2750_vm6, %v1002_v62, %v1006_v54  ;;  %v1034_v10 = vrot.slane %v1032_v63, 5  ;;  %v1039_v11 = vrot.slane %v1037_v0, 4  ;;  %v1042_v12 = vrot.slane %v1040_v1, 5  ;;  %v2296_v17 = vld [vmem:[%s2720_s13 + $0x34] sm:$0x1] }
  0x35   : > { %v1021_v14 = vsel %vm2750_vm6, %v1016_v3, %v1020_v24  ;;  %v1029_v15 = vor.u32 %v1028_v5, %v1025_v4  ;;  %v1048_v16 = vrot.slane %v1046_v6, 5  ;;  %v1051_v18 = vshrl.u32 %v2293_v2, 16  ;;  %v2297_v23 = vld [vmem:[%s2720_s13 + $0x38] sm:$0xf]  ;;  %v2298_v30 = vld [vmem:[%s2720_s13 + $0x3c] sm:$0x1] }
  0x36   : > { %v2302_v19 = vcombine.low %v1007_v9, %v1021_v14  ;;  %v1043_v20 = vor.u32 %v1042_v12, %v1039_v11  ;;  %v1054_v21 = vshll.u32 %v2293_v2, 16  ;;  %v1060_v22 = vshll.u32 %v2294_v7, 16  ;;  %v2636_v31 = vld [vmem:[%s2720_s13 + $0x38] ss:$8 sps:$4 sm:$0xff]   ;;  %v2300_v42 = vld [vmem:[%s2720_s13 + $0x44] sm:$0x1] }
  0x37   : > { %v1030_v25 = vrot.slane %v1029_v15, 4  ;;  %v1053_v26 = vrot.slane %v1051_v18, 4  ;;  %v1065_v28 = vshrl.u32 %v2295_v13, 16  ;;  %v1068_v29 = vshll.u32 %v2295_v13, 16  ;;  %v2299_v37 = vld [vmem:[%s2720_s13 + $0x40] sm:$0xf] }
  0x38   : > { %2551 = vmatmul.mubr.msk.bf16.vlgmr.msra.gmra.mxu1 %vm319_vm1, %v2634_v52  ;;  %2560 = vmatprep.mubr.msk.bf16.mxu0 %vm319_vm1, %v2302_v19  ;;  %v1044_v32 = vrot.slane %v1043_v20, 4  ;;  %v1056_v33 = vrot.slane %v1054_v21, 5  ;;  %v1062_v34 = vrot.slane %v1060_v22, 5  ;;  %v1074_v35 = vshll.u32 %v2296_v17, 16  ;;  %v2310_v48 = vld [vmem:[%s2720_s13 + $0x8] sm:$0xe] }
  0x39   : > { %2554 = vmatprep.mubr.msk.bf16.mxu1 %vm319_vm1, %v2635_v57  ;;  %2569 = vmatpush3.bf16.msra.mxu1 %v1315_v47  ;;  %v1035_v38 = vsel %vm2750_vm6, %v1030_v25, %v1034_v10  ;;  %v1067_v39 = vrot.slane %v1065_v28, 4  ;;  %v1070_v40 = vrot.slane %v1068_v29, 5  ;;  %v1079_v43 = vshrl.u32 %v2297_v23, 16  ;;  %v2893_v49 = vld [vmem:[%s3186_s1 + $0x20] sm:$0xf] }
  0x3a   : > { %2618 = vmatprep.subr.msk.bf16.mxu1 %vm332_vm0, %v2835_v27  ;;  %v1049_v44 = vsel %vm2750_vm6, %v1044_v32, %v1048_v16  ;;  %v1057_v45 = vor.u32 %v1056_v33, %v1053_v26  ;;  %v1076_v46 = vrot.slane %v1074_v35, 5  ;;  %v1082_v47 = vshll.u32 %v2297_v23, 16  ;;  %v2311_v27 = vld [vmem:[%s2720_s13 + $0xc] sm:$0x1]  ;;  %v2312_v8 = vld [vmem:[%s2720_s13 + $0x10] sm:$0xe] }
  0x3b   : > { %v2303_v52 = vcombine.low %v1035_v38, %v1049_v44  ;;  %v1071_v53 = vor.u32 %v1070_v40, %v1067_v39  ;;  %v1081_v54 = vrot.slane %v1079_v43, 4  ;;  %v1088_v24 = vshll.u32 %v2298_v30, 16  ;;  %v2313_v55 = vld [vmem:[%s2720_s13 + $0x14] sm:$0x1]  ;;  %v2314_v61 = vld [vmem:[%s2720_s13 + $0x18] sm:$0xe] }
  0x3c   : > { %v1058_v57 = vrot.slane %v1057_v45, 4  ;;  %v1084_v58 = vrot.slane %v1082_v47, 5  ;;  %v1093_v59 = vshrl.u32 %v2299_v37, 16  ;;  %v1096_v60 = vshll.u32 %v2299_v37, 16  ;;  %v2315_v36 = vld [vmem:[%s2720_s13 + $0x1c] sm:$0x1] }
  0x3d   : > { %v2316_v62 = vld [vmem:[%s2720_s13 + $0x20] sm:$0xe]  ;;  %2561 = vmatmul.mubr.msk.bf16.vlgmr.msra.gmra.mxu0 %vm319_vm1, %v2303_v52  ;;  %v1072_v63 = vrot.slane %v1071_v53, 4  ;;  %v1090_v0 = vrot.slane %v1088_v24, 5  ;;  %v1102_v1 = vshll.u32 %v2300_v42, 16  ;;  %v2326_v2 = vrot.slane %v2310_v48, 9 }
  0x3e   : > { %v2317_v3 = vld [vmem:[%s2720_s13 + $0x24] sm:$0x1]  ;;  %v1063_v4 = vsel %vm2750_vm6, %v1058_v57, %v1062_v34  ;;  %v1085_v5 = vor.u32 %v1084_v58, %v1081_v54  ;;  %v1095_v6 = vrot.slane %v1093_v59, 4  ;;  %v1098_v7 = vrot.slane %v1096_v60, 5  ;;  %2579 = vmatpush3.bf16.msra.mxu0 %v2854_v50  ;;  %v2318_v9 = vld [vmem:[%s2720_s13 + $0x28] sm:$0xe] }
  0x3f   : > { %v2319_v10 = vld [vmem:[%s2720_s13 + $0x2c] sm:$0x1]  ;;  %v1077_v11 = vsel %vm2750_vm6, %v1072_v63, %v1076_v46  ;;  %v1104_v12 = vrot.slane %v1102_v1, 5  ;;  %v1258_v13 = vrot.slane %v2311_v27, 5  ;;  %v2327_v14 = vrot.slane %v2312_v8, 9  ;;  %2619 = vmatprep.subr.msk.bf16.mxu0 %vm332_vm0, %v2893_v49 }
  0x40   : > { %2555 = vmatmul.mubr.msk.bf16.gmra.mxu1 %vm319_vm1, %v2636_v31  ;;  %v2320_v15 = vld [vmem:[%s2720_s13 + $0x30] sm:$0xe]  ;;  %v2304_v16 = vcombine.low %v1063_v4, %v1077_v11  ;;  %v1086_v17 = vrot.slane %v1085_v5, 4  ;;  %v1099_v18 = vor.u32 %v1098_v7, %v1095_v6  ;;  %v1262_v19 = vrot.slane %v2313_v55, 5  ;;  %v2321_v50 = vld [vmem:[%s2720_s13 + $0x34] sm:$0x1] }
  0x41   : > { %v2322_v20 = vld [vmem:[%s2720_s13 + $0x38] sm:$0xe]  ;;  %v1259_v21 = vsel %vm2759_vm7, %v2326_v2, %v1258_v13  ;;  %v2328_v22 = vrot.slane %v2314_v61, 9  ;;  %v1266_v23 = vrot.slane %v2315_v36, 5  ;;  %v2329_v25 = vrot.slane %v2316_v62, 9 }
  0x42   : > { %v2323_v26 = vld [vmem:[%s2720_s13 + $0x3c] sm:$0x1]  ;;  %2564 = vmatprep.mubr.msk.bf16.mxu0 %vm319_vm1, %v2304_v16  ;;  %v1091_v28 = vsel %vm2750_vm6, %v1086_v17, %v1090_v0  ;;  %v1100_v29 = vrot.slane %v1099_v18, 4  ;;  %v1263_v30 = vsel %vm2759_vm7, %v2327_v14, %v1262_v19  ;;  %v1270_v31 = vrot.slane %v2317_v3, 5  ;;  %v2324_v32 = vld [vmem:[%s2720_s13 + $0x40] sm:$0xe] }
  0x43   : > { %v2325_v33 = vld [vmem:[%s2720_s13 + $0x44] sm:$0x1]  ;;  %v2335_v34 = vcombine.low %v1259_v21, %v1263_v30  ;;  %v1267_v35 = vsel %vm2759_vm7, %v2328_v22, %v1266_v23  ;;  %v2330_v37 = vrot.slane %v2318_v9, 9  ;;  %v1274_v38 = vrot.slane %v2319_v10, 5  ;;  %v2637_v44 = vld [vmem:[%s2720_s13 + $0x10] ss:$8 sps:$4 sm:$0xff]  }
  0x44   : > { %v1105_v39 = vsel %vm2750_vm6, %v1100_v29, %v1104_v12  ;;  %v1271_v40 = vsel %vm2759_vm7, %v2329_v25, %v1270_v31  ;;  %v2331_v42 = vrot.slane %v2320_v15, 9  ;;  %v1278_v43 = vrot.slane %v2321_v50, 5  ;;  %v2360_v57 = vld [vmem:[%s2720_s13 + $0x10] sm:$0xf]  ;;  %v2638_v59 = vld [vmem:[%s2720_s13 + $0x20] ss:$8 sps:$4 sm:$0xff]  }
  0x45   : > { %v2305_v45 = vcombine.low %v1091_v28, %v1105_v39  ;;  %2570 = vmatprep.mubr.msk.bf16.mxu1 %vm319_vm1, %v2335_v34  ;;  %v2336_v46 = vcombine.low %v1267_v35, %v1271_v40  ;;  %v1275_v47 = vsel %vm2759_vm7, %v2330_v37, %v1274_v38  ;;  %v2332_v48 = vrot.slane %v2322_v20, 9  ;;  %v2361_v60 = vld [vmem:[%s2720_s13 + $0x14] sm:$0x1]  ;;  %v2362_v61 = vld [vmem:[%s2720_s13 + $0x18] sm:$0xf] }
  0x46   : > { %v1279_v27 = vsel %vm2759_vm7, %v2331_v42, %v1278_v43  ;;  %v1282_v52 = vrot.slane %v2323_v26, 5  ;;  %v2333_v53 = vrot.slane %v2324_v32, 9  ;;  %v1286_v54 = vrot.slane %v2325_v33, 5  ;;  %v2363_v36 = vld [vmem:[%s2720_s13 + $0x1c] sm:$0x1] }
  0x47   : > { %2565 = vmatmul.mubr.msk.bf16.gmra.mxu0 %vm319_vm1, %v2305_v45  ;;  %v2337_v24 = vcombine.low %v1275_v47, %v1279_v27  ;;  %v1878_v58 = vsel %vm332_vm0, %v2893_v49, 0  ;;  %v2639_v62 = vld [vmem:[%s2720_s13 + $0x30] ss:$8 sps:$4 sm:$0xff]   ;;  %v1558_v63 = vshrl.u32 %v2360_v57, 16  ;;  %v1561_v0 = vshll.u32 %v2360_v57, 16 }
  0x48   : > { %2571 = vmatmul.mubr.msk.bf16.vlgmr.msra.gmra.mxu1 %vm319_vm1, %v2336_v46  ;;  %v1283_v8 = vsel %vm2759_vm7, %v2332_v48, %v1282_v52  ;;  %v1287_v55 = vsel %vm2759_vm7, %v2333_v53, %v1286_v54  ;;  %2580 = vmatprep.mubr.msk.bf16.mxu0 %vm319_vm1, %v2637_v44  ;;  %v1567_v1 = vshll.u32 %v2361_v60, 16  ;;  %v1572_v2 = vshrl.u32 %v2362_v61, 16  ;;  %v2364_v3 = vld [vmem:[%s2720_s13 + $0x20] sm:$0xf]  ;;  %v2365_v6 = vld [vmem:[%s2720_s13 + $0x24] sm:$0x1] }
  0x49   : > { %2589 = vmatpush3.bf16.msra.mxu1 %v2858_v51  ;;  %2574 = vmatprep.mubr.msk.bf16.mxu1 %vm319_vm1, %v2337_v24  ;;  %v2338_v51 = vcombine.low %v1283_v8, %v1287_v55  ;;  %v1575_v4 = vshll.u32 %v2362_v61, 16  ;;  %v1581_v5 = vshll.u32 %v2363_v36, 16  ;;  %v2366_v49 = vld [vmem:[%s2720_s13 + $0x28] sm:$0xf]  ;;  %v1560_v7 = vrot.slane %v1558_v63, 4 }
  0x4a   : > { %v1563_v9 = vrot.slane %v1561_v0, 5  ;;  %v1569_v10 = vrot.slane %v1567_v1, 5  ;;  %v1574_v11 = vrot.slane %v1572_v2, 4  ;;  %v2367_v12 = vld [vmem:[%s2720_s13 + $0x2c] sm:$0x1]  ;;  %v1586_v15 = vshrl.u32 %v2364_v3, 16 }
  0x4b   : > { %v1577_v13 = vrot.slane %v1575_v4, 5  ;;  %v1583_v14 = vrot.slane %v1581_v5, 5  ;;  %v1589_v16 = vshll.u32 %v2364_v3, 16  ;;  %v1595_v18 = vshll.u32 %v2365_v6, 16  ;;  %v2368_v20 = vld [vmem:[%s2720_s13 + $0x30] sm:$0xf] }
  0x4c   : > { %v1564_v17 = vor.u32 %v1563_v9, %v1560_v7  ;;  %v1600_v19 = vshrl.u32 %v2366_v49, 16  ;;  %v1603_v50 = vshll.u32 %v2366_v49, 16  ;;  %v1588_v22 = vrot.slane %v1586_v15, 4  ;;  %v2369_v26 = vld [vmem:[%s2720_s13 + $0x34] sm:$0x1] }
  0x4d   : > { %v1578_v21 = vor.u32 %v1577_v13, %v1574_v11  ;;  %v1591_v23 = vrot.slane %v1589_v16, 5  ;;  %v1609_v25 = vshll.u32 %v2367_v12, 16  ;;  %v1597_v29 = vrot.slane %v1595_v18, 5  ;;  %v2370_v32 = vld [vmem:[%s2720_s13 + $0x38] sm:$0xf] }
  0x4e   : > { %v1565_v28 = vrot.slane %v1564_v17, 4  ;;  %v1602_v30 = vrot.slane %v1600_v19, 4  ;;  %v1605_v31 = vrot.slane %v1603_v50, 5  ;;  %v2640_v33 = vld [vmem:[%s2720_s13 + $0x40] ss:$8 sps:$4 sm:$0xff]   ;;  %v1614_v38 = vshrl.u32 %v2368_v20, 16 }
  0x4f   : > { %2581 = vmatmul.mubr.msk.bf16.vlgmr.msra.gmra.mxu0 %vm319_vm1, %v2638_v59  ;;  %v1579_v34 = vrot.slane %v1578_v21, 4  ;;  %v1592_v35 = vor.u32 %v1591_v23, %v1588_v22  ;;  %v1611_v37 = vrot.slane %v1609_v25, 5  ;;  %v2371_v42 = vld [vmem:[%s2720_s13 + $0x3c] sm:$0x1]  ;;  %v1617_v43 = vshll.u32 %v2368_v20, 16 }
  0x50   : > { %2575 = vmatmul.mubr.msk.bf16.gmra.mxu1 %vm319_vm1, %v2338_v51  ;;  %2584 = vmatprep.mubr.msk.bf16.mxu0 %vm319_vm1, %v2639_v62  ;;  %v1570_v39 = vsel %vm2750_vm6, %v1565_v28, %v1569_v10  ;;  %v1606_v40 = vor.u32 %v1605_v31, %v1602_v30  ;;  %v1623_v44 = vshll.u32 %v2369_v26, 16  ;;  %v2372_v45 = vld [vmem:[%s2720_s13 + $0x40] sm:$0xf]  ;;  %v1616_v48 = vrot.slane %v1614_v38, 4  ;;  %v2373_v52 = vld [vmem:[%s2720_s13 + $0x44] sm:$0x1] }
  0x51   : > { %2599 = vmatpush3.bf16.msra.mxu0 %v1878_v58  ;;  %v1584_v46 = vsel %vm2750_vm6, %v1579_v34, %v1583_v14  ;;  %v1593_v47 = vrot.slane %v1592_v35, 4  ;;  %v1628_v27 = vshrl.u32 %v2370_v32, 16  ;;  %v1619_v24 = vrot.slane %v1617_v43, 5  ;;  %v2374_v55 = vld [vmem:[%s2720_s13 + $0x48] sm:$0xf] }
  0x52   : > { %v2377_v53 = vcombine.low %v1570_v39, %v1584_v46  ;;  %v1607_v54 = vrot.slane %v1606_v40, 4  ;;  %v1625_v8 = vrot.slane %v1623_v44, 5  ;;  %v1631_v59 = vshll.u32 %v2370_v32, 16  ;;  %v2375_v61 = vld [vmem:[%s2720_s13 + $0x4c] sm:$0x1] }
  0x53   : > { %v1598_v57 = vsel %vm2750_vm6, %v1593_v47, %v1597_v29  ;;  %v1630_v58 = vrot.slane %v1628_v27, 4  ;;  %v1637_v60 = vshll.u32 %v2371_v42, 16  ;;  %v1620_v62 = vor.u32 %v1619_v24, %v1616_v48  ;;  %v2385_v1 = vld [vmem:[%s2720_s13 + $0x10] sm:$0xe]  ;;  %v2386_v2 = vld [vmem:[%s2720_s13 + $0x14] sm:$0x1] }
  0x54   : > { %2590 = vmatprep.mubr.msk.bf16.mxu1 %vm319_vm1, %v2377_v53  ;;  %v1612_v36 = vsel %vm2750_vm6, %v1607_v54, %v1611_v37  ;;  %v1642_v63 = vshrl.u32 %v2372_v45, 16  ;;  %v1645_v0 = vshll.u32 %v2372_v45, 16  ;;  %v1633_v51 = vrot.slane %v1631_v59, 5  ;;  %v2387_v6 = vld [vmem:[%s2720_s13 + $0x18] sm:$0xe] }
  0x55   : > { %v2378_v3 = vcombine.low %v1598_v57, %v1612_v36  ;;  %v1639_v4 = vrot.slane %v1637_v60, 5  ;;  %v1651_v5 = vshll.u32 %v2373_v52, 16  ;;  %v2388_v49 = vld [vmem:[%s2720_s13 + $0x1c] sm:$0x1]  ;;  %v1621_v7 = vrot.slane %v1620_v62, 4 }
  0x56   : > { %v1644_v9 = vrot.slane %v1642_v63, 4  ;;  %v1647_v10 = vrot.slane %v1645_v0, 5  ;;  %v1656_v11 = vshrl.u32 %v2374_v55, 16  ;;  %v2389_v12 = vld [vmem:[%s2720_s13 + $0x20] sm:$0xe]  ;;  %v1634_v13 = vor.u32 %v1633_v51, %v1630_v58 }
  0x57   : > { %2585 = vmatmul.mubr.msk.bf16.gmra.mxu0 %vm319_vm1, %v2640_v33  ;;  %v1653_v14 = vrot.slane %v1651_v5, 5  ;;  %v1659_v15 = vshll.u32 %v2374_v55, 16  ;;  %v1665_v16 = vshll.u32 %v2375_v61, 16  ;;  %v2390_v17 = vld [vmem:[%s2720_s13 + $0x24] sm:$0x1]  ;;  %v1626_v18 = vsel %vm2750_vm6, %v1621_v7, %v1625_v8 }
  0x58   : > { %2591 = vmatmul.mubr.msk.bf16.vlgmr.msra.gmra.mxu1 %vm319_vm1, %v2378_v3  ;;  %v1648_v19 = vor.u32 %v1647_v10, %v1644_v9  ;;  %v1658_v50 = vrot.slane %v1656_v11, 4  ;;  %v2401_v20 = vrot.slane %v2385_v1, 9  ;;  %v2391_v21 = vld [vmem:[%s2720_s13 + $0x28] sm:$0xe]  ;;  %v2392_v22 = vld [vmem:[%s2720_s13 + $0x2c] sm:$0x1] }
  0x59   : > { %v1635_v23 = vrot.slane %v1634_v13, 4  ;;  %v1661_v25 = vrot.slane %v1659_v15, 5  ;;  %v1667_v26 = vrot.slane %v1665_v16, 5  ;;  %v1821_v28 = vrot.slane %v2386_v2, 5  ;;  %v2393_v29 = vld [vmem:[%s2720_s13 + $0x30] sm:$0xe] }
  0x5a   : > { %v1649_v30 = vrot.slane %v1648_v19, 4  ;;  %v2402_v31 = vrot.slane %v2387_v6, 9  ;;  %v1825_v32 = vrot.slane %v2388_v49, 5  ;;  %v2403_v33 = vrot.slane %v2389_v12, 9  ;;  %v2394_v34 = vld [vmem:[%s2720_s13 + $0x34] sm:$0x1] }
  0x5b   : > { %v1640_v35 = vsel %vm2750_vm6, %v1635_v23, %v1639_v4  ;;  %v1662_v37 = vor.u32 %v1661_v25, %v1658_v50  ;;  %v1822_v38 = vsel %vm2759_vm7, %v2401_v20, %v1821_v28  ;;  %v1829_v39 = vrot.slane %v2390_v17, 5  ;;  %v2395_v40 = vld [vmem:[%s2720_s13 + $0x38] sm:$0xe]  ;;  %v2396_v42 = vld [vmem:[%s2720_s13 + $0x3c] sm:$0x1] }
  0x5c   : > { %v2379_v43 = vcombine.low %v1626_v18, %v1640_v35  ;;  %v1654_v44 = vsel %vm2750_vm6, %v1649_v30, %v1653_v14  ;;  %v1826_v45 = vsel %vm2759_vm7, %v2402_v31, %v1825_v32  ;;  %v2404_v46 = vrot.slane %v2391_v21, 9  ;;  %v2397_v47 = vld [vmem:[%s2720_s13 + $0x40] sm:$0xe]  ;;  %v2398_v48 = vld [vmem:[%s2720_s13 + $0x44] sm:$0x1] }
  0x5d   : > { %v1663_v27 = vrot.slane %v1662_v37, 4  ;;  %v2410_v52 = vcombine.low %v1822_v38, %v1826_v45  ;;  %v1830_v53 = vsel %vm2759_vm7, %v2403_v33, %v1829_v39  ;;  %v1833_v54 = vrot.slane %v2392_v22, 5  ;;  %v2399_v24 = vld [vmem:[%s2720_s13 + $0x48] sm:$0xe]  ;;  %v2400_v59 = vld [vmem:[%s2720_s13 + $0x4c] sm:$0x1]  ;;  %s3137_s13 = scalar_lea.vmem %s3191_s6, %s3085_s22 }
  0x5e   : > { %2594 = vmatprep.mubr.msk.bf16.mxu1 %vm319_vm1, %v2379_v43  ;;  %v2405_v8 = vrot.slane %v2393_v29, 9  ;;  %v1837_v55 = vrot.slane %v2394_v34, 5  ;;  %v2406_v57 = vrot.slane %v2395_v40, 9  ;;  %v1841_v58 = vrot.slane %v2396_v42, 5 }
  0x5f   : > { %v1668_v60 = vsel %vm2750_vm6, %v1663_v27, %v1667_v26  ;;  %2600 = vmatprep.mubr.msk.bf16.mxu0 %vm319_vm1, %v2410_v52  ;;  %v1834_v61 = vsel %vm2759_vm7, %v2404_v46, %v1833_v54  ;;  %v2407_v36 = vrot.slane %v2397_v47, 9  ;;  %v1845_v62 = vrot.slane %v2398_v48, 5 }
  0x60   : > { %v2380_v63 = vcombine.low %v1654_v44, %v1668_v60  ;;  %v2411_v0 = vcombine.low %v1830_v53, %v1834_v61  ;;  %v1838_v1 = vsel %vm2759_vm7, %v2405_v8, %v1837_v55  ;;  %v1842_v2 = vsel %vm2759_vm7, %v2406_v57, %v1841_v58 }
  0x61   : > { %v2412_v3 = vcombine.low %v1838_v1, %v1842_v2  ;;  %v2408_v51 = vrot.slane %v2399_v24, 9  ;;  %v1849_v4 = vrot.slane %v2400_v59, 5  ;;  %v1846_v41 = vsel %vm2759_vm7, %v2407_v36, %v1845_v62 }
  0x62   : > { %2595 = vmatmul.mubr.msk.bf16.gmra.mxu1 %vm319_vm1, %v2380_v63  ;;  %2601 = vmatmul.mubr.msk.bf16.vlgmr.msra.gmra.mxu0 %vm319_vm1, %v2411_v0 }
  0x63   : > { %2604 = vmatprep.mubr.msk.bf16.mxu0 %vm319_vm1, %v2412_v3  ;;  %v1850_v5 = vsel %vm2759_vm7, %v2408_v51, %v1849_v4 }
  0x64   : > { %v2413_v6 = vcombine.low %v1846_v41, %v1850_v5 }
  0x6a   : > { %2605 = vmatmul.mubr.msk.bf16.gmra.mxu0 %vm319_vm1, %v2413_v6 }
  0xd2   : > { %v2526_v49 = vpop.f32.mrf.mxu1 }
  0xd3   : > { %407 = vst.msk [vmem:[#allocation2 + $0x30] sm:$0xff] %vm319_vm1, %v2526_v49  ;;  %v2522_v7 = vpop.f32.mrf.mxu0 }
  0xd4   : > { %403 = vst.msk [vmem:[#allocation2 + $0x10] sm:$0xff] %vm319_vm1, %v2522_v7  ;;  %v386_v9 = vpop.f32.mrf.mxu1 }
  0xd5   : > { %405 = vst.msk [vmem:[#allocation2 + $0x20] sm:$0xff] %vm319_vm1, %v386_v9  ;;  %v370_v10 = vpop.f32.mrf.mxu0 }
  0xd6   : > { %401 = vst.msk [vmem:[#allocation2] sm:$0xff] %vm319_vm1, %v370_v10  ;;  %v2527_v11 = vpop.f32.mrf.mxu1 }
  0xd7   : > { %408 = vst.msk [vmem:[#allocation2 + $0x38] sm:$0xff] %vm319_vm1, %v2527_v11  ;;  %v2523_v56 = vpop.f32.mrf.mxu0 }
  0xd8   : > { %404 = vst.msk [vmem:[#allocation2 + $0x18] sm:$0xff] %vm319_vm1, %v2523_v56  ;;  %v389_v12 = vpop.f32.mrf.mxu1 }
  0xd9   : > { %406 = vst.msk [vmem:[#allocation2 + $0x28] sm:$0xff] %vm319_vm1, %v389_v12  ;;  %v373_v13 = vpop.f32.mrf.mxu0 }
  0xda   : > { %402 = vst.msk [vmem:[#allocation2 + $0x8] sm:$0xff] %vm319_vm1, %v373_v13  ;;  %v640_v37 = vld [vmem:[#allocation2 + $0x30] sm:$0xff] }
  0xdb   : > { %v636_v14 = vld [vmem:[#allocation2 + $0x10] sm:$0xff] }
  0xdc   : > { %v638_v44 = vld [vmem:[#allocation2 + $0x20] sm:$0xff] }
  0xdd   : > { %v634_v16 = vld [vmem:[#allocation2] sm:$0xff] }
  0xde   : > { %v641_v27 = vld [vmem:[#allocation2 + $0x38] sm:$0xff] }
  0xdf   : > { %v637_v19 = vld [vmem:[#allocation2 + $0x18] sm:$0xff] }
  0xe0   : > { %v639_v24 = vld [vmem:[#allocation2 + $0x28] sm:$0xff] }
  0xe1   : > { %v635_v22 = vld [vmem:[#allocation2 + $0x8] sm:$0xff] }
  0xe2   : > { %v2532_v15 = vpop.f32.mrf.mxu1 }
  0xe3   : > { %v644_v17 = vadd.f32 %v2532_v15, %v636_v14  ;;  %v2542_v50 = vpop.f32.mrf.mxu0 }
  0xe4   : > { %v603_v18 = vpop.f32.mrf.mxu1 }
  0xe5   : > { %652 = vst.msk [vmem:[#allocation2 + $0x10] sm:$0xff] %vm319_vm1, %v644_v17  ;;  %v642_v20 = vadd.f32 %v634_v16, %v603_v18  ;;  %v788_v23 = vpop.f32.mrf.mxu0 }
  0xe6   : > { %v2533_v21 = vpop.f32.mrf.mxu1 }
  0xe7   : > { %650 = vst.msk [vmem:[#allocation2] sm:$0xff] %vm319_vm1, %v642_v20  ;;  %v645_v25 = vadd.f32 %v2533_v21, %v637_v19  ;;  %v2543_v29 = vpop.f32.mrf.mxu0 }
  0xe8   : > { %v606_v26 = vpop.f32.mrf.mxu1 }
  0xe9   : > { %653 = vst.msk [vmem:[#allocation2 + $0x18] sm:$0xff] %vm319_vm1, %v645_v25  ;;  %v643_v28 = vadd.f32 %v635_v22, %v606_v26  ;;  %v791_v32 = vpop.f32.mrf.mxu0 }
  0xeb   : > { %651 = vst.msk [vmem:[#allocation2 + $0x8] sm:$0xff] %vm319_vm1, %v643_v28 }
  0xec   : > { %v821_v30 = vld [vmem:[#allocation2 + $0x10] sm:$0xff] }
  0xed   : > { %v829_v31 = vadd.f32 %v2542_v50, %v821_v30 }
  0xee   : > { %v819_v33 = vld [vmem:[#allocation2] sm:$0xff] }
  0xef   : > { %837 = vst.msk [vmem:[#allocation2 + $0x10] sm:$0xff] %vm319_vm1, %v829_v31  ;;  %v827_v34 = vadd.f32 %v819_v33, %v788_v23 }
  0xf0   : > { %v2536_v35 = vpop.f32.mrf.mxu1  ;;  %v822_v38 = vld [vmem:[#allocation2 + $0x18] sm:$0xff]  ;;  %v2546_v42 = vpop.f32.mrf.mxu0 }
  0xf1   : > { %835 = vst.msk [vmem:[#allocation2] sm:$0xff] %vm319_vm1, %v827_v34  ;;  %v648_v39 = vadd.f32 %v2536_v35, %v640_v37  ;;  %v830_v40 = vadd.f32 %v2543_v29, %v822_v38 }
  0xf2   : > { %v619_v43 = vpop.f32.mrf.mxu1  ;;  %v820_v45 = vld [vmem:[#allocation2 + $0x8] sm:$0xff]  ;;  %v804_v53 = vpop.f32.mrf.mxu0 }
  0xf3   : > { %656 = vst.msk [vmem:[#allocation2 + $0x30] sm:$0xff] %vm319_vm1, %v648_v39  ;;  %838 = vst.msk [vmem:[#allocation2 + $0x18] sm:$0xff] %vm319_vm1, %v830_v40  ;;  %v646_v46 = vadd.f32 %v638_v44, %v619_v43  ;;  %v828_v47 = vadd.f32 %v820_v45, %v791_v32 }
  0xf4   : > { %v2537_v48 = vpop.f32.mrf.mxu1  ;;  %v2547_v59 = vpop.f32.mrf.mxu0 }
  0xf5   : > { %654 = vst.msk [vmem:[#allocation2 + $0x20] sm:$0xff] %vm319_vm1, %v646_v46  ;;  %836 = vst.msk [vmem:[#allocation2 + $0x8] sm:$0xff] %vm319_vm1, %v828_v47  ;;  %v649_v52 = vadd.f32 %v2537_v48, %v641_v27 }
  0xf6   : > { %v622_v54 = vpop.f32.mrf.mxu1  ;;  %v956_v8 = vld [vmem:[#allocation2 + $0x10] sm:$0xff]  ;;  %v807_v4 = vpop.f32.mrf.mxu0 }
  0xf7   : > { %657 = vst.msk [vmem:[#allocation2 + $0x38] sm:$0xff] %vm319_vm1, %v649_v52  ;;  %v647_v55 = vadd.f32 %v639_v24, %v622_v54 }
  0xf8   : > { %v2552_v57 = vpop.f32.mrf.mxu1  ;;  %v954_v58 = vld [vmem:[#allocation2] sm:$0xff] }
  0xf9   : > { %655 = vst.msk [vmem:[#allocation2 + $0x28] sm:$0xff] %vm319_vm1, %v647_v55  ;;  %v964_v60 = vadd.f32 %v2552_v57, %v956_v8 }
  0xfa   : > { %v825_v61 = vld [vmem:[#allocation2 + $0x30] sm:$0xff]  ;;  %v923_v36 = vpop.f32.mrf.mxu1  ;;  %v957_v62 = vld [vmem:[#allocation2 + $0x18] sm:$0xff] }
  0xfb   : > { %v833_v63 = vadd.f32 %v2546_v42, %v825_v61  ;;  %972 = vst.msk [vmem:[#allocation2 + $0x10] sm:$0xff] %vm319_vm1, %v964_v60  ;;  %v962_v0 = vadd.f32 %v954_v58, %v923_v36 }
  0xfc   : > { %v823_v1 = vld [vmem:[#allocation2 + $0x20] sm:$0xff]  ;;  %v2553_v2 = vpop.f32.mrf.mxu1  ;;  %v955_v3 = vld [vmem:[#allocation2 + $0x8] sm:$0xff] }
  0xfd   : > { %841 = vst.msk [vmem:[#allocation2 + $0x30] sm:$0xff] %vm319_vm1, %v833_v63  ;;  %v831_v51 = vadd.f32 %v823_v1, %v804_v53  ;;  %970 = vst.msk [vmem:[#allocation2] sm:$0xff] %vm319_vm1, %v962_v0  ;;  %v965_v41 = vadd.f32 %v2553_v2, %v957_v62  ;;  %v2562_v9 = vpop.f32.mrf.mxu0 }
  0xfe   : > { %v826_v5 = vld [vmem:[#allocation2 + $0x38] sm:$0xff]  ;;  %v926_v6 = vpop.f32.mrf.mxu1 }
  0xff   : > { %839 = vst.msk [vmem:[#allocation2 + $0x20] sm:$0xff] %vm319_vm1, %v831_v51  ;;  %v834_v49 = vadd.f32 %v2547_v59, %v826_v5  ;;  %973 = vst.msk [vmem:[#allocation2 + $0x18] sm:$0xff] %vm319_vm1, %v965_v41  ;;  %v963_v7 = vadd.f32 %v955_v3, %v926_v6  ;;  %v1169_v12 = vpop.f32.mrf.mxu0 }
 0x100   : > { %v824_v10 = vld [vmem:[#allocation2 + $0x28] sm:$0xff]  ;;  %v2556_v11 = vpop.f32.mrf.mxu1 }
 0x101   : > { %842 = vst.msk [vmem:[#allocation2 + $0x38] sm:$0xff] %vm319_vm1, %v834_v49  ;;  %v832_v56 = vadd.f32 %v824_v10, %v807_v4  ;;  %971 = vst.msk [vmem:[#allocation2 + $0x8] sm:$0xff] %vm319_vm1, %v963_v7  ;;  %v2563_v16 = vpop.f32.mrf.mxu0 }
 0x102   : > { %v1202_v13 = vld [vmem:[#allocation2 + $0x10] sm:$0xff]  ;;  %v939_v14 = vpop.f32.mrf.mxu1 }
 0x103   : > { %840 = vst.msk [vmem:[#allocation2 + $0x28] sm:$0xff] %vm319_vm1, %v832_v56  ;;  %v1210_v15 = vadd.f32 %v2562_v9, %v1202_v13  ;;  %v1172_v21 = vpop.f32.mrf.mxu0 }
 0x104   : > { %v960_v17 = vld [vmem:[#allocation2 + $0x30] sm:$0xff]  ;;  %v1200_v18 = vld [vmem:[#allocation2] sm:$0xff]  ;;  %v2557_v19 = vpop.f32.mrf.mxu1 }
 0x105   : > { %v968_v50 = vadd.f32 %v2556_v11, %v960_v17  ;;  %1218 = vst.msk [vmem:[#allocation2 + $0x10] sm:$0xff] %vm319_vm1, %v1210_v15  ;;  %v1208_v20 = vadd.f32 %v1200_v18, %v1169_v12 }
 0x106   : > { %v958_v22 = vld [vmem:[#allocation2 + $0x20] sm:$0xff]  ;;  %v1203_v23 = vld [vmem:[#allocation2 + $0x18] sm:$0xff]  ;;  %v942_v28 = vpop.f32.mrf.mxu1 }
 0x107   : > { %976 = vst.msk [vmem:[#allocation2 + $0x30] sm:$0xff] %vm319_vm1, %v968_v50  ;;  %v966_v25 = vadd.f32 %v958_v22, %v939_v14  ;;  %1216 = vst.msk [vmem:[#allocation2] sm:$0xff] %vm319_vm1, %v1208_v20  ;;  %v1211_v26 = vadd.f32 %v2563_v16, %v1203_v23  ;;  %v2566_v33 = vpop.f32.mrf.mxu0 }
 0x108   : > { %v961_v29 = vld [vmem:[#allocation2 + $0x38] sm:$0xff]  ;;  %v1201_v30 = vld [vmem:[#allocation2 + $0x8] sm:$0xff]  ;;  %v2572_v34 = vpop.f32.mrf.mxu1 }
 0x109   : > { %974 = vst.msk [vmem:[#allocation2 + $0x20] sm:$0xff] %vm319_vm1, %v966_v25  ;;  %v969_v31 = vadd.f32 %v2557_v19, %v961_v29  ;;  %1219 = vst.msk [vmem:[#allocation2 + $0x18] sm:$0xff] %vm319_vm1, %v1211_v26  ;;  %v1209_v32 = vadd.f32 %v1201_v30, %v1172_v21  ;;  %v1185_v38 = vpop.f32.mrf.mxu0 }
 0x10a   : > { %v959_v35 = vld [vmem:[#allocation2 + $0x28] sm:$0xff]  ;;  %v1351_v39 = vpop.f32.mrf.mxu1 }
 0x10b   : > { %977 = vst.msk [vmem:[#allocation2 + $0x38] sm:$0xff] %vm319_vm1, %v969_v31  ;;  %v967_v37 = vadd.f32 %v959_v35, %v942_v28  ;;  %1217 = vst.msk [vmem:[#allocation2 + $0x8] sm:$0xff] %vm319_vm1, %v1209_v32  ;;  %v2567_v43 = vpop.f32.mrf.mxu0 }
 0x10c   : > { %v1384_v40 = vld [vmem:[#allocation2 + $0x10] sm:$0xff]  ;;  %v2573_v44 = vpop.f32.mrf.mxu1 }
 0x10d   : > { %975 = vst.msk [vmem:[#allocation2 + $0x28] sm:$0xff] %vm319_vm1, %v967_v37  ;;  %v1392_v42 = vadd.f32 %v2572_v34, %v1384_v40  ;;  %v1188_v27 = vpop.f32.mrf.mxu0 }
 0x10e   : > { %v1206_v45 = vld [vmem:[#allocation2 + $0x30] sm:$0xff]  ;;  %v1382_v46 = vld [vmem:[#allocation2] sm:$0xff]  ;;  %v1354_v52 = vpop.f32.mrf.mxu1 }
 0x10f   : > { %v1214_v47 = vadd.f32 %v2566_v33, %v1206_v45  ;;  %1400 = vst.msk [vmem:[#allocation2 + $0x10] sm:$0xff] %vm319_vm1, %v1392_v42  ;;  %v1390_v48 = vadd.f32 %v1382_v46, %v1351_v39  ;;  %v2582_v57 = vpop.f32.mrf.mxu0 }
 0x110   : > { %v1204_v53 = vld [vmem:[#allocation2 + $0x20] sm:$0xff]  ;;  %v1385_v54 = vld [vmem:[#allocation2 + $0x18] sm:$0xff]  ;;  %v2576_v55 = vpop.f32.mrf.mxu1 }
 0x111   : > { %1222 = vst.msk [vmem:[#allocation2 + $0x30] sm:$0xff] %vm319_vm1, %v1214_v47  ;;  %v1212_v24 = vadd.f32 %v1204_v53, %v1185_v38  ;;  %1398 = vst.msk [vmem:[#allocation2] sm:$0xff] %vm319_vm1, %v1390_v48  ;;  %v1393_v8 = vadd.f32 %v2573_v44, %v1385_v54  ;;  %v1486_v62 = vpop.f32.mrf.mxu0 }
 0x112   : > { %v1207_v58 = vld [vmem:[#allocation2 + $0x38] sm:$0xff]  ;;  %v1383_v59 = vld [vmem:[#allocation2 + $0x8] sm:$0xff]  ;;  %v1367_v36 = vpop.f32.mrf.mxu1 }
 0x113   : > { %1220 = vst.msk [vmem:[#allocation2 + $0x20] sm:$0xff] %vm319_vm1, %v1212_v24  ;;  %v1215_v60 = vadd.f32 %v2567_v43, %v1207_v58  ;;  %1401 = vst.msk [vmem:[#allocation2 + $0x18] sm:$0xff] %vm319_vm1, %v1393_v8  ;;  %v1391_v61 = vadd.f32 %v1383_v59, %v1354_v52  ;;  %v2583_v2 = vpop.f32.mrf.mxu0  ;;  %v2470_v59 = vld [vmem:[%s3094_s27 + $0x8] sm:$0xff]  }
 0x114   : > { %v1205_v63 = vld [vmem:[#allocation2 + $0x28] sm:$0xff]  ;;  %v2577_v1 = vpop.f32.mrf.mxu1 }
 0x115   : > { %1223 = vst.msk [vmem:[#allocation2 + $0x38] sm:$0xff] %vm319_vm1, %v1215_v60  ;;  %v1213_v0 = vadd.f32 %v1205_v63, %v1188_v27  ;;  %1399 = vst.msk [vmem:[#allocation2 + $0x8] sm:$0xff] %vm319_vm1, %v1391_v61  ;;  %v1489_v4 = vpop.f32.mrf.mxu0 }
 0x116   : > { %v1519_v3 = vld [vmem:[#allocation2 + $0x10] sm:$0xff]  ;;  %v1370_v7 = vpop.f32.mrf.mxu1 }
 0x117   : > { %1221 = vst.msk [vmem:[#allocation2 + $0x28] sm:$0xff] %vm319_vm1, %v1213_v0  ;;  %v1527_v51 = vadd.f32 %v2582_v57, %v1519_v3  ;;  %v2586_v9 = vpop.f32.mrf.mxu0  ;;  %v2455_v0 = vld [vmem:[%s3094_s27] sm:$0xff]   ;;  %v2460_v3 = vunpack.c.l.bf16 %v2470_v59 }
 0x118   : > { %v1388_v41 = vld [vmem:[#allocation2 + $0x30] sm:$0xff]  ;;  %v1517_v5 = vld [vmem:[#allocation2] sm:$0xff]  ;;  %v2592_v13 = vpop.f32.mrf.mxu1 }
 0x119   : > { %v1396_v6 = vadd.f32 %v2576_v55, %v1388_v41  ;;  %1535 = vst.msk [vmem:[#allocation2 + $0x10] sm:$0xff] %vm319_vm1, %v1527_v51  ;;  %v1525_v49 = vadd.f32 %v1517_v5, %v1486_v62  ;;  %v1502_v16 = vpop.f32.mrf.mxu0 }
 0x11a   : > { %v1386_v10 = vld [vmem:[#allocation2 + $0x20] sm:$0xff]  ;;  %v1520_v11 = vld [vmem:[#allocation2 + $0x18] sm:$0xff]  ;;  %v1732_v19 = vpop.f32.mrf.mxu1 }
 0x11b   : > { %1404 = vst.msk [vmem:[#allocation2 + $0x30] sm:$0xff] %vm319_vm1, %v1396_v6  ;;  %v1394_v56 = vadd.f32 %v1386_v10, %v1367_v36  ;;  %1533 = vst.msk [vmem:[#allocation2] sm:$0xff] %vm319_vm1, %v1525_v49  ;;  %v1528_v12 = vadd.f32 %v2583_v2, %v1520_v11  ;;  %v2587_v23 = vpop.f32.mrf.mxu0  ;;  %v2456_v6 = vunpack.c.l.bf16 %v2455_v0 }
 0x11c   : > { %v1389_v14 = vld [vmem:[#allocation2 + $0x38] sm:$0xff]  ;;  %v1518_v15 = vld [vmem:[#allocation2 + $0x8] sm:$0xff]  ;;  %v2593_v21 = vpop.f32.mrf.mxu1 }
 0x11d   : > { %1402 = vst.msk [vmem:[#allocation2 + $0x20] sm:$0xff] %vm319_vm1, %v1394_v56  ;;  %v1397_v17 = vadd.f32 %v2577_v1, %v1389_v14  ;;  %1536 = vst.msk [vmem:[#allocation2 + $0x18] sm:$0xff] %vm319_vm1, %v1528_v12  ;;  %v1526_v18 = vadd.f32 %v1518_v15, %v1489_v4  ;;  %v1505_v33 = vpop.f32.mrf.mxu0  ;;  %v2461_v56 = vunpack.c.h.bf16 %v2470_v59  ;;  %v3120_v12 = vld [vmem:[%s3189_s4] ss:$0 sm:$0xff] }
 0x11e   : > { %v1387_v50 = vld [vmem:[#allocation2 + $0x28] sm:$0xff]  ;;  %v1735_v29 = vpop.f32.mrf.mxu1 }
 0x11f   : > { %1405 = vst.msk [vmem:[#allocation2 + $0x38] sm:$0xff] %vm319_vm1, %v1397_v17  ;;  %v1395_v20 = vadd.f32 %v1387_v50, %v1370_v7  ;;  %1534 = vst.msk [vmem:[#allocation2 + $0x8] sm:$0xff] %vm319_vm1, %v1526_v18  ;;  %v2457_v50 = vunpack.c.h.bf16 %v2455_v0 }
 0x120   : > { %v1765_v22 = vld [vmem:[#allocation2 + $0x10] sm:$0xff] }
 0x121   : > { %1403 = vst.msk [vmem:[#allocation2 + $0x28] sm:$0xff] %vm319_vm1, %v1395_v20  ;;  %v1773_v25 = vadd.f32 %v2592_v13, %v1765_v22 }
 0x122   : > { %v1523_v26 = vld [vmem:[#allocation2 + $0x30] sm:$0xff]  ;;  %v1763_v28 = vld [vmem:[#allocation2] sm:$0xff]  ;;  %v2596_v40 = vpop.f32.mrf.mxu1  ;;  %v2602_v42 = vpop.f32.mrf.mxu0 }
 0x123   : > { %v1531_v30 = vadd.f32 %v2586_v9, %v1523_v26  ;;  %1781 = vst.msk [vmem:[#allocation2 + $0x10] sm:$0xff] %vm319_vm1, %v1773_v25  ;;  %v1771_v31 = vadd.f32 %v1763_v28, %v1732_v19  ;;  %v3108_v9 = vld [vmem:[%s3188_s3] ss:$0 sm:$0xff]  ;;  %v2472_v28 = vld [vmem:[%s3094_s27 + $0x18] sm:$0xff]  }
 0x124   : > { %v1521_v32 = vld [vmem:[#allocation2 + $0x20] sm:$0xff]  ;;  %v1766_v34 = vld [vmem:[#allocation2 + $0x18] sm:$0xff]  ;;  %v1914_v46 = vpop.f32.mrf.mxu0  ;;  %v1748_v48 = vpop.f32.mrf.mxu1  ;;  %v2469_v59 = vunpack.c.h.bf16 %v2472_v28 }
 0x125   : > { %1539 = vst.msk [vmem:[#allocation2 + $0x30] sm:$0xff] %vm319_vm1, %v1531_v30  ;;  %v1529_v35 = vadd.f32 %v1521_v32, %v1502_v16  ;;  %1779 = vst.msk [vmem:[#allocation2] sm:$0xff] %vm319_vm1, %v1771_v31  ;;  %v1774_v37 = vadd.f32 %v2593_v21, %v1766_v34 }
 0x126   : > { %v1524_v38 = vld [vmem:[#allocation2 + $0x38] sm:$0xff]  ;;  %v1764_v39 = vld [vmem:[#allocation2 + $0x8] sm:$0xff]  ;;  %v2603_v52 = vpop.f32.mrf.mxu0  ;;  %v2597_v60 = vpop.f32.mrf.mxu1 }
 0x127   : > { %1537 = vst.msk [vmem:[#allocation2 + $0x20] sm:$0xff] %vm319_vm1, %v1529_v35  ;;  %v1532_v43 = vadd.f32 %v2587_v23, %v1524_v38  ;;  %1782 = vst.msk [vmem:[#allocation2 + $0x18] sm:$0xff] %vm319_vm1, %v1774_v37  ;;  %v1772_v44 = vadd.f32 %v1764_v39, %v1735_v29  ;;  %v2468_v38 = vunpack.c.l.bf16 %v2472_v28 }
 0x128   : > { %v1522_v45 = vld [vmem:[#allocation2 + $0x28] sm:$0xff]  ;;  %v1917_v8 = vpop.f32.mrf.mxu0  ;;  %v1751_v41 = vpop.f32.mrf.mxu1 }
 0x129   : > { %1540 = vst.msk [vmem:[#allocation2 + $0x38] sm:$0xff] %vm319_vm1, %v1532_v43  ;;  %v1530_v47 = vadd.f32 %v1522_v45, %v1505_v33  ;;  %1780 = vst.msk [vmem:[#allocation2 + $0x8] sm:$0xff] %vm319_vm1, %v1772_v44 }
 0x12a   : > { %v1947_v27 = vld [vmem:[#allocation2 + $0x10] sm:$0xff]  ;;  %v2606_v2 = vpop.f32.mrf.mxu0 }
 0x12b   : > { %1538 = vst.msk [vmem:[#allocation2 + $0x28] sm:$0xff] %vm319_vm1, %v1530_v47  ;;  %v1955_v53 = vadd.f32 %v2602_v42, %v1947_v27 }
 0x12c   : > { %v1769_v54 = vld [vmem:[#allocation2 + $0x30] sm:$0xff]  ;;  %v1945_v24 = vld [vmem:[#allocation2] sm:$0xff]  ;;  %v1930_v10 = vpop.f32.mrf.mxu0 }
 0x12d   : > { %v1777_v55 = vadd.f32 %v2596_v40, %v1769_v54  ;;  %1963 = vst.msk [vmem:[#allocation2 + $0x10] sm:$0xff] %vm319_vm1, %v1955_v53  ;;  %v1953_v57 = vadd.f32 %v1945_v24, %v1914_v46  ;;  %v2471_v46 = vld [vmem:[%s3094_s27 + $0x10] sm:$0xff]  }
 0x12e   : > { %v1767_v58 = vld [vmem:[#allocation2 + $0x20] sm:$0xff]  ;;  %v1948_v61 = vld [vmem:[#allocation2 + $0x18] sm:$0xff]  ;;  %v2607_v21 = vpop.f32.mrf.mxu0 }
 0x12f   : > { %1785 = vst.msk [vmem:[#allocation2 + $0x30] sm:$0xff] %vm319_vm1, %v1777_v55  ;;  %v1775_v36 = vadd.f32 %v1767_v58, %v1748_v48  ;;  %1961 = vst.msk [vmem:[#allocation2] sm:$0xff] %vm319_vm1, %v1953_v57  ;;  %v1956_v62 = vadd.f32 %v2603_v52, %v1948_v61 }
 0x130   : > { %v1770_v63 = vld [vmem:[#allocation2 + $0x38] sm:$0xff]  ;;  %v1946_v1 = vld [vmem:[#allocation2 + $0x8] sm:$0xff]  ;;  %v1933_v40 = vpop.f32.mrf.mxu0 }
 0x131   : > { %1783 = vst.msk [vmem:[#allocation2 + $0x20] sm:$0xff] %vm319_vm1, %v1775_v36  ;;  %v1778_v51 = vadd.f32 %v2597_v60, %v1770_v63  ;;  %1964 = vst.msk [vmem:[#allocation2 + $0x18] sm:$0xff] %vm319_vm1, %v1956_v62  ;;  %v1954_v4 = vadd.f32 %v1946_v1, %v1917_v8  ;;  %v2464_v8 = vunpack.c.l.bf16 %v2471_v46  ;;  %v2465_v62 = vunpack.c.h.bf16 %v2471_v46 }
 0x132   : > { %v1768_v5 = vld [vmem:[#allocation2 + $0x28] sm:$0xff] }
 0x133   : > { %1786 = vst.msk [vmem:[#allocation2 + $0x38] sm:$0xff] %vm319_vm1, %v1778_v51  ;;  %v1776_v49 = vadd.f32 %v1768_v5, %v1751_v41  ;;  %1962 = vst.msk [vmem:[#allocation2 + $0x8] sm:$0xff] %vm319_vm1, %v1954_v4 }
 0x134   : > { %v1971_v7 = vld [vmem:[#allocation2 + $0x10] sm:$0xff] }
 0x135   : > { %v1995_v11 = vadd.f32 %v2460_v3, %v1971_v7  ;;  %1784 = vst.msk [vmem:[#allocation2 + $0x28] sm:$0xff] %vm319_vm1, %v1776_v49 }
 0x136   : > { %v1969_v13 = vld [vmem:[#allocation2] sm:$0xff]  ;;  %v1951_v14 = vld [vmem:[#allocation2 + $0x30] sm:$0xff] }
 0x137   : > { %v2440_v15 = vpack.c.bf16 %v1995_v11, %v1995_v11  ;;  %v2051_v16 = vmul.f32 %v3108_v9, %v1995_v11  ;;  %v1993_v17 = vadd.f32 %v2456_v6, %v1969_v13  ;;  %v1959_v18 = vadd.f32 %v2606_v2, %v1951_v14 }
 0x138   : > { %v1972_v19 = vld [vmem:[#allocation2 + $0x18] sm:$0xff]  ;;  %v1949_v20 = vld [vmem:[#allocation2 + $0x20] sm:$0xff] }
 0x139   : > { %2036 = vst.msk [vmem:[%s3115_s8 + $0x8] sm:$0xf] %vm2033_vm8, %v2440_v15  ;;  %v2066_v22 = vadd.f32 %v3120_v12, %v2051_v16  ;;  %v2438_v23 = vpack.c.bf16 %v1993_v17, %v1993_v17  ;;  %v2049_v25 = vmul.f32 %v3108_v9, %v1993_v17  ;;  %v1996_v26 = vadd.f32 %v2461_v56, %v1972_v19 }
 0x13a   : > { %1967 = vst.msk [vmem:[#allocation2 + $0x30] sm:$0xff] %vm319_vm1, %v1959_v18  ;;  %v1970_v29 = vld [vmem:[#allocation2 + $0x8] sm:$0xff]  ;;  %v1957_v30 = vadd.f32 %v1949_v20, %v1930_v10  ;;  %v1952_v31 = vld [vmem:[#allocation2 + $0x38] sm:$0xff] }
 0x13b   : > { %v2074_v32 = vmax.f32 %v2066_v22, 0.0  ;;  %2034 = vst.msk [vmem:[%s3115_s8] sm:$0xf] %vm2033_vm8, %v2438_v23  ;;  %v2064_v33 = vadd.f32 %v3120_v12, %v2049_v25  ;;  %v2441_v34 = vpack.c.bf16 %v1996_v26, %v1996_v26  ;;  %v2052_v35 = vmul.f32 %v3108_v9, %v1996_v26 }
 0x13c   : > { %v1994_v37 = vadd.f32 %v2457_v50, %v1970_v29  ;;  %1965 = vst.msk [vmem:[#allocation2 + $0x20] sm:$0xff] %vm319_vm1, %v1957_v30  ;;  %v1960_v39 = vadd.f32 %v2607_v21, %v1952_v31  ;;  %v1950_v42 = vld [vmem:[#allocation2 + $0x28] sm:$0xff] }
 0x13d   : > { %v2448_v43 = vpack.c.bf16 %v2074_v32, %v2074_v32  ;;  %v2072_v44 = vmax.f32 %v2064_v33, 0.0  ;;  %2037 = vst.msk [vmem:[%s3115_s8 + $0xc] sm:$0xf] %vm2033_vm8, %v2441_v34  ;;  %v2067_v45 = vadd.f32 %v3120_v12, %v2052_v35  ;;  %v1958_v47 = vadd.f32 %v1950_v42, %v1933_v40 }
 0x13e   : > { %v2439_v48 = vpack.c.bf16 %v1994_v37, %v1994_v37  ;;  %v2050_v27 = vmul.f32 %v3108_v9, %v1994_v37  ;;  %1968 = vst.msk [vmem:[#allocation2 + $0x38] sm:$0xff] %vm319_vm1, %v1960_v39 }
 0x13f   : > { %2114 = vst.msk [vmem:[%s3137_s13 + $0x8] sm:$0xf] %vm2033_vm8, %v2448_v43  ;;  %v2446_v52 = vpack.c.bf16 %v2072_v44, %v2072_v44  ;;  %v2075_v53 = vmax.f32 %v2067_v45, 0.0 }
 0x140   : > { %1966 = vst.msk [vmem:[#allocation2 + $0x28] sm:$0xff] %vm319_vm1, %v1958_v47  ;;  %v2065_v54 = vadd.f32 %v3120_v12, %v2050_v27 }
 0x141   : > { %2035 = vst.msk [vmem:[%s3115_s8 + $0x4] sm:$0xf] %vm2033_vm8, %v2439_v48  ;;  %v1975_v24 = vld [vmem:[#allocation2 + $0x30] sm:$0xff]  ;;  %2112 = vst.msk [vmem:[%s3137_s13] sm:$0xf] %vm2033_vm8, %v2446_v52  ;;  %v2449_v55 = vpack.c.bf16 %v2075_v53, %v2075_v53 }
 0x142   : > { %v1999_v57 = vadd.f32 %v2468_v38, %v1975_v24  ;;  %v2073_v58 = vmax.f32 %v2065_v54, 0.0 }
 0x143   : > { %2115 = vst.msk [vmem:[%s3137_s13 + $0xc] sm:$0xf] %vm2033_vm8, %v2449_v55  ;;  %v1973_v36 = vld [vmem:[#allocation2 + $0x20] sm:$0xff] }
 0x144   : > { %v2444_v60 = vpack.c.bf16 %v1999_v57, %v1999_v57  ;;  %v2055_v61 = vmul.f32 %v3108_v9, %v1999_v57  ;;  %v2447_v63 = vpack.c.bf16 %v2073_v58, %v2073_v58  ;;  %v1997_v0 = vadd.f32 %v2464_v8, %v1973_v36 }
 0x145   : > { %v1976_v2 = vld [vmem:[#allocation2 + $0x38] sm:$0xff] }
 0x146   : > { %2040 = vst.msk [vmem:[%s3115_s8 + $0x18] sm:$0xf] %vm2033_vm8, %v2444_v60  ;;  %v2070_v1 = vadd.f32 %v3120_v12, %v2055_v61  ;;  %2113 = vst.msk [vmem:[%s3137_s13 + $0x4] sm:$0xf] %vm2033_vm8, %v2447_v63  ;;  %v2442_v3 = vpack.c.bf16 %v1997_v0, %v1997_v0  ;;  %v2053_v51 = vmul.f32 %v3108_v9, %v1997_v0 }
 0x147   : > { %v2000_v4 = vadd.f32 %v2469_v59, %v1976_v2  ;;  %v1974_v41 = vld [vmem:[#allocation2 + $0x28] sm:$0xff] }
 0x148   : > { %v2078_v5 = vmax.f32 %v2070_v1, 0.0  ;;  %v1998_v6 = vadd.f32 %v2465_v62, %v1974_v41  ;;  %2038 = vst.msk [vmem:[%s3115_s8 + $0x10] sm:$0xf] %vm2033_vm8, %v2442_v3  ;;  %v2068_v49 = vadd.f32 %v3120_v12, %v2053_v51 }
 0x149   : > { %v2445_v7 = vpack.c.bf16 %v2000_v4, %v2000_v4  ;;  %v2056_v10 = vmul.f32 %v3108_v9, %v2000_v4 }
 0x14a   : > { %v2452_v11 = vpack.c.bf16 %v2078_v5, %v2078_v5  ;;  %v2443_v56 = vpack.c.bf16 %v1998_v6, %v1998_v6  ;;  %v2054_v13 = vmul.f32 %v3108_v9, %v1998_v6  ;;  %v2076_v14 = vmax.f32 %v2068_v49, 0.0 }
 0x14b   : > { %2041 = vst.msk [vmem:[%s3115_s8 + $0x1c] sm:$0xf] %vm2033_vm8, %v2445_v7  ;;  %v2071_v15 = vadd.f32 %v3120_v12, %v2056_v10 }
 0x14c   : > { %2118 = vst.msk [vmem:[%s3137_s13 + $0x18] sm:$0xf] %vm2033_vm8, %v2452_v11  ;;  %2039 = vst.msk [vmem:[%s3115_s8 + $0x14] sm:$0xf] %vm2033_vm8, %v2443_v56  ;;  %v2069_v16 = vadd.f32 %v3120_v12, %v2054_v13  ;;  %v2450_v17 = vpack.c.bf16 %v2076_v14, %v2076_v14 }
 0x14d   : > { %v2079_v18 = vmax.f32 %v2071_v15, 0.0 }
 0x14e   : > { %v2077_v19 = vmax.f32 %v2069_v16, 0.0  ;;  %2116 = vst.msk [vmem:[%s3137_s13 + $0x10] sm:$0xf] %vm2033_vm8, %v2450_v17 }
 0x14f   : > { %v2453_v50 = vpack.c.bf16 %v2079_v18, %v2079_v18 }
 0x150   : > { %v2451_v20 = vpack.c.bf16 %v2077_v19, %v2077_v19 }
 0x151   : > { %2119 = vst.msk [vmem:[%s3137_s13 + $0x1c] sm:$0xf] %vm2033_vm8, %v2453_v50 }
 0x152   : > { %2117 = vst.msk [vmem:[%s3137_s13 + $0x14] sm:$0xf] %vm2033_vm8, %v2451_v20 }
 0x153 PF: > { %s17_s21 = sadd.s32 1, %s2647_s21  }
 0x154   : > { %p14_p5 = scmp.ge.s32.totalorder %s17_s21, 4  }
 0x156   :  { %16 = sbr.rel (!%p14_p5) target bundleno = 1 (0x1), region = 95 }

</bundles_post_ra>
